<compile_context>
chip_gen: v6e
topology: v6e:2x2x1
jax: 0.10.0
libtpu: 0.0.40
codegen_flags: <defaults>
</compile_context>

<pallas_src>
import functools

import jax
import jax.numpy as jnp
from jax import lax
from jax.experimental import pallas as pl
from jax.experimental.pallas import tpu as pltpu


def _round_up(n, m):
    return ((n + m - 1) // m) * m


# ------------------------------ fused kernel --------------------------------

def fused_encoder_kernel(
    # inputs
    patches_ref, w1_ref, b1_ref, oh_ref, ow_ref, pool_ref,
    dw2_ref, dwb2_ref, pw2_ref, pwb2_ref, g2_ref, bt2_ref,
    dw3_ref, dwb3_ref, pw3_ref, pwb3_ref, g3_ref, bt3_ref,
    wl_ref, bl_ref,
    # outputs
    feat_ref, prob_ref,
    # VMEM scratch: margin buffers for the two depthwise convs
    buf2_ref, buf3_ref,
    *, OH, OW,
):
    oh_idx = oh_ref[...]                     # [M,1] i32 output-row spatial coords
    ow_idx = ow_ref[...]                     # [M,1] i32

    # --- Conv2d(3,16,3,stride=2,padding=1) + ReLU : im2col matmul on the MXU ---
    y1 = jnp.dot(patches_ref[...], w1_ref[...], preferred_element_type=jnp.float32)
    y1 = jnp.maximum(y1 + b1_ref[...], 0.0)                        # [M,16] f32

    def ds_block(x_flat, buf_ref, dw_ref, dwb_ref, pw_ref, pwb_ref, g_ref, beta_ref):
        # Depthwise 3x3 / padding=1 / groups=Cin on a flat [M,C] view: tap (dy,dx)
        # is a sublane shift by dy*OW+dx out of a zeroed margin buffer, masked so
        # image borders and batch boundaries contribute zero (same as zero padding).
        M, Cin = x_flat.shape
        margin = (buf_ref.shape[0] - M) // 2                       # multiple of 8 -> aligned
        buf_ref[...] = jnp.zeros_like(buf_ref)
        buf_ref[margin:margin + M, :] = x_flat                     # tile-aligned interior store
        dwk = dw_ref[...]                                          # [9,1,Cin], hoisted load
        acc = jnp.zeros((M, Cin), jnp.float32)
        for kh in range(3):
            dy = kh - 1
            row_ok = (oh_idx + dy >= 0) & (oh_idx + dy < OH)
            for kw in range(3):
                dx = kw - 1
                ok = row_ok & (ow_idx + dx >= 0) & (ow_idx + dx < OW)
                off = margin + dy * OW + dx
                tap = buf_ref[off:off + M, :]                      # shifted sublane read
                acc = acc + jnp.where(ok, tap, 0.0) * dwk[kh * 3 + kw]
        dwo = acc + dwb_ref[...]                                   # [M,Cin] f32

        # Pointwise 1x1 on the MXU: bf16 inputs, f32 accumulation.
        y = jnp.dot(dwo.astype(jnp.bfloat16), pw_ref[...],
                    preferred_element_type=jnp.float32) + pwb_ref[...]

        # BatchNorm2d with batch statistics over the full B*H*W axis (biased var,
        # eps=1e-5), then ReLU.  Valid because the whole M axis lives in this one
        # kernel invocation; an M-grid would require a two-pass (global-stat) BN.
        mean = jnp.mean(y, axis=0, keepdims=True)
        var = jnp.mean((y - mean) ** 2, axis=0, keepdims=True)
        yn = (y - mean) * lax.rsqrt(var + 1e-5)
        return jnp.maximum(yn * g_ref[...] + beta_ref[...], 0.0)

    y2 = ds_block(y1, buf2_ref, dw2_ref, dwb2_ref, pw2_ref, pwb2_ref, g2_ref, bt2_ref)   # [M,32]
    y3 = ds_block(y2, buf3_ref, dw3_ref, dwb3_ref, pw3_ref, pwb3_ref, g3_ref, bt3_ref)   # [M,64]

    feat_ref[...] = y3                                             # [M,64] NHWC-flat (lane = C)

    # --- state head: AdaptiveAvgPool2d(1) -> Linear(64,1) -> Sigmoid ---
    # Spatial mean via a tiny [B,M] averaging matmul; the 64->1 projection stays
    # on the VPU (an N=1 MXU matmul would run at 1/128 column utilization).
    pooled = jnp.dot(pool_ref[...], y3, preferred_element_type=jnp.float32)    # [B,64]
    logits = jnp.sum(pooled * wl_ref[...], axis=-1, keepdims=True) + bl_ref[...]
    prob_ref[...] = jax.nn.sigmoid(logits)                          # [B,1]


# ------------------------------- glue (JAX) ---------------------------------

def _im2col_s2(x):
    # 3x3, stride=2, pad=1 im2col (pure one-shot XLA data movement on the tiny
    # network input; all matmuls/conv math happen inside the fused kernel).
    B, H, W, C = x.shape
    xp = jnp.pad(x, ((0, 0), (1, 1), (1, 1), (0, 0)))
    OH = (H + 2 - 3) // 2 + 1
    OW = (W + 2 - 3) // 2 + 1
    cols = []
    for kh in range(3):
        for kw in range(3):
            cols.append(xp[:, kh:kh + 2 * OH:2, kw:kw + 2 * OW:2, :])
    patches = jnp.stack(cols, axis=3)                               # [B,OH,OW,9,C]
    return patches.reshape(B * OH * OW, 9 * C), (B, OH, OW)


def state_aware_encoder(x_nchw, p):
    x = jnp.transpose(x_nchw, (0, 2, 3, 1)).astype(jnp.float32)     # NCHW -> NHWC
    patches, (B, OH, OW) = _im2col_s2(x)                            # [M, 27] f32
    M, K = patches.shape
    Kp = _round_up(K, 16)                                           # 27 -> 32: aligned MXU K
    patches = jnp.pad(patches, ((0, 0), (0, Kp - K))).astype(jnp.bfloat16)
    w1 = jnp.pad(p["w1"], ((0, Kp - K), (0, 0))).astype(jnp.bfloat16)

    # Depthwise weights as [9,1,C] so a tap is a static leading-dim index inside
    # the kernel (no sublane slicing); pointwise weights in bf16 for native MXU rate.
    dw2 = p["dw2"].reshape(9, 1, -1)
    dw3 = p["dw3"].reshape(9, 1, -1)
    pw2 = p["pw2"].astype(jnp.bfloat16)
    pw3 = p["pw3"].astype(jnp.bfloat16)

    # Tiny precomputed helpers (avoid in-kernel iota/reshape plumbing).
    m = jnp.arange(M, dtype=jnp.int32)
    oh_idx = ((m // OW) % OH)[:, None]                              # [M,1]
    ow_idx = (m % OW)[:, None]                                      # [M,1]
    hw = OH * OW
    pool_mat = ((m[None, :] // hw) == jnp.arange(B, dtype=jnp.int32)[:, None]
                ).astype(jnp.float32) / hw                          # [B,M] averaging matrix

    C1 = p["pw2"].shape[0]                                          # 16
    Cm = p["pw3"].shape[0]                                          # 32
    C3 = p["pw3"].shape[1]                                          # 64
    margin = _round_up(OW + 1, 8)                                   # max tap shift, tile aligned
    rows = M + 2 * margin

    vspec = pl.BlockSpec(memory_space=pltpu.MemorySpace.VMEM)
    feat_flat, prob = pl.pallas_call(
        functools.partial(fused_encoder_kernel, OH=OH, OW=OW),
        out_shape=(
            jax.ShapeDtypeStruct((M, C3), jnp.float32),             # NHWC-flat features
            jax.ShapeDtypeStruct((B, 1), jnp.float32),              # state probability
        ),
        in_specs=[vspec] * 20,
        out_specs=(vspec, vspec),
        scratch_shapes=[
            pltpu.VMEM((rows, C1), jnp.float32),                    # depthwise margin buffer (16 ch)
            pltpu.VMEM((rows, Cm), jnp.float32),                    # depthwise margin buffer (32 ch)
        ],
    )(patches, w1, p["b1"], oh_idx, ow_idx, pool_mat,
      dw2, p["dwb2"], pw2, p["pwb2"], p["g2"], p["beta2"],
      dw3, p["dwb3"], pw3, p["pwb3"], p["g3"], p["beta3"],
      p["wl"], p["bl"])

    # NCHW for PyTorch API parity; downstream TPU consumers should keep feat_flat/NHWC.
    features = jnp.transpose(feat_flat.reshape(B, OH, OW, C3), (0, 3, 1, 2))
    return features, prob


# ------------------------------- parameters ---------------------------------

def init_params(key):
    ks = jax.random.split(key, 12)
    f32 = jnp.float32
    p = {}
    # Conv2d(3,16,3): weight rows ordered (kh, kw, cin) to match the im2col layout.
    p["w1"] = 0.1 * jax.random.normal(ks[0], (27, 16), f32)
    p["b1"] = 0.1 * jax.random.normal(ks[1], (1, 16), f32)
    # DepthwiseSeparableConv(16, 32)
    p["dw2"] = 0.1 * jax.random.normal(ks[2], (9, 16), f32)
    p["dwb2"] = 0.1 * jax.random.normal(ks[3], (1, 16), f32)
    p["pw2"] = 0.1 * jax.random.normal(ks[4], (16, 32), f32)
    p["pwb2"] = 0.1 * jax.random.normal(ks[5], (1, 32), f32)
    p["g2"], p["beta2"] = jnp.ones((1, 32), f32), jnp.zeros((1, 32), f32)
    # DepthwiseSeparableConv(32, 64)
    p["dw3"] = 0.1 * jax.random.normal(ks[6], (9, 32), f32)
    p["dwb3"] = 0.1 * jax.random.normal(ks[7], (1, 32), f32)
    p["pw3"] = 0.1 * jax.random.normal(ks[8], (32, 64), f32)
    p["pwb3"] = 0.1 * jax.random.normal(ks[9], (1, 64), f32)
    p["g3"], p["beta3"] = jnp.ones((1, 64), f32), jnp.zeros((1, 64), f32)
    # Linear(64, 1): weight stored as (out,in) = (1,64), used as a VPU row-dot.
    p["wl"] = 0.1 * jax.random.normal(ks[10], (1, 64), f32)
    p["bl"] = 0.1 * jax.random.normal(ks[11], (1, 1), f32)
    return p


if __name__ == "__main__":
    key = jax.random.PRNGKey(0)
    kx, kp = jax.random.split(key)
    x = jax.random.normal(kx, (2, 3, 16, 16), jnp.float32)          # NCHW, like PyTorch
    params = init_params(kp)

    features, state_prob = jax.jit(state_aware_encoder)(x, params)
    jax.block_until_ready((features, state_prob))

    assert features.shape == (2, 64, 8, 8) and features.dtype == jnp.float32
    assert state_prob.shape == (2, 1) and state_prob.dtype == jnp.float32
    assert bool(jnp.all(jnp.isfinite(features))) and bool(jnp.all(jnp.isfinite(state_prob)))
    print("KERNEL_OK")
</pallas_src>

<mosaic_0001>
module attributes {stable_mosaic.version = 11 : i64} {
  func.func @fused_encoder_kernel(%arg0: memref<128x32xbf16, #tpu.memory_space<vmem>>, %arg1: memref<32x16xbf16, #tpu.memory_space<vmem>>, %arg2: memref<1x16xf32, #tpu.memory_space<vmem>>, %arg3: memref<128x1xi32, #tpu.memory_space<vmem>>, %arg4: memref<128x1xi32, #tpu.memory_space<vmem>>, %arg5: memref<2x128xf32, #tpu.memory_space<vmem>>, %arg6: memref<9x1x16xf32, #tpu.memory_space<vmem>>, %arg7: memref<1x16xf32, #tpu.memory_space<vmem>>, %arg8: memref<16x32xbf16, #tpu.memory_space<vmem>>, %arg9: memref<1x32xf32, #tpu.memory_space<vmem>>, %arg10: memref<1x32xf32, #tpu.memory_space<vmem>>, %arg11: memref<1x32xf32, #tpu.memory_space<vmem>>, %arg12: memref<9x1x32xf32, #tpu.memory_space<vmem>>, %arg13: memref<1x32xf32, #tpu.memory_space<vmem>>, %arg14: memref<32x64xbf16, #tpu.memory_space<vmem>>, %arg15: memref<1x64xf32, #tpu.memory_space<vmem>>, %arg16: memref<1x64xf32, #tpu.memory_space<vmem>>, %arg17: memref<1x64xf32, #tpu.memory_space<vmem>>, %arg18: memref<1x64xf32, #tpu.memory_space<vmem>>, %arg19: memref<1x1xf32, #tpu.memory_space<vmem>>, %arg20: memref<128x64xf32, #tpu.memory_space<vmem>>, %arg21: memref<2x1xf32, #tpu.memory_space<vmem>>, %arg22: memref<160x16xf32, #tpu.memory_space<vmem>>, %arg23: memref<160x32xf32, #tpu.memory_space<vmem>>) attributes {dimension_semantics = [], scalar_prefetch = 0 : i64, scratch_operands = 2 : i64, tpu.core_type = #tpu.core_type<tc>} {
    %c0 = arith.constant 0 : index
    %c0_0 = arith.constant 0 : index
    %0 = vector.load %arg3[%c0, %c0_0] : memref<128x1xi32, #tpu.memory_space<vmem>>, vector<128x1xi32>
    %c0_1 = arith.constant 0 : index
    %c0_2 = arith.constant 0 : index
    %1 = vector.load %arg4[%c0_1, %c0_2] : memref<128x1xi32, #tpu.memory_space<vmem>>, vector<128x1xi32>
    %c0_3 = arith.constant 0 : index
    %c0_4 = arith.constant 0 : index
    %2 = vector.load %arg0[%c0_3, %c0_4] : memref<128x32xbf16, #tpu.memory_space<vmem>>, vector<128x32xbf16>
    %c0_5 = arith.constant 0 : index
    %c0_6 = arith.constant 0 : index
    %3 = vector.load %arg1[%c0_5, %c0_6] : memref<32x16xbf16, #tpu.memory_space<vmem>>, vector<32x16xbf16>
    %cst = arith.constant dense<0.000000e+00> : vector<128x16xf32>
    %4 = tpu.matmul %2, %3, %cst {dimension_numbers = #tpu.dot_dimension_numbers<[1], [0], [0], [1], [0, 0, 1, 1], [], []>} : vector<128x32xbf16>, vector<32x16xbf16>, vector<128x16xf32> -> vector<128x16xf32>
    %c0_7 = arith.constant 0 : index
    %c0_8 = arith.constant 0 : index
    %5 = vector.load %arg2[%c0_7, %c0_8] : memref<1x16xf32, #tpu.memory_space<vmem>>, vector<1x16xf32>
    %6 = vector.broadcast %5 : vector<1x16xf32> to vector<128x16xf32>
    %7 = arith.addf %4, %6 : vector<128x16xf32>
    %cst_9 = arith.constant 0.000000e+00 : f32
    %8 = vector.broadcast %cst_9 : f32 to vector<128x16xf32>
    %9 = arith.maximumf %7, %8 : vector<128x16xf32>
    %cst_10 = arith.constant 0.000000e+00 : f32
    %10 = vector.broadcast %cst_10 : f32 to vector<160x16xf32>
    %c0_11 = arith.constant 0 : index
    %c0_12 = arith.constant 0 : index
    %11 = vector.load %arg22[%c0_11, %c0_12] : memref<160x16xf32, #tpu.memory_space<vmem>>, vector<160x16xf32>
    tpu.vector_store %arg22[%c0_11, %c0_12], %10 {strides = array<i32>} : memref<160x16xf32, #tpu.memory_space<vmem>>, vector<160x16xf32>,
    %c16 = arith.constant 16 : index
    %c0_13 = arith.constant 0 : index
    %12 = vector.load %arg22[%c16, %c0_13] : memref<160x16xf32, #tpu.memory_space<vmem>>, vector<128x16xf32>
    tpu.vector_store %arg22[%c16, %c0_13], %9 {strides = array<i32>} : memref<160x16xf32, #tpu.memory_space<vmem>>, vector<128x16xf32>,
    %c0_14 = arith.constant 0 : index
    %c0_15 = arith.constant 0 : index
    %c0_16 = arith.constant 0 : index
    %13 = vector.load %arg6[%c0_14, %c0_15, %c0_16] : memref<9x1x16xf32, #tpu.memory_space<vmem>>, vector<9x1x16xf32>
    %cst_17 = arith.constant 0.000000e+00 : f32
    %14 = vector.broadcast %cst_17 : f32 to vector<128x16xf32>
    %c-1_i32 = arith.constant -1 : i32
    %15 = vector.broadcast %c-1_i32 : i32 to vector<128x1xi32>
    %16 = arith.addi %0, %15 : vector<128x1xi32>
    %c0_i32 = arith.constant 0 : i32
    %17 = vector.broadcast %c0_i32 : i32 to vector<128x1xi32>
    %18 = arith.cmpi sge, %16, %17 : vector<128x1xi32>
    %c-1_i32_18 = arith.constant -1 : i32
    %19 = vector.broadcast %c-1_i32_18 : i32 to vector<128x1xi32>
    %20 = arith.addi %0, %19 : vector<128x1xi32>
    %c8_i32 = arith.constant 8 : i32
    %21 = vector.broadcast %c8_i32 : i32 to vector<128x1xi32>
    %22 = arith.cmpi slt, %20, %21 : vector<128x1xi32>
    %23 = arith.andi %18, %22 : vector<128x1xi1>
    %c-1_i32_19 = arith.constant -1 : i32
    %24 = vector.broadcast %c-1_i32_19 : i32 to vector<128x1xi32>
    %25 = arith.addi %1, %24 : vector<128x1xi32>
    %c0_i32_20 = arith.constant 0 : i32
    %26 = vector.broadcast %c0_i32_20 : i32 to vector<128x1xi32>
    %27 = arith.cmpi sge, %25, %26 : vector<128x1xi32>
    %28 = arith.andi %23, %27 : vector<128x1xi1>
    %c-1_i32_21 = arith.constant -1 : i32
    %29 = vector.broadcast %c-1_i32_21 : i32 to vector<128x1xi32>
    %30 = arith.addi %1, %29 : vector<128x1xi32>
    %c8_i32_22 = arith.constant 8 : i32
    %31 = vector.broadcast %c8_i32_22 : i32 to vector<128x1xi32>
    %32 = arith.cmpi slt, %30, %31 : vector<128x1xi32>
    %33 = arith.andi %28, %32 : vector<128x1xi1>
    %c7 = arith.constant 7 : index
    %c0_23 = arith.constant 0 : index
    %34 = vector.load %arg22[%c7, %c0_23] : memref<160x16xf32, #tpu.memory_space<vmem>>, vector<128x16xf32>
    %cst_24 = arith.constant 0.000000e+00 : f32
    %35 = vector.shape_cast %33 : vector<128x1xi1> to vector<128x1xi1>
    %36 = vector.broadcast %35 : vector<128x1xi1> to vector<128x16xi1>
    %37 = vector.broadcast %cst_24 : f32 to vector<128x16xf32>
    %38 = arith.select %36, %34, %37 : vector<128x16xi1>, vector<128x16xf32>
    %39 = vector.extract_strided_slice %13 {offsets = [0, 0, 0], sizes = [1, 1, 16], strides = [1, 1, 1]} : vector<9x1x16xf32> to vector<1x1x16xf32>
    %40 = vector.shape_cast %39 : vector<1x1x16xf32> to vector<1x16xf32>
    %41 = vector.broadcast %40 : vector<1x16xf32> to vector<128x16xf32>
    %42 = arith.mulf %38, %41 : vector<128x16xf32>
    %43 = arith.addf %14, %42 : vector<128x16xf32>
    %c0_i32_25 = arith.constant 0 : i32
    %44 = vector.broadcast %c0_i32_25 : i32 to vector<128x1xi32>
    %45 = arith.addi %1, %44 : vector<128x1xi32>
    %c0_i32_26 = arith.constant 0 : i32
    %46 = vector.broadcast %c0_i32_26 : i32 to vector<128x1xi32>
    %47 = arith.cmpi sge, %45, %46 : vector<128x1xi32>
    %48 = arith.andi %23, %47 : vector<128x1xi1>
    %c0_i32_27 = arith.constant 0 : i32
    %49 = vector.broadcast %c0_i32_27 : i32 to vector<128x1xi32>
    %50 = arith.addi %1, %49 : vector<128x1xi32>
    %c8_i32_28 = arith.constant 8 : i32
    %51 = vector.broadcast %c8_i32_28 : i32 to vector<128x1xi32>
    %52 = arith.cmpi slt, %50, %51 : vector<128x1xi32>
    %53 = arith.andi %48, %52 : vector<128x1xi1>
    %c8 = arith.constant 8 : index
    %c0_29 = arith.constant 0 : index
    %54 = vector.load %arg22[%c8, %c0_29] : memref<160x16xf32, #tpu.memory_space<vmem>>, vector<128x16xf32>
    %cst_30 = arith.constant 0.000000e+00 : f32
    %55 = vector.shape_cast %53 : vector<128x1xi1> to vector<128x1xi1>
    %56 = vector.broadcast %55 : vector<128x1xi1> to vector<128x16xi1>
    %57 = vector.broadcast %cst_30 : f32 to vector<128x16xf32>
    %58 = arith.select %56, %54, %57 : vector<128x16xi1>, vector<128x16xf32>
    %59 = vector.extract_strided_slice %13 {offsets = [1, 0, 0], sizes = [1, 1, 16], strides = [1, 1, 1]} : vector<9x1x16xf32> to vector<1x1x16xf32>
    %60 = vector.shape_cast %59 : vector<1x1x16xf32> to vector<1x16xf32>
    %61 = vector.broadcast %60 : vector<1x16xf32> to vector<128x16xf32>
    %62 = arith.mulf %58, %61 : vector<128x16xf32>
    %63 = arith.addf %43, %62 : vector<128x16xf32>
    %c1_i32 = arith.constant 1 : i32
    %64 = vector.broadcast %c1_i32 : i32 to vector<128x1xi32>
    %65 = arith.addi %1, %64 : vector<128x1xi32>
    %c0_i32_31 = arith.constant 0 : i32
    %66 = vector.broadcast %c0_i32_31 : i32 to vector<128x1xi32>
    %67 = arith.cmpi sge, %65, %66 : vector<128x1xi32>
    %68 = arith.andi %23, %67 : vector<128x1xi1>
    %c1_i32_32 = arith.constant 1 : i32
    %69 = vector.broadcast %c1_i32_32 : i32 to vector<128x1xi32>
    %70 = arith.addi %1, %69 : vector<128x1xi32>
    %c8_i32_33 = arith.constant 8 : i32
    %71 = vector.broadcast %c8_i32_33 : i32 to vector<128x1xi32>
    %72 = arith.cmpi slt, %70, %71 : vector<128x1xi32>
    %73 = arith.andi %68, %72 : vector<128x1xi1>
    %c9 = arith.constant 9 : index
    %c0_34 = arith.constant 0 : index
    %74 = vector.load %arg22[%c9, %c0_34] : memref<160x16xf32, #tpu.memory_space<vmem>>, vector<128x16xf32>
    %cst_35 = arith.constant 0.000000e+00 : f32
    %75 = vector.shape_cast %73 : vector<128x1xi1> to vector<128x1xi1>
    %76 = vector.broadcast %75 : vector<128x1xi1> to vector<128x16xi1>
    %77 = vector.broadcast %cst_35 : f32 to vector<128x16xf32>
    %78 = arith.select %76, %74, %77 : vector<128x16xi1>, vector<128x16xf32>
    %79 = vector.extract_strided_slice %13 {offsets = [2, 0, 0], sizes = [1, 1, 16], strides = [1, 1, 1]} : vector<9x1x16xf32> to vector<1x1x16xf32>
    %80 = vector.shape_cast %79 : vector<1x1x16xf32> to vector<1x16xf32>
    %81 = vector.broadcast %80 : vector<1x16xf32> to vector<128x16xf32>
    %82 = arith.mulf %78, %81 : vector<128x16xf32>
    %83 = arith.addf %63, %82 : vector<128x16xf32>
    %c0_i32_36 = arith.constant 0 : i32
    %84 = vector.broadcast %c0_i32_36 : i32 to vector<128x1xi32>
    %85 = arith.addi %0, %84 : vector<128x1xi32>
    %c0_i32_37 = arith.constant 0 : i32
    %86 = vector.broadcast %c0_i32_37 : i32 to vector<128x1xi32>
    %87 = arith.cmpi sge, %85, %86 : vector<128x1xi32>
    %c0_i32_38 = arith.constant 0 : i32
    %88 = vector.broadcast %c0_i32_38 : i32 to vector<128x1xi32>
    %89 = arith.addi %0, %88 : vector<128x1xi32>
    %c8_i32_39 = arith.constant 8 : i32
    %90 = vector.broadcast %c8_i32_39 : i32 to vector<128x1xi32>
    %91 = arith.cmpi slt, %89, %90 : vector<128x1xi32>
    %92 = arith.andi %87, %91 : vector<128x1xi1>
    %c-1_i32_40 = arith.constant -1 : i32
    %93 = vector.broadcast %c-1_i32_40 : i32 to vector<128x1xi32>
    %94 = arith.addi %1, %93 : vector<128x1xi32>
    %c0_i32_41 = arith.constant 0 : i32
    %95 = vector.broadcast %c0_i32_41 : i32 to vector<128x1xi32>
    %96 = arith.cmpi sge, %94, %95 : vector<128x1xi32>
    %97 = arith.andi %92, %96 : vector<128x1xi1>
    %c-1_i32_42 = arith.constant -1 : i32
    %98 = vector.broadcast %c-1_i32_42 : i32 to vector<128x1xi32>
    %99 = arith.addi %1, %98 : vector<128x1xi32>
    %c8_i32_43 = arith.constant 8 : i32
    %100 = vector.broadcast %c8_i32_43 : i32 to vector<128x1xi32>
    %101 = arith.cmpi slt, %99, %100 : vector<128x1xi32>
    %102 = arith.andi %97, %101 : vector<128x1xi1>
    %c15 = arith.constant 15 : index
    %c0_44 = arith.constant 0 : index
    %103 = vector.load %arg22[%c15, %c0_44] : memref<160x16xf32, #tpu.memory_space<vmem>>, vector<128x16xf32>
    %cst_45 = arith.constant 0.000000e+00 : f32
    %104 = vector.shape_cast %102 : vector<128x1xi1> to vector<128x1xi1>
    %105 = vector.broadcast %104 : vector<128x1xi1> to vector<128x16xi1>
    %106 = vector.broadcast %cst_45 : f32 to vector<128x16xf32>
    %107 = arith.select %105, %103, %106 : vector<128x16xi1>, vector<128x16xf32>
    %108 = vector.extract_strided_slice %13 {offsets = [3, 0, 0], sizes = [1, 1, 16], strides = [1, 1, 1]} : vector<9x1x16xf32> to vector<1x1x16xf32>
    %109 = vector.shape_cast %108 : vector<1x1x16xf32> to vector<1x16xf32>
    %110 = vector.broadcast %109 : vector<1x16xf32> to vector<128x16xf32>
    %111 = arith.mulf %107, %110 : vector<128x16xf32>
    %112 = arith.addf %83, %111 : vector<128x16xf32>
    %c0_i32_46 = arith.constant 0 : i32
    %113 = vector.broadcast %c0_i32_46 : i32 to vector<128x1xi32>
    %114 = arith.addi %1, %113 : vector<128x1xi32>
    %c0_i32_47 = arith.constant 0 : i32
    %115 = vector.broadcast %c0_i32_47 : i32 to vector<128x1xi32>
    %116 = arith.cmpi sge, %114, %115 : vector<128x1xi32>
    %117 = arith.andi %92, %116 : vector<128x1xi1>
    %c0_i32_48 = arith.constant 0 : i32
    %118 = vector.broadcast %c0_i32_48 : i32 to vector<128x1xi32>
    %119 = arith.addi %1, %118 : vector<128x1xi32>
    %c8_i32_49 = arith.constant 8 : i32
    %120 = vector.broadcast %c8_i32_49 : i32 to vector<128x1xi32>
    %121 = arith.cmpi slt, %119, %120 : vector<128x1xi32>
    %122 = arith.andi %117, %121 : vector<128x1xi1>
    %c16_50 = arith.constant 16 : index
    %c0_51 = arith.constant 0 : index
    %123 = vector.load %arg22[%c16_50, %c0_51] : memref<160x16xf32, #tpu.memory_space<vmem>>, vector<128x16xf32>
    %cst_52 = arith.constant 0.000000e+00 : f32
    %124 = vector.shape_cast %122 : vector<128x1xi1> to vector<128x1xi1>
    %125 = vector.broadcast %124 : vector<128x1xi1> to vector<128x16xi1>
    %126 = vector.broadcast %cst_52 : f32 to vector<128x16xf32>
    %127 = arith.select %125, %123, %126 : vector<128x16xi1>, vector<128x16xf32>
    %128 = vector.extract_strided_slice %13 {offsets = [4, 0, 0], sizes = [1, 1, 16], strides = [1, 1, 1]} : vector<9x1x16xf32> to vector<1x1x16xf32>
    %129 = vector.shape_cast %128 : vector<1x1x16xf32> to vector<1x16xf32>
    %130 = vector.broadcast %129 : vector<1x16xf32> to vector<128x16xf32>
    %131 = arith.mulf %127, %130 : vector<128x16xf32>
    %132 = arith.addf %112, %131 : vector<128x16xf32>
    %c1_i32_53 = arith.constant 1 : i32
    %133 = vector.broadcast %c1_i32_53 : i32 to vector<128x1xi32>
    %134 = arith.addi %1, %133 : vector<128x1xi32>
    %c0_i32_54 = arith.constant 0 : i32
    %135 = vector.broadcast %c0_i32_54 : i32 to vector<128x1xi32>
    %136 = arith.cmpi sge, %134, %135 : vector<128x1xi32>
    %137 = arith.andi %92, %136 : vector<128x1xi1>
    %c1_i32_55 = arith.constant 1 : i32
    %138 = vector.broadcast %c1_i32_55 : i32 to vector<128x1xi32>
    %139 = arith.addi %1, %138 : vector<128x1xi32>
    %c8_i32_56 = arith.constant 8 : i32
    %140 = vector.broadcast %c8_i32_56 : i32 to vector<128x1xi32>
    %141 = arith.cmpi slt, %139, %140 : vector<128x1xi32>
    %142 = arith.andi %137, %141 : vector<128x1xi1>
    %c17 = arith.constant 17 : index
    %c0_57 = arith.constant 0 : index
    %143 = vector.load %arg22[%c17, %c0_57] : memref<160x16xf32, #tpu.memory_space<vmem>>, vector<128x16xf32>
    %cst_58 = arith.constant 0.000000e+00 : f32
    %144 = vector.shape_cast %142 : vector<128x1xi1> to vector<128x1xi1>
    %145 = vector.broadcast %144 : vector<128x1xi1> to vector<128x16xi1>
    %146 = vector.broadcast %cst_58 : f32 to vector<128x16xf32>
    %147 = arith.select %145, %143, %146 : vector<128x16xi1>, vector<128x16xf32>
    %148 = vector.extract_strided_slice %13 {offsets = [5, 0, 0], sizes = [1, 1, 16], strides = [1, 1, 1]} : vector<9x1x16xf32> to vector<1x1x16xf32>
    %149 = vector.shape_cast %148 : vector<1x1x16xf32> to vector<1x16xf32>
    %150 = vector.broadcast %149 : vector<1x16xf32> to vector<128x16xf32>
    %151 = arith.mulf %147, %150 : vector<128x16xf32>
    %152 = arith.addf %132, %151 : vector<128x16xf32>
    %c1_i32_59 = arith.constant 1 : i32
    %153 = vector.broadcast %c1_i32_59 : i32 to vector<128x1xi32>
    %154 = arith.addi %0, %153 : vector<128x1xi32>
    %c0_i32_60 = arith.constant 0 : i32
    %155 = vector.broadcast %c0_i32_60 : i32 to vector<128x1xi32>
    %156 = arith.cmpi sge, %154, %155 : vector<128x1xi32>
    %c1_i32_61 = arith.constant 1 : i32
    %157 = vector.broadcast %c1_i32_61 : i32 to vector<128x1xi32>
    %158 = arith.addi %0, %157 : vector<128x1xi32>
    %c8_i32_62 = arith.constant 8 : i32
    %159 = vector.broadcast %c8_i32_62 : i32 to vector<128x1xi32>
    %160 = arith.cmpi slt, %158, %159 : vector<128x1xi32>
    %161 = arith.andi %156, %160 : vector<128x1xi1>
    %c-1_i32_63 = arith.constant -1 : i32
    %162 = vector.broadcast %c-1_i32_63 : i32 to vector<128x1xi32>
    %163 = arith.addi %1, %162 : vector<128x1xi32>
    %c0_i32_64 = arith.constant 0 : i32
    %164 = vector.broadcast %c0_i32_64 : i32 to vector<128x1xi32>
    %165 = arith.cmpi sge, %163, %164 : vector<128x1xi32>
    %166 = arith.andi %161, %165 : vector<128x1xi1>
    %c-1_i32_65 = arith.constant -1 : i32
    %167 = vector.broadcast %c-1_i32_65 : i32 to vector<128x1xi32>
    %168 = arith.addi %1, %167 : vector<128x1xi32>
    %c8_i32_66 = arith.constant 8 : i32
    %169 = vector.broadcast %c8_i32_66 : i32 to vector<128x1xi32>
    %170 = arith.cmpi slt, %168, %169 : vector<128x1xi32>
    %171 = arith.andi %166, %170 : vector<128x1xi1>
    %c23 = arith.constant 23 : index
    %c0_67 = arith.constant 0 : index
    %172 = vector.load %arg22[%c23, %c0_67] : memref<160x16xf32, #tpu.memory_space<vmem>>, vector<128x16xf32>
    %cst_68 = arith.constant 0.000000e+00 : f32
    %173 = vector.shape_cast %171 : vector<128x1xi1> to vector<128x1xi1>
    %174 = vector.broadcast %173 : vector<128x1xi1> to vector<128x16xi1>
    %175 = vector.broadcast %cst_68 : f32 to vector<128x16xf32>
    %176 = arith.select %174, %172, %175 : vector<128x16xi1>, vector<128x16xf32>
    %177 = vector.extract_strided_slice %13 {offsets = [6, 0, 0], sizes = [1, 1, 16], strides = [1, 1, 1]} : vector<9x1x16xf32> to vector<1x1x16xf32>
    %178 = vector.shape_cast %177 : vector<1x1x16xf32> to vector<1x16xf32>
    %179 = vector.broadcast %178 : vector<1x16xf32> to vector<128x16xf32>
    %180 = arith.mulf %176, %179 : vector<128x16xf32>
    %181 = arith.addf %152, %180 : vector<128x16xf32>
    %c0_i32_69 = arith.constant 0 : i32
    %182 = vector.broadcast %c0_i32_69 : i32 to vector<128x1xi32>
    %183 = arith.addi %1, %182 : vector<128x1xi32>
    %c0_i32_70 = arith.constant 0 : i32
    %184 = vector.broadcast %c0_i32_70 : i32 to vector<128x1xi32>
    %185 = arith.cmpi sge, %183, %184 : vector<128x1xi32>
    %186 = arith.andi %161, %185 : vector<128x1xi1>
    %c0_i32_71 = arith.constant 0 : i32
    %187 = vector.broadcast %c0_i32_71 : i32 to vector<128x1xi32>
    %188 = arith.addi %1, %187 : vector<128x1xi32>
    %c8_i32_72 = arith.constant 8 : i32
    %189 = vector.broadcast %c8_i32_72 : i32 to vector<128x1xi32>
    %190 = arith.cmpi slt, %188, %189 : vector<128x1xi32>
    %191 = arith.andi %186, %190 : vector<128x1xi1>
    %c24 = arith.constant 24 : index
    %c0_73 = arith.constant 0 : index
    %192 = vector.load %arg22[%c24, %c0_73] : memref<160x16xf32, #tpu.memory_space<vmem>>, vector<128x16xf32>
    %cst_74 = arith.constant 0.000000e+00 : f32
    %193 = vector.shape_cast %191 : vector<128x1xi1> to vector<128x1xi1>
    %194 = vector.broadcast %193 : vector<128x1xi1> to vector<128x16xi1>
    %195 = vector.broadcast %cst_74 : f32 to vector<128x16xf32>
    %196 = arith.select %194, %192, %195 : vector<128x16xi1>, vector<128x16xf32>
    %197 = vector.extract_strided_slice %13 {offsets = [7, 0, 0], sizes = [1, 1, 16], strides = [1, 1, 1]} : vector<9x1x16xf32> to vector<1x1x16xf32>
    %198 = vector.shape_cast %197 : vector<1x1x16xf32> to vector<1x16xf32>
    %199 = vector.broadcast %198 : vector<1x16xf32> to vector<128x16xf32>
    %200 = arith.mulf %196, %199 : vector<128x16xf32>
    %201 = arith.addf %181, %200 : vector<128x16xf32>
    %c1_i32_75 = arith.constant 1 : i32
    %202 = vector.broadcast %c1_i32_75 : i32 to vector<128x1xi32>
    %203 = arith.addi %1, %202 : vector<128x1xi32>
    %c0_i32_76 = arith.constant 0 : i32
    %204 = vector.broadcast %c0_i32_76 : i32 to vector<128x1xi32>
    %205 = arith.cmpi sge, %203, %204 : vector<128x1xi32>
    %206 = arith.andi %161, %205 : vector<128x1xi1>
    %c1_i32_77 = arith.constant 1 : i32
    %207 = vector.broadcast %c1_i32_77 : i32 to vector<128x1xi32>
    %208 = arith.addi %1, %207 : vector<128x1xi32>
    %c8_i32_78 = arith.constant 8 : i32
    %209 = vector.broadcast %c8_i32_78 : i32 to vector<128x1xi32>
    %210 = arith.cmpi slt, %208, %209 : vector<128x1xi32>
    %211 = arith.andi %206, %210 : vector<128x1xi1>
    %c25 = arith.constant 25 : index
    %c0_79 = arith.constant 0 : index
    %212 = vector.load %arg22[%c25, %c0_79] : memref<160x16xf32, #tpu.memory_space<vmem>>, vector<128x16xf32>
    %cst_80 = arith.constant 0.000000e+00 : f32
    %213 = vector.shape_cast %211 : vector<128x1xi1> to vector<128x1xi1>
    %214 = vector.broadcast %213 : vector<128x1xi1> to vector<128x16xi1>
    %215 = vector.broadcast %cst_80 : f32 to vector<128x16xf32>
    %216 = arith.select %214, %212, %215 : vector<128x16xi1>, vector<128x16xf32>
    %217 = vector.extract_strided_slice %13 {offsets = [8, 0, 0], sizes = [1, 1, 16], strides = [1, 1, 1]} : vector<9x1x16xf32> to vector<1x1x16xf32>
    %218 = vector.shape_cast %217 : vector<1x1x16xf32> to vector<1x16xf32>
    %219 = vector.broadcast %218 : vector<1x16xf32> to vector<128x16xf32>
    %220 = arith.mulf %216, %219 : vector<128x16xf32>
    %221 = arith.addf %201, %220 : vector<128x16xf32>
    %c0_81 = arith.constant 0 : index
    %c0_82 = arith.constant 0 : index
    %222 = vector.load %arg7[%c0_81, %c0_82] : memref<1x16xf32, #tpu.memory_space<vmem>>, vector<1x16xf32>
    %223 = vector.broadcast %222 : vector<1x16xf32> to vector<128x16xf32>
    %224 = arith.addf %221, %223 : vector<128x16xf32>
    %225 = arith.truncf %224 : vector<128x16xf32> to vector<128x16xbf16>
    %c0_83 = arith.constant 0 : index
    %c0_84 = arith.constant 0 : index
    %226 = vector.load %arg8[%c0_83, %c0_84] : memref<16x32xbf16, #tpu.memory_space<vmem>>, vector<16x32xbf16>
    %cst_85 = arith.constant dense<0.000000e+00> : vector<128x32xf32>
    %227 = tpu.matmul %225, %226, %cst_85 {dimension_numbers = #tpu.dot_dimension_numbers<[1], [0], [0], [1], [0, 0, 1, 1], [], []>} : vector<128x16xbf16>, vector<16x32xbf16>, vector<128x32xf32> -> vector<128x32xf32>
    %c0_86 = arith.constant 0 : index
    %c0_87 = arith.constant 0 : index
    %228 = vector.load %arg9[%c0_86, %c0_87] : memref<1x32xf32, #tpu.memory_space<vmem>>, vector<1x32xf32>
    %229 = vector.broadcast %228 : vector<1x32xf32> to vector<128x32xf32>
    %230 = arith.addf %227, %229 : vector<128x32xf32>
    %cst_88 = arith.constant dense<0.000000e+00> : vector<32xf32>
    %231 = vector.multi_reduction <add>, %230, %cst_88 [0] : vector<128x32xf32> to vector<32xf32>
    %232 = vector.shape_cast %231 : vector<32xf32> to vector<1x32xf32>
    %cst_89 = arith.constant 1.280000e+02 : f32
    %233 = vector.broadcast %cst_89 : f32 to vector<1x32xf32>
    %234 = arith.divf %232, %233 : vector<1x32xf32>
    %235 = vector.broadcast %234 : vector<1x32xf32> to vector<128x32xf32>
    %236 = arith.subf %230, %235 : vector<128x32xf32>
    %237 = arith.mulf %236, %236 : vector<128x32xf32>
    %cst_90 = arith.constant dense<0.000000e+00> : vector<32xf32>
    %238 = vector.multi_reduction <add>, %237, %cst_90 [0] : vector<128x32xf32> to vector<32xf32>
    %239 = vector.shape_cast %238 : vector<32xf32> to vector<1x32xf32>
    %cst_91 = arith.constant 1.280000e+02 : f32
    %240 = vector.broadcast %cst_91 : f32 to vector<1x32xf32>
    %241 = arith.divf %239, %240 : vector<1x32xf32>
    %242 = vector.broadcast %234 : vector<1x32xf32> to vector<128x32xf32>
    %243 = arith.subf %230, %242 : vector<128x32xf32>
    %cst_92 = arith.constant 9.99999974E-6 : f32
    %244 = vector.broadcast %cst_92 : f32 to vector<1x32xf32>
    %245 = arith.addf %241, %244 : vector<1x32xf32>
    %246 = math.rsqrt %245 : vector<1x32xf32>
    %247 = vector.broadcast %246 : vector<1x32xf32> to vector<128x32xf32>
    %248 = arith.mulf %243, %247 : vector<128x32xf32>
    %c0_93 = arith.constant 0 : index
    %c0_94 = arith.constant 0 : index
    %249 = vector.load %arg10[%c0_93, %c0_94] : memref<1x32xf32, #tpu.memory_space<vmem>>, vector<1x32xf32>
    %250 = vector.broadcast %249 : vector<1x32xf32> to vector<128x32xf32>
    %251 = arith.mulf %248, %250 : vector<128x32xf32>
    %c0_95 = arith.constant 0 : index
    %c0_96 = arith.constant 0 : index
    %252 = vector.load %arg11[%c0_95, %c0_96] : memref<1x32xf32, #tpu.memory_space<vmem>>, vector<1x32xf32>
    %253 = vector.broadcast %252 : vector<1x32xf32> to vector<128x32xf32>
    %254 = arith.addf %251, %253 : vector<128x32xf32>
    %cst_97 = arith.constant 0.000000e+00 : f32
    %255 = vector.broadcast %cst_97 : f32 to vector<128x32xf32>
    %256 = arith.maximumf %254, %255 : vector<128x32xf32>
    %cst_98 = arith.constant 0.000000e+00 : f32
    %257 = vector.broadcast %cst_98 : f32 to vector<160x32xf32>
    %c0_99 = arith.constant 0 : index
    %c0_100 = arith.constant 0 : index
    %258 = vector.load %arg23[%c0_99, %c0_100] : memref<160x32xf32, #tpu.memory_space<vmem>>, vector<160x32xf32>
    tpu.vector_store %arg23[%c0_99, %c0_100], %257 {strides = array<i32>} : memref<160x32xf32, #tpu.memory_space<vmem>>, vector<160x32xf32>,
    %c16_101 = arith.constant 16 : index
    %c0_102 = arith.constant 0 : index
    %259 = vector.load %arg23[%c16_101, %c0_102] : memref<160x32xf32, #tpu.memory_space<vmem>>, vector<128x32xf32>
    tpu.vector_store %arg23[%c16_101, %c0_102], %256 {strides = array<i32>} : memref<160x32xf32, #tpu.memory_space<vmem>>, vector<128x32xf32>,
    %c0_103 = arith.constant 0 : index
    %c0_104 = arith.constant 0 : index
    %c0_105 = arith.constant 0 : index
    %260 = vector.load %arg12[%c0_103, %c0_104, %c0_105] : memref<9x1x32xf32, #tpu.memory_space<vmem>>, vector<9x1x32xf32>
    %cst_106 = arith.constant 0.000000e+00 : f32
    %261 = vector.broadcast %cst_106 : f32 to vector<128x32xf32>
    %c-1_i32_107 = arith.constant -1 : i32
    %262 = vector.broadcast %c-1_i32_107 : i32 to vector<128x1xi32>
    %263 = arith.addi %0, %262 : vector<128x1xi32>
    %c0_i32_108 = arith.constant 0 : i32
    %264 = vector.broadcast %c0_i32_108 : i32 to vector<128x1xi32>
    %265 = arith.cmpi sge, %263, %264 : vector<128x1xi32>
    %c-1_i32_109 = arith.constant -1 : i32
    %266 = vector.broadcast %c-1_i32_109 : i32 to vector<128x1xi32>
    %267 = arith.addi %0, %266 : vector<128x1xi32>
    %c8_i32_110 = arith.constant 8 : i32
    %268 = vector.broadcast %c8_i32_110 : i32 to vector<128x1xi32>
    %269 = arith.cmpi slt, %267, %268 : vector<128x1xi32>
    %270 = arith.andi %265, %269 : vector<128x1xi1>
    %c-1_i32_111 = arith.constant -1 : i32
    %271 = vector.broadcast %c-1_i32_111 : i32 to vector<128x1xi32>
    %272 = arith.addi %1, %271 : vector<128x1xi32>
    %c0_i32_112 = arith.constant 0 : i32
    %273 = vector.broadcast %c0_i32_112 : i32 to vector<128x1xi32>
    %274 = arith.cmpi sge, %272, %273 : vector<128x1xi32>
    %275 = arith.andi %270, %274 : vector<128x1xi1>
    %c-1_i32_113 = arith.constant -1 : i32
    %276 = vector.broadcast %c-1_i32_113 : i32 to vector<128x1xi32>
    %277 = arith.addi %1, %276 : vector<128x1xi32>
    %c8_i32_114 = arith.constant 8 : i32
    %278 = vector.broadcast %c8_i32_114 : i32 to vector<128x1xi32>
    %279 = arith.cmpi slt, %277, %278 : vector<128x1xi32>
    %280 = arith.andi %275, %279 : vector<128x1xi1>
    %c7_115 = arith.constant 7 : index
    %c0_116 = arith.constant 0 : index
    %281 = vector.load %arg23[%c7_115, %c0_116] : memref<160x32xf32, #tpu.memory_space<vmem>>, vector<128x32xf32>
    %cst_117 = arith.constant 0.000000e+00 : f32
    %282 = vector.shape_cast %280 : vector<128x1xi1> to vector<128x1xi1>
    %283 = vector.broadcast %282 : vector<128x1xi1> to vector<128x32xi1>
    %284 = vector.broadcast %cst_117 : f32 to vector<128x32xf32>
    %285 = arith.select %283, %281, %284 : vector<128x32xi1>, vector<128x32xf32>
    %286 = vector.extract_strided_slice %260 {offsets = [0, 0, 0], sizes = [1, 1, 32], strides = [1, 1, 1]} : vector<9x1x32xf32> to vector<1x1x32xf32>
    %287 = vector.shape_cast %286 : vector<1x1x32xf32> to vector<1x32xf32>
    %288 = vector.broadcast %287 : vector<1x32xf32> to vector<128x32xf32>
    %289 = arith.mulf %285, %288 : vector<128x32xf32>
    %290 = arith.addf %261, %289 : vector<128x32xf32>
    %c0_i32_118 = arith.constant 0 : i32
    %291 = vector.broadcast %c0_i32_118 : i32 to vector<128x1xi32>
    %292 = arith.addi %1, %291 : vector<128x1xi32>
    %c0_i32_119 = arith.constant 0 : i32
    %293 = vector.broadcast %c0_i32_119 : i32 to vector<128x1xi32>
    %294 = arith.cmpi sge, %292, %293 : vector<128x1xi32>
    %295 = arith.andi %270, %294 : vector<128x1xi1>
    %c0_i32_120 = arith.constant 0 : i32
    %296 = vector.broadcast %c0_i32_120 : i32 to vector<128x1xi32>
    %297 = arith.addi %1, %296 : vector<128x1xi32>
    %c8_i32_121 = arith.constant 8 : i32
    %298 = vector.broadcast %c8_i32_121 : i32 to vector<128x1xi32>
    %299 = arith.cmpi slt, %297, %298 : vector<128x1xi32>
    %300 = arith.andi %295, %299 : vector<128x1xi1>
    %c8_122 = arith.constant 8 : index
    %c0_123 = arith.constant 0 : index
    %301 = vector.load %arg23[%c8_122, %c0_123] : memref<160x32xf32, #tpu.memory_space<vmem>>, vector<128x32xf32>
    %cst_124 = arith.constant 0.000000e+00 : f32
    %302 = vector.shape_cast %300 : vector<128x1xi1> to vector<128x1xi1>
    %303 = vector.broadcast %302 : vector<128x1xi1> to vector<128x32xi1>
    %304 = vector.broadcast %cst_124 : f32 to vector<128x32xf32>
    %305 = arith.select %303, %301, %304 : vector<128x32xi1>, vector<128x32xf32>
    %306 = vector.extract_strided_slice %260 {offsets = [1, 0, 0], sizes = [1, 1, 32], strides = [1, 1, 1]} : vector<9x1x32xf32> to vector<1x1x32xf32>
    %307 = vector.shape_cast %306 : vector<1x1x32xf32> to vector<1x32xf32>
    %308 = vector.broadcast %307 : vector<1x32xf32> to vector<128x32xf32>
    %309 = arith.mulf %305, %308 : vector<128x32xf32>
    %310 = arith.addf %290, %309 : vector<128x32xf32>
    %c1_i32_125 = arith.constant 1 : i32
    %311 = vector.broadcast %c1_i32_125 : i32 to vector<128x1xi32>
    %312 = arith.addi %1, %311 : vector<128x1xi32>
    %c0_i32_126 = arith.constant 0 : i32
    %313 = vector.broadcast %c0_i32_126 : i32 to vector<128x1xi32>
    %314 = arith.cmpi sge, %312, %313 : vector<128x1xi32>
    %315 = arith.andi %270, %314 : vector<128x1xi1>
    %c1_i32_127 = arith.constant 1 : i32
    %316 = vector.broadcast %c1_i32_127 : i32 to vector<128x1xi32>
    %317 = arith.addi %1, %316 : vector<128x1xi32>
    %c8_i32_128 = arith.constant 8 : i32
    %318 = vector.broadcast %c8_i32_128 : i32 to vector<128x1xi32>
    %319 = arith.cmpi slt, %317, %318 : vector<128x1xi32>
    %320 = arith.andi %315, %319 : vector<128x1xi1>
    %c9_129 = arith.constant 9 : index
    %c0_130 = arith.constant 0 : index
    %321 = vector.load %arg23[%c9_129, %c0_130] : memref<160x32xf32, #tpu.memory_space<vmem>>, vector<128x32xf32>
    %cst_131 = arith.constant 0.000000e+00 : f32
    %322 = vector.shape_cast %320 : vector<128x1xi1> to vector<128x1xi1>
    %323 = vector.broadcast %322 : vector<128x1xi1> to vector<128x32xi1>
    %324 = vector.broadcast %cst_131 : f32 to vector<128x32xf32>
    %325 = arith.select %323, %321, %324 : vector<128x32xi1>, vector<128x32xf32>
    %326 = vector.extract_strided_slice %260 {offsets = [2, 0, 0], sizes = [1, 1, 32], strides = [1, 1, 1]} : vector<9x1x32xf32> to vector<1x1x32xf32>
    %327 = vector.shape_cast %326 : vector<1x1x32xf32> to vector<1x32xf32>
    %328 = vector.broadcast %327 : vector<1x32xf32> to vector<128x32xf32>
    %329 = arith.mulf %325, %328 : vector<128x32xf32>
    %330 = arith.addf %310, %329 : vector<128x32xf32>
    %c0_i32_132 = arith.constant 0 : i32
    %331 = vector.broadcast %c0_i32_132 : i32 to vector<128x1xi32>
    %332 = arith.addi %0, %331 : vector<128x1xi32>
    %c0_i32_133 = arith.constant 0 : i32
    %333 = vector.broadcast %c0_i32_133 : i32 to vector<128x1xi32>
    %334 = arith.cmpi sge, %332, %333 : vector<128x1xi32>
    %c0_i32_134 = arith.constant 0 : i32
    %335 = vector.broadcast %c0_i32_134 : i32 to vector<128x1xi32>
    %336 = arith.addi %0, %335 : vector<128x1xi32>
    %c8_i32_135 = arith.constant 8 : i32
    %337 = vector.broadcast %c8_i32_135 : i32 to vector<128x1xi32>
    %338 = arith.cmpi slt, %336, %337 : vector<128x1xi32>
    %339 = arith.andi %334, %338 : vector<128x1xi1>
    %c-1_i32_136 = arith.constant -1 : i32
    %340 = vector.broadcast %c-1_i32_136 : i32 to vector<128x1xi32>
    %341 = arith.addi %1, %340 : vector<128x1xi32>
    %c0_i32_137 = arith.constant 0 : i32
    %342 = vector.broadcast %c0_i32_137 : i32 to vector<128x1xi32>
    %343 = arith.cmpi sge, %341, %342 : vector<128x1xi32>
    %344 = arith.andi %339, %343 : vector<128x1xi1>
    %c-1_i32_138 = arith.constant -1 : i32
    %345 = vector.broadcast %c-1_i32_138 : i32 to vector<128x1xi32>
    %346 = arith.addi %1, %345 : vector<128x1xi32>
    %c8_i32_139 = arith.constant 8 : i32
    %347 = vector.broadcast %c8_i32_139 : i32 to vector<128x1xi32>
    %348 = arith.cmpi slt, %346, %347 : vector<128x1xi32>
    %349 = arith.andi %344, %348 : vector<128x1xi1>
    %c15_140 = arith.constant 15 : index
    %c0_141 = arith.constant 0 : index
    %350 = vector.load %arg23[%c15_140, %c0_141] : memref<160x32xf32, #tpu.memory_space<vmem>>, vector<128x32xf32>
    %cst_142 = arith.constant 0.000000e+00 : f32
    %351 = vector.shape_cast %349 : vector<128x1xi1> to vector<128x1xi1>
    %352 = vector.broadcast %351 : vector<128x1xi1> to vector<128x32xi1>
    %353 = vector.broadcast %cst_142 : f32 to vector<128x32xf32>
    %354 = arith.select %352, %350, %353 : vector<128x32xi1>, vector<128x32xf32>
    %355 = vector.extract_strided_slice %260 {offsets = [3, 0, 0], sizes = [1, 1, 32], strides = [1, 1, 1]} : vector<9x1x32xf32> to vector<1x1x32xf32>
    %356 = vector.shape_cast %355 : vector<1x1x32xf32> to vector<1x32xf32>
    %357 = vector.broadcast %356 : vector<1x32xf32> to vector<128x32xf32>
    %358 = arith.mulf %354, %357 : vector<128x32xf32>
    %359 = arith.addf %330, %358 : vector<128x32xf32>
    %c0_i32_143 = arith.constant 0 : i32
    %360 = vector.broadcast %c0_i32_143 : i32 to vector<128x1xi32>
    %361 = arith.addi %1, %360 : vector<128x1xi32>
    %c0_i32_144 = arith.constant 0 : i32
    %362 = vector.broadcast %c0_i32_144 : i32 to vector<128x1xi32>
    %363 = arith.cmpi sge, %361, %362 : vector<128x1xi32>
    %364 = arith.andi %339, %363 : vector<128x1xi1>
    %c0_i32_145 = arith.constant 0 : i32
    %365 = vector.broadcast %c0_i32_145 : i32 to vector<128x1xi32>
    %366 = arith.addi %1, %365 : vector<128x1xi32>
    %c8_i32_146 = arith.constant 8 : i32
    %367 = vector.broadcast %c8_i32_146 : i32 to vector<128x1xi32>
    %368 = arith.cmpi slt, %366, %367 : vector<128x1xi32>
    %369 = arith.andi %364, %368 : vector<128x1xi1>
    %c16_147 = arith.constant 16 : index
    %c0_148 = arith.constant 0 : index
    %370 = vector.load %arg23[%c16_147, %c0_148] : memref<160x32xf32, #tpu.memory_space<vmem>>, vector<128x32xf32>
    %cst_149 = arith.constant 0.000000e+00 : f32
    %371 = vector.shape_cast %369 : vector<128x1xi1> to vector<128x1xi1>
    %372 = vector.broadcast %371 : vector<128x1xi1> to vector<128x32xi1>
    %373 = vector.broadcast %cst_149 : f32 to vector<128x32xf32>
    %374 = arith.select %372, %370, %373 : vector<128x32xi1>, vector<128x32xf32>
    %375 = vector.extract_strided_slice %260 {offsets = [4, 0, 0], sizes = [1, 1, 32], strides = [1, 1, 1]} : vector<9x1x32xf32> to vector<1x1x32xf32>
    %376 = vector.shape_cast %375 : vector<1x1x32xf32> to vector<1x32xf32>
    %377 = vector.broadcast %376 : vector<1x32xf32> to vector<128x32xf32>
    %378 = arith.mulf %374, %377 : vector<128x32xf32>
    %379 = arith.addf %359, %378 : vector<128x32xf32>
    %c1_i32_150 = arith.constant 1 : i32
    %380 = vector.broadcast %c1_i32_150 : i32 to vector<128x1xi32>
    %381 = arith.addi %1, %380 : vector<128x1xi32>
    %c0_i32_151 = arith.constant 0 : i32
    %382 = vector.broadcast %c0_i32_151 : i32 to vector<128x1xi32>
    %383 = arith.cmpi sge, %381, %382 : vector<128x1xi32>
    %384 = arith.andi %339, %383 : vector<128x1xi1>
    %c1_i32_152 = arith.constant 1 : i32
    %385 = vector.broadcast %c1_i32_152 : i32 to vector<128x1xi32>
    %386 = arith.addi %1, %385 : vector<128x1xi32>
    %c8_i32_153 = arith.constant 8 : i32
    %387 = vector.broadcast %c8_i32_153 : i32 to vector<128x1xi32>
    %388 = arith.cmpi slt, %386, %387 : vector<128x1xi32>
    %389 = arith.andi %384, %388 : vector<128x1xi1>
    %c17_154 = arith.constant 17 : index
    %c0_155 = arith.constant 0 : index
    %390 = vector.load %arg23[%c17_154, %c0_155] : memref<160x32xf32, #tpu.memory_space<vmem>>, vector<128x32xf32>
    %cst_156 = arith.constant 0.000000e+00 : f32
    %391 = vector.shape_cast %389 : vector<128x1xi1> to vector<128x1xi1>
    %392 = vector.broadcast %391 : vector<128x1xi1> to vector<128x32xi1>
    %393 = vector.broadcast %cst_156 : f32 to vector<128x32xf32>
    %394 = arith.select %392, %390, %393 : vector<128x32xi1>, vector<128x32xf32>
    %395 = vector.extract_strided_slice %260 {offsets = [5, 0, 0], sizes = [1, 1, 32], strides = [1, 1, 1]} : vector<9x1x32xf32> to vector<1x1x32xf32>
    %396 = vector.shape_cast %395 : vector<1x1x32xf32> to vector<1x32xf32>
    %397 = vector.broadcast %396 : vector<1x32xf32> to vector<128x32xf32>
    %398 = arith.mulf %394, %397 : vector<128x32xf32>
    %399 = arith.addf %379, %398 : vector<128x32xf32>
    %c1_i32_157 = arith.constant 1 : i32
    %400 = vector.broadcast %c1_i32_157 : i32 to vector<128x1xi32>
    %401 = arith.addi %0, %400 : vector<128x1xi32>
    %c0_i32_158 = arith.constant 0 : i32
    %402 = vector.broadcast %c0_i32_158 : i32 to vector<128x1xi32>
    %403 = arith.cmpi sge, %401, %402 : vector<128x1xi32>
    %c1_i32_159 = arith.constant 1 : i32
    %404 = vector.broadcast %c1_i32_159 : i32 to vector<128x1xi32>
    %405 = arith.addi %0, %404 : vector<128x1xi32>
    %c8_i32_160 = arith.constant 8 : i32
    %406 = vector.broadcast %c8_i32_160 : i32 to vector<128x1xi32>
    %407 = arith.cmpi slt, %405, %406 : vector<128x1xi32>
    %408 = arith.andi %403, %407 : vector<128x1xi1>
    %c-1_i32_161 = arith.constant -1 : i32
    %409 = vector.broadcast %c-1_i32_161 : i32 to vector<128x1xi32>
    %410 = arith.addi %1, %409 : vector<128x1xi32>
    %c0_i32_162 = arith.constant 0 : i32
    %411 = vector.broadcast %c0_i32_162 : i32 to vector<128x1xi32>
    %412 = arith.cmpi sge, %410, %411 : vector<128x1xi32>
    %413 = arith.andi %408, %412 : vector<128x1xi1>
    %c-1_i32_163 = arith.constant -1 : i32
    %414 = vector.broadcast %c-1_i32_163 : i32 to vector<128x1xi32>
    %415 = arith.addi %1, %414 : vector<128x1xi32>
    %c8_i32_164 = arith.constant 8 : i32
    %416 = vector.broadcast %c8_i32_164 : i32 to vector<128x1xi32>
    %417 = arith.cmpi slt, %415, %416 : vector<128x1xi32>
    %418 = arith.andi %413, %417 : vector<128x1xi1>
    %c23_165 = arith.constant 23 : index
    %c0_166 = arith.constant 0 : index
    %419 = vector.load %arg23[%c23_165, %c0_166] : memref<160x32xf32, #tpu.memory_space<vmem>>, vector<128x32xf32>
    %cst_167 = arith.constant 0.000000e+00 : f32
    %420 = vector.shape_cast %418 : vector<128x1xi1> to vector<128x1xi1>
    %421 = vector.broadcast %420 : vector<128x1xi1> to vector<128x32xi1>
    %422 = vector.broadcast %cst_167 : f32 to vector<128x32xf32>
    %423 = arith.select %421, %419, %422 : vector<128x32xi1>, vector<128x32xf32>
    %424 = vector.extract_strided_slice %260 {offsets = [6, 0, 0], sizes = [1, 1, 32], strides = [1, 1, 1]} : vector<9x1x32xf32> to vector<1x1x32xf32>
    %425 = vector.shape_cast %424 : vector<1x1x32xf32> to vector<1x32xf32>
    %426 = vector.broadcast %425 : vector<1x32xf32> to vector<128x32xf32>
    %427 = arith.mulf %423, %426 : vector<128x32xf32>
    %428 = arith.addf %399, %427 : vector<128x32xf32>
    %c0_i32_168 = arith.constant 0 : i32
    %429 = vector.broadcast %c0_i32_168 : i32 to vector<128x1xi32>
    %430 = arith.addi %1, %429 : vector<128x1xi32>
    %c0_i32_169 = arith.constant 0 : i32
    %431 = vector.broadcast %c0_i32_169 : i32 to vector<128x1xi32>
    %432 = arith.cmpi sge, %430, %431 : vector<128x1xi32>
    %433 = arith.andi %408, %432 : vector<128x1xi1>
    %c0_i32_170 = arith.constant 0 : i32
    %434 = vector.broadcast %c0_i32_170 : i32 to vector<128x1xi32>
    %435 = arith.addi %1, %434 : vector<128x1xi32>
    %c8_i32_171 = arith.constant 8 : i32
    %436 = vector.broadcast %c8_i32_171 : i32 to vector<128x1xi32>
    %437 = arith.cmpi slt, %435, %436 : vector<128x1xi32>
    %438 = arith.andi %433, %437 : vector<128x1xi1>
    %c24_172 = arith.constant 24 : index
    %c0_173 = arith.constant 0 : index
    %439 = vector.load %arg23[%c24_172, %c0_173] : memref<160x32xf32, #tpu.memory_space<vmem>>, vector<128x32xf32>
    %cst_174 = arith.constant 0.000000e+00 : f32
    %440 = vector.shape_cast %438 : vector<128x1xi1> to vector<128x1xi1>
    %441 = vector.broadcast %440 : vector<128x1xi1> to vector<128x32xi1>
    %442 = vector.broadcast %cst_174 : f32 to vector<128x32xf32>
    %443 = arith.select %441, %439, %442 : vector<128x32xi1>, vector<128x32xf32>
    %444 = vector.extract_strided_slice %260 {offsets = [7, 0, 0], sizes = [1, 1, 32], strides = [1, 1, 1]} : vector<9x1x32xf32> to vector<1x1x32xf32>
    %445 = vector.shape_cast %444 : vector<1x1x32xf32> to vector<1x32xf32>
    %446 = vector.broadcast %445 : vector<1x32xf32> to vector<128x32xf32>
    %447 = arith.mulf %443, %446 : vector<128x32xf32>
    %448 = arith.addf %428, %447 : vector<128x32xf32>
    %c1_i32_175 = arith.constant 1 : i32
    %449 = vector.broadcast %c1_i32_175 : i32 to vector<128x1xi32>
    %450 = arith.addi %1, %449 : vector<128x1xi32>
    %c0_i32_176 = arith.constant 0 : i32
    %451 = vector.broadcast %c0_i32_176 : i32 to vector<128x1xi32>
    %452 = arith.cmpi sge, %450, %451 : vector<128x1xi32>
    %453 = arith.andi %408, %452 : vector<128x1xi1>
    %c1_i32_177 = arith.constant 1 : i32
    %454 = vector.broadcast %c1_i32_177 : i32 to vector<128x1xi32>
    %455 = arith.addi %1, %454 : vector<128x1xi32>
    %c8_i32_178 = arith.constant 8 : i32
    %456 = vector.broadcast %c8_i32_178 : i32 to vector<128x1xi32>
    %457 = arith.cmpi slt, %455, %456 : vector<128x1xi32>
    %458 = arith.andi %453, %457 : vector<128x1xi1>
    %c25_179 = arith.constant 25 : index
    %c0_180 = arith.constant 0 : index
    %459 = vector.load %arg23[%c25_179, %c0_180] : memref<160x32xf32, #tpu.memory_space<vmem>>, vector<128x32xf32>
    %cst_181 = arith.constant 0.000000e+00 : f32
    %460 = vector.shape_cast %458 : vector<128x1xi1> to vector<128x1xi1>
    %461 = vector.broadcast %460 : vector<128x1xi1> to vector<128x32xi1>
    %462 = vector.broadcast %cst_181 : f32 to vector<128x32xf32>
    %463 = arith.select %461, %459, %462 : vector<128x32xi1>, vector<128x32xf32>
    %464 = vector.extract_strided_slice %260 {offsets = [8, 0, 0], sizes = [1, 1, 32], strides = [1, 1, 1]} : vector<9x1x32xf32> to vector<1x1x32xf32>
    %465 = vector.shape_cast %464 : vector<1x1x32xf32> to vector<1x32xf32>
    %466 = vector.broadcast %465 : vector<1x32xf32> to vector<128x32xf32>
    %467 = arith.mulf %463, %466 : vector<128x32xf32>
    %468 = arith.addf %448, %467 : vector<128x32xf32>
    %c0_182 = arith.constant 0 : index
    %c0_183 = arith.constant 0 : index
    %469 = vector.load %arg13[%c0_182, %c0_183] : memref<1x32xf32, #tpu.memory_space<vmem>>, vector<1x32xf32>
    %470 = vector.broadcast %469 : vector<1x32xf32> to vector<128x32xf32>
    %471 = arith.addf %468, %470 : vector<128x32xf32>
    %472 = arith.truncf %471 : vector<128x32xf32> to vector<128x32xbf16>
    %c0_184 = arith.constant 0 : index
    %c0_185 = arith.constant 0 : index
    %473 = vector.load %arg14[%c0_184, %c0_185] : memref<32x64xbf16, #tpu.memory_space<vmem>>, vector<32x64xbf16>
    %cst_186 = arith.constant dense<0.000000e+00> : vector<128x64xf32>
    %474 = tpu.matmul %472, %473, %cst_186 {dimension_numbers = #tpu.dot_dimension_numbers<[1], [0], [0], [1], [0, 0, 1, 1], [], []>} : vector<128x32xbf16>, vector<32x64xbf16>, vector<128x64xf32> -> vector<128x64xf32>
    %c0_187 = arith.constant 0 : index
    %c0_188 = arith.constant 0 : index
    %475 = vector.load %arg15[%c0_187, %c0_188] : memref<1x64xf32, #tpu.memory_space<vmem>>, vector<1x64xf32>
    %476 = vector.broadcast %475 : vector<1x64xf32> to vector<128x64xf32>
    %477 = arith.addf %474, %476 : vector<128x64xf32>
    %cst_189 = arith.constant dense<0.000000e+00> : vector<64xf32>
    %478 = vector.multi_reduction <add>, %477, %cst_189 [0] : vector<128x64xf32> to vector<64xf32>
    %479 = vector.shape_cast %478 : vector<64xf32> to vector<1x64xf32>
    %cst_190 = arith.constant 1.280000e+02 : f32
    %480 = vector.broadcast %cst_190 : f32 to vector<1x64xf32>
    %481 = arith.divf %479, %480 : vector<1x64xf32>
    %482 = vector.broadcast %481 : vector<1x64xf32> to vector<128x64xf32>
    %483 = arith.subf %477, %482 : vector<128x64xf32>
    %484 = arith.mulf %483, %483 : vector<128x64xf32>
    %cst_191 = arith.constant dense<0.000000e+00> : vector<64xf32>
    %485 = vector.multi_reduction <add>, %484, %cst_191 [0] : vector<128x64xf32> to vector<64xf32>
    %486 = vector.shape_cast %485 : vector<64xf32> to vector<1x64xf32>
    %cst_192 = arith.constant 1.280000e+02 : f32
    %487 = vector.broadcast %cst_192 : f32 to vector<1x64xf32>
    %488 = arith.divf %486, %487 : vector<1x64xf32>
    %489 = vector.broadcast %481 : vector<1x64xf32> to vector<128x64xf32>
    %490 = arith.subf %477, %489 : vector<128x64xf32>
    %cst_193 = arith.constant 9.99999974E-6 : f32
    %491 = vector.broadcast %cst_193 : f32 to vector<1x64xf32>
    %492 = arith.addf %488, %491 : vector<1x64xf32>
    %493 = math.rsqrt %492 : vector<1x64xf32>
    %494 = vector.broadcast %493 : vector<1x64xf32> to vector<128x64xf32>
    %495 = arith.mulf %490, %494 : vector<128x64xf32>
    %c0_194 = arith.constant 0 : index
    %c0_195 = arith.constant 0 : index
    %496 = vector.load %arg16[%c0_194, %c0_195] : memref<1x64xf32, #tpu.memory_space<vmem>>, vector<1x64xf32>
    %497 = vector.broadcast %496 : vector<1x64xf32> to vector<128x64xf32>
    %498 = arith.mulf %495, %497 : vector<128x64xf32>
    %c0_196 = arith.constant 0 : index
    %c0_197 = arith.constant 0 : index
    %499 = vector.load %arg17[%c0_196, %c0_197] : memref<1x64xf32, #tpu.memory_space<vmem>>, vector<1x64xf32>
    %500 = vector.broadcast %499 : vector<1x64xf32> to vector<128x64xf32>
    %501 = arith.addf %498, %500 : vector<128x64xf32>
    %cst_198 = arith.constant 0.000000e+00 : f32
    %502 = vector.broadcast %cst_198 : f32 to vector<128x64xf32>
    %503 = arith.maximumf %501, %502 : vector<128x64xf32>
    %c0_199 = arith.constant 0 : index
    %c0_200 = arith.constant 0 : index
    %504 = vector.load %arg20[%c0_199, %c0_200] : memref<128x64xf32, #tpu.memory_space<vmem>>, vector<128x64xf32>
    tpu.vector_store %arg20[%c0_199, %c0_200], %503 {strides = array<i32>} : memref<128x64xf32, #tpu.memory_space<vmem>>, vector<128x64xf32>,
    %c0_201 = arith.constant 0 : index
    %c0_202 = arith.constant 0 : index
    %505 = vector.load %arg5[%c0_201, %c0_202] : memref<2x128xf32, #tpu.memory_space<vmem>>, vector<2x128xf32>
    %cst_203 = arith.constant dense<0.000000e+00> : vector<2x64xf32>
    %506 = tpu.matmul %505, %503, %cst_203 {dimension_numbers = #tpu.dot_dimension_numbers<[1], [0], [0], [1], [0, 0, 1, 1], [], []>} : vector<2x128xf32>, vector<128x64xf32>, vector<2x64xf32> -> vector<2x64xf32>
    %c0_204 = arith.constant 0 : index
    %c0_205 = arith.constant 0 : index
    %507 = vector.load %arg18[%c0_204, %c0_205] : memref<1x64xf32, #tpu.memory_space<vmem>>, vector<1x64xf32>
    %508 = vector.broadcast %507 : vector<1x64xf32> to vector<2x64xf32>
    %509 = arith.mulf %506, %508 : vector<2x64xf32>
    %cst_206 = arith.constant dense<0.000000e+00> : vector<2xf32>
    %510 = vector.multi_reduction <add>, %509, %cst_206 [1] : vector<2x64xf32> to vector<2xf32>
    %511 = vector.shape_cast %510 : vector<2xf32> to vector<2x1xf32>
    %c0_207 = arith.constant 0 : index
    %c0_208 = arith.constant 0 : index
    %512 = vector.load %arg19[%c0_207, %c0_208] : memref<1x1xf32, #tpu.memory_space<vmem>>, vector<1x1xf32>
    %513 = vector.broadcast %512 : vector<1x1xf32> to vector<2x1xf32>
    %514 = arith.addf %511, %513 : vector<2x1xf32>
    %515 = arith.negf %514 : vector<2x1xf32>
    %516 = math.exp %515 : vector<2x1xf32>
    %cst_209 = arith.constant 1.000000e+00 : f32
    %517 = vector.broadcast %cst_209 : f32 to vector<2x1xf32>
    %518 = arith.addf %517, %516 : vector<2x1xf32>
    %519 = arith.divf %517, %518 : vector<2x1xf32>
    %c0_210 = arith.constant 0 : index
    %c0_211 = arith.constant 0 : index
    %520 = vector.load %arg21[%c0_210, %c0_211] : memref<2x1xf32, #tpu.memory_space<vmem>>, vector<2x1xf32>
    tpu.vector_store %arg21[%c0_210, %c0_211], %519 {strides = array<i32>} : memref<2x1xf32, #tpu.memory_space<vmem>>, vector<2x1xf32>,
    return
  }
}

</mosaic_0001>

<bundles_post_ra>
// kernel: state_aware_encoder.1
= control target key start
LH: loop header
LB: loop body
LE: loop exit
PB: predicated region body
PF: predicated region fallthrough
CT: control target
= control target key end

     0   :  { %s8233_s0 = inlined_call_operand.vmem [shape: bf16[128,32], index: 0, kind: input, shape index: {}]   ;;  %s8234_s1 = inlined_call_operand.vmem [shape: bf16[32,16], index: 1, kind: input, shape index: {}]   ;;  %s8235_s2 = inlined_call_operand.vmem [shape: f32[1,16], index: 2, kind: input, shape index: {}]   ;;  %s8236_s3 = inlined_call_operand.vmem [shape: s32[128,1], index: 3, kind: input, shape index: {}]   ;;  %s8237_s4 = inlined_call_operand.vmem [shape: s32[128,1], index: 4, kind: input, shape index: {}]   ;;  %s8238_s5 = inlined_call_operand.vmem [shape: f32[2,128], index: 5, kind: input, shape index: {}]   ;;  %s8239_s6 = inlined_call_operand.vmem [shape: f32[9,1,16], index: 6, kind: input, shape index: {}]   ;;  %s8240_s7 = inlined_call_operand.vmem [shape: f32[1,16], index: 7, kind: input, shape index: {}]   ;;  %s8241_s8 = inlined_call_operand.vmem [shape: bf16[16,32], index: 8, kind: input, shape index: {}]   ;;  %s8242_s9 = inlined_call_operand.vmem [shape: f32[1,32], index: 9, kind: input, shape index: {}]   ;;  %s8243_s10 = inlined_call_operand.vmem [shape: f32[1,32], index: 10, kind: input, shape index: {}]   ;;  %s8244_s11 = inlined_call_operand.vmem [shape: f32[1,32], index: 11, kind: input, shape index: {}]   ;;  %s8245_s12 = inlined_call_operand.vmem [shape: f32[9,1,32], index: 12, kind: input, shape index: {}]   ;;  %s8246_s13 = inlined_call_operand.vmem [shape: f32[1,32], index: 13, kind: input, shape index: {}]   ;;  %s8247_s14 = inlined_call_operand.vmem [shape: bf16[32,64], index: 14, kind: input, shape index: {}]   ;;  %s8248_s15 = inlined_call_operand.vmem [shape: f32[1,64], index: 15, kind: input, shape index: {}]   ;;  %s8249_s16 = inlined_call_operand.vmem [shape: f32[1,64], index: 16, kind: input, shape index: {}]   ;;  %s8250_s17 = inlined_call_operand.vmem [shape: f32[1,64], index: 17, kind: input, shape index: {}]   ;;  %s8251_s18 = inlined_call_operand.vmem [shape: f32[1,64], index: 18, kind: input, shape index: {}]   ;;  %s8252_s19 = inlined_call_operand.<no memory space> [shape: f32[1,1], index: 19, kind: input, shape index: {}]   ;;  %s8253_s20 = inlined_call_operand.hbm [shape: f32[128,64], index: 20, kind: output, shape index: {0}]   ;;  %s8254_s21 = inlined_call_operand.vmem [shape: f32[2,1], index: 21, kind: output, shape index: {1}]  }
   0x1   :  { %8665 = sst [smem:[#allocation131_spill]] %s8233_s0  ;;  %v27_v0 = vstv %s8252_s19 }
   0x2   :  { %8666 = sst [smem:[#allocation132_spill]] %s8234_s1  ;;  %28 = vst [vmem:[#allocation4] sm:$0x1] %v27_v0 }
   0x3   :  { %8667 = sst [smem:[#allocation133_spill]] %s8235_s2 }
   0x4   :  { %8668 = sst [smem:[#allocation134_spill]] %s8236_s3 }
   0x5   :  { %8669 = sst [smem:[#allocation135_spill]] %s8237_s4 }
   0x6   :  { %8670 = sst [smem:[#allocation136_spill]] %s8238_s5 }
   0x7   :  { %s8671_s3 = sld [smem:[#allocation132_spill]]  ;;  %v8349_v2 = vmov 0   ;;  %vm8281_vm0 = vcmask 261120   ;;  %v8337_v54 = vmov 0.0   ;;  %v8723_v52 = vmov 0 }
   0x8   :  { %3961 = vset.pattern.permute.xlu1 %v8349_v2  ;;  %3960 = vset.pattern.permute.xlu0 %v8349_v2  ;;  %s8672_s30 = sld [smem:[#allocation134_spill]]  ;;  %2665 = vst.msk [vmem:[#allocation3 + $0x8] sm:$0xff] %vm8281_vm0, %v8337_v54  ;;  %2664 = vst.msk [vmem:[#allocation3] sm:$0xff] %vm8281_vm0, %v8337_v54  ;;  %v8727_v56 = vmov 0 }
   0x9   :  { %s8673_s22 = sld [smem:[#allocation135_spill]]  ;;  %2666 = vst.msk [vmem:[#allocation3 + $0x10] sm:$0xff] %vm8281_vm0, %v8337_v54  ;;  %2667 = vst.msk [vmem:[#allocation3 + $0x18] sm:$0xff] %vm8281_vm0, %v8337_v54 }
   0xa   :  { %s8674_s24 = sld [smem:[#allocation131_spill]]  ;;  %2668 = vst.msk [vmem:[#allocation3 + $0x20] sm:$0xff] %vm8281_vm0, %v8337_v54  ;;  %2669 = vst.msk [vmem:[#allocation3 + $0x28] sm:$0xff] %vm8281_vm0, %v8337_v54 }
   0xb   :  { %2670 = vst.msk [vmem:[#allocation3 + $0x30] sm:$0xff] %vm8281_vm0, %v8337_v54  ;;  %2671 = vst.msk [vmem:[#allocation3 + $0x38] sm:$0xff] %vm8281_vm0, %v8337_v54  ;;  %s8873_s5 = sld [smem:[#allocation133_spill]] }
   0xc   :  { %2672 = vst.msk [vmem:[#allocation3 + $0x40] sm:$0xff] %vm8281_vm0, %v8337_v54  ;;  %2673 = vst.msk [vmem:[#allocation3 + $0x48] sm:$0xff] %vm8281_vm0, %v8337_v54 }
   0xd   :  { %v3962_v1 = vld [vmem:[%s8671_s3 + $0x8] sm:$0xff]   ;;  %v3963_v3 = vld [vmem:[%s8671_s3] sm:$0xff]   ;;  %2674 = vst.msk [vmem:[#allocation3 + $0x50] sm:$0xff] %vm8281_vm0, %v8337_v54  ;;  %2675 = vst.msk [vmem:[#allocation3 + $0x58] sm:$0xff] %vm8281_vm0, %v8337_v54 }
   0xe   :  { %3861 = vmatprep.subr.bf16.mxu0 %v3962_v1  ;;  %v4150_v4 = vld [vmem:[%s8672_s30] sm:$0xff]  ;;  %v4172_v10 = vld [vmem:[%s8672_s30 + $0x8] sm:$0xff]  ;;  %v4189_v14 = vld [vmem:[%s8672_s30 + $0x18] sm:$0xff]  ;;  %2676 = vst.msk [vmem:[#allocation3 + $0x60] sm:$0xff] %vm8281_vm0, %v8337_v54 }
   0xf   :  { %v4155_v5 = vld [vmem:[%s8673_s22] sm:$0xff]  ;;  %3862 = vmatpush3.bf16.msra.mxu0 %v3962_v1  ;;  %v366_v6 = vadd.s32 4294967295, %v4150_v4  ;;  %v4183_v12 = vld [vmem:[%s8673_s22 + $0x8] sm:$0xff]  ;;  %v367_v13 = vadd.s32 4294967295, %v4172_v10  ;;  %v4202_v16 = vld [vmem:[%s8673_s22 + $0x18] sm:$0xff]  ;;  %v369_v19 = vadd.s32 4294967295, %v4189_v14 }
  0x10   :  { %v4159_v7 = vadd.s32 4294967295, %v4155_v5  ;;  %3863 = vmatprep.subr.bf16.mxu0 %v3963_v3  ;;  %vm8260_vm1 = vcmp.ge.s32.totalorder %v4155_v5, 0  ;;  %v3964_v8 = vld [vmem:[%s8674_s24] sm:$0xff]   ;;  %vm8259_vm4 = vcmp.lt.s32.totalorder %v4155_v5, 8  ;;  %v3965_v9 = vld [vmem:[%s8674_s24 + $0x8] sm:$0xff]   ;;  %v4197_v15 = vadd.s32 4294967295, %v4183_v12 }
  0x11   :  { %vm382_vm2 = vcmp.ge.s32.totalorder %v366_v6, 0  ;;  %vm398_vm3 = vcmp.lt.s32.totalorder %v366_v6, 8  ;;  %3865 = vmatprep.mubr.msk.bf16.mxu0 %vm8281_vm0, %v3964_v8  ;;  %vm383_vm10 = vcmp.ge.s32.totalorder %v367_v13, 0  ;;  %vm399_vm11 = vcmp.lt.s32.totalorder %v367_v13, 8  ;;  %v3966_v17 = vld [vmem:[%s8674_s24 + $0x10] sm:$0xff]   ;;  %v3967_v28 = vld [vmem:[%s8674_s24 + $0x18] sm:$0xff]  }
  0x12   :  { %vm4174_vm5 = vmand %vm382_vm2, %vm398_vm3  ;;  %vm8264_vm6 = vcmp.ge.s32.totalorder %v4159_v7, 0  ;;  %vm8263_vm8 = vcmp.lt.s32.totalorder %v4159_v7, 8  ;;  %vm8262_vm13 = vcmp.ge.s32.totalorder %v4183_v12, 0  ;;  %v4219_v20 = vld [vmem:[%s8672_s30 + $0x10] sm:$0xff]  ;;  %vm8261_vm15 = vcmp.lt.s32.totalorder %v4183_v12, 8  ;;  %v3968_v29 = vld [vmem:[%s8674_s24 + $0x20] sm:$0xff]  }
  0x13   :  { %3864 = vmatpush3.bf16.msra.mxu0 %v3963_v3  ;;  %vm676_vm7 = vmand %vm4174_vm5, %vm8260_vm1  ;;  %v4226_v21 = vadd.s32 4294967295, %v4202_v16  ;;  %v4231_v22 = vld [vmem:[%s8673_s22 + $0x10] sm:$0xff]  ;;  %vm8279_vm3 = vcmp.ge.s32.totalorder %v4197_v15, 0  ;;  %v368_v25 = vadd.s32 4294967295, %v4219_v20  ;;  %v4288_v34 = vadd.s32 1, %v4183_v12  ;;  %v3969_v37 = vld [vmem:[%s8674_s24 + $0x28] sm:$0xff]  }
  0x14   :  { %vm708_vm9 = vmand %vm676_vm7, %vm8259_vm4  ;;  %v4250_v26 = vadd.s32 4294967295, %v4231_v22  ;;  %v4300_v35 = vadd.s32 1, %v4155_v5  ;;  %v4315_v38 = vadd.s32 1, %v4202_v16  ;;  %v3970_v40 = vld [vmem:[%s8674_s24 + $0x30] sm:$0xff]   ;;  %v4330_v41 = vadd.s32 1, %v4231_v22  ;;  %v3971_v45 = vld [vmem:[%s8674_s24 + $0x38] sm:$0xff]   ;;  %3919 = vmatprep.subr.mxu0 %v8337_v54 }
  0x15   :  { %v740_v18 = vsel %vm708_vm9, 1, %v8349_v2  ;;  %vm462_vm12 = vmand %vm4174_vm5, %vm8264_vm6  ;;  %vm8265_vm9 = vcmp.lt.s32.totalorder %v4197_v15, 8  ;;  %vm8283_vm4 = vcmp.ge.s32.totalorder %v4226_v21, 0  ;;  %vm8266_vm1 = vcmp.lt.s32.totalorder %v4226_v21, 8  ;;  %2677 = vst.msk [vmem:[#allocation3 + $0x68] sm:$0xff] %vm8281_vm0, %v8337_v54  ;;  %v4515_v57 = vld [vmem:[%s8672_s30 + $0x28] sm:$0xff] }
  0x16   :  { %757 = vperm.xlu1 %3961, %v740_v18   ;;  %vm494_vm14 = vmand %vm462_vm12, %vm8263_vm8  ;;  %3866 = vmatmul.mubr.msk.bf16.vlgmr.msra.gmra.mxu0 %vm8281_vm0, %v3965_v9  ;;  %vm401_vm12 = vcmp.lt.s32.totalorder %v369_v19, 8  ;;  %vm8273_vm8 = vcmp.ge.s32.totalorder %v4250_v26, 0  ;;  %2678 = vst.msk [vmem:[#allocation3 + $0x70] sm:$0xff] %vm8281_vm0, %v8337_v54  ;;  %v4522_v58 = vld [vmem:[%s8673_s22 + $0x28] sm:$0xff]  ;;  %v371_v60 = vadd.s32 4294967295, %v4515_v57  ;;  %v4535_v61 = vld [vmem:[%s8672_s30 + $0x20] sm:$0xff] }
  0x17   :  { %v526_v23 = vsel %vm494_vm14, 1, %v8349_v2  ;;  %vm4235_vm2 = vmand %vm383_vm10, %vm399_vm11  ;;  %3869 = vmatprep.mubr.msk.bf16.mxu0 %vm8281_vm0, %v3966_v17  ;;  %vm385_vm11 = vcmp.ge.s32.totalorder %v369_v19, 0  ;;  %2679 = vst.msk [vmem:[#allocation3 + $0x78] sm:$0xff] %vm8281_vm0, %v8337_v54  ;;  %v4543_v63 = vadd.s32 4294967295, %v4522_v58  ;;  %v4548_v0 = vld [vmem:[%s8673_s22 + $0x20] sm:$0xff]  ;;  %v370_v3 = vadd.s32 4294967295, %v4535_v61 }
  0x18   :  { %543 = vperm.xlu0 %3960, %v526_v23   ;;  %vm677_vm7 = vmand %vm4235_vm2, %vm8262_vm13  ;;  %vm400_vm13 = vcmp.lt.s32.totalorder %v368_v25, 8  ;;  %2680 = vst.msk [vmem:[#allocation3 + $0x80] sm:$0xff] %vm8281_vm0, %v8337_v54  ;;  %v4561_v6 = vadd.s32 4294967295, %v4548_v0  ;;  %v4599_v18 = vld [vmem:[%s8672_s30 + $0x38] sm:$0xff]  ;;  %v1702_v17 = vadd.s32 1, %v4535_v61 }
  0x19   :  { %vm709_vm10 = vmand %vm677_vm7, %vm8261_vm15  ;;  %vm384_vm15 = vcmp.ge.s32.totalorder %v368_v25, 0  ;;  %2681 = vst.msk [vmem:[#allocation3 + $0x88] sm:$0xff] %vm8281_vm0, %v8337_v54  ;;  %v4607_v19 = vld [vmem:[%s8673_s22 + $0x38] sm:$0xff]  ;;  %v373_v24 = vadd.s32 4294967295, %v4599_v18  ;;  %v4621_v25 = vld [vmem:[%s8672_s30 + $0x30] sm:$0xff] }
  0x1a   :  { %v741_v27 = vsel %vm709_vm10, 1, %v8349_v2  ;;  %vm463_vm14 = vmand %vm4235_vm2, %vm8279_vm3  ;;  %2682 = vst.msk [vmem:[#allocation3 + $0x90] sm:$0xff] %vm8281_vm0, %v8337_v54  ;;  %v372_v31 = vadd.s32 4294967295, %v4621_v25 }
  0x1b   :  { %760 = vperm.xlu1 %3961, %v741_v27   ;;  %vm495_vm7 = vmand %vm463_vm14, %vm8265_vm9  ;;  %vm8267_vm9 = vcmp.lt.s32.totalorder %v4250_v26, 8  ;;  %2683 = vst.msk [vmem:[#allocation3 + $0x98] sm:$0xff] %vm8281_vm0, %v8337_v54 }
  0x1c   :  { %v527_v30 = vsel %vm495_vm7, 1, %v8349_v2  ;;  %vm4268_vm10 = vmand %vm385_vm11, %vm401_vm12  ;;  %vm8268_vm12 = vcmp.ge.s32.totalorder %v4202_v16, 0 }
  0x1d   :  { %546 = vperm.xlu0 %3960, %v527_v30   ;;  %vm465_vm14 = vmand %vm4268_vm10, %vm8283_vm4 }
  0x1e   :  { %vm497_vm6 = vmand %vm465_vm14, %vm8266_vm1  ;;  %3870 = vmatmul.mubr.msk.bf16.gmra.mxu0 %vm8281_vm0, %v3967_v28  ;;  %vm8269_vm14 = vcmp.lt.s32.totalorder %v4202_v16, 8  ;;  %vm8271_vm1 = vcmp.lt.s32.totalorder %v4231_v22, 8  ;;  %v4629_v28 = vadd.s32 4294967295, %v4607_v19 }
  0x1f   :  { %v529_v32 = vsel %vm497_vm6, 1, %v8349_v2  ;;  %vm4282_vm11 = vmand %vm384_vm15, %vm400_vm13  ;;  %3873 = vmatprep.mubr.msk.bf16.mxu0 %vm8281_vm0, %v3968_v29  ;;  %vm8270_vm13 = vcmp.ge.s32.totalorder %v4231_v22, 0  ;;  %v4634_v29 = vld [vmem:[%s8673_s22 + $0x30] sm:$0xff] }
  0x20   :  { %552 = vperm.xlu1 %3961, %v529_v32   ;;  %vm464_vm7 = vmand %vm4282_vm11, %vm8273_vm8  ;;  %vm8278_vm8 = vcmp.ge.s32.totalorder %v4330_v41, 0  ;;  %v4647_v32 = vadd.s32 4294967295, %v4634_v29  ;;  %v4753_v53 = vadd.s32 1, %v4634_v29 }
  0x21   :  { %vm496_vm6 = vmand %vm464_vm7, %vm8267_vm9  ;;  %vm8272_vm9 = vcmp.ge.s32.totalorder %v4288_v34, 0 }
  0x22   :  { %v528_v36 = vsel %vm496_vm6, 1, %v8349_v2  ;;  %vm679_vm15 = vmand %vm4268_vm10, %vm8268_vm12  ;;  %vm8284_vm12 = vcmp.lt.s32.totalorder %v4288_v34, 8 }
  0x23   :  { %549 = vperm.xlu0 %3960, %v528_v36   ;;  %vm711_vm7 = vmand %vm679_vm15, %vm8269_vm14  ;;  %vm8280_vm14 = vcmp.ge.s32.totalorder %v4300_v35, 0 }
  0x24   :  { %v743_v39 = vsel %vm711_vm7, 1, %v8349_v2  ;;  %vm678_vm6 = vmand %vm4282_vm11, %vm8270_vm13  ;;  %vm8274_vm13 = vcmp.lt.s32.totalorder %v4300_v35, 8 }
  0x25   :  { %766 = vperm.xlu1 %3961, %v743_v39   ;;  %vm710_vm15 = vmand %vm678_vm6, %vm8271_vm1  ;;  %vm8275_vm1 = vcmp.ge.s32.totalorder %v4315_v38, 0 }
  0x26   :  { %v742_v42 = vsel %vm710_vm15, 1, %v8349_v2  ;;  %vm907_vm7 = vmand %vm4235_vm2, %vm8272_vm9  ;;  %3874 = vmatmul.mubr.msk.bf16.gmra.mxu0 %vm8281_vm0, %v3969_v37  ;;  %vm8276_vm2 = vcmp.lt.s32.totalorder %v4315_v38, 8 }
  0x27   :  { %763 = vperm.xlu0 %3960, %v742_v42   ;;  %vm939_vm6 = vmand %vm907_vm7, %vm8284_vm12  ;;  %3877 = vmatprep.mubr.msk.bf16.mxu0 %vm8281_vm0, %v3970_v40  ;;  %vm8290_vm12 = vcmp.ge.s32.totalorder %v4561_v6, 0  ;;  %v4952_v40 = vld [vmem:[%s8673_s22 + $0x40] sm:$0xff] }
  0x28   :  { %v971_v43 = vsel %vm939_vm6, 1, %v8349_v2  ;;  %vm906_vm15 = vmand %vm4174_vm5, %vm8280_vm14  ;;  %vm8277_vm6 = vcmp.lt.s32.totalorder %v4330_v41, 8  ;;  %8778 = vst [vmem:[#allocation10_spill] sm:$0xff] %v4952_v40 }
  0x29   :  { %990 = vperm.xlu1 %3961, %v971_v43   ;;  %vm938_vm9 = vmand %vm906_vm15, %vm8274_vm13  ;;  %vm1105_vm15 = vcmp.ge.s32.totalorder %v4172_v10, 0  ;;  %vm1121_vm13 = vcmp.lt.s32.totalorder %v4172_v10, 8  ;;  %v4694_v43 = vadd.s32 1, %v4522_v58 }
  0x2a   :  { %v970_v44 = vsel %vm938_vm9, 1, %v8349_v2  ;;  %vm909_vm7 = vmand %vm4268_vm10, %vm8275_vm1 }
  0x2b   :  { %987 = vperm.xlu0 %3960, %v970_v44   ;;  %vm941_vm5 = vmand %vm909_vm7, %vm8276_vm2  ;;  %vm1104_vm7 = vcmp.ge.s32.totalorder %v4150_v4, 0  ;;  %vm1120_vm2 = vcmp.lt.s32.totalorder %v4150_v4, 8 }
  0x2c   :  { %v973_v46 = vsel %vm941_vm5, 1, %v8349_v2  ;;  %vm908_vm9 = vmand %vm4282_vm11, %vm8278_vm8  ;;  %vm8685_vm5 = vcmp.lt.s32.totalorder %v4197_v15, 8 }
  0x2d   :  { %996 = vperm.xlu1 %3961, %v973_v46   ;;  %vm940_vm10 = vmand %vm908_vm9, %vm8277_vm6  ;;  %vm8688_vm6 = vcmp.ge.s32.totalorder %v4159_v7, 0 }
  0x2e   :  { %v972_v47 = vsel %vm940_vm10, 1, %v8349_v2  ;;  %vm4373_vm1 = vmand %vm1105_vm15, %vm1121_vm13  ;;  %3878 = vmatmul.mubr.msk.bf16.gmra.mxu0 %vm8281_vm0, %v3971_v45  ;;  %vm1107_vm15 = vcmp.ge.s32.totalorder %v4189_v14, 0  ;;  %vm1123_vm10 = vcmp.lt.s32.totalorder %v4189_v14, 8  ;;  %vm403_vm0 = vcmp.lt.s32.totalorder %v371_v60, 8 }
  0x2f   :  { %993 = vperm.xlu0 %3960, %v972_v47   ;;  %vm1153_vm11 = vmand %vm4373_vm1, %vm8279_vm3  ;;  %vm8689_vm3 = vcmp.lt.s32.totalorder %v4159_v7, 8  ;;  %v4704_v45 = vadd.s32 1, %v4548_v0  ;;  %v1699_v47 = vadd.s32 1, %v4172_v10  ;;  %v1698_v10 = vadd.s32 1, %v4150_v4 }
  0x30   :  { %vm1169_vm9 = vmand %vm1153_vm11, %vm8685_vm5  ;;  %vm1106_vm11 = vcmp.ge.s32.totalorder %v4219_v20, 0  ;;  %vm8282_vm5 = vcmask 130048  }
  0x31   :  { %v1201_v49 = vsel %vm1169_vm9, 1, %v8349_v2  ;;  %vm4387_vm13 = vmand %vm1104_vm7, %vm1120_vm2  ;;  %vm1122_vm7 = vcmp.lt.s32.totalorder %v4219_v20, 8  ;;  %322 = vst.msk [vmem:[#allocation2 + $0x8] sm:$0xff] %vm8282_vm5, %v8337_v54  ;;  %vm8697_vm9 = vcmp.ge.s32.totalorder %v4250_v26, 0 }
  0x32   :  { %1220 = vperm.xlu1 %3961, %v1201_v49   ;;  %vm1152_vm8 = vmand %vm4387_vm13, %vm8688_vm6  ;;  %321 = vst.msk [vmem:[#allocation2] sm:$0xff] %vm8282_vm5, %v8337_v54 }
  0x33   :  { %vm1168_vm14 = vmand %vm1152_vm8, %vm8689_vm3  ;;  %323 = vst.msk [vmem:[#allocation2 + $0x10] sm:$0xff] %vm8282_vm5, %v8337_v54  ;;  %vm8694_vm8 = vcmp.lt.s32.totalorder %v4226_v21, 8 }
  0x34   :  { %v1200_v51 = vsel %vm1168_vm14, 1, %v8349_v2  ;;  %vm4401_vm2 = vmand %vm1107_vm15, %vm1123_vm10  ;;  %324 = vst.msk [vmem:[#allocation2 + $0x18] sm:$0xff] %vm8282_vm5, %v8337_v54  ;;  %vm8698_vm10 = vcmp.lt.s32.totalorder %v4250_v26, 8 }
  0x35   :  { %1217 = vperm.xlu0 %3960, %v1200_v51   ;;  %vm4410_vm6 = vmand %vm4401_vm2, %vm8283_vm4  ;;  %325 = vst.msk [vmem:[#allocation2 + $0x20] sm:$0xff] %vm8282_vm5, %v8337_v54  ;;  %vm402_vm4 = vcmp.lt.s32.totalorder %v370_v3, 8  ;;  %v4741_v51 = vadd.s32 1, %v4607_v19 }
  0x36   :  { %326 = vst.msk [vmem:[#allocation2 + $0x28] sm:$0xff] %vm8282_vm5, %v8337_v54  ;;  %327 = vst.msk [vmem:[#allocation2 + $0x30] sm:$0xff] %vm8282_vm5, %v8337_v54 }
  0x37   :  { %328 = vst.msk [vmem:[#allocation2 + $0x38] sm:$0xff] %vm8282_vm5, %v8337_v54  ;;  %329 = vst.msk [vmem:[#allocation2 + $0x40] sm:$0xff] %vm8282_vm5, %v8337_v54 }
  0x38   :  { %330 = vst.msk [vmem:[#allocation2 + $0x48] sm:$0xff] %vm8282_vm5, %v8337_v54  ;;  %331 = vst.msk [vmem:[#allocation2 + $0x50] sm:$0xff] %vm8282_vm5, %v8337_v54 }
  0x39   :  { %332 = vst.msk [vmem:[#allocation2 + $0x58] sm:$0xff] %vm8282_vm5, %v8337_v54  ;;  %333 = vst.msk [vmem:[#allocation2 + $0x60] sm:$0xff] %vm8282_vm5, %v8337_v54 }
  0x3a   :  { %334 = vst.msk [vmem:[#allocation2 + $0x68] sm:$0xff] %vm8282_vm5, %v8337_v54  ;;  %335 = vst.msk [vmem:[#allocation2 + $0x70] sm:$0xff] %vm8282_vm5, %v8337_v54 }
  0x3b   :  { %336 = vst.msk [vmem:[#allocation2 + $0x78] sm:$0xff] %vm8282_vm5, %v8337_v54  ;;  %337 = vst.msk [vmem:[#allocation2 + $0x80] sm:$0xff] %vm8282_vm5, %v8337_v54 }
  0x3c   :  { %338 = vst.msk [vmem:[#allocation2 + $0x88] sm:$0xff] %vm8282_vm5, %v8337_v54  ;;  %339 = vst.msk [vmem:[#allocation2 + $0x90] sm:$0xff] %vm8282_vm5, %v8337_v54 }
  0x3d   :  { %340 = vst.msk [vmem:[#allocation2 + $0x98] sm:$0xff] %vm8282_vm5, %v8337_v54  ;;  %vm1171_vm3 = vmand %vm4410_vm6, %vm8694_vm8  ;;  %vm8700_vm8 = vcmp.lt.s32.totalorder %v4183_v12, 8 }
  0x3e   :  { %v1203_v55 = vsel %vm1171_vm3, 1, %v8349_v2  ;;  %vm4504_vm14 = vmand %vm1106_vm11, %vm1122_vm7  ;;  %vm8699_vm11 = vcmp.ge.s32.totalorder %v4183_v12, 0 }
  0x3f   :  { %1226 = vperm.xlu1 %3961, %v1203_v55   ;;  %vm1154_vm15 = vmand %vm4504_vm14, %vm8697_vm9  ;;  %vm8701_vm9 = vcmp.ge.s32.totalorder %v4155_v5, 0 }
  0x40   :  { %vm1170_vm6 = vmand %vm1154_vm15, %vm8698_vm10  ;;  %vm8702_vm10 = vcmp.lt.s32.totalorder %v4155_v5, 8 }
  0x41   :  { %v1202_v59 = vsel %vm1170_vm6, 1, %v8349_v2  ;;  %vm1335_vm7 = vmand %vm4373_vm1, %vm8699_vm11  ;;  %vm8703_vm11 = vcmp.ge.s32.totalorder %v4202_v16, 0 }
  0x42   :  { %1223 = vperm.xlu0 %3960, %v1202_v59   ;;  %vm1351_vm3 = vmand %vm1335_vm7, %vm8700_vm8  ;;  %vm8704_vm8 = vcmp.lt.s32.totalorder %v4202_v16, 8  ;;  %v1701_v59 = vadd.s32 1, %v4189_v14  ;;  %v1700_v14 = vadd.s32 1, %v4219_v20 }
  0x43   :  { %v1383_v62 = vsel %vm1351_vm3, 1, %v8349_v2  ;;  %vm1334_vm15 = vmand %vm4387_vm13, %vm8701_vm9  ;;  %vm387_vm9 = vcmp.ge.s32.totalorder %v371_v60, 0 }
  0x44   :  { %1402 = vperm.xlu1 %3961, %v1383_v62   ;;  %vm1350_vm6 = vmand %vm1334_vm15, %vm8702_vm10  ;;  %vm8705_vm15 = vcmp.ge.s32.totalorder %v4231_v22, 0 }
  0x45   :  { %v1382_v1 = vsel %vm1350_vm6, 1, %v8349_v2  ;;  %vm1337_vm7 = vmand %vm4401_vm2, %vm8703_vm11  ;;  %vm8285_vm6 = vcmp.ge.s32.totalorder %v4543_v63, 0  ;;  %vm8706_vm11 = vcmp.lt.s32.totalorder %v4231_v22, 8 }
  0x46   :  { %1399 = vperm.xlu0 %3960, %v1382_v1   ;;  %vm1353_vm3 = vmand %vm1337_vm7, %vm8704_vm8  ;;  %vm8292_vm7 = vcmp.lt.s32.totalorder %v4543_v63, 8  ;;  %v5027_v1 = vld [vmem:[%s8672_s30 + $0x58] sm:$0xff] }
  0x47   :  { %v1385_v8 = vsel %vm1353_vm3, 1, %v8349_v2  ;;  %vm1336_vm10 = vmand %vm4504_vm14, %vm8705_vm15  ;;  %vm386_vm3 = vcmp.ge.s32.totalorder %v370_v3, 0 }
  0x48   :  { %1408 = vperm.xlu1 %3961, %v1385_v8   ;;  %vm1352_vm5 = vmand %vm1336_vm10, %vm8706_vm11  ;;  %vm8289_vm11 = vcmp.lt.s32.totalorder %v4561_v6, 8  ;;  %v8743_v8 = vmov 0 }
  0x49   :  { %v1384_v9 = vsel %vm1352_vm5, 1, %v8349_v2  ;;  %vm4573_vm8 = vmand %vm387_vm9, %vm403_vm0  ;;  %vm8288_vm5 = vcmp.ge.s32.totalorder %v4522_v58, 0 }
  0x4a   :  { %1405 = vperm.xlu0 %3960, %v1384_v9   ;;  %vm467_vm15 = vmand %vm4573_vm8, %vm8285_vm6  ;;  %vm8286_vm6 = vcmp.lt.s32.totalorder %v4522_v58, 8 }
  0x4b   :  { %vm499_vm10 = vmand %vm467_vm15, %vm8292_vm7  ;;  %vm404_vm7 = vcmp.lt.s32.totalorder %v372_v31, 8 }
  0x4c   :  { %v531_v13 = vsel %vm499_vm10, 1, %v8349_v2  ;;  %vm4586_vm0 = vmand %vm386_vm3, %vm402_vm4  ;;  %vm8287_vm3 = vcmp.ge.s32.totalorder %v4548_v0, 0  ;;  %vm8291_vm10 = vcmp.lt.s32.totalorder %v4548_v0, 8 }
  0x4d   :  { %558 = vperm.xlu1 %3961, %v531_v13   ;;  %vm466_vm9 = vmand %vm4586_vm0, %vm8290_vm12  ;;  %vm405_vm12 = vcmp.lt.s32.totalorder %v373_v24, 8 }
  0x4e   :  { %vm498_vm4 = vmand %vm466_vm9, %vm8289_vm11  ;;  %vm389_vm11 = vcmp.ge.s32.totalorder %v373_v24, 0 }
  0x4f   :  { %v530_v23 = vsel %vm498_vm4, 1, %v8349_v2  ;;  %vm681_vm15 = vmand %vm4573_vm8, %vm8288_vm5 }
  0x50   :  { %555 = vperm.xlu0 %3960, %v530_v23   ;;  %vm713_vm9 = vmand %vm681_vm15, %vm8286_vm6 }
  0x51   :  { %v745_v27 = vsel %vm713_vm9, 1, %v8349_v2  ;;  %vm680_vm4 = vmand %vm4586_vm0, %vm8287_vm3  ;;  %vm8711_vm9 = vcmp.ge.s32.totalorder %v4288_v34, 0  ;;  %vm8712_vm3 = vcmp.lt.s32.totalorder %v4288_v34, 8 }
  0x52   :  { %772 = vperm.xlu1 %3961, %v745_v27   ;;  %vm712_vm15 = vmand %vm680_vm4, %vm8291_vm10  ;;  %vm8713_vm4 = vcmp.ge.s32.totalorder %v4300_v35, 0 }
  0x53   :  { %v744_v30 = vsel %vm712_vm15, 1, %v8349_v2  ;;  %vm1517_vm6 = vmand %vm4373_vm1, %vm8711_vm9  ;;  %vm8293_vm1 = vcmp.ge.s32.totalorder %v4629_v28, 0  ;;  %vm8714_vm9 = vcmp.lt.s32.totalorder %v4300_v35, 8 }
  0x54   :  { %769 = vperm.xlu0 %3960, %v744_v30   ;;  %vm1533_vm5 = vmand %vm1517_vm6, %vm8712_vm3  ;;  %vm8294_vm6 = vcmp.lt.s32.totalorder %v4629_v28, 8 }
  0x55   :  { %v1565_v33 = vsel %vm1533_vm5, 1, %v8349_v2  ;;  %vm1516_vm15 = vmand %vm4387_vm13, %vm8713_vm4  ;;  %vm388_vm5 = vcmp.ge.s32.totalorder %v372_v31, 0  ;;  %vm8308_vm4 = vcmp.ge.s32.totalorder %v4647_v32, 0  ;;  %v4919_v31 = vld [vmem:[%s8672_s30 + $0x48] sm:$0xff] }
  0x56   :  { %1584 = vperm.xlu1 %3961, %v1565_v33   ;;  %vm1532_vm10 = vmand %vm1516_vm15, %vm8714_vm9  ;;  %vm8299_vm9 = vcmp.lt.s32.totalorder %v4647_v32, 8 }
  0x57   :  { %v1564_v36 = vsel %vm1532_vm10, 1, %v8349_v2  ;;  %vm4659_vm3 = vmand %vm389_vm11, %vm405_vm12  ;;  %vm8296_vm11 = vcmp.ge.s32.totalorder %v4607_v19, 0 }
  0x58   :  { %1581 = vperm.xlu0 %3960, %v1564_v36   ;;  %vm469_vm13 = vmand %vm4659_vm3, %vm8293_vm1  ;;  %vm8295_vm1 = vcmp.lt.s32.totalorder %v4607_v19, 8  ;;  %v375_v36 = vadd.s32 4294967295, %v4919_v31 }
  0x59   :  { %vm501_vm15 = vmand %vm469_vm13, %vm8294_vm6  ;;  %vm8297_vm6 = vcmp.ge.s32.totalorder %v4634_v29, 0 }
  0x5a   :  { %v533_v39 = vsel %vm501_vm15, 1, %v8349_v2  ;;  %vm4672_vm12 = vmand %vm388_vm5, %vm404_vm7  ;;  %vm8298_vm5 = vcmp.lt.s32.totalorder %v4634_v29, 8 }
  0x5b   :  { %564 = vperm.xlu1 %3961, %v533_v39   ;;  %vm468_vm10 = vmand %vm4672_vm12, %vm8308_vm4 }
  0x5c   :  { %vm500_vm13 = vmand %vm468_vm10, %vm8299_vm9  ;;  %vm8301_vm9 = vcmp.ge.s32.totalorder %v4704_v45, 0 }
  0x5d   :  { %v532_v42 = vsel %vm500_vm13, 1, %v8349_v2  ;;  %vm683_vm7 = vmand %vm4659_vm3, %vm8296_vm11 }
  0x5e   :  { %561 = vperm.xlu0 %3960, %v532_v42   ;;  %vm715_vm15 = vmand %vm683_vm7, %vm8295_vm1  ;;  %vm8719_vm7 = vcmp.ge.s32.totalorder %v4315_v38, 0  ;;  %v2779_v42 = vld [vmem:[#allocation3 + $0x8] sm:$0xff] }
  0x5f   :  { %v747_v44 = vsel %vm715_vm15, 1, %v8349_v2  ;;  %vm682_vm10 = vmand %vm4672_vm12, %vm8297_vm6  ;;  %vm8720_vm15 = vcmp.lt.s32.totalorder %v4315_v38, 8  ;;  %vm8303_vm6 = vcmp.ge.s32.totalorder %v4694_v43, 0 }
  0x60   :  { %778 = vperm.xlu1 %3961, %v747_v44   ;;  %vm714_vm13 = vmand %vm682_vm10, %vm8298_vm5  ;;  %vm8721_vm10 = vcmp.ge.s32.totalorder %v4330_v41, 0  ;;  %vm8302_vm5 = vcmp.lt.s32.totalorder %v4694_v43, 8  ;;  %v3790_v44 = vld [vmem:[%s8245_s12 + $0x1] ss:$0 sm:$0xff] }
  0x61   :  { %v746_v46 = vsel %vm714_vm13, 1, %v8349_v2  ;;  %vm1519_vm1 = vmand %vm4401_vm2, %vm8719_vm7  ;;  %vm8722_vm2 = vcmp.lt.s32.totalorder %v4330_v41, 8 }
  0x62   :  { %775 = vperm.xlu0 %3960, %v746_v46   ;;  %vm1535_vm11 = vmand %vm1519_vm1, %vm8720_vm15  ;;  %vm1715_vm15 = vcmp.ge.s32.totalorder %v1699_v47, 0 }
  0x63   :  { %v1567_v48 = vsel %vm1535_vm11, 1, %v8349_v2  ;;  %vm1518_vm13 = vmand %vm4504_vm14, %vm8721_vm10  ;;  %vm8300_vm11 = vcmp.lt.s32.totalorder %v4704_v45, 8  ;;  %vm1731_vm10 = vcmp.lt.s32.totalorder %v1699_v47, 8 }
  0x64   :  { %1590 = vperm.xlu1 %3961, %v1567_v48   ;;  %vm1534_vm7 = vmand %vm1518_vm13, %vm8722_vm2 }
  0x65   :  { %v1566_v49 = vsel %vm1534_vm7, 1, %v8349_v2  ;;  %vm911_vm1 = vmand %vm4573_vm8, %vm8303_vm6  ;;  %vm1714_vm7 = vcmp.ge.s32.totalorder %v1698_v10, 0  ;;  %vm1733_vm6 = vcmp.lt.s32.totalorder %v1701_v59, 8 }
  0x66   :  { %1587 = vperm.xlu0 %3960, %v1566_v49   ;;  %vm943_vm14 = vmand %vm911_vm1, %vm8302_vm5  ;;  %vm1730_vm1 = vcmp.lt.s32.totalorder %v1698_v10, 8  ;;  %vm1717_vm5 = vcmp.ge.s32.totalorder %v1701_v59, 0  ;;  %v2709_v49 = vld [vmem:[#allocation3 + $0x7] sm:$0xff]  ;;  %v4971_v10 = vadd.s32 4294967295, %v4952_v40 }
  0x67   :  { %v975_v50 = vsel %vm943_vm14, 1, %v8349_v2  ;;  %vm910_vm13 = vmand %vm4586_vm0, %vm8301_vm9  ;;  %vm8725_vm14 = vcmp.ge.s32.totalorder %v4197_v15, 0  ;;  %vm8304_vm9 = vcmp.lt.s32.totalorder %v4741_v51, 8 }
  0x68   :  { %1002 = vperm.xlu1 %3961, %v975_v50   ;;  %vm942_vm8 = vmand %vm910_vm13, %vm8300_vm11  ;;  %vm8726_vm13 = vcmp.lt.s32.totalorder %v4197_v15, 8  ;;  %8782 = vst [vmem:[#allocation11_spill] sm:$0xff] %v4971_v10 }
  0x69   :  { %v974_v4 = vsel %vm942_vm8, 1, %v8349_v2  ;;  %vm4744_vm2 = vmand %vm1715_vm15, %vm1731_vm10  ;;  %vm8307_vm10 = vcmp.ge.s32.totalorder %v4741_v51, 0  ;;  %vm8729_vm8 = vcmp.ge.s32.totalorder %v4159_v7, 0 }
  0x6a   :  { %v8724_v52 = vsel %vm4744_vm2, 4294967295, %v8723_v52  ;;  %999 = vperm.xlu0 %3960, %v974_v4   ;;  %vm1763_vm0 = vmand %vm4744_vm2, %vm8725_vm14  ;;  %v3789_v4 = vld [vmem:[%s8245_s12] ss:$0 sm:$0xff] }
  0x6b   :  { %vm1779_vm11 = vmand %vm1763_vm0, %vm8726_vm13  ;;  %vm8730_vm0 = vcmp.lt.s32.totalorder %v4159_v7, 8 }
  0x6c   :  { %v1811_v55 = vsel %vm1779_vm11, 1, %v8349_v2  ;;  %vm4758_vm15 = vmand %vm1714_vm7, %vm1730_vm1  ;;  %vm8305_vm11 = vcmp.ge.s32.totalorder %v4753_v53, 0  ;;  %vm8306_vm1 = vcmp.lt.s32.totalorder %v4753_v53, 8 }
  0x6d   :  { %v8728_v56 = vsel %vm4758_vm15, 4294967295, %v8727_v56  ;;  %1830 = vperm.xlu1 %3961, %v1811_v55   ;;  %vm1762_vm14 = vmand %vm4758_vm15, %vm8729_vm8 }
  0x6e   :  { %vm1778_vm13 = vmand %vm1762_vm14, %vm8730_vm0 }
  0x6f   :  { %v1810_v15 = vsel %vm1778_vm13, 1, %v8349_v2  ;;  %vm913_vm7 = vmand %vm4659_vm3, %vm8307_vm10  ;;  %vm1716_vm13 = vcmp.ge.s32.totalorder %v1700_v14, 0 }
  0x70   :  { %1827 = vperm.xlu0 %3960, %v1810_v15   ;;  %vm945_vm8 = vmand %vm913_vm7, %vm8304_vm9  ;;  %vm1732_vm7 = vcmp.lt.s32.totalorder %v1700_v14, 8 }
  0x71   :  { %v977_v7 = vsel %vm945_vm8, 1, %v8349_v2  ;;  %vm912_vm14 = vmand %vm4672_vm12, %vm8305_vm11  ;;  %vm8733_vm8 = vcmp.ge.s32.totalorder %v4226_v21, 0  ;;  %vm8734_vm12 = vcmp.lt.s32.totalorder %v4226_v21, 8 }
  0x72   :  { %1008 = vperm.xlu1 %3961, %v977_v7   ;;  %vm944_vm3 = vmand %vm912_vm14, %vm8306_vm1 }
  0x73   :  { %v976_v60 = vsel %vm944_vm3, 1, %v8349_v2  ;;  %vm4789_vm0 = vmand %vm1717_vm5, %vm1733_vm6  ;;  %vm1109_vm6 = vcmp.ge.s32.totalorder %v4515_v57, 0  ;;  %vm1125_vm5 = vcmp.lt.s32.totalorder %v4515_v57, 8  ;;  %vm8737_vm3 = vcmp.ge.s32.totalorder %v4250_v26, 0 }
  0x74   :  { %1005 = vperm.xlu0 %3960, %v976_v60   ;;  %vm1765_vm9 = vmand %vm4789_vm0, %vm8733_vm8  ;;  %vm8738_vm8 = vcmp.lt.s32.totalorder %v4250_v26, 8 }
  0x75   :  { %vm1781_vm11 = vmand %vm1765_vm9, %vm8734_vm12 }
  0x76   :  { %v1813_v62 = vsel %vm1781_vm11, 1, %v8349_v2  ;;  %vm4800_vm14 = vmand %vm1716_vm13, %vm1732_vm7  ;;  %vm1108_vm11 = vcmp.ge.s32.totalorder %v4535_v61, 0  ;;  %vm1124_vm13 = vcmp.lt.s32.totalorder %v4535_v61, 8  ;;  %vm8741_vm7 = vcmp.ge.s32.totalorder %v4543_v63, 0 }
  0x77   :  { %1836 = vperm.xlu1 %3961, %v1813_v62   ;;  %vm1764_vm1 = vmand %vm4800_vm14, %vm8737_vm3  ;;  %vm8742_vm3 = vcmp.lt.s32.totalorder %v4543_v63, 8 }
  0x78   :  { %vm1780_vm10 = vmand %vm1764_vm1, %vm8738_vm8  ;;  %vm8745_vm1 = vcmp.ge.s32.totalorder %v4561_v6, 0 }
  0x79   :  { %v1812_v21 = vsel %vm1780_vm10, 1, %v8349_v2  ;;  %vm4813_vm9 = vmand %vm1109_vm6, %vm1125_vm5  ;;  %vm8746_vm5 = vcmp.lt.s32.totalorder %v4561_v6, 8 }
  0x7a   :  { %1833 = vperm.xlu0 %3960, %v1812_v21   ;;  %vm1157_vm12 = vmand %vm4813_vm9, %vm8741_vm7  ;;  %vm8747_vm7 = vcmp.ge.s32.totalorder %v4183_v12, 0  ;;  %v5035_v21 = vld [vmem:[%s8673_s22 + $0x58] sm:$0xff] }
  0x7b   :  { %vm1173_vm4 = vmand %vm1157_vm12, %vm8742_vm3  ;;  %vm1111_vm12 = vcmp.ge.s32.totalorder %v4599_v18, 0  ;;  %vm1127_vm3 = vcmp.lt.s32.totalorder %v4599_v18, 8  ;;  %8792 = vst [vmem:[#allocation15_spill] sm:$0xff] %v5035_v21  ;;  %v5194_v61 = vadd.s32 1, %v5035_v21 }
  0x7c   :  { %v1205_v26 = vsel %vm1173_vm4, 1, %v8349_v2  ;;  %vm4826_vm10 = vmand %vm1108_vm11, %vm1124_vm13  ;;  %vm8748_vm11 = vcmp.lt.s32.totalorder %v4183_v12, 8 }
  0x7d   :  { %v8744_v8 = vsel %vm4826_vm10, 4294967295, %v8743_v8  ;;  %1232 = vperm.xlu1 %3961, %v1205_v26   ;;  %vm1156_vm6 = vmand %vm4826_vm10, %vm8745_vm1  ;;  %vm8749_vm1 = vcmp.ge.s32.totalorder %v4155_v5, 0  ;;  %8821 = vst [vmem:[#allocation31_spill] sm:$0xff] %v5194_v61 }
  0x7e   :  { %vm1172_vm8 = vmand %vm1156_vm6, %vm8746_vm5  ;;  %vm8750_vm5 = vcmp.lt.s32.totalorder %v4155_v5, 8 }
  0x7f   :  { %v1204_v9 = vsel %vm1172_vm8, 1, %v8349_v2  ;;  %vm1945_vm4 = vmand %vm4744_vm2, %vm8747_vm7 }
  0x80   :  { %1229 = vperm.xlu0 %3960, %v1204_v9   ;;  %vm1961_vm13 = vmand %vm1945_vm4, %vm8748_vm11  ;;  %vm1110_vm4 = vcmp.ge.s32.totalorder %v4621_v25, 0  ;;  %vm1126_vm11 = vcmp.lt.s32.totalorder %v4621_v25, 8 }
  0x81   :  { %v1993_v11 = vsel %vm1961_vm13, 1, %v8349_v2  ;;  %vm1944_vm6 = vmand %vm4758_vm15, %vm8749_vm1  ;;  %vm8753_vm13 = vcmp.ge.s32.totalorder %v4629_v28, 0  ;;  %vm8754_vm15 = vcmp.lt.s32.totalorder %v4629_v28, 8 }
  0x82   :  { %2012 = vperm.xlu1 %3961, %v1993_v11   ;;  %vm1960_vm8 = vmand %vm1944_vm6, %vm8750_vm5  ;;  %vm8758_vm5 = vcmp.lt.s32.totalorder %v4647_v32, 8  ;;  %v377_v11 = vadd.s32 4294967295, %v5027_v1 }
  0x83   :  { %v1992_v13 = vsel %vm1960_vm8, 1, %v8349_v2  ;;  %vm4853_vm7 = vmand %vm1111_vm12, %vm1127_vm3  ;;  %vm8757_vm12 = vcmp.ge.s32.totalorder %v4647_v32, 0 }
  0x84   :  { %2009 = vperm.xlu0 %3960, %v1992_v13   ;;  %vm1159_vm1 = vmand %vm4853_vm7, %vm8753_vm13  ;;  %vm8759_vm13 = vcmp.ge.s32.totalorder %v4202_v16, 0  ;;  %v5051_v13 = vld [vmem:[%s8672_s30 + $0x50] sm:$0xff] }
  0x85   :  { %vm1175_vm2 = vmand %vm1159_vm1, %vm8754_vm15  ;;  %vm8760_vm15 = vcmp.lt.s32.totalorder %v4202_v16, 8 }
  0x86   :  { %v1207_v5 = vsel %vm1175_vm2, 1, %v8349_v2  ;;  %vm4866_vm6 = vmand %vm1110_vm4, %vm1126_vm11  ;;  %vm8761_vm11 = vcmp.ge.s32.totalorder %v4231_v22, 0 }
  0x87   :  { %1238 = vperm.xlu1 %3961, %v1207_v5   ;;  %vm1158_vm3 = vmand %vm4866_vm6, %vm8757_vm12  ;;  %vm8762_vm12 = vcmp.lt.s32.totalorder %v4231_v22, 8 }
  0x88   :  { %vm1174_vm8 = vmand %vm1158_vm3, %vm8758_vm5  ;;  %vm8763_vm5 = vcmp.ge.s32.totalorder %v4522_v58, 0 }
  0x89   :  { %v1206_v23 = vsel %vm1174_vm8, 1, %v8349_v2  ;;  %vm1947_vm2 = vmand %vm4789_vm0, %vm8759_vm13  ;;  %vm8764_vm13 = vcmp.lt.s32.totalorder %v4522_v58, 8 }
  0x8a   :  { %1235 = vperm.xlu0 %3960, %v1206_v23   ;;  %vm1963_vm4 = vmand %vm1947_vm2, %vm8760_vm15  ;;  %vm8765_vm15 = vcmp.ge.s32.totalorder %v4548_v0, 0  ;;  %v5059_v23 = vadd.s32 4294967295, %v5035_v21 }
  0x8b   :  { %v1995_v24 = vsel %vm1963_vm4, 1, %v8349_v2  ;;  %vm1946_vm1 = vmand %vm4800_vm14, %vm8761_vm11  ;;  %vm8766_vm11 = vcmp.lt.s32.totalorder %v4548_v0, 8 }
  0x8c   :  { %2018 = vperm.xlu1 %3961, %v1995_v24   ;;  %vm1962_vm3 = vmand %vm1946_vm1, %vm8762_vm12  ;;  %vm8767_vm12 = vcmp.ge.s32.totalorder %v4288_v34, 0  ;;  %8794 = vst [vmem:[#allocation17_spill] sm:$0xff] %v5059_v23  ;;  %v5064_v24 = vld [vmem:[%s8673_s22 + $0x50] sm:$0xff] }
  0x8d   :  { %v1994_v27 = vsel %vm1962_vm3, 1, %v8349_v2  ;;  %vm1339_vm8 = vmand %vm4813_vm9, %vm8763_vm5  ;;  %vm8768_vm3 = vnez %v8724_v52  ;;  %8795 = vst [vmem:[#allocation18_spill] sm:$0xff] %v5064_v24  ;;  %v5208_v62 = vadd.s32 1, %v5064_v24 }
  0x8e   :  { %2015 = vperm.xlu0 %3960, %v1994_v27   ;;  %vm1355_vm2 = vmand %vm1339_vm8, %vm8764_vm13  ;;  %vm8769_vm8 = vcmp.lt.s32.totalorder %v4288_v34, 8  ;;  %v4926_v34 = vld [vmem:[%s8673_s22 + $0x48] sm:$0xff] }
  0x8f   :  { %v1387_v16 = vsel %vm1355_vm2, 1, %v8349_v2  ;;  %vm1338_vm4 = vmand %vm4826_vm10, %vm8765_vm15  ;;  %vm8770_vm2 = vcmp.ge.s32.totalorder %v4300_v35, 0  ;;  %vm8771_vm15 = vnez %v8728_v56  ;;  %8773 = vst [vmem:[#allocation8_spill] sm:$0xff] %v4926_v34  ;;  %v4947_v39 = vadd.s32 4294967295, %v4926_v34 }
  0x90   :  { %1414 = vperm.xlu1 %3961, %v1387_v16   ;;  %vm1354_vm1 = vmand %vm1338_vm4, %vm8766_vm11  ;;  %vm8772_vm4 = vcmp.lt.s32.totalorder %v4300_v35, 8  ;;  %v4939_v35 = vld [vmem:[%s8672_s30 + $0x40] sm:$0xff]  ;;  %8826 = vst [vmem:[#allocation33_spill] sm:$0xff] %v5208_v62 }
  0x91   :  { %v1386_v22 = vsel %vm1354_vm1, 1, %v8349_v2  ;;  %vm2127_vm5 = vmand %vm8768_vm3, %vm8767_vm12  ;;  %vm8774_vm1 = vcmp.ge.s32.totalorder %v4607_v19, 0  ;;  %vm8775_vm3 = vcmp.lt.s32.totalorder %v4607_v19, 8  ;;  %8777 = vst [vmem:[#allocation9_spill] sm:$0xff] %v4947_v39  ;;  %v4959_v46 = vpop.permute.xlu1 %757  ;;  %v374_v48 = vadd.s32 4294967295, %v4939_v35 }
  0x92   :  { %1411 = vperm.xlu0 %3960, %v1386_v22   ;;  %vm2143_vm13 = vmand %vm2127_vm5, %vm8769_vm8  ;;  %v376_v22 = vadd.s32 4294967295, %v5051_v13 }
  0x93   :  { %v2175_v30 = vsel %vm2143_vm13, 1, %v8349_v2  ;;  %vm2126_vm10 = vmand %vm8771_vm15, %vm8770_vm2  ;;  %vm8779_vm13 = vcmp.lt.s32.totalorder %v4634_v29, 8  ;;  %vm8780_vm15 = vcmp.ge.s32.totalorder %v4315_v38, 0  ;;  %v4978_v52 = vpop.permute.xlu0 %543 }
  0x94   :  { %2194 = vperm.xlu1 %3961, %v2175_v30   ;;  %vm2142_vm11 = vmand %vm2126_vm10, %vm8772_vm4  ;;  %vm8776_vm10 = vcmp.ge.s32.totalorder %v4634_v29, 0 }
  0x95   :  { %v2174_v33 = vsel %vm2142_vm11, 1, %v8349_v2  ;;  %vm1341_vm12 = vmand %vm4853_vm7, %vm8774_vm1  ;;  %vm8313_vm11 = vcmp.eq.s32.totalorder %v4959_v46, 1  ;;  %vm8781_vm1 = vcmp.lt.s32.totalorder %v4315_v38, 8 }
  0x96   :  { %2191 = vperm.xlu0 %3960, %v2174_v33   ;;  %vm1357_vm5 = vmand %vm1341_vm12, %vm8775_vm3  ;;  %vm391_vm3 = vcmp.ge.s32.totalorder %v375_v36, 0  ;;  %v2795_v50 = vsel %vm8313_vm11, %v2779_v42, 0.0  ;;  %v4999_v7 = vpop.permute.xlu1 %760  ;;  %vm8319_vm11 = vcmp.lt.s32.totalorder %v4952_v40, 8  ;;  %v5081_v33 = vadd.s32 4294967295, %v5064_v24 }
  0x97   :  { %v1389_v37 = vsel %vm1357_vm5, 1, %v8349_v2  ;;  %vm1340_vm8 = vmand %vm4866_vm6, %vm8776_vm10  ;;  %vm407_vm5 = vcmp.lt.s32.totalorder %v375_v36, 8  ;;  %v2817_v38 = vmul.f32 %v3790_v44, %v2795_v50  ;;  %8787 = vst [vmem:[#allocation12_spill] sm:$0xff] %v4999_v7 }
  0x98   :  { %1420 = vperm.xlu1 %3961, %v1389_v37   ;;  %vm1356_vm2 = vmand %vm1340_vm8, %vm8779_vm13  ;;  %vm8321_vm8 = vcmp.ge.s32.totalorder %v4947_v39, 0  ;;  %vm8312_vm13 = vcmp.eq.s32.totalorder %v4978_v52, 1  ;;  %v5011_v60 = vpop.permute.xlu0 %546  ;;  %8800 = vst [vmem:[#allocation21_spill] sm:$0xff] %v5081_v33 }
  0x99   :  { %v1388_v47 = vsel %vm1356_vm2, 1, %v8349_v2  ;;  %vm2129_vm4 = vmand %vm4789_vm0, %vm8780_vm15  ;;  %vm8783_vm0 = vcmp.ge.s32.totalorder %v4330_v41, 0  ;;  %vm8784_vm2 = vcmp.lt.s32.totalorder %v4330_v41, 8  ;;  %v2725_v56 = vsel %vm8312_vm13, %v2709_v49, 0.0  ;;  %8789 = vst [vmem:[#allocation14_spill] sm:$0xff] %v5011_v60 }
  0x9a   :  { %1417 = vperm.xlu0 %3960, %v1388_v47   ;;  %vm2145_vm12 = vmand %vm2129_vm4, %vm8781_vm1  ;;  %vm8320_vm4 = vcmp.lt.s32.totalorder %v4947_v39, 8  ;;  %v2747_v14 = vmul.f32 %v3789_v4, %v2725_v56  ;;  %vm8315_vm13 = vcmp.lt.s32.totalorder %v4926_v34, 8  ;;  %v5148_v56 = vadd.s32 1, %v4952_v40 }
  0x9b   :  { %v2177_v55 = vsel %vm2145_vm12, 1, %v8349_v2  ;;  %vm2128_vm10 = vmand %vm4800_vm14, %vm8783_vm0  ;;  %vm390_vm14 = vcmp.ge.s32.totalorder %v374_v48, 0  ;;  %vm406_vm12 = vcmp.lt.s32.totalorder %v374_v48, 8  ;;  %v5037_v26 = vpop.permute.xlu1 %552 }
  0x9c   :  { %2200 = vperm.xlu1 %3961, %v2177_v55   ;;  %vm2144_vm15 = vmand %vm2128_vm10, %vm8784_vm2  ;;  %vm8318_vm10 = vcmp.ge.s32.totalorder %v4971_v10, 0  ;;  %v5009_v41 = vadd.f32 %v2817_v38, %v2747_v14  ;;  %8793 = vst [vmem:[#allocation16_spill] sm:$0xff] %v5037_v26  ;;  %v5138_v55 = vadd.s32 1, %v4926_v34 }
  0x9d   :  { %v2176_v59 = vsel %vm2144_vm15, 1, %v8349_v2  ;;  %vm4995_vm1 = vmand %vm391_vm3, %vm407_vm5  ;;  %vm8317_vm3 = vcmp.lt.s32.totalorder %v4971_v10, 8  ;;  %vm8316_vm15 = vcmp.ge.s32.totalorder %v4926_v34, 0  ;;  %8813 = vst [vmem:[#allocation27_spill] sm:$0xff] %v5148_v56 }
  0x9e   :  { %2197 = vperm.xlu0 %3960, %v2176_v59   ;;  %vm471_vm0 = vmand %vm4995_vm1, %vm8321_vm8  ;;  %8788 = vst [vmem:[#allocation13_spill] sm:$0xff] %v5009_v41  ;;  %v5066_v27 = vpop.permute.xlu0 %549  ;;  %vm408_vm8 = vcmp.lt.s32.totalorder %v376_v22, 8 }
  0x9f   :  { %vm503_vm2 = vmand %vm471_vm0, %vm8320_vm4  ;;  %8796 = vst [vmem:[#allocation19_spill] sm:$0xff] %v5066_v27 }
  0xa0   :  { %v535_v20 = vsel %vm503_vm2, 1, %v8349_v2  ;;  %vm5014_vm5 = vmand %vm390_vm14, %vm406_vm12  ;;  %vm8314_vm12 = vcmp.ge.s32.totalorder %v4952_v40, 0  ;;  %v5076_v30 = vpop.permute.xlu1 %766 }
  0xa1   :  { %570 = vperm.xlu1 %3961, %v535_v20   ;;  %vm470_vm0 = vmand %vm5014_vm5, %vm8318_vm10  ;;  %8798 = vst [vmem:[#allocation20_spill] sm:$0xff] %v5076_v30  ;;  %vm409_vm10 = vcmp.lt.s32.totalorder %v377_v11, 8  ;;  %v1703_v20 = vadd.s32 1, %v4515_v57 }
  0xa2   :  { %vm502_vm14 = vmand %vm470_vm0, %vm8317_vm3  ;;  %vm393_vm3 = vcmp.ge.s32.totalorder %v377_v11, 0  ;;  %v5089_v3 = vpop.permute.xlu0 %763 }
  0xa3   :  { %v534_v9 = vsel %vm502_vm14, 1, %v8349_v2  ;;  %vm685_vm2 = vmand %vm4995_vm1, %vm8316_vm15  ;;  %8803 = vst [vmem:[#allocation22_spill] sm:$0xff] %v5089_v3 }
  0xa4   :  { %567 = vperm.xlu0 %3960, %v534_v9   ;;  %vm717_vm0 = vmand %vm685_vm2, %vm8315_vm13  ;;  %vm8799_vm13 = vcmp.lt.s32.totalorder %v4694_v43, 8  ;;  %v3972_v9 = vld [vmem:[%s8241_s8] sm:$0xff]  }
  0xa5   :  { %v749_v5 = vsel %vm717_vm0, 1, %v8349_v2  ;;  %vm684_vm14 = vmand %vm5014_vm5, %vm8314_vm12  ;;  %vm8797_vm0 = vcmp.ge.s32.totalorder %v4694_v43, 0  ;;  %3881 = vmatprep.subr.bf16.mxu1 %v3972_v9 }
  0xa6   :  { %784 = vperm.xlu1 %3961, %v749_v5   ;;  %vm716_vm2 = vmand %vm684_vm14, %vm8319_vm11  ;;  %vm8801_vm14 = vcmp.ge.s32.totalorder %v4704_v45, 0  ;;  %vm8804_vm11 = vcmp.lt.s32.totalorder %v4704_v45, 8  ;;  %v5109_v44 = vpop.permute.xlu0 %987  ;;  %3882 = vmatpush3.bf16.msra.mxu1 %v3972_v9  ;;  %v5514_v9 = vld [vmem:[%s8239_s6 + $0x1] ss:$0 sm:$0xff] }
  0xa7   :  { %v748_v16 = vsel %vm716_vm2, 1, %v8349_v2  ;;  %vm1521_vm12 = vmand %vm4813_vm9, %vm8797_vm0  ;;  %vm8802_vm2 = vnez %v8744_v8  ;;  %vm8345_vm0 = vcmp.ge.s32.totalorder %v5059_v23, 0  ;;  %v5099_v8 = vpop.permute.xlu1 %990  ;;  %8808 = vst [vmem:[#allocation24_spill] sm:$0xff] %v5109_v44 }
  0xa8   :  { %781 = vperm.xlu0 %3960, %v748_v16   ;;  %vm1537_vm15 = vmand %vm1521_vm12, %vm8799_vm13  ;;  %vm8322_vm12 = vcmp.lt.s32.totalorder %v5059_v23, 8  ;;  %8807 = vst [vmem:[#allocation23_spill] sm:$0xff] %v5099_v8 }
  0xa9   :  { %v1569_v36 = vsel %vm1537_vm15, 1, %v8349_v2  ;;  %vm1520_vm9 = vmand %vm8802_vm2, %vm8801_vm14  ;;  %vm392_vm15 = vcmp.ge.s32.totalorder %v376_v22, 0  ;;  %v5431_v22 = vld [vmem:[%s8673_s22 + $0x60] sm:$0xff] }
  0xaa   :  { %1596 = vperm.xlu1 %3961, %v1569_v36   ;;  %vm1536_vm13 = vmand %vm1520_vm9, %vm8804_vm11  ;;  %vm8323_vm11 = vcmp.ge.s32.totalorder %v5081_v33, 0  ;;  %vm8326_vm9 = vcmp.ge.s32.totalorder %v5035_v21, 0  ;;  %v5133_v4 = vpop.permute.xlu0 %993  ;;  %8893 = vst [vmem:[#allocation56_spill] sm:$0xff] %v5431_v22 }
  0xab   :  { %v1568_v37 = vsel %vm1536_vm13, 1, %v8349_v2  ;;  %vm5095_vm4 = vmand %vm393_vm3, %vm409_vm10  ;;  %vm8336_vm10 = vcmp.lt.s32.totalorder %v5081_v33, 8  ;;  %v5122_v49 = vpop.permute.xlu1 %996  ;;  %8812 = vst [vmem:[#allocation26_spill] sm:$0xff] %v5133_v4 }
  0xac   :  { %1593 = vperm.xlu0 %3960, %v1568_v37   ;;  %vm473_vm14 = vmand %vm5095_vm4, %vm8345_vm0  ;;  %8811 = vst [vmem:[#allocation25_spill] sm:$0xff] %v5122_v49 }
  0xad   :  { %vm505_vm2 = vmand %vm473_vm14, %vm8322_vm12  ;;  %vm8324_vm14 = vcmp.lt.s32.totalorder %v5035_v21, 8 }
  0xae   :  { %v537_v47 = vsel %vm505_vm2, 1, %v8349_v2  ;;  %vm5112_vm3 = vmand %vm392_vm15, %vm408_vm8  ;;  %vm8325_vm8 = vcmp.ge.s32.totalorder %v5064_v24, 0  ;;  %vm8334_vm2 = vcmp.lt.s32.totalorder %v5064_v24, 8 }
  0xaf   :  { %576 = vperm.xlu1 %3961, %v537_v47   ;;  %vm472_vm13 = vmand %vm5112_vm3, %vm8323_vm11  ;;  %v5150_v59 = vpop.permute.xlu1 %1220 }
  0xb0   :  { %vm504_vm12 = vmand %vm472_vm13, %vm8336_vm10  ;;  %8814 = vst [vmem:[#allocation28_spill] sm:$0xff] %v5150_v59  ;;  %v5170_v12 = vpop.permute.xlu0 %1217 }
  0xb1   :  { %v536_v50 = vsel %vm504_vm12, 1, %v8349_v2  ;;  %vm687_vm15 = vmand %vm5095_vm4, %vm8326_vm9  ;;  %vm8330_vm9 = vcmp.ge.s32.totalorder %v5138_v55, 0  ;;  %8818 = vst [vmem:[#allocation29_spill] sm:$0xff] %v5170_v12 }
  0xb2   :  { %573 = vperm.xlu0 %3960, %v536_v50   ;;  %vm719_vm11 = vmand %vm687_vm15, %vm8324_vm14  ;;  %vm8815_vm15 = vcmp.ge.s32.totalorder %v4741_v51, 0  ;;  %vm8816_vm14 = vcmp.lt.s32.totalorder %v4741_v51, 8 }
  0xb3   :  { %v751_v38 = vsel %vm719_vm11, 1, %v8349_v2  ;;  %vm686_vm12 = vmand %vm5112_vm3, %vm8325_vm8 }
  0xb4   :  { %790 = vperm.xlu1 %3961, %v751_v38   ;;  %vm718_vm13 = vmand %vm686_vm12, %vm8334_vm2  ;;  %vm8817_vm12 = vcmp.ge.s32.totalorder %v4753_v53, 0  ;;  %v1705_v38 = vadd.s32 1, %v4599_v18  ;;  %v1704_v18 = vadd.s32 1, %v4621_v25 }
  0xb5   :  { %v750_v14 = vsel %vm718_vm13, 1, %v8349_v2  ;;  %vm1523_vm11 = vmand %vm4853_vm7, %vm8815_vm15  ;;  %vm8327_vm7 = vcmp.lt.s32.totalorder %v5138_v55, 8 }
  0xb6   :  { %787 = vperm.xlu0 %3960, %v750_v14   ;;  %vm1539_vm8 = vmand %vm1523_vm11, %vm8816_vm14  ;;  %vm8819_vm14 = vcmp.lt.s32.totalorder %v4753_v53, 8  ;;  %vm8328_vm11 = vcmp.ge.s32.totalorder %v5148_v56, 0 }
  0xb7   :  { %v1571_v11 = vsel %vm1539_vm8, 1, %v8349_v2  ;;  %vm1522_vm13 = vmand %vm4866_vm6, %vm8817_vm12  ;;  %vm8329_vm6 = vcmp.lt.s32.totalorder %v5148_v56, 8 }
  0xb8   :  { %1602 = vperm.xlu1 %3961, %v1571_v11   ;;  %vm1538_vm15 = vmand %vm1522_vm13, %vm8819_vm14  ;;  %vm1719_vm13 = vcmp.ge.s32.totalorder %v1703_v20, 0  ;;  %vm1735_vm14 = vcmp.lt.s32.totalorder %v1703_v20, 8 }
  0xb9   :  { %v1570_v57 = vsel %vm1538_vm15, 1, %v8349_v2  ;;  %vm915_vm8 = vmand %vm4995_vm1, %vm8330_vm9  ;;  %vm8335_vm9 = vcmp.lt.s32.totalorder %v5208_v62, 8 }
  0xba   :  { %1599 = vperm.xlu0 %3960, %v1570_v57   ;;  %vm947_vm12 = vmand %vm915_vm8, %vm8327_vm7  ;;  %v5184_v5 = vpop.permute.xlu1 %1226  ;;  %vm1718_vm7 = vcmp.ge.s32.totalorder %v1702_v17, 0 }
  0xbb   :  { %8820 = vst [vmem:[#allocation30_spill] sm:$0xff] %v5184_v5  ;;  %v979_v16 = vsel %vm947_vm12, 1, %v8349_v2  ;;  %vm914_vm1 = vmand %vm5014_vm5, %vm8328_vm11  ;;  %vm1734_vm12 = vcmp.lt.s32.totalorder %v1702_v17, 8  ;;  %vm8825_vm5 = vcmp.ge.s32.totalorder %v4543_v63, 0 }
  0xbc   :  { %1014 = vperm.xlu1 %3961, %v979_v16   ;;  %vm946_vm15 = vmand %vm914_vm1, %vm8329_vm6  ;;  %vm8827_vm1 = vcmp.lt.s32.totalorder %v4543_v63, 8 }
  0xbd   :  { %v978_v15 = vsel %vm946_vm15, 1, %v8349_v2  ;;  %vm5197_vm8 = vmand %vm1719_vm13, %vm1735_vm14  ;;  %v5201_v36 = vpop.permute.xlu0 %1223  ;;  %vm8331_vm14 = vcmp.ge.s32.totalorder %v5194_v61, 0 }
  0xbe   :  { %8824 = vst [vmem:[#allocation32_spill] sm:$0xff] %v5201_v36  ;;  %1011 = vperm.xlu0 %3960, %v978_v15   ;;  %vm1767_vm11 = vmand %vm5197_vm8, %vm8825_vm5  ;;  %vm8831_vm5 = vcmp.ge.s32.totalorder %v4561_v6, 0 }
  0xbf   :  { %vm1783_vm15 = vmand %vm1767_vm11, %vm8827_vm1  ;;  %v5212_v37 = vpop.permute.xlu1 %1402  ;;  %vm8332_vm11 = vcmp.lt.s32.totalorder %v5194_v61, 8  ;;  %vm8833_vm1 = vcmp.lt.s32.totalorder %v4561_v6, 8 }
  0xc0   :  { %8828 = vst [vmem:[#allocation34_spill] sm:$0xff] %v5212_v37  ;;  %v1815_v47 = vsel %vm1783_vm15, 1, %v8349_v2  ;;  %vm5215_vm13 = vmand %vm1718_vm7, %vm1734_vm12  ;;  %vm8333_vm12 = vcmp.ge.s32.totalorder %v5208_v62, 0 }
  0xc1   :  { %1842 = vperm.xlu1 %3961, %v1815_v47   ;;  %vm1766_vm6 = vmand %vm5215_vm13, %vm8831_vm5  ;;  %v5226_v63 = vpop.permute.xlu0 %1399 }
  0xc2   :  { %8832 = vst [vmem:[#allocation35_spill] sm:$0xff] %v5226_v63  ;;  %vm1782_vm7 = vmand %vm1766_vm6, %vm8833_vm1  ;;  %vm1721_vm6 = vcmp.ge.s32.totalorder %v1705_v38, 0  ;;  %vm1737_vm1 = vcmp.lt.s32.totalorder %v1705_v38, 8 }
  0xc3   :  { %v1814_v14 = vsel %vm1782_vm7, 1, %v8349_v2  ;;  %vm917_vm15 = vmand %vm5095_vm4, %vm8331_vm14  ;;  %v5238_v20 = vpop.permute.xlu1 %1408 }
  0xc4   :  { %8834 = vst [vmem:[#allocation36_spill] sm:$0xff] %v5238_v20  ;;  %1839 = vperm.xlu0 %3960, %v1814_v14   ;;  %vm949_vm5 = vmand %vm917_vm15, %vm8332_vm11  ;;  %vm1720_vm15 = vcmp.ge.s32.totalorder %v1704_v18, 0  ;;  %vm1736_vm11 = vcmp.lt.s32.totalorder %v1704_v18, 8 }
  0xc5   :  { %v981_v6 = vsel %vm949_vm5, 1, %v8349_v2  ;;  %vm916_vm7 = vmand %vm5112_vm3, %vm8333_vm12  ;;  %v5247_v42 = vpop.permute.xlu0 %1405  ;;  %vm8838_vm5 = vcmp.ge.s32.totalorder %v4629_v28, 0  ;;  %vm8840_vm12 = vcmp.lt.s32.totalorder %v4629_v28, 8 }
  0xc6   :  { %8835 = vst [vmem:[#allocation37_spill] sm:$0xff] %v5247_v42  ;;  %1020 = vperm.xlu1 %3961, %v981_v6   ;;  %vm948_vm4 = vmand %vm916_vm7, %vm8335_vm9 }
  0xc7   :  { %v980_v25 = vsel %vm948_vm4, 1, %v8349_v2  ;;  %vm5252_vm14 = vmand %vm1721_vm6, %vm1737_vm1  ;;  %vm1113_vm6 = vcmp.ge.s32.totalorder %v4919_v31, 0  ;;  %vm1129_vm1 = vcmp.lt.s32.totalorder %v4919_v31, 8  ;;  %vm8843_vm4 = vcmp.ge.s32.totalorder %v4647_v32, 0 }
  0xc8   :  { %1017 = vperm.xlu0 %3960, %v980_v25   ;;  %vm1769_vm3 = vmand %vm5252_vm14, %vm8838_vm5  ;;  %v5260_v48 = vpop.permute.xlu1 %558 }
  0xc9   :  { %8839 = vst [vmem:[#allocation38_spill] sm:$0xff] %v5260_v48  ;;  %vm1785_vm2 = vmand %vm1769_vm3, %vm8840_vm12  ;;  %vm8845_vm12 = vcmp.lt.s32.totalorder %v4647_v32, 8 }
  0xca   :  { %v1817_v11 = vsel %vm1785_vm2, 1, %v8349_v2  ;;  %vm5265_vm7 = vmand %vm1720_vm15, %vm1736_vm11  ;;  %vm1112_vm11 = vcmp.ge.s32.totalorder %v4939_v35, 0  ;;  %vm1128_vm15 = vcmp.lt.s32.totalorder %v4939_v35, 8 }
  0xcb   :  { %1848 = vperm.xlu1 %3961, %v1817_v11   ;;  %vm1768_vm5 = vmand %vm5265_vm7, %vm8843_vm4  ;;  %v5275_v17 = vpop.permute.xlu0 %555  ;;  %vm8849_vm4 = vcmp.ge.s32.totalorder %v4947_v39, 0 }
  0xcc   :  { %8844 = vst [vmem:[#allocation39_spill] sm:$0xff] %v5275_v17  ;;  %vm1784_vm3 = vmand %vm1768_vm5, %vm8845_vm12  ;;  %vm8850_vm5 = vcmp.lt.s32.totalorder %v4947_v39, 8 }
  0xcd   :  { %v1816_v28 = vsel %vm1784_vm3, 1, %v8349_v2  ;;  %vm5280_vm2 = vmand %vm1113_vm6, %vm1129_vm1  ;;  %v5286_v15 = vpop.permute.xlu1 %772  ;;  %vm8854_vm1 = vcmp.ge.s32.totalorder %v4971_v10, 0 }
  0xce   :  { %8848 = vst [vmem:[#allocation40_spill] sm:$0xff] %v5286_v15  ;;  %1845 = vperm.xlu0 %3960, %v1816_v28   ;;  %vm1161_vm9 = vmand %vm5280_vm2, %vm8849_vm4  ;;  %vm8856_vm4 = vcmp.lt.s32.totalorder %v4971_v10, 8  ;;  %v8863_v28 = vmov 0 }
  0xcf   :  { %vm1177_vm12 = vmand %vm1161_vm9, %vm8850_vm5  ;;  %v5294_v32 = vpop.permute.xlu0 %769  ;;  %vm8857_vm9 = vcmp.ge.s32.totalorder %v4522_v58, 0 }
  0xd0   :  { %8851 = vst [vmem:[#allocation41_spill] sm:$0xff] %v5294_v32  ;;  %v1209_v47 = vsel %vm1177_vm12, 1, %v8349_v2  ;;  %vm5297_vm6 = vmand %vm1112_vm11, %vm1128_vm15  ;;  %vm8859_vm15 = vcmp.lt.s32.totalorder %v4522_v58, 8  ;;  %vm1115_vm12 = vcmp.ge.s32.totalorder %v5027_v1, 0 }
  0xd1   :  { %1244 = vperm.xlu1 %3961, %v1209_v47   ;;  %vm1160_vm3 = vmand %vm5297_vm6, %vm8854_vm1  ;;  %v5305_v14 = vpop.permute.xlu1 %1584  ;;  %vm1131_vm1 = vcmp.lt.s32.totalorder %v5027_v1, 8 }
  0xd2   :  { %8855 = vst [vmem:[#allocation42_spill] sm:$0xff] %v5305_v14  ;;  %vm1176_vm10 = vmand %vm1160_vm3, %vm8856_vm4  ;;  %vm8860_vm3 = vcmp.ge.s32.totalorder %v4548_v0, 0  ;;  %vm8861_vm4 = vcmp.lt.s32.totalorder %v4548_v0, 8 }
  0xd3   :  { %v1208_v18 = vsel %vm1176_vm10, 1, %v8349_v2  ;;  %vm1949_vm11 = vmand %vm5197_vm8, %vm8857_vm9  ;;  %v5314_v6 = vpop.permute.xlu0 %1581 }
  0xd4   :  { %8858 = vst [vmem:[#allocation43_spill] sm:$0xff] %v5314_v6  ;;  %1241 = vperm.xlu0 %3960, %v1208_v18   ;;  %vm1965_vm5 = vmand %vm1949_vm11, %vm8859_vm15  ;;  %vm1114_vm15 = vcmp.ge.s32.totalorder %v5051_v13, 0  ;;  %v8868_v18 = vmov 0 }
  0xd5   :  { %v1997_v25 = vsel %vm1965_vm5, 1, %v8349_v2  ;;  %vm1948_vm10 = vmand %vm5215_vm13, %vm8860_vm3  ;;  %vm1130_vm5 = vcmp.lt.s32.totalorder %v5051_v13, 8 }
  0xd6   :  { %2024 = vperm.xlu1 %3961, %v1997_v25   ;;  %vm1964_vm9 = vmand %vm1948_vm10, %vm8861_vm4  ;;  %v5327_v11 = vpop.permute.xlu1 %564  ;;  %vm8866_vm10 = vcmp.lt.s32.totalorder %v5059_v23, 8  ;;  %v3867_v41 = vpop.f32.mrf.mxu0 }
  0xd7   :  { %8862 = vst [vmem:[#allocation44_spill] sm:$0xff] %v5327_v11  ;;  %v1996_v58 = vsel %vm1964_vm9, 1, %v8349_v2  ;;  %vm5330_vm11 = vmand %vm1115_vm12, %vm1131_vm1  ;;  %vm8871_vm1 = vcmp.ge.s32.totalorder %v5081_v33, 0 }
  0xd8   :  { %v8864_v28 = vsel %vm5330_vm11, 4294967295, %v8863_v28  ;;  %2021 = vperm.xlu0 %3960, %v1996_v58   ;;  %vm1163_vm3 = vmand %vm5330_vm11, %vm8345_vm0  ;;  %v5358_v58 = vld [vmem:[%s8873_s5] ss:$0 sm:$0xff]  ;;  %v241_v15 = vpop.f32.mrf.mxu0  ;;  %vm8884_vm0 = vcmask 130048  }
  0xd9   :  { %8865 = vst [vmem:[#allocation45_spill] sm:$0xff] %v8864_v28  ;;  %vm1179_vm4 = vmand %vm1163_vm3, %vm8866_vm10  ;;  %v5342_v0 = vpop.permute.xlu0 %561  ;;  %vm8874_vm3 = vcmp.lt.s32.totalorder %v5081_v33, 8 }
  0xda   :  { %8867 = vst [vmem:[#allocation46_spill] sm:$0xff] %v5342_v0  ;;  %v1211_v47 = vsel %vm1179_vm4, 1, %v8349_v2  ;;  %vm5345_vm12 = vmand %vm1114_vm15, %vm1130_vm5  ;;  %vm8875_vm15 = vcmp.ge.s32.totalorder %v4607_v19, 0  ;;  %vm8877_vm4 = vcmp.lt.s32.totalorder %v4607_v19, 8  ;;  %v242_v19 = vadd.f32 %v5358_v58, %v241_v15  ;;  %v3868_v48 = vpop.f32.mrf.mxu0 }
  0xdb   :  { %v8869_v18 = vsel %vm5345_vm12, 4294967295, %v8868_v18  ;;  %1250 = vperm.xlu1 %3961, %v1211_v47   ;;  %vm1162_vm9 = vmand %vm5345_vm12, %vm8871_vm1  ;;  %v5353_v25 = vpop.permute.xlu1 %778 }
  0xdc   :  { %8870 = vst [vmem:[#allocation47_spill] sm:$0xff] %v8869_v18  ;;  %8872 = vst [vmem:[#allocation48_spill] sm:$0xff] %v5353_v25  ;;  %v250_v25 = vadd.f32 %v3867_v41, %v5358_v58  ;;  %v244_v33 = vpop.f32.mrf.mxu0  ;;  %v5574_v18 = vadd.s32 1, %v4919_v31 }
  0xdd   :  { %vm1178_vm10 = vmand %vm1162_vm9, %vm8874_vm3  ;;  %v5367_v47 = vpop.permute.xlu0 %775  ;;  %vm8878_vm9 = vcmp.ge.s32.totalorder %v4634_v29, 0 }
  0xde   :  { %v1210_v54 = vsel %vm1178_vm10, 1, %v8349_v2  ;;  %vm1951_vm5 = vmand %vm5252_vm14, %vm8875_vm15  ;;  %8876 = vst [vmem:[#allocation49_spill] sm:$0xff] %v5367_v47  ;;  %vm8880_vm10 = vcmp.lt.s32.totalorder %v4634_v29, 8  ;;  %v304_v29 = vmax.f32 %v242_v19, 0.0 }
  0xdf   :  { %1247 = vperm.xlu0 %3960, %v1210_v54   ;;  %vm1967_vm1 = vmand %vm1951_vm5, %vm8877_vm4  ;;  %v5377_v11 = vpop.permute.xlu1 %1590  ;;  %v306_v54 = vmax.f32 %v250_v25, 0.0  ;;  %vm8881_vm5 = vcmp.ge.s32.totalorder %v4926_v34, 0 }
  0xe0   :  { %v1999_v0 = vsel %vm1967_vm1, 1, %v8349_v2  ;;  %vm1950_vm3 = vmand %vm5265_vm7, %vm8878_vm9  ;;  %8879 = vst [vmem:[#allocation50_spill] sm:$0xff] %v5377_v11  ;;  %vm8883_vm1 = vcmp.lt.s32.totalorder %v4926_v34, 8 }
  0xe1   :  { %2030 = vperm.xlu1 %3961, %v1999_v0   ;;  %vm1966_vm15 = vmand %vm1950_vm3, %vm8880_vm10  ;;  %v5387_v41 = vpop.permute.xlu0 %1587  ;;  %343 = vst.msk [vmem:[#allocation2 + $0x20] sm:$0xff] %vm8884_vm0, %v306_v54  ;;  %v253_v0 = vadd.f32 %v3868_v48, %v5358_v58  ;;  %vm8885_vm3 = vcmp.ge.s32.totalorder %v4952_v40, 0  ;;  %v245_v54 = vadd.f32 %v5358_v58, %v244_v33  ;;  %v3871_v33 = vpop.f32.mrf.mxu0 }
  0xe2   :  { %v1998_v47 = vsel %vm1966_vm15, 1, %v8349_v2  ;;  %vm1343_vm4 = vmand %vm5280_vm2, %vm8881_vm5  ;;  %8882 = vst [vmem:[#allocation51_spill] sm:$0xff] %v5387_v41  ;;  %vm8887_vm15 = vcmp.lt.s32.totalorder %v4952_v40, 8  ;;  %v8895_v40 = vmov 0  }
  0xe3   :  { %2027 = vperm.xlu0 %3960, %v1998_v47   ;;  %vm1359_vm9 = vmand %vm1343_vm4, %vm8883_vm1  ;;  %v5398_v25 = vpop.permute.xlu1 %1002  ;;  %v5405_v47 = vld [vmem:[%s8672_s30 + $0x68] sm:$0xff]  ;;  %341 = vst.msk [vmem:[#allocation2 + $0x10] sm:$0xff] %vm8884_vm0, %v304_v29  ;;  %v307_v48 = vmax.f32 %v253_v0, 0.0  ;;  %vm8889_vm4 = vcmp.ge.s32.totalorder %v4694_v43, 0  ;;  %v305_v0 = vmax.f32 %v245_v54, 0.0 }
  0xe4   :  { %v1391_v15 = vsel %vm1359_vm9, 1, %v8349_v2  ;;  %vm1342_vm10 = vmand %vm5297_vm6, %vm8885_vm3  ;;  %8886 = vst [vmem:[#allocation52_spill] sm:$0xff] %v5398_v25  ;;  %v5422_v25 = vld [vmem:[%s8672_s30 + $0x60] sm:$0xff]  ;;  %vm8892_vm9 = vcmp.lt.s32.totalorder %v4694_v43, 8  ;;  %v5441_v43 = vadd.s32 4294967295, %v5405_v47 }
  0xe5   :  { %1426 = vperm.xlu1 %3961, %v1391_v15   ;;  %vm1358_vm5 = vmand %vm1342_vm10, %vm8887_vm15  ;;  %8888 = vst [vmem:[#allocation53_spill] sm:$0xff] %v5405_v47  ;;  %v5417_v15 = vld [vmem:[%s8673_s22 + $0x68] sm:$0xff]  ;;  %v5424_v29 = vpop.permute.xlu0 %999  ;;  %vm8896_vm10 = vcmp.ge.s32.totalorder %v4704_v45, 0  ;;  %v5449_v54 = vadd.s32 4294967295, %v5422_v25 }
  0xe6   :  { %v1390_v19 = vsel %vm1358_vm5, 1, %v8349_v2  ;;  %vm2131_vm1 = vmand %vm5197_vm8, %vm8889_vm4  ;;  %8890 = vst [vmem:[#allocation54_spill] sm:$0xff] %v5422_v25  ;;  %v266_v2 = vadd.f32 %v3871_v33, %v5358_v58  ;;  %vm8897_vm5 = vcmp.lt.s32.totalorder %v4704_v45, 8  ;;  %v5461_v45 = vadd.s32 4294967295, %v5431_v22  ;;  %v510_v25 = vld [vmem:[#allocation2 + $0x7] sm:$0xff] }
  0xe7   :  { %8891 = vst [vmem:[#allocation55_spill] sm:$0xff] %v5424_v29  ;;  %1423 = vperm.xlu0 %3960, %v1390_v19   ;;  %vm2147_vm3 = vmand %vm2131_vm1, %vm8892_vm9  ;;  %v257_v19 = vpop.f32.mrf.mxu0  ;;  %vm8902_vm9 = vcmp.lt.s32.totalorder %v5035_v21, 8 }
  0xe8   :  { %vm8894_vm8 = vmmov %vm8884_vm0  ;;  %v2179_v34 = vsel %vm2147_vm3, 1, %v8895_v40  ;;  %v5451_v33 = vpop.permute.xlu1 %1830  ;;  %v310_v50 = vmax.f32 %v266_v2, 0.0  ;;  %v258_v23 = vadd.f32 %v5358_v58, %v257_v19  ;;  %v724_v19 = vld [vmem:[#allocation2 + $0x8] sm:$0xff] }
  0xe9   :  { %344 = vst.msk [vmem:[#allocation2 + $0x28] sm:$0xff] %vm8894_vm8, %v307_v48  ;;  %vm2130_vm15 = vmand %vm5215_vm13, %vm8896_vm10  ;;  %2206 = vperm.xlu1 %3961, %v2179_v34   ;;  %v5446_v48 = vadd.s32 4294967295, %v5417_v15  ;;  %vm8901_vm13 = vcmp.ge.s32.totalorder %v5035_v21, 0  ;;  %v3872_v34 = vpop.f32.mrf.mxu0  ;;  %vm8904_vm10 = vcmp.ge.s32.totalorder %v5064_v24, 0 }
  0xea   :  { %vm2146_vm0 = vmand %vm2130_vm15, %vm8897_vm5  ;;  %8899 = vst [vmem:[#allocation58_spill] sm:$0xff] %v5451_v33  ;;  %v308_v2 = vmax.f32 %v258_v23, 0.0  ;;  %vm395_vm5 = vcmp.ge.s32.totalorder %v5441_v43, 0  ;;  %v5483_v23 = vld [vmem:[%s8672_s30 + $0x78] sm:$0xff]  ;;  %v5556_v39 = vld [vmem:[#allocation2 + $0x10] sm:$0xff] }
  0xeb   :  { %8898 = vst [vmem:[#allocation57_spill] sm:$0xff] %v5446_v48  ;;  %vm8900_vm4 = vmmov %vm8894_vm8  ;;  %v2178_v47 = vsel %vm2146_vm0, 1, %v8895_v40  ;;  %vm8906_vm0 = vcmp.lt.s32.totalorder %v5064_v24, 8  ;;  %v260_v31 = vpop.f32.mrf.mxu0 }
  0xec   :  { %342 = vst.msk [vmem:[#allocation2 + $0x18] sm:$0xff] %vm8900_vm4, %v305_v0  ;;  %vm1345_vm1 = vmand %vm5330_vm11, %vm8901_vm13  ;;  %2203 = vperm.xlu0 %3960, %v2178_v47   ;;  %v269_v0 = vadd.f32 %v3872_v34, %v5358_v58  ;;  %v5473_v47 = vpop.permute.xlu0 %1827  ;;  %vm411_vm13 = vcmp.lt.s32.totalorder %v5441_v43, 8 }
  0xed   :  { %vm1361_vm3 = vmand %vm1345_vm1, %vm8902_vm9  ;;  %8905 = vst [vmem:[#allocation59_spill] sm:$0xff] %v5473_v47  ;;  %v5499_v24 = vpop.permute.xlu1 %1008  ;;  %vm8916_vm1 = vcmp.eq.s32.totalorder %v4959_v46, 1  ;;  %v5543_v46 = vadd.s32 4294967295, %v5483_v23 }
  0xee   :  { %vm8903_vm8 = vmmov %vm8900_vm4  ;;  %v1393_v10 = vsel %vm1361_vm3, 1, %v8895_v40  ;;  %8907 = vst [vmem:[#allocation60_spill] sm:$0xff] %v5483_v23  ;;  %v5571_v23 = vadd.s32 1, %v5431_v22 }
  0xef   :  { %347 = vst.msk [vmem:[#allocation2 + $0x40] sm:$0xff] %vm8903_vm8, %v310_v50  ;;  %vm1344_vm15 = vmand %vm5345_vm12, %vm8904_vm10  ;;  %1432 = vperm.xlu1 %3961, %v1393_v10   ;;  %v5488_v50 = vld [vmem:[%s8672_s30 + $0x70] sm:$0xff]  ;;  %v311_v10 = vmax.f32 %v269_v0, 0.0 }
  0xf0   :  { %vm1360_vm4 = vmand %vm1344_vm15, %vm8906_vm0  ;;  %8908 = vst [vmem:[#allocation61_spill] sm:$0xff] %v5488_v50  ;;  %v5509_v0 = vld [vmem:[%s8673_s22 + $0x70] sm:$0xff]  ;;  %vm8915_vm15 = vcmask 130048  }
  0xf1   :  { %vm8909_vm3 = vmmov %vm8903_vm8  ;;  %v1392_v34 = vsel %vm1360_vm4, 1, %v8895_v40  ;;  %vm8910_vm8 = vcmp.ge.s32.totalorder %v4741_v51, 0  ;;  %8911 = vst [vmem:[#allocation62_spill] sm:$0xff] %v5499_v24  ;;  %v820_v24 = vsel %vm8916_vm1, %v724_v19, 0.0  ;;  %vm8920_vm1 = vcmp.lt.s32.totalorder %v4753_v53, 8  ;;  %v5554_v19 = vld [vmem:[#allocation2 + $0xf] sm:$0xff] }
  0xf2   :  { %345 = vst.msk [vmem:[#allocation2 + $0x30] sm:$0xff] %vm8909_vm3, %v308_v2  ;;  %vm2133_vm10 = vmand %vm5252_vm14, %vm8910_vm8  ;;  %v5504_v2 = vld [vmem:[%s8673_s22 + $0x78] sm:$0xff]  ;;  %1429 = vperm.xlu0 %3960, %v1392_v34   ;;  %vm8914_vm14 = vcmp.lt.s32.totalorder %v4741_v51, 8  ;;  %vm8396_vm3 = vcmp.lt.s32.totalorder %v5461_v45, 8  ;;  %vm8397_vm8 = vcmp.ge.s32.totalorder %v5417_v15, 0  ;;  %v5552_v57 = vadd.s32 4294967295, %v5509_v0  ;;  %v5584_v43 = vpop.permute.xlu1 %1836 }
  0xf3   :  { %8912 = vst [vmem:[#allocation63_spill] sm:$0xff] %v5504_v2  ;;  %8913 = vst [vmem:[#allocation64_spill] sm:$0xff] %v5509_v0  ;;  %v5528_v34 = vld [vmem:[%s8239_s6] ss:$0 sm:$0xff]  ;;  %v842_v62 = vmul.f32 %v5514_v9, %v820_v24  ;;  %v5586_v61 = vld [vmem:[#allocation2 + $0x11] sm:$0xff] }
  0xf4   :  { %vm2149_vm4 = vmand %vm2133_vm10, %vm8914_vm14  ;;  %348 = vst.msk [vmem:[#allocation2 + $0x48] sm:$0xff] %vm8915_vm15, %v311_v10  ;;  %vm8917_vm10 = vcmp.eq.s32.totalorder %v4978_v52, 1  ;;  %vm8918_vm14 = vcmp.ge.s32.totalorder %v4753_v53, 0  ;;  %v5538_v10 = vpop.permute.xlu0 %1005  ;;  %v5546_v52 = vadd.s32 4294967295, %v5504_v2  ;;  %vm8928_vm15 = vcmp.ge.s32.totalorder %v5449_v54, 0 }
  0xf5   :  { %v606_v51 = vsel %vm8917_vm10, %v510_v25, 0.0  ;;  %v2181_v21 = vsel %vm2149_vm4, 1, %v8895_v40  ;;  %vm2132_vm0 = vmand %vm5265_vm7, %vm8918_vm14  ;;  %8919 = vst [vmem:[#allocation65_spill] sm:$0xff] %v5538_v10  ;;  %v5549_v25 = vadd.s32 4294967295, %v5488_v50  ;;  %v954_v10 = vld [vmem:[#allocation2 + $0x9] sm:$0xff]  ;;  %v5568_v50 = vadd.s32 1, %v5417_v15 }
  0xf6   :  { %2212 = vperm.xlu1 %3961, %v2181_v21   ;;  %vm2148_vm9 = vmand %vm2132_vm0, %vm8920_vm1  ;;  %v628_v28 = vmul.f32 %v5528_v34, %v606_v51  ;;  %8924 = vst [vmem:[#allocation66_spill] sm:$0xff] %v5584_v43  ;;  %vm8390_vm4 = vcmp.eq.s32.totalorder %v5109_v44, 1  ;;  %vm8925_vm10 = vcmp.lt.s32.totalorder %v5446_v48, 8  ;;  %vm8394_vm1 = vcmp.eq.s32.totalorder %v5099_v8, 1 }
  0xf7   :  { %v2180_v21 = vsel %vm2148_vm9, 1, %v8895_v40  ;;  %vm5563_vm7 = vmand %vm395_vm5, %vm411_vm13  ;;  %vm8384_vm9 = vcmp.eq.s32.totalorder %v4999_v7, 1  ;;  %vm8395_vm5 = vcmp.eq.s32.totalorder %v5011_v60, 1  ;;  %vm8923_vm13 = vcmp.ge.s32.totalorder %v5446_v48, 0 }
  0xf8   :  { %2209 = vperm.xlu0 %3960, %v2180_v21   ;;  %vm475_vm0 = vmand %vm5563_vm7, %vm8923_vm13  ;;  %v821_v24 = vsel %vm8384_vm9, %v5556_v39, 0.0  ;;  %v607_v51 = vsel %vm8395_vm5, %v5554_v19, 0.0  ;;  %v5598_v21 = vadd.s32 1, %v4939_v35  ;;  %vm8927_vm13 = vcmp.lt.s32.totalorder %v5449_v54, 8  ;;  %v5615_v35 = vld [vmem:[%s8239_s6 + $0x2] ss:$0 sm:$0xff]  ;;  %v5627_v54 = vpop.permute.xlu0 %1833 }
  0xf9   :  { %vm507_vm14 = vmand %vm475_vm0, %vm8925_vm10  ;;  %v1050_v7 = vsel %vm8390_vm4, %v954_v10, 0.0  ;;  %v5620_v60 = vadd.s32 1, %v5504_v2  ;;  %8933 = vst [vmem:[#allocation69_spill] sm:$0xff] %v5627_v54  ;;  %v261_v44 = vadd.f32 %v5358_v58, %v260_v31  ;;  %v5634_v10 = vadd.s32 1, %v5509_v0  ;;  %v5665_v31 = vld [vmem:[#allocation2 + $0x17] sm:$0xff] }
  0xfa   :  { %8926 = vst [vmem:[#allocation67_spill] sm:$0xff] %v5598_v21  ;;  %v539_v29 = vsel %vm507_vm14, 1, %v8895_v40  ;;  %vm5606_vm0 = vmand %vm8928_vm15, %vm8927_vm13  ;;  %vm8932_vm15 = vcmp.ge.s32.totalorder %v5461_v45, 0  ;;  %v1051_v21 = vsel %vm8394_vm1, %v5586_v61, 0.0  ;;  %v843_v54 = vmul.f32 %v5514_v9, %v821_v24  ;;  %v5667_v24 = vld [vmem:[#allocation2 + $0x1f] sm:$0xff] }
  0xfb   :  { %8931 = vst [vmem:[#allocation68_spill] sm:$0xff] %v5620_v60  ;;  %582 = vperm.xlu1 %3961, %v539_v29   ;;  %vm474_vm14 = vmand %vm5606_vm0, %vm8932_vm15  ;;  %v5637_v29 = vadd.s32 1, %v5027_v1  ;;  %v858_v60 = vadd.f32 %v842_v62, %v628_v28  ;;  %v629_v32 = vmul.f32 %v5528_v34, %v607_v51  ;;  %v5645_v8 = vadd.s32 1, %v5051_v13  ;;  %v5662_v13 = vpop.permute.xlu1 %1232 }
  0xfc   :  { %8934 = vst [vmem:[#allocation70_spill] sm:$0xff] %v5634_v10  ;;  %vm506_vm15 = vmand %vm474_vm14, %vm8396_vm3  ;;  %v1072_v62 = vmul.f32 %v5615_v35, %v1050_v7  ;;  %vm8935_vm5 = vcmp.lt.s32.totalorder %v5417_v15, 8  ;;  %v1073_v28 = vmul.f32 %v5615_v35, %v1051_v21  ;;  %v309_v51 = vmax.f32 %v261_v44, 0.0  ;;  %v5678_v21 = vld [vmem:[#allocation2 + $0x20] sm:$0xff] }
  0xfd   :  { %v538_v1 = vsel %vm506_vm15, 1, %v8895_v40  ;;  %vm689_vm14 = vmand %vm5563_vm7, %vm8397_vm8  ;;  %8936 = vst [vmem:[#allocation71_spill] sm:$0xff] %v5662_v13  ;;  %vm8401_vm4 = vcmp.eq.s32.totalorder %v5170_v12, 1  ;;  %vm8407_vm10 = vcmp.eq.s32.totalorder %v5212_v37, 1  ;;  %vm8938_vm8 = vcmp.lt.s32.totalorder %v5431_v22, 8  ;;  %v5737_v12 = vld [vmem:[#allocation2 + $0x19] sm:$0xff] }
  0xfe   :  { %579 = vperm.xlu0 %3960, %v538_v1   ;;  %vm721_vm9 = vmand %vm689_vm14, %vm8935_vm5  ;;  %vm8937_vm5 = vcmp.ge.s32.totalorder %v5431_v22, 0  ;;  %v5688_v44 = vld [vmem:[%s8239_s6 + $0x3] ss:$0 sm:$0xff]  ;;  %v859_v1 = vadd.f32 %v843_v54, %v629_v32  ;;  %v1280_v13 = vsel %vm8401_vm4, %v5554_v19, 0.0  ;;  %v5701_v22 = vpop.permute.xlu0 %1229  ;;  %vm8942_vm15 = vcmp.eq.s32.totalorder %v5150_v59, 1  ;;  %v5706_v19 = vld [vmem:[#allocation2 + $0x18] sm:$0xff] }
  0xff   :  { %v753_v7 = vsel %vm721_vm9, 1, %v8895_v40  ;;  %vm688_vm14 = vmand %vm5606_vm0, %vm8937_vm5  ;;  %vm8939_vm9 = vcmask 130048   ;;  %8941 = vst [vmem:[#allocation72_spill] sm:$0xff] %v5701_v22  ;;  %v1281_v32 = vsel %vm8942_vm15, %v5665_v31, 0.0  ;;  %v1088_v54 = vadd.f32 %v1072_v62, %v858_v60 }
 0x100   :  { %796 = vperm.xlu1 %3961, %v753_v7   ;;  %vm720_vm1 = vmand %vm688_vm14, %vm8938_vm8  ;;  %346 = vst.msk [vmem:[#allocation2 + $0x38] sm:$0xff] %vm8939_vm9, %v309_v51  ;;  %vm8940_vm8 = vcmp.ge.s32.totalorder %v5138_v55, 0  ;;  %vm8943_vm9 = vcmp.eq.s32.totalorder %v5037_v26, 1  ;;  %vm8408_vm4 = vcmp.eq.s32.totalorder %v5247_v42, 1  ;;  %v1089_v16 = vadd.f32 %v1073_v28, %v859_v1  ;;  %v5743_v26 = vld [vmem:[#allocation2 + $0x21] sm:$0xff] }
 0x101   :  { %v752_v7 = vsel %vm720_vm1, 1, %v8895_v40  ;;  %vm1525_vm14 = vmand %vm5280_vm2, %vm8940_vm8  ;;  %v609_v51 = vsel %vm8943_vm9, %v5667_v24, 0.0  ;;  %vm8944_vm8 = vcmp.lt.s32.totalorder %v5138_v55, 8  ;;  %vm8945_vm15 = vcmp.eq.s32.totalorder %v5076_v30, 1 }
 0x102   :  { %793 = vperm.xlu0 %3960, %v752_v7   ;;  %vm1541_vm3 = vmand %vm1525_vm14, %vm8944_vm8  ;;  %v823_v60 = vsel %vm8945_vm15, %v5678_v21, 0.0  ;;  %vm8419_vm13 = vcmp.eq.s32.totalorder %v5314_v6, 1  ;;  %vm8417_vm9 = vcmp.eq.s32.totalorder %v5451_v33, 1  ;;  %vm8946_vm1 = vcmp.ge.s32.totalorder %v5148_v56, 0  ;;  %v5728_v7 = vpop.permute.xlu1 %2012  ;;  %v5755_v37 = vpop.permute.xlu0 %2009 }
 0x103   :  { %v1573_v62 = vsel %vm1541_vm3, 1, %v8895_v40  ;;  %vm1524_vm2 = vmand %vm5297_vm6, %vm8946_vm1  ;;  %8947 = vst [vmem:[#allocation73_spill] sm:$0xff] %v5728_v7  ;;  %v1302_v28 = vmul.f32 %v5688_v44, %v1280_v13  ;;  %vm8948_vm8 = vcmp.lt.s32.totalorder %v5148_v56, 8  ;;  %v1303_v1 = vmul.f32 %v5688_v44, %v1281_v32 }
 0x104   :  { %1608 = vperm.xlu1 %3961, %v1573_v62   ;;  %vm1540_vm15 = vmand %vm1524_vm2, %vm8948_vm8  ;;  %v1463_v59 = vsel %vm8407_vm10, %v5706_v19, 0.0  ;;  %vm8949_vm6 = vcmp.eq.s32.totalorder %v5226_v63, 1  ;;  %v631_v30 = vmul.f32 %v5528_v34, %v609_v51  ;;  %vm8950_vm1 = vcmp.lt.s32.totalorder %v5543_v46, 8  ;;  %8954 = vst [vmem:[#allocation74_spill] sm:$0xff] %v5755_v37 }
 0x105   :  { %v1462_v38 = vsel %vm8949_vm6, %v5556_v39, 0.0  ;;  %v1572_v13 = vsel %vm1540_vm15, 1, %v8895_v40  ;;  %vm8951_vm2 = vcmp.ge.s32.totalorder %v5543_v46, 0  ;;  %v1318_v62 = vadd.f32 %v1302_v28, %v1088_v54  ;;  %v5770_v46 = vld [vmem:[%s8239_s6 + $0x4] ss:$0 sm:$0xff] }
 0x106   :  { %vm5751_vm8 = vmand %vm8951_vm2, %vm8950_vm1  ;;  %v845_v39 = vmul.f32 %v5514_v9, %v823_v60  ;;  %v1464_v51 = vsel %vm8408_vm4, %v5678_v21, 0.0  ;;  %vm8418_vm15 = vcmp.eq.s32.totalorder %v5473_v47, 1  ;;  %1605 = vperm.xlu0 %3960, %v1572_v13   ;;  %vm8955_vm10 = vcmp.ge.s32.totalorder %v5546_v52, 0 }
 0x107   :  { %vm477_vm1 = vmand %vm5751_vm8, %vm8955_vm10  ;;  %v1319_v54 = vadd.f32 %v1303_v1, %v1089_v16  ;;  %vm8956_vm2 = vcmp.eq.s32.totalorder %v5066_v27, 1  ;;  %vm8957_vm4 = vcmp.eq.s32.totalorder %v5089_v3, 1  ;;  %vm8958_vm3 = vcmp.lt.s32.totalorder %v5546_v52, 8 }
 0x108   :  { %v608_v60 = vsel %vm8956_vm2, %v5665_v31, 0.0  ;;  %v822_v28 = vsel %vm8957_vm4, %v5706_v19, 0.0  ;;  %vm509_vm14 = vmand %vm477_vm1, %vm8958_vm3  ;;  %v1485_v13 = vmul.f32 %v5770_v46, %v1463_v59  ;;  %vm8959_vm10 = vcmp.eq.s32.totalorder %v5305_v14, 1  ;;  %v5798_v59 = vld [vmem:[#allocation2 + $0x27] sm:$0xff] }
 0x109   :  { %v1645_v42 = vsel %vm8959_vm10, %v5737_v12, 0.0  ;;  %v1484_v16 = vmul.f32 %v5770_v46, %v1462_v38  ;;  %vm8960_vm2 = vcmp.eq.s32.totalorder %v5122_v49, 1  ;;  %v541_v63 = vsel %vm509_vm14, 1, %v8895_v40  ;;  %v5807_v49 = vpop.permute.xlu1 %1238 }
 0x10a   :  { %v1053_v1 = vsel %vm8960_vm2, %v5743_v26, 0.0  ;;  %vm8961_vm4 = vcmp.lt.s32.totalorder %v5549_v25, 8  ;;  %vm8962_vm6 = vcmp.ge.s32.totalorder %v5549_v25, 0  ;;  %v1891_v38 = vsel %vm8417_vm9, %v5667_v24, 0.0  ;;  %8965 = vst [vmem:[#allocation75_spill] sm:$0xff] %v5807_v49  ;;  %588 = vperm.xlu1 %3961, %v541_v63   ;;  %v8975_v49 = vld [vmem:[#allocation41_spill] sm:$0xff] }
 0x10b   :  { %vm5794_vm5 = vmand %vm8962_vm6, %vm8961_vm4  ;;  %v1644_v14 = vsel %vm8419_vm13, %v5586_v61, 0.0  ;;  %v861_v27 = vadd.f32 %v845_v39, %v631_v30  ;;  %vm8966_vm3 = vcmp.ge.s32.totalorder %v5552_v57, 0  ;;  %v1500_v25 = vadd.f32 %v1484_v16, %v1318_v62  ;;  %v5824_v30 = vld [vmem:[%s8239_s6 + $0x5] ss:$0 sm:$0xff] }
 0x10c   :  { %vm476_vm6 = vmand %vm5794_vm5, %vm8966_vm3  ;;  %v1890_v33 = vsel %vm8418_vm15, %v5665_v31, 0.0  ;;  %v630_v61 = vmul.f32 %v5528_v34, %v608_v60  ;;  %v844_v6 = vmul.f32 %v5514_v9, %v822_v28  ;;  %vm8967_vm10 = vcmp.lt.s32.totalorder %v5552_v57, 8  ;;  %v5839_v28 = vld [vmem:[%s8239_s6 + $0x6] ss:$0 sm:$0xff] }
 0x10d   :  { %vm508_vm2 = vmand %vm476_vm6, %vm8967_vm10  ;;  %v1501_v63 = vadd.f32 %v1485_v13, %v1319_v54  ;;  %v1075_v62 = vmul.f32 %v5615_v35, %v1053_v1  ;;  %vm8968_vm3 = vcmp.eq.s32.totalorder %v5133_v4, 1  ;;  %v5832_v39 = vmul.f32 %v5770_v46, %v1464_v51  ;;  %v5847_v51 = vpop.permute.xlu0 %1235 }
 0x10e   :  { %v1052_v31 = vsel %vm8968_vm3, %v5737_v12, 0.0  ;;  %v540_v60 = vsel %vm508_vm2, 1, %v8895_v40  ;;  %vm8438_vm6 = vcmp.eq.s32.totalorder %v5584_v43, 1  ;;  %vm8969_vm10 = vcmp.ge.s32.totalorder %v5504_v2, 0  ;;  %8970 = vst [vmem:[#allocation76_spill] sm:$0xff] %v5847_v51 }
 0x10f   :  { %vm691_vm9 = vmand %vm5751_vm8, %vm8969_vm10  ;;  %v1666_v54 = vmul.f32 %v5824_v30, %v1644_v14  ;;  %vm8971_vm2 = vcmp.eq.s32.totalorder %v5184_v5, 1  ;;  %585 = vperm.xlu0 %3960, %v540_v60   ;;  %vm8972_vm4 = vcmp.lt.s32.totalorder %v5504_v2, 8  ;;  %v1667_v16 = vmul.f32 %v5824_v30, %v1645_v42  ;;  %v5861_v5 = vld [vmem:[#allocation2 + $0x28] sm:$0xff] }
 0x110   :  { %v1283_v13 = vsel %vm8971_vm2, %v5798_v59, 0.0  ;;  %vm723_vm1 = vmand %vm691_vm9, %vm8972_vm4  ;;  %v1913_v14 = vmul.f32 %v5839_v28, %v1891_v38  ;;  %v1912_v1 = vmul.f32 %v5839_v28, %v1890_v33  ;;  %v1091_v47 = vadd.f32 %v1075_v62, %v861_v27  ;;  %v5868_v42 = vld [vmem:[#allocation2 + $0x29] sm:$0xff]  ;;  %v5870_v38 = vpop.permute.xlu1 %2018  ;;  %v8976_v27 = vld [vmem:[#allocation55_spill] sm:$0xff] }
 0x111   :  { %v755_v4 = vsel %vm723_vm1, 1, %v8895_v40  ;;  %vm8973_vm2 = vcmp.ge.s32.totalorder %v5509_v0, 0  ;;  %v1682_v60 = vadd.f32 %v1666_v54, %v1500_v25  ;;  %8974 = vst [vmem:[#allocation77_spill] sm:$0xff] %v5870_v38  ;;  %v860_v33 = vadd.f32 %v844_v6, %v630_v61  ;;  %v8979_v6 = vld [vmem:[#allocation69_spill] sm:$0xff] }
 0x112   :  { %vm690_vm9 = vmand %vm5794_vm5, %vm8973_vm2  ;;  %v1074_v51 = vmul.f32 %v5615_v35, %v1052_v31  ;;  %802 = vperm.xlu1 %3961, %v755_v4   ;;  %vm8977_vm1 = vcmp.lt.s32.totalorder %v5509_v0, 8  ;;  %v1683_v62 = vadd.f32 %v1667_v16, %v1501_v63  ;;  %vm8439_vm15 = vcmp.eq.s32.totalorder %v5728_v7, 1  ;;  %v8980_v31 = vld [vmem:[#allocation31_spill] sm:$0xff]  ;;  %v5895_v16 = vpop.permute.xlu0 %2015  ;;  %v8993_v7 = vld [vmem:[#allocation68_spill] sm:$0xff] }
 0x113   :  { %vm722_vm3 = vmand %vm690_vm9, %vm8977_vm1  ;;  %v1305_v25 = vmul.f32 %v5688_v44, %v1283_v13  ;;  %vm8978_vm2 = vcmp.eq.s32.totalorder %v5201_v36, 1  ;;  %vm8441_vm13 = vcmp.eq.s32.totalorder %v8979_v6, 1  ;;  %vm8981_vm4 = vcmp.ge.s32.totalorder %v8980_v31, 0  ;;  %v8983_v4 = vld [vmem:[#allocation67_spill] sm:$0xff]  ;;  %v5893_v13 = vld [vmem:[#allocation2 + $0x2f] sm:$0xff]  ;;  %8985 = vst [vmem:[#allocation45_spill] sm:$0xff] %v5895_v16 }
 0x114   :  { %v1282_v54 = vsel %vm8978_vm2, %v5667_v24, 0.0  ;;  %v754_v61 = vsel %vm722_vm3, 1, %v8895_v40  ;;  %vm1527_vm10 = vmand %vm5330_vm11, %vm8981_vm4  ;;  %vm1738_vm1 = vcmp.lt.s32.totalorder %v8983_v4, 8  ;;  %vm8984_vm14 = vcmp.eq.s32.totalorder %v5238_v20, 1  ;;  %v5923_v6 = vpop.permute.xlu1 %1414 }
 0x115   :  { %v1465_v63 = vsel %vm8984_vm14, %v5861_v5, 0.0  ;;  %v1090_v24 = vadd.f32 %v1074_v51, %v860_v33  ;;  %v1892_v36 = vsel %vm8441_vm13, %v5798_v59, 0.0  ;;  %799 = vperm.xlu0 %3960, %v754_v61   ;;  %vm8986_vm11 = vcmp.lt.s32.totalorder %v8980_v31, 8  ;;  %v8988_v51 = vld [vmem:[#allocation33_spill] sm:$0xff]  ;;  %v5914_v61 = vld [vmem:[%s8239_s6 + $0x7] ss:$0 sm:$0xff] }
 0x116   :  { %vm1543_vm3 = vmand %vm1527_vm10, %vm8986_vm11  ;;  %vm8440_vm4 = vcmp.eq.s32.totalorder %v5755_v37, 1  ;;  %v1321_v2 = vadd.f32 %v1305_v25, %v1091_v47  ;;  %vm8987_vm2 = vcmp.eq.s32.totalorder %v5377_v11, 1  ;;  %vm8989_vm14 = vcmp.ge.s32.totalorder %v8988_v51, 0  ;;  %8991 = vst [vmem:[#allocation67_spill] sm:$0xff] %v5923_v6  ;;  %v3875_v37 = vpop.f32.mrf.mxu0 }
 0x117   :  { %v1647_v20 = vsel %vm8987_vm2, %v5868_v42, 0.0  ;;  %v1575_v0 = vsel %vm1543_vm3, 1, %v8895_v40  ;;  %vm1526_vm9 = vmand %vm5345_vm12, %vm8989_vm14  ;;  %v2073_v47 = vsel %vm8439_vm15, %v5678_v21, 0.0  ;;  %v2072_v25 = vsel %vm8440_vm4, %v5706_v19, 0.0 }
 0x118   :  { %v1304_v11 = vmul.f32 %v5688_v44, %v1282_v54  ;;  %1614 = vperm.xlu1 %3961, %v1575_v0   ;;  %vm8992_vm12 = vcmp.lt.s32.totalorder %v8988_v51, 8  ;;  %v1929_v33 = vadd.f32 %v1913_v14, %v1683_v62  ;;  %v1928_v31 = vadd.f32 %v1912_v1, %v1682_v60  ;;  %v5942_v1 = vpop.permute.xlu0 %1411 }
 0x119   :  { %vm1542_vm10 = vmand %vm1526_vm9, %vm8992_vm12  ;;  %v1487_v56 = vmul.f32 %v5770_v46, %v1465_v63  ;;  %v1893_v21 = vsel %vm8438_vm6, %v5893_v13, 0.0  ;;  %vm8462_vm11 = vcmp.ge.s32.totalorder %v8993_v7, 0  ;;  %v5933_v19 = vmul.f32 %v5839_v28, %v1892_v36  ;;  %8995 = vst [vmem:[#allocation33_spill] sm:$0xff] %v5942_v1 }
 0x11a   :  { %vm8442_vm3 = vcmp.eq.s32.totalorder %v5701_v22, 1  ;;  %v1574_v0 = vsel %vm1542_vm10, 1, %v8895_v40  ;;  %vm8994_vm9 = vcmp.ge.s32.totalorder %v5568_v50, 0  ;;  %v1320_v14 = vadd.f32 %v1304_v11, %v1090_v24  ;;  %v9017_v22 = vld [vmem:[#allocation11_spill] sm:$0xff] }
 0x11b   :  { %vm919_vm2 = vmand %vm5563_vm7, %vm8994_vm9  ;;  %vm8460_vm14 = vcmp.lt.s32.totalorder %v8993_v7, 8  ;;  %1611 = vperm.xlu0 %3960, %v1574_v0   ;;  %v2095_v60 = vmul.f32 %v5914_v61, %v2073_v47  ;;  %v2094_v36 = vmul.f32 %v5914_v61, %v2072_v25  ;;  %vm8996_vm12 = vcmp.lt.s32.totalorder %v5568_v50, 8  ;;  %v273_v47 = vpop.f32.mrf.mxu0  ;;  %v5984_v25 = vld [vmem:[#allocation2 + $0x30] sm:$0xff] }
 0x11c   :  { %vm951_vm6 = vmand %vm919_vm2, %vm8996_vm12  ;;  %v1503_v62 = vadd.f32 %v1487_v56, %v1321_v2  ;;  %v1669_v54 = vmul.f32 %v5824_v30, %v1647_v20  ;;  %vm8457_vm10 = vcmp.ge.s32.totalorder %v5634_v10, 0  ;;  %vm8997_vm7 = vcmp.ge.s32.totalorder %v5571_v23, 0  ;;  %v5963_v20 = vpop.permute.xlu1 %2194 }
 0x11d   :  { %v983_v53 = vsel %vm951_vm6, 1, %v8895_v40  ;;  %vm918_vm9 = vmand %vm5606_vm0, %vm8997_vm7  ;;  %v1915_v11 = vmul.f32 %v5839_v28, %v1893_v21  ;;  %vm8998_vm15 = vcmp.eq.s32.totalorder %v5387_v41, 1  ;;  %vm8999_vm12 = vcmp.eq.s32.totalorder %v5275_v17, 1  ;;  %9000 = vst [vmem:[#allocation47_spill] sm:$0xff] %v5963_v20 }
 0x11e   :  { %v1646_v63 = vsel %vm8998_vm15, %v5743_v26, 0.0  ;;  %v610_v56 = vsel %vm8999_vm12, %v5798_v59, 0.0  ;;  %v5965_v24 = vadd.f32 %v2095_v60, %v1929_v33  ;;  %v5967_v2 = vadd.f32 %v2094_v36, %v1928_v31  ;;  %1026 = vperm.xlu1 %3961, %v983_v53   ;;  %v5993_v60 = vpop.permute.xlu0 %2191 }
 0x11f   :  { %vm9001_vm0 = vcmp.lt.s32.totalorder %v5571_v23, 8  ;;  %vm8451_vm7 = vcmp.eq.s32.totalorder %v5870_v38, 1  ;;  %v632_v48 = vmul.f32 %v5528_v34, %v610_v56  ;;  %vm9002_vm12 = vcmp.lt.s32.totalorder %v5574_v18, 8  ;;  %9008 = vst [vmem:[#allocation68_spill] sm:$0xff] %v5993_v60  ;;  %v6002_v56 = vpop.f32.mrf.mxu0 }
 0x120   :  { %vm950_vm6 = vmand %vm918_vm9, %vm9001_vm0  ;;  %vm9003_vm13 = vcmp.ge.s32.totalorder %v5574_v18, 0  ;;  %v1502_v33 = vadd.f32 %v5832_v39, %v1320_v14  ;;  %vm9006_vm9 = vcmp.eq.s32.totalorder %v8975_v49, 1  ;;  %vm9007_vm0 = vcmp.eq.s32.totalorder %v8976_v27, 1  ;;  %v9009_v18 = vld [vmem:[#allocation9_spill] sm:$0xff] }
 0x121   :  { %v982_v59 = vsel %vm950_vm6, 1, %v8895_v40  ;;  %vm5980_vm2 = vmand %vm9003_vm13, %vm9002_vm12  ;;  %v824_v21 = vsel %vm9006_vm9, %v5861_v5, 0.0  ;;  %v1054_v0 = vsel %vm9007_vm0, %v5868_v42, 0.0  ;;  %vm9010_vm13 = vcmp.ge.s32.totalorder %v9009_v18, 0 }
 0x122   :  { %1023 = vperm.xlu0 %3960, %v982_v59   ;;  %vm1771_vm6 = vmand %vm5980_vm2, %vm9010_vm13  ;;  %v1685_v36 = vadd.f32 %v1669_v54, %v1503_v62  ;;  %v1668_v53 = vmul.f32 %v5824_v30, %v1646_v63  ;;  %v846_v39 = vmul.f32 %v5514_v9, %v824_v21  ;;  %v1076_v14 = vmul.f32 %v5615_v35, %v1054_v0  ;;  %v6016_v54 = vld [vmem:[%s8239_s6 + $0x8] ss:$0 sm:$0xff]  ;;  %v6019_v63 = vpop.permute.xlu1 %1420  ;;  %v6044_v38 = vpop.permute.xlu0 %1417 }
 0x123   :  { %vm9011_vm12 = vcmp.lt.s32.totalorder %v9009_v18, 8  ;;  %v1284_v59 = vsel %vm8442_vm3, %v5893_v13, 0.0  ;;  %vm8450_vm0 = vcmp.eq.s32.totalorder %v5942_v1, 1  ;;  %vm1740_vm15 = vcmp.lt.s32.totalorder %v5645_v8, 8  ;;  %9012 = vst [vmem:[#allocation9_spill] sm:$0xff] %v6016_v54  ;;  %9013 = vst [vmem:[#allocation78_spill] sm:$0xff] %v6019_v63  ;;  %v276_v1 = vpop.f32.mrf.mxu0 }
 0x124   :  { %vm1787_vm9 = vmand %vm1771_vm6, %vm9011_vm12  ;;  %v282_v62 = vadd.f32 %v3875_v37, %v5358_v58  ;;  %vm8453_vm4 = vcmp.eq.s32.totalorder %v5963_v20, 1  ;;  %vm9014_vm6 = vcmp.ge.s32.totalorder %v8983_v4, 0  ;;  %v2075_v37 = vsel %vm8451_vm7, %v5984_v25, 0.0  ;;  %9019 = vst [vmem:[#allocation11_spill] sm:$0xff] %v6044_v38  ;;  %v9110_v0 = vld [vmem:[#allocation64_spill] sm:$0xff] }
 0x125   :  { %v1819_v21 = vsel %vm1787_vm9, 1, %v8895_v40  ;;  %vm6026_vm12 = vmand %vm9014_vm6, %vm1738_vm1  ;;  %vm8452_vm3 = vcmp.eq.s32.totalorder %v5895_v16, 1  ;;  %v862_v18 = vadd.f32 %v846_v39, %v632_v48  ;;  %vm9018_vm13 = vcmp.ge.s32.totalorder %v9017_v22, 0  ;;  %v6400_v16 = vld [vmem:[#allocation2 + $0x48] sm:$0xff]  ;;  %v6410_v20 = vld [vmem:[#allocation2 + $0x3f] sm:$0xff] }
 0x126   :  { %1854 = vperm.xlu1 %3961, %v1819_v21   ;;  %vm1770_vm9 = vmand %vm6026_vm12, %vm9018_vm13  ;;  %v1684_v27 = vadd.f32 %v1668_v53, %v1502_v33  ;;  %v1466_v4 = vsel %vm8450_vm0, %v5984_v25, 0.0  ;;  %v314_v49 = vmax.f32 %v282_v62, 0.0  ;;  %v2255_v17 = vsel %vm8453_vm4, %v5743_v26, 0.0  ;;  %v9021_v53 = vld [vmem:[#allocation53_spill] sm:$0xff] }
 0x127   :  { %vm9020_vm1 = vcmp.lt.s32.totalorder %v9017_v22, 8  ;;  %v1092_v48 = vadd.f32 %v1076_v14, %v862_v18  ;;  %v1306_v39 = vmul.f32 %v5688_v44, %v1284_v59  ;;  %v1488_v21 = vmul.f32 %v5770_v46, %v1466_v4  ;;  %vm921_vm0 = vmand %vm5751_vm8, %vm8462_vm11  ;;  %v6060_v22 = vpop.permute.xlu1 %2200  ;;  %v6094_v4 = vld [vmem:[#allocation2 + $0x31] sm:$0xff] }
 0x128   :  { %vm1786_vm6 = vmand %vm1770_vm9, %vm9020_vm1  ;;  %v2277_v33 = vmul.f32 %v6016_v54, %v2255_v17  ;;  %vm1117_vm13 = vcmp.ge.s32.totalorder %v9021_v53, 0  ;;  %v1931_v43 = vadd.f32 %v1915_v11, %v1685_v36  ;;  %vm9022_vm7 = vcmask 130048   ;;  %9023 = vst [vmem:[#allocation53_spill] sm:$0xff] %v6060_v22  ;;  %v3879_v36 = vpop.f32.mrf.mxu0 }
 0x129   :  { %v1818_v62 = vsel %vm1786_vm6, 1, %v8895_v40  ;;  %351 = vst.msk [vmem:[#allocation2 + $0x60] sm:$0xff] %vm9022_vm7, %v314_v49  ;;  %vm8454_vm9 = vcmp.eq.s32.totalorder %v5993_v60, 1  ;;  %v274_v26 = vadd.f32 %v5358_v58, %v273_v47  ;;  %v2097_v17 = vmul.f32 %v5914_v61, %v2075_v37  ;;  %vm953_vm1 = vmand %vm921_vm0, %vm8460_vm14  ;;  %v6078_v37 = vpop.permute.xlu0 %2197  ;;  %v6412_v60 = vld [vmem:[#allocation2 + $0x37] sm:$0xff] }
 0x12a   :  { %1851 = vperm.xlu0 %3960, %v1818_v62   ;;  %v2074_v11 = vsel %vm8452_vm3, %v5861_v5, 0.0  ;;  %v1322_v32 = vadd.f32 %v1306_v39, %v1092_v48  ;;  %v2254_v49 = vsel %vm8454_vm9, %v5737_v12, 0.0  ;;  %v1930_v47 = vadd.f32 %v5933_v19, %v1684_v27  ;;  %vm920_vm8 = vmand %vm5794_vm5, %vm8457_vm10  ;;  %9024 = vst [vmem:[#allocation79_spill] sm:$0xff] %v6078_v37  ;;  %v6088_v19 = vld [vmem:[%s8240_s7] ss:$0 sm:$0xff] }
 0x12b   :  { %v985_v14 = vsel %vm953_vm1, 1, %v8895_v40  ;;  %v2276_v5 = vmul.f32 %v6016_v54, %v2254_v49  ;;  %v312_v59 = vmax.f32 %v274_v26, 0.0  ;;  %vm9025_vm7 = vcmp.lt.s32.totalorder %v5634_v10, 8  ;;  %9026 = vst [vmem:[#allocation80_spill] sm:$0xff] %v6088_v19  ;;  %v6119_v62 = vpop.permute.xlu1 %570 }
 0x12c   :  { %1032 = vperm.xlu1 %3961, %v985_v14   ;;  %vm952_vm0 = vmand %vm920_vm8, %vm9025_vm7  ;;  %v6082_v12 = vadd.f32 %v1488_v21, %v1322_v32  ;;  %v2293_v27 = vadd.f32 %v2277_v33, %v5965_v24  ;;  %vm8455_vm5 = vcmp.eq.s32.totalorder %v6060_v22, 1  ;;  %vm8456_vm6 = vcmp.eq.s32.totalorder %v6078_v37, 1  ;;  %v9032_v21 = vld [vmem:[#allocation17_spill] sm:$0xff] }
 0x12d   :  { %v2096_v3 = vmul.f32 %v5914_v61, %v2074_v11  ;;  %v984_v18 = vsel %vm952_vm0, 1, %v8895_v40  ;;  %vm9027_vm1 = vcmp.lt.s32.totalorder %v5637_v29, 8  ;;  %vm9028_vm8 = vcmp.ge.s32.totalorder %v5637_v29, 0  ;;  %9034 = vst [vmem:[#allocation17_spill] sm:$0xff] %v6119_v62  ;;  %v6398_v37 = vld [vmem:[#allocation2 + $0x47] sm:$0xff] }
 0x12e   :  { %vm6100_vm7 = vmand %vm9028_vm8, %vm9027_vm1  ;;  %v2292_v48 = vadd.f32 %v2276_v5, %v5967_v2  ;;  %vm9031_vm3 = vcmask 130048   ;;  %vm1133_vm4 = vcmp.lt.s32.totalorder %v9021_v53, 8  ;;  %v2113_v39 = vadd.f32 %v2097_v17, %v1931_v43  ;;  %1029 = vperm.xlu0 %3960, %v984_v18   ;;  %v289_v43 = vpop.f32.mrf.mxu0 }
 0x12f   :  { %349 = vst.msk [vmem:[#allocation2 + $0x50] sm:$0xff] %vm9031_vm3, %v312_v59  ;;  %vm9033_vm0 = vcmp.ge.s32.totalorder %v9032_v21, 0  ;;  %v2257_v29 = vsel %vm8455_vm5, %v6094_v4, 0.0  ;;  %v2256_v33 = vsel %vm8456_vm6, %v5868_v42, 0.0  ;;  %v285_v2 = vadd.f32 %v6002_v56, %v5358_v58  ;;  %v9039_v56 = vld [vmem:[#allocation54_spill] sm:$0xff]  ;;  %v9040_v59 = vld [vmem:[#allocation21_spill] sm:$0xff] }
 0x130   :  { %vm1773_vm9 = vmand %vm6100_vm7, %vm9033_vm0  ;;  %v2112_v26 = vadd.f32 %v2096_v3, %v1930_v47  ;;  %vm9035_vm3 = vcmp.lt.s32.totalorder %v9032_v21, 8  ;;  %v2279_v17 = vmul.f32 %v6016_v54, %v2257_v29  ;;  %v2278_v11 = vmul.f32 %v6016_v54, %v2256_v33  ;;  %v3880_v5 = vpop.f32.mrf.mxu0  ;;  %v9125_v42 = vld [vmem:[#allocation40_spill] sm:$0xff] }
 0x131   :  { %vm1789_vm1 = vmand %vm1773_vm9, %vm9035_vm3  ;;  %v2315_v32 = vadd.f32 %v6088_v19, %v2292_v48  ;;  %vm9036_vm8 = vcmp.ge.s32.totalorder %v5645_v8, 0  ;;  %vm1116_vm5 = vcmp.ge.s32.totalorder %v9039_v56, 0  ;;  %v315_v47 = vmax.f32 %v285_v2, 0.0  ;;  %v6141_v48 = vpop.permute.xlu0 %567  ;;  %v6162_v2 = vpop.permute.xlu1 %784 }
 0x132   :  { %v1821_v49 = vsel %vm1789_vm1, 1, %v8895_v40  ;;  %vm6131_vm0 = vmand %vm9036_vm8, %vm1740_vm15  ;;  %v2316_v14 = vadd.f32 %v6088_v19, %v2293_v27  ;;  %vm9041_vm9 = vcmp.ge.s32.totalorder %v9040_v59, 0  ;;  %v2295_v3 = vadd.f32 %v2279_v17, %v2113_v39  ;;  %9042 = vst [vmem:[#allocation54_spill] sm:$0xff] %v6141_v48 }
 0x133   :  { %1860 = vperm.xlu1 %3961, %v1821_v49   ;;  %vm1772_vm3 = vmand %vm6131_vm0, %vm9041_vm9  ;;  %v2294_v18 = vadd.f32 %v2278_v11, %v2112_v26  ;;  %v277_v8 = vadd.f32 %v5358_v58, %v276_v1  ;;  %v298_v21 = vadd.f32 %v3879_v36, %v5358_v58  ;;  %vm9043_vm15 = vcmp.lt.s32.totalorder %v9040_v59, 8  ;;  %9047 = vst [vmem:[#allocation21_spill] sm:$0xff] %v6162_v2  ;;  %v292_v49 = vpop.f32.mrf.mxu0 }
 0x134   :  { %vm1788_vm1 = vmand %vm1772_vm3, %vm9043_vm15  ;;  %vm1132_vm8 = vcmp.lt.s32.totalorder %v9039_v56, 8  ;;  %vm9044_vm6 = vcmask 130048   ;;  %vm8459_vm10 = vcmp.eq.s32.totalorder %v6119_v62, 1  ;;  %v2331_v27 = vpack.c.bf16 %v2316_v14, %v2315_v32 }
 0x135   :  { %352 = vst.msk [vmem:[#allocation2 + $0x68] sm:$0xff] %vm9044_vm6, %v315_v47  ;;  %v290_v29 = vadd.f32 %v5358_v58, %v289_v43  ;;  %v1820_v39 = vsel %vm1788_vm1, 1, %v8895_v40  ;;  %vm6156_vm9 = vmand %vm1117_vm13, %vm1133_vm4  ;;  %v2318_v36 = vadd.f32 %v6088_v19, %v2295_v3  ;;  %v2317_v33 = vadd.f32 %v6088_v19, %v2294_v18  ;;  %v9048_v43 = vld [vmem:[#allocation57_spill] sm:$0xff]  ;;  %v6203_v56 = vpop.permute.xlu1 %1596 }
 0x136   :  { %v301_v26 = vadd.f32 %v3880_v5, %v5358_v58  ;;  %1857 = vperm.xlu0 %3960, %v1820_v39   ;;  %vm9049_vm6 = vcmp.ge.s32.totalorder %v9048_v43, 0  ;;  %v6169_v17 = vld [vmem:[#allocation2 + $0x4f] sm:$0xff]  ;;  %vm9050_vm4 = vcmask 130048   ;;  %v313_v53 = vmax.f32 %v277_v8, 0.0  ;;  %v6183_v5 = vpop.permute.xlu0 %781  ;;  %9059 = vst [vmem:[#allocation81_spill] sm:$0xff] %v6203_v56  ;;  %v9128_v8 = vld [vmem:[#allocation44_spill] sm:$0xff] }
 0x137   :  { %vm1165_vm3 = vmand %vm6156_vm9, %vm9049_vm6  ;;  %3883 = vmatprep.mubr.msk.bf16.mxu1 %vm9050_vm4, %v2331_v27  ;;  %v6172_v11 = vld [vmem:[#allocation2 + $0x50] sm:$0xff]  ;;  %vm8458_vm13 = vcmp.eq.s32.totalorder %v6162_v2, 1  ;;  %v318_v32 = vmax.f32 %v298_v21, 0.0  ;;  %vm9051_vm15 = vcmp.lt.s32.totalorder %v9048_v43, 8  ;;  %v615_v47 = vsel %vm8459_vm10, %v6169_v17, 0.0  ;;  %9052 = vst [vmem:[#allocation57_spill] sm:$0xff] %v6183_v5 }
 0x138   :  { %vm1181_vm1 = vmand %vm1165_vm3, %vm9051_vm15  ;;  %v829_v14 = vsel %vm8458_vm13, %v6172_v11, 0.0  ;;  %v2332_v59 = vpack.c.bf16 %v2318_v36, %v2317_v33  ;;  %v316_v3 = vmax.f32 %v290_v29, 0.0  ;;  %v637_v21 = vmul.f32 %v5528_v34, %v615_v47  ;;  %v9063_v36 = vld [vmem:[#allocation8_spill] sm:$0xff]  ;;  %v9106_v2 = vld [vmem:[#allocation63_spill] sm:$0xff] }
 0x139   :  { %v1213_v18 = vsel %vm1181_vm1, 1, %v8895_v40  ;;  %vm6190_vm6 = vmand %vm1116_vm5, %vm1132_vm8  ;;  %v851_v27 = vmul.f32 %v5514_v9, %v829_v14  ;;  %vm9057_vm15 = vcmp.ge.s32.totalorder %v5461_v45, 0  ;;  %v319_v29 = vmax.f32 %v301_v26, 0.0  ;;  %v6236_v14 = vpop.permute.xlu1 %576 }
 0x13a   :  { %vm9055_vm3 = vmmov %vm9050_vm4  ;;  %1256 = vperm.xlu1 %3961, %v1213_v18   ;;  %v293_v34 = vadd.f32 %v5358_v58, %v292_v49  ;;  %vm9061_vm8 = vcmp.lt.s32.totalorder %v5461_v45, 8  ;;  %v6216_v33 = vpop.permute.xlu0 %1593  ;;  %v9068_v58 = vld [vmem:[#allocation60_spill] sm:$0xff]  ;;  %v9075_v18 = vld [vmem:[#allocation61_spill] sm:$0xff]  ;;  %vm9083_vm11 = vcmp.lt.s32.totalorder %v5552_v57, 8 }
 0x13b   :  { %350 = vst.msk [vmem:[#allocation2 + $0x58] sm:$0xff] %vm9055_vm3, %v313_v53  ;;  %vm9056_vm4 = vmmov %vm9055_vm3  ;;  %v6209_v9 = vadd.f32 %v851_v27, %v637_v21 }
 0x13c   :  { %355 = vst.msk [vmem:[#allocation2 + $0x80] sm:$0xff] %vm9056_vm4, %v318_v32  ;;  %vm1164_vm1 = vmand %vm6190_vm6, %vm9057_vm15  ;;  %vm9064_vm4 = vcmp.ge.s32.totalorder %v9063_v36, 0  ;;  %v317_v53 = vmax.f32 %v293_v34, 0.0  ;;  %v9069_v32 = vld [vmem:[#allocation10_spill] sm:$0xff] }
 0x13d   :  { %vm9058_vm13 = vmmov %vm9055_vm3  ;;  %9062 = vst [vmem:[#allocation82_spill] sm:$0xff] %v6209_v9  ;;  %vm9070_vm14 = vcmp.ge.s32.totalorder %v9069_v32, 0 }
 0x13e   :  { %3884 = vmatmul.mubr.msk.bf16.vlgmr.msra.gmra.mxu1 %vm9058_vm13, %v2332_v59  ;;  %vm9060_vm5 = vmmov %vm9055_vm3  ;;  %9065 = vst [vmem:[#allocation8_spill] sm:$0xff] %v6216_v33  ;;  %v6254_v27 = vpop.permute.xlu0 %573 }
 0x13f   :  { %353 = vst.msk [vmem:[#allocation2 + $0x70] sm:$0xff] %vm9060_vm5, %v316_v3  ;;  %vm1180_vm3 = vmand %vm1164_vm1, %vm9061_vm8  ;;  %vm1119_vm1 = vcmp.ge.s32.totalorder %v9068_v58, 0  ;;  %vm1135_vm8 = vcmp.lt.s32.totalorder %v9068_v58, 8  ;;  %v9073_v3 = vmov 0 }
 0x140   :  { %v1212_v39 = vsel %vm1180_vm3, 1, %v8895_v40  ;;  %vm1953_vm15 = vmand %vm5980_vm2, %vm9064_vm4  ;;  %vm8461_vm3 = vcmp.eq.s32.totalorder %v6216_v33, 1  ;;  %9072 = vst [vmem:[#allocation60_spill] sm:$0xff] %v6236_v14  ;;  %v3984_v33 = vld [vmem:[%s8672_s30 + $0x60] sm:$0xff] }
 0x141   :  { %vm9066_vm13 = vmmov %vm9060_vm5  ;;  %1253 = vperm.xlu0 %3960, %v1212_v39   ;;  %vm9067_vm5 = vcmp.lt.s32.totalorder %v9063_v36, 8  ;;  %v1648_v49 = vsel %vm8461_vm3, %v6094_v4, 0.0  ;;  %vm1134_vm3 = vcmp.lt.s32.totalorder %v9075_v18, 8  ;;  %9078 = vst [vmem:[#allocation10_spill] sm:$0xff] %v6254_v27  ;;  %v6265_v39 = vpop.permute.xlu1 %790  ;;  %v9084_v36 = vld [vmem:[#allocation15_spill] sm:$0xff]  ;;  %v6356_v22 = vadd.s32 1, %v3984_v33 }
 0x142   :  { %356 = vst.msk [vmem:[#allocation2 + $0x88] sm:$0xff] %vm9066_vm13, %v319_v29  ;;  %vm1969_vm10 = vmand %vm1953_vm15, %vm9067_vm5  ;;  %vm9071_vm15 = vcmp.lt.s32.totalorder %v9069_v32, 8  ;;  %v1670_v47 = vmul.f32 %v5824_v30, %v1648_v49  ;;  %v9088_v32 = vld [vmem:[#allocation18_spill] sm:$0xff]  ;;  %v9133_v27 = vld [vmem:[#allocation49_spill] sm:$0xff] }
 0x143   :  { %v2001_v26 = vsel %vm1969_vm10, 1, %v8895_v40  ;;  %vm1952_vm4 = vmand %vm6026_vm12, %vm9070_vm14  ;;  %354 = vst.msk [vmem:[#allocation2 + $0x78] sm:$0xff] %vm9066_vm13, %v317_v53  ;;  %vm1118_vm14 = vcmp.ge.s32.totalorder %v9075_v18, 0  ;;  %vm9076_vm13 = vcmp.ge.s32.totalorder %v5546_v52, 0  ;;  %v6274_v53 = vpop.permute.xlu0 %787 }
 0x144   :  { %2036 = vperm.xlu1 %3961, %v2001_v26   ;;  %vm1968_vm5 = vmand %vm1952_vm4, %vm9071_vm15  ;;  %v6250_v21 = vadd.f32 %v1670_v47, %v6082_v12  ;;  %vm9077_vm15 = vcmp.lt.s32.totalorder %v5546_v52, 8  ;;  %9082 = vst [vmem:[#allocation61_spill] sm:$0xff] %v6265_v39 }
 0x145   :  { %v2000_v59 = vsel %vm1968_vm5, 1, %v8895_v40  ;;  %vm6239_vm10 = vmand %vm1119_vm1, %vm1135_vm8  ;;  %vm9081_vm8 = vcmp.ge.s32.totalorder %v5552_v57, 0  ;;  %9086 = vst [vmem:[#allocation15_spill] sm:$0xff] %v6274_v53  ;;  %v6283_v49 = vpop.permute.xlu1 %1602  ;;  %v6432_v53 = vld [vmem:[#allocation2 + $0x49] sm:$0xff] }
 0x146   :  { %v9074_v3 = vsel %vm6239_vm10, 4294967295, %v9073_v3  ;;  %2033 = vperm.xlu0 %3960, %v2000_v59   ;;  %vm1167_vm4 = vmand %vm6239_vm10, %vm9076_vm13  ;;  %9090 = vst [vmem:[#allocation18_spill] sm:$0xff] %v6283_v49 }
 0x147   :  { %vm1183_vm5 = vmand %vm1167_vm4, %vm9077_vm15  ;;  %vm9085_vm4 = vcmp.ge.s32.totalorder %v9084_v36, 0  ;;  %v6292_v59 = vpop.permute.xlu0 %1599 }
 0x148   :  { %v1215_v29 = vsel %vm1183_vm5, 1, %v8895_v40  ;;  %vm6257_vm1 = vmand %vm1118_vm14, %vm1134_vm3  ;;  %vm9087_vm14 = vcmp.lt.s32.totalorder %v9084_v36, 8  ;;  %vm9089_vm5 = vcmp.ge.s32.totalorder %v9088_v32, 0  ;;  %9093 = vst [vmem:[#allocation83_spill] sm:$0xff] %v6292_v59 }
 0x149   :  { %1262 = vperm.xlu1 %3961, %v1215_v29   ;;  %vm1166_vm13 = vmand %vm6257_vm1, %vm9081_vm8  ;;  %v9095_v29 = vld [vmem:[#allocation56_spill] sm:$0xff] }
 0x14a   :  { %vm1182_vm10 = vmand %vm1166_vm13, %vm9083_vm11  ;;  %vm9092_vm13 = vcmp.ge.s32.totalorder %v5417_v15, 0 }
 0x14b   :  { %v1214_v12 = vsel %vm1182_vm10, 1, %v8895_v40  ;;  %vm1955_vm3 = vmand %vm6100_vm7, %vm9085_vm4  ;;  %vm9091_vm10 = vcmp.lt.s32.totalorder %v9088_v32, 8 }
 0x14c   :  { %1259 = vperm.xlu0 %3960, %v1214_v12   ;;  %vm1971_vm15 = vmand %vm1955_vm3, %vm9087_vm14  ;;  %vm9094_vm3 = vcmp.lt.s32.totalorder %v5417_v15, 8  ;;  %v6301_v12 = vpop.permute.xlu1 %1014 }
 0x14d   :  { %v2003_v26 = vsel %vm1971_vm15, 1, %v8895_v40  ;;  %vm1954_vm11 = vmand %vm6131_vm0, %vm9089_vm5  ;;  %vm9096_vm15 = vcmp.ge.s32.totalorder %v9095_v29, 0  ;;  %9097 = vst [vmem:[#allocation56_spill] sm:$0xff] %v6301_v12  ;;  %v6427_v12 = vld [vmem:[#allocation2 + $0x38] sm:$0xff] }
 0x14e   :  { %2042 = vperm.xlu1 %3961, %v2003_v26   ;;  %vm1970_vm8 = vmand %vm1954_vm11, %vm9091_vm10  ;;  %vm9098_vm11 = vcmp.lt.s32.totalorder %v9095_v29, 8  ;;  %v6310_v26 = vpop.permute.xlu0 %1011 }
 0x14f   :  { %v2002_v47 = vsel %vm1970_vm8, 1, %v8895_v40  ;;  %vm1347_vm4 = vmand %vm6156_vm9, %vm9092_vm13  ;;  %vm9099_vm8 = vcmp.ge.s32.totalorder %v5138_v55, 0  ;;  %9100 = vst [vmem:[#allocation84_spill] sm:$0xff] %v6310_v26 }
 0x150   :  { %2039 = vperm.xlu0 %3960, %v2002_v47   ;;  %vm1363_vm14 = vmand %vm1347_vm4, %vm9094_vm3  ;;  %vm9101_vm4 = vcmp.lt.s32.totalorder %v5138_v55, 8  ;;  %v9102_v47 = vld [vmem:[#allocation27_spill] sm:$0xff] }
 0x151   :  { %v1395_v18 = vsel %vm1363_vm14, 1, %v8895_v40  ;;  %vm1346_vm5 = vmand %vm6190_vm6, %vm9096_vm15  ;;  %vm9103_vm14 = vcmp.ge.s32.totalorder %v9102_v47, 0 }
 0x152   :  { %1438 = vperm.xlu1 %3961, %v1395_v18   ;;  %vm1362_vm10 = vmand %vm1346_vm5, %vm9098_vm11  ;;  %vm9104_vm5 = vcmp.lt.s32.totalorder %v9102_v47, 8  ;;  %v6321_v18 = vpop.permute.xlu1 %1842  ;;  %v9114_v47 = vld [vmem:[#allocation31_spill] sm:$0xff] }
 0x153   :  { %v1394_v36 = vsel %vm1362_vm10, 1, %v8895_v40  ;;  %vm2135_vm13 = vmand %vm5980_vm2, %vm9099_vm8  ;;  %9105 = vst [vmem:[#allocation27_spill] sm:$0xff] %v6321_v18  ;;  %vm9107_vm2 = vcmp.ge.s32.totalorder %v9106_v2, 0  ;;  %vm9108_vm10 = vnez %v9074_v3 }
 0x154   :  { %1435 = vperm.xlu0 %3960, %v1394_v36   ;;  %vm2151_vm3 = vmand %vm2135_vm13, %vm9101_vm4  ;;  %vm9109_vm13 = vcmp.lt.s32.totalorder %v9106_v2, 8  ;;  %v6335_v36 = vpop.permute.xlu0 %1839 }
 0x155   :  { %v2183_v32 = vsel %vm2151_vm3, 1, %v8895_v40  ;;  %vm2134_vm15 = vmand %vm6026_vm12, %vm9103_vm14  ;;  %vm9111_vm12 = vcmp.ge.s32.totalorder %v9110_v0, 0  ;;  %9112 = vst [vmem:[#allocation63_spill] sm:$0xff] %v6335_v36  ;;  %vm9113_vm14 = vcmp.lt.s32.totalorder %v9110_v0, 8 }
 0x156   :  { %2218 = vperm.xlu1 %3961, %v2183_v32   ;;  %vm2150_vm11 = vmand %vm2134_vm15, %vm9104_vm5  ;;  %vm9115_vm5 = vcmp.ge.s32.totalorder %v9114_v47, 0 }
 0x157   :  { %v2182_v31 = vsel %vm2150_vm11, 1, %v8895_v40  ;;  %vm1349_vm8 = vmand %vm9108_vm10, %vm9107_vm2  ;;  %vm9117_vm2 = vcmp.lt.s32.totalorder %v9114_v47, 8  ;;  %v6368_v47 = vadd.s32 1, %v9068_v58  ;;  %v6385_v58 = vld [vmem:[#allocation2 + $0x40] sm:$0xff] }
 0x158   :  { %2215 = vperm.xlu0 %3960, %v2182_v31   ;;  %vm1365_vm4 = vmand %vm1349_vm8, %vm9109_vm13  ;;  %v6344_v31 = vpop.permute.xlu1 %1020 }
 0x159   :  { %v1397_v55 = vsel %vm1365_vm4, 1, %v8895_v40  ;;  %vm1348_vm3 = vmand %vm6257_vm1, %vm9111_vm12  ;;  %9116 = vst [vmem:[#allocation64_spill] sm:$0xff] %v6344_v31  ;;  %vm9120_vm4 = vcmp.lt.s32.totalorder %v8988_v51, 8  ;;  %v9134_v31 = vld [vmem:[#allocation52_spill] sm:$0xff] }
 0x15a   :  { %1444 = vperm.xlu1 %3961, %v1397_v55   ;;  %vm1364_vm15 = vmand %vm1348_vm3, %vm9113_vm14  ;;  %v3983_v55 = vld [vmem:[%s8672_s30 + $0x68] sm:$0xff]  ;;  %vm9122_vm14 = vcmp.ge.s32.totalorder %v5568_v50, 0 }
 0x15b   :  { %v1396_v32 = vsel %vm1364_vm15, 1, %v8895_v40  ;;  %vm2137_vm11 = vmand %vm6100_vm7, %vm9115_vm5  ;;  %v6351_v62 = vadd.s32 1, %v3983_v55  ;;  %vm9118_vm7 = vcmp.ge.s32.totalorder %v8988_v51, 0  ;;  %v9121_v55 = vld [vmem:[#allocation38_spill] sm:$0xff]  ;;  %vm9123_vm5 = vcmp.lt.s32.totalorder %v5568_v50, 8 }
 0x15c   :  { %1441 = vperm.xlu0 %3960, %v1396_v32   ;;  %vm2153_vm8 = vmand %vm2137_vm11, %vm9117_vm2  ;;  %v6363_v32 = vpop.permute.xlu0 %1017  ;;  %vm595_vm3 = vcmp.eq.s32.totalorder %v9121_v55, 1  ;;  %v6382_v51 = vpop.permute.xlu1 %1848  ;;  %vm8503_vm2 = vcmp.eq.s32.totalorder %v9134_v31, 1 }
 0x15d   :  { %v2185_v24 = vsel %vm2153_vm8, 1, %v8895_v40  ;;  %vm2136_vm13 = vmand %vm6131_vm0, %vm9118_vm7  ;;  %9119 = vst [vmem:[#allocation31_spill] sm:$0xff] %v6363_v32  ;;  %vm8482_vm0 = vcmp.eq.s32.totalorder %v6183_v5, 1  ;;  %vm1743_vm8 = vcmp.lt.s32.totalorder %v6351_v62, 8  ;;  %vm8518_vm7 = vcmp.eq.s32.totalorder %v9128_v8, 1  ;;  %v9132_v32 = vld [vmem:[#allocation48_spill] sm:$0xff] }
 0x15e   :  { %2224 = vperm.xlu1 %3961, %v2185_v24   ;;  %vm2152_vm12 = vmand %vm2136_vm13, %vm9120_vm4  ;;  %9124 = vst [vmem:[#allocation85_spill] sm:$0xff] %v6382_v51  ;;  %vm8512_vm13 = vcmp.eq.s32.totalorder %v9125_v42, 1  ;;  %v3985_v24 = vld [vmem:[%s8672_s30 + $0x70] sm:$0xff]  ;;  %v611_v5 = vsel %vm595_vm3, %v5893_v13, 0.0  ;;  %v6457_v42 = vld [vmem:[#allocation2 + $0x41] sm:$0xff]  ;;  %v1055_v19 = vsel %vm8503_vm2, %v6094_v4, 0.0 }
 0x15f   :  { %v2184_v33 = vsel %vm2152_vm12, 1, %v8895_v40  ;;  %vm1529_vm15 = vmand %vm6156_vm9, %vm9122_vm14  ;;  %vm9126_vm9 = vcmp.ge.s32.totalorder %v5571_v23, 0  ;;  %vm8498_vm14 = vcmp.eq.s32.totalorder %v6141_v48, 1  ;;  %v825_v3 = vsel %vm8512_vm13, %v5984_v25, 0.0 }
 0x160   :  { %2221 = vperm.xlu0 %3960, %v2184_v33   ;;  %vm1545_vm11 = vmand %vm1529_vm15, %vm9123_vm5  ;;  %v6396_v33 = vadd.s32 1, %v3985_v24  ;;  %vm9127_vm15 = vcmp.lt.s32.totalorder %v5571_v23, 8  ;;  %v9129_v24 = vld [vmem:[#allocation46_spill] sm:$0xff]  ;;  %v6422_v9 = vpop.permute.xlu0 %1845  ;;  %v614_v14 = vsel %vm8498_vm14, %v6398_v37, 0.0  ;;  %v613_v25 = vsel %vm8518_vm7, %v6410_v20, 0.0  ;;  %v6467_v55 = vpop.permute.xlu1 %1244 }
 0x161   :  { %v1577_v1 = vsel %vm1545_vm11, 1, %v8895_v40  ;;  %vm1528_vm4 = vmand %vm6190_vm6, %vm9126_vm9  ;;  %vm8497_vm6 = vcmp.eq.s32.totalorder %v6310_v26, 1  ;;  %vm596_vm12 = vcmp.eq.s32.totalorder %v9129_v24, 1  ;;  %9131 = vst [vmem:[#allocation86_spill] sm:$0xff] %v6422_v9  ;;  %vm8504_vm11 = vcmp.eq.s32.totalorder %v9132_v32, 1 }
 0x162   :  { %1620 = vperm.xlu1 %3961, %v1577_v1   ;;  %vm1544_vm5 = vmand %vm1528_vm4, %vm9127_vm15  ;;  %v828_v1 = vsel %vm8482_vm0, %v6400_v16, 0.0  ;;  %vm9130_vm4 = vcmp.ge.s32.totalorder %v8993_v7, 0  ;;  %vm8509_vm9 = vcmp.eq.s32.totalorder %v9133_v27, 1  ;;  %v1058_v39 = vsel %vm8497_vm6, %v6432_v53, 0.0  ;;  %v6462_v26 = vld [vmem:[%s8239_s6 + $0x1] ss:$0 sm:$0xff] }
 0x163   :  { %v1576_v41 = vsel %vm1544_vm5, 1, %v8895_v40  ;;  %vm1531_vm15 = vmand %vm9108_vm10, %vm9130_vm4  ;;  %vm9135_vm5 = vcmp.lt.s32.totalorder %v8993_v7, 8  ;;  %vm9136_vm4 = vcmp.ge.s32.totalorder %v5634_v10, 0  ;;  %v827_v48 = vsel %vm8504_vm11, %v6385_v58, 0.0  ;;  %9139 = vst [vmem:[#allocation87_spill] sm:$0xff] %v6467_v55 }
 0x164   :  { %1617 = vperm.xlu0 %3960, %v1576_v41   ;;  %vm1547_vm10 = vmand %vm1531_vm15, %vm9135_vm5  ;;  %v9137_v41 = vld [vmem:[#allocation62_spill] sm:$0xff]  ;;  %v850_v34 = vmul.f32 %v6462_v26, %v828_v1  ;;  %v612_v32 = vsel %vm596_vm12, %v6412_v60, 0.0  ;;  %v826_v8 = vsel %vm8509_vm9, %v6427_v12, 0.0  ;;  %v6490_v24 = vld [vmem:[%s8239_s6] ss:$0 sm:$0xff]  ;;  %v847_v31 = vmul.f32 %v6462_v26, %v825_v3 }
 0x165   :  { %v1579_v13 = vsel %vm1547_vm10, 1, %v8895_v40  ;;  %vm1530_vm0 = vmand %vm6257_vm1, %vm9136_vm4  ;;  %vm8500_vm15 = vcmp.eq.s32.totalorder %v9137_v41, 1  ;;  %vm9138_vm1 = vcmp.lt.s32.totalorder %v5634_v10, 8  ;;  %9143 = vst [vmem:[#allocation88_spill] sm:$0xff] %v6490_v24  ;;  %v633_v27 = vmul.f32 %v6490_v24, %v611_v5  ;;  %v6513_v5 = vld [vmem:[%s8239_s6 + $0x2] ss:$0 sm:$0xff] }
 0x166   :  { %1626 = vperm.xlu1 %3961, %v1579_v13   ;;  %vm1546_vm5 = vmand %vm1530_vm0, %vm9138_vm1  ;;  %vm9140_vm0 = vcmp.ge.s32.totalorder %v6351_v62, 0  ;;  %v636_v4 = vmul.f32 %v6490_v24, %v614_v14  ;;  %v1080_v55 = vmul.f32 %v5615_v35, %v1058_v39  ;;  %vm9144_vm4 = vcmp.ge.s32.totalorder %v9048_v43, 0  ;;  %v6508_v35 = vpop.permute.xlu0 %1241 }
 0x167   :  { %v1578_v1 = vsel %vm1546_vm5, 1, %v8895_v40  ;;  %vm6483_vm10 = vmand %vm9140_vm0, %vm1743_vm8  ;;  %v635_v62 = vmul.f32 %v6490_v24, %v613_v25  ;;  %v1057_v10 = vsel %vm8500_vm15, %v6457_v42, 0.0  ;;  %vm9145_vm1 = vcmp.lt.s32.totalorder %v9048_v43, 8  ;;  %9146 = vst [vmem:[#allocation89_spill] sm:$0xff] %v6508_v35 }
 0x168   :  { %1623 = vperm.xlu0 %3960, %v1578_v1   ;;  %vm1775_vm8 = vmand %vm6483_vm10, %vm9144_vm4  ;;  %vm1728_vm0 = vcmp.ge.s32.totalorder %v6396_v33, 0  ;;  %vm1744_vm6 = vcmp.lt.s32.totalorder %v6396_v33, 8  ;;  %v1077_v14 = vmul.f32 %v6513_v5, %v1055_v19  ;;  %v866_v39 = vadd.f32 %v850_v34, %v636_v4  ;;  %v960_v19 = vld [vmem:[#allocation2 + $0x39] sm:$0xff]  ;;  %v6536_v34 = vpop.permute.xlu1 %2024 }
 0x169   :  { %vm1791_vm5 = vmand %vm1775_vm8, %vm9145_vm1  ;;  %vm9147_vm4 = vcmp.lt.s32.totalorder %v6356_v22, 8  ;;  %vm9148_vm8 = vcmp.ge.s32.totalorder %v6356_v22, 0  ;;  %vm8508_vm14 = vcmp.eq.s32.totalorder %v6508_v35, 1  ;;  %v849_v25 = vmul.f32 %v6462_v26, %v827_v48  ;;  %9152 = vst [vmem:[#allocation90_spill] sm:$0xff] %v6536_v34  ;;  %v9153_v4 = vld [vmem:[#allocation71_spill] sm:$0xff] }
 0x16a   :  { %v1823_v3 = vsel %vm1791_vm5, 1, %v8895_v40  ;;  %vm6521_vm1 = vmand %vm9148_vm8, %vm9147_vm4  ;;  %v634_v1 = vmul.f32 %v6490_v24, %v612_v32  ;;  %v848_v41 = vmul.f32 %v6462_v26, %v826_v8  ;;  %vm9151_vm5 = vcmp.ge.s32.totalorder %v5461_v45, 0  ;;  %v9155_v8 = vld [vmem:[#allocation65_spill] sm:$0xff] }
 0x16b   :  { %1866 = vperm.xlu1 %3961, %v1823_v3   ;;  %vm1774_vm15 = vmand %vm6521_vm1, %vm9151_vm5  ;;  %v1288_v22 = vsel %vm8508_vm14, %v6169_v17, 0.0  ;;  %vm8510_vm4 = vcmp.eq.s32.totalorder %v9153_v4, 1  ;;  %v863_v48 = vadd.f32 %v847_v31, %v633_v27  ;;  %v1096_v54 = vadd.f32 %v1080_v55, %v866_v39  ;;  %v9162_v39 = vld [vmem:[#allocation75_spill] sm:$0xff]  ;;  %v6748_v27 = vld [vmem:[%s8239_s6 + $0x5] ss:$0 sm:$0xff] }
 0x16c   :  { %vm9154_vm8 = vcmp.lt.s32.totalorder %v5461_v45, 8  ;;  %v1310_v32 = vmul.f32 %v5688_v44, %v1288_v22  ;;  %vm8511_vm11 = vcmp.eq.s32.totalorder %v9155_v8, 1  ;;  %v865_v3 = vadd.f32 %v849_v25, %v635_v62  ;;  %v6555_v45 = vpop.permute.xlu0 %2021 }
 0x16d   :  { %vm1790_vm2 = vmand %vm1774_vm15, %vm9154_vm8  ;;  %v1285_v24 = vsel %vm8510_vm4, %v6412_v60, 0.0  ;;  %vm9156_vm5 = vcmp.lt.s32.totalorder %v6368_v47, 8  ;;  %vm9157_vm14 = vcmp.ge.s32.totalorder %v6368_v47, 0  ;;  %9160 = vst [vmem:[#allocation71_spill] sm:$0xff] %v6555_v45  ;;  %v1056_v31 = vsel %vm8511_vm11, %v960_v19, 0.0 }
 0x16e   :  { %v1822_v35 = vsel %vm1790_vm2, 1, %v8895_v40  ;;  %vm6551_vm9 = vmand %vm9157_vm14, %vm9156_vm5  ;;  %v1093_v55 = vadd.f32 %v1077_v14, %v863_v48  ;;  %vm8514_vm15 = vcmp.eq.s32.totalorder %v5923_v6, 1  ;;  %vm9161_vm8 = vcmp.ge.s32.totalorder %v5546_v52, 0 }
 0x16f   :  { %1863 = vperm.xlu0 %3960, %v1822_v35   ;;  %vm1777_vm2 = vmand %vm6551_vm9, %vm9161_vm8  ;;  %v6564_v62 = vadd.f32 %v1310_v32, %v1096_v54  ;;  %v1079_v47 = vmul.f32 %v6513_v5, %v1057_v10  ;;  %vm8513_vm14 = vcmp.eq.s32.totalorder %v9162_v39, 1  ;;  %v864_v25 = vadd.f32 %v848_v41, %v634_v1  ;;  %v6582_v54 = vpop.permute.xlu1 %1250 }
 0x170   :  { %vm9163_vm5 = vcmp.lt.s32.totalorder %v5546_v52, 8  ;;  %v1307_v14 = vmul.f32 %v5688_v44, %v1285_v24  ;;  %vm8516_vm11 = vcmp.eq.s32.totalorder %v6019_v63, 1  ;;  %vm8517_vm13 = vcmp.eq.s32.totalorder %v6203_v56, 1  ;;  %vm6578_vm8 = vmand %vm1728_vm0, %vm1744_vm6  ;;  %9166 = vst [vmem:[#allocation65_spill] sm:$0xff] %v6582_v54  ;;  %v9167_v24 = vld [vmem:[#allocation76_spill] sm:$0xff] }
 0x171   :  { %vm1793_vm4 = vmand %vm1777_vm2, %vm9163_vm5  ;;  %v1287_v52 = vsel %vm8513_vm14, %v6398_v37, 0.0  ;;  %v1078_v44 = vmul.f32 %v6513_v5, %v1056_v31  ;;  %vm8515_vm2 = vcmp.eq.s32.totalorder %v9167_v24, 1  ;;  %v1467_v41 = vsel %vm8514_vm15, %v6427_v12, 0.0  ;;  %v6613_v31 = vpop.permute.xlu0 %1247 }
 0x172   :  { %v1825_v35 = vsel %vm1793_vm4, 1, %v8895_v40  ;;  %vm9168_vm6 = vcmp.ge.s32.totalorder %v5552_v57, 0  ;;  %v1095_v33 = vadd.f32 %v1079_v47, %v865_v3  ;;  %v1286_v1 = vsel %vm8515_vm2, %v6410_v20, 0.0 }
 0x173   :  { %1872 = vperm.xlu1 %3961, %v1825_v35   ;;  %vm1776_vm0 = vmand %vm6578_vm8, %vm9168_vm6  ;;  %v1323_v22 = vadd.f32 %v1307_v14, %v1093_v55  ;;  %vm8522_vm4 = vcmp.eq.s32.totalorder %v6321_v18, 1  ;;  %vm9169_vm5 = vcmp.lt.s32.totalorder %v5552_v57, 8  ;;  %v1469_v48 = vsel %vm8516_vm11, %v6400_v16, 0.0  ;;  %v6618_v57 = vld [vmem:[%s8239_s6 + $0x3] ss:$0 sm:$0xff] }
 0x174   :  { %vm1792_vm14 = vmand %vm1776_vm0, %vm9169_vm5  ;;  %v1649_v32 = vsel %vm8517_vm13, %v960_v19, 0.0  ;;  %vm1878_vm6 = vcmp.eq.s32.totalorder %v6335_v36, 1  ;;  %vm9170_vm15 = vcmp.ge.s32.totalorder %v5417_v15, 0  ;;  %v1309_v55 = vmul.f32 %v6618_v57, %v1287_v52  ;;  %v6635_v52 = vpop.permute.xlu1 %2030 }
 0x175   :  { %v1824_v3 = vsel %vm1792_vm14, 1, %v8895_v40  ;;  %vm1957_vm2 = vmand %vm6483_vm10, %vm9170_vm15  ;;  %v1094_v47 = vadd.f32 %v1078_v44, %v864_v25  ;;  %v1489_v19 = vmul.f32 %v5770_v46, %v1467_v41  ;;  %vm1452_vm0 = vcmp.eq.s32.totalorder %v6044_v38, 1  ;;  %v1981_v25 = vld [vmem:[#allocation2 + $0x40] sm:$0xff]  ;;  %9173 = vst [vmem:[#allocation91_spill] sm:$0xff] %v6635_v52 }
 0x176   :  { %1869 = vperm.xlu0 %3960, %v1824_v3   ;;  %vm9171_vm14 = vcmp.lt.s32.totalorder %v5417_v15, 8  ;;  %vm8521_vm15 = vcmp.eq.s32.totalorder %v6283_v49, 1  ;;  %v1895_v14 = vsel %vm8522_vm4, %v6410_v20, 0.0  ;;  %vm9172_vm11 = vcmp.ge.s32.totalorder %v9095_v29, 0 }
 0x177   :  { %vm1973_vm5 = vmand %vm1957_vm2, %vm9171_vm14  ;;  %vm8523_vm7 = vcmp.eq.s32.totalorder %v6536_v34, 1  ;;  %v1308_v15 = vmul.f32 %v6618_v57, %v1286_v1  ;;  %v1491_v44 = vmul.f32 %v5770_v46, %v1469_v48  ;;  %v1671_v41 = vmul.f32 %v5824_v30, %v1649_v32  ;;  %v6653_v46 = vpop.permute.xlu0 %2027 }
 0x178   :  { %v2005_v35 = vsel %vm1973_vm5, 1, %v8895_v40  ;;  %vm1956_vm13 = vmand %vm6521_vm1, %vm9172_vm11  ;;  %v1894_v20 = vsel %vm1878_vm6, %v6412_v60, 0.0  ;;  %vm9174_vm2 = vcmp.lt.s32.totalorder %v9095_v29, 8  ;;  %v1325_v3 = vadd.f32 %v1309_v55, %v1095_v33  ;;  %9176 = vst [vmem:[#allocation92_spill] sm:$0xff] %v6653_v46  ;;  %v6680_v55 = vld [vmem:[%s8239_s6 + $0x4] ss:$0 sm:$0xff] }
 0x179   :  { %2048 = vperm.xlu1 %3961, %v2005_v35   ;;  %vm1972_vm14 = vmand %vm1956_vm13, %vm9174_vm2  ;;  %v1505_v63 = vadd.f32 %v1489_v19, %v1323_v22  ;;  %v1468_v39 = vsel %vm1452_vm0, %v6385_v58, 0.0  ;;  %vm9175_vm11 = vcmp.ge.s32.totalorder %v9106_v2, 0  ;;  %v1651_v60 = vsel %vm8521_vm15, %v6432_v53, 0.0 }
 0x17a   :  { %v2004_v1 = vsel %vm1972_vm14, 1, %v8895_v40  ;;  %vm1959_vm5 = vmand %vm6551_vm9, %vm9175_vm11  ;;  %v1917_v29 = vmul.f32 %v5839_v28, %v1895_v14  ;;  %vm9177_vm13 = vcmp.lt.s32.totalorder %v9106_v2, 8  ;;  %v2077_v58 = vsel %vm8523_vm7, %v1981_v25, 0.0  ;;  %v6673_v2 = vpop.permute.xlu1 %1426 }
 0x17b   :  { %2045 = vperm.xlu0 %3960, %v2004_v1   ;;  %vm1975_vm2 = vmand %vm1959_vm5, %vm9177_vm13  ;;  %vm8524_vm14 = vcmp.eq.s32.totalorder %v6555_v45, 1  ;;  %v6664_v33 = vadd.f32 %v1308_v15, %v1094_v47  ;;  %vm1634_vm11 = vcmp.eq.s32.totalorder %v6292_v59, 1  ;;  %v1916_v22 = vmul.f32 %v5839_v28, %v1894_v20  ;;  %9179 = vst [vmem:[#allocation93_spill] sm:$0xff] %v6673_v2  ;;  %v9190_v1 = vld [vmem:[#allocation9_spill] sm:$0xff] }
 0x17c   :  { %v2007_v48 = vsel %vm1975_vm2, 1, %v8895_v40  ;;  %vm9178_vm15 = vcmp.ge.s32.totalorder %v9110_v0, 0  ;;  %v6675_v32 = vadd.f32 %v1491_v44, %v1325_v3  ;;  %v1490_v47 = vmul.f32 %v6680_v55, %v1468_v39 }
 0x17d   :  { %vm1958_vm4 = vmand %vm6578_vm8, %vm9178_vm15  ;;  %v1687_v19 = vadd.f32 %v1671_v41, %v1505_v63  ;;  %vm8525_vm5 = vcmp.eq.s32.totalorder %v6382_v51, 1  ;;  %2054 = vperm.xlu1 %3961, %v2007_v48   ;;  %vm9180_vm13 = vcmp.lt.s32.totalorder %v9110_v0, 8  ;;  %v1673_v28 = vmul.f32 %v5824_v30, %v1651_v60  ;;  %v6696_v63 = vpop.permute.xlu0 %1423 }
 0x17e   :  { %vm1974_vm2 = vmand %vm1958_vm4, %vm9180_vm13  ;;  %v2099_v35 = vmul.f32 %v5914_v61, %v2077_v58  ;;  %v2076_v25 = vsel %vm8524_vm14, %v6427_v12, 0.0  ;;  %vm9181_vm15 = vcmp.ge.s32.totalorder %v5568_v50, 0  ;;  %9182 = vst [vmem:[#allocation94_spill] sm:$0xff] %v6696_v63  ;;  %v1650_v0 = vsel %vm1634_vm11, %v6457_v42, 0.0  ;;  %v2163_v12 = vld [vmem:[#allocation2 + $0x41] sm:$0xff]  ;;  %v6717_v42 = vpop.permute.xlu1 %2206 }
 0x17f   :  { %v2006_v14 = vsel %vm1974_vm2, 1, %v8895_v40  ;;  %vm2139_vm7 = vmand %vm6483_vm10, %vm9181_vm15  ;;  %v1933_v30 = vadd.f32 %v1917_v29, %v1687_v19  ;;  %vm8572_vm4 = vcmp.eq.s32.totalorder %v6422_v9, 1  ;;  %vm9183_vm13 = vcmp.lt.s32.totalorder %v5568_v50, 8  ;;  %9185 = vst [vmem:[#allocation95_spill] sm:$0xff] %v6717_v42  ;;  %v6766_v19 = vld [vmem:[%s8239_s6 + $0x6] ss:$0 sm:$0xff] }
 0x180   :  { %2051 = vperm.xlu0 %3960, %v2006_v14   ;;  %vm2155_vm2 = vmand %vm2139_vm7, %vm9183_vm13  ;;  %vm8526_vm14 = vcmp.eq.s32.totalorder %v6696_v63, 1  ;;  %v1932_v39 = vadd.f32 %v1916_v22, %v6250_v21  ;;  %v1897_v13 = vsel %vm8525_vm5, %v6169_v17, 0.0  ;;  %vm9184_vm10 = vcmp.ge.s32.totalorder %v5571_v23, 0  ;;  %v2162_v21 = vld [vmem:[#allocation2 + $0x39] sm:$0xff] }
 0x181   :  { %v2187_v15 = vsel %vm2155_vm2, 1, %v8895_v40  ;;  %vm2138_vm15 = vmand %vm6521_vm1, %vm9184_vm10  ;;  %v1470_v50 = vsel %vm8526_vm14, %v6172_v11, 0.0  ;;  %v2098_v44 = vmul.f32 %v5914_v61, %v2076_v25  ;;  %vm9186_vm7 = vcmp.lt.s32.totalorder %v5571_v23, 8  ;;  %v6735_v3 = vpop.permute.xlu0 %2203 }
 0x182   :  { %2230 = vperm.xlu1 %3961, %v2187_v15   ;;  %vm2154_vm13 = vmand %vm2138_vm15, %vm9186_vm7  ;;  %vm8541_vm5 = vcmp.eq.s32.totalorder %v6635_v52, 1  ;;  %v1492_v17 = vmul.f32 %v6680_v55, %v1470_v50  ;;  %vm8657_vm2 = vcmp.eq.s32.totalorder %v6717_v42, 1  ;;  %v1896_v43 = vsel %vm8572_vm4, %v6398_v37, 0.0  ;;  %9188 = vst [vmem:[#allocation96_spill] sm:$0xff] %v6735_v3  ;;  %v6761_v48 = vpop.permute.xlu1 %1432 }
 0x183   :  { %v2115_v41 = vadd.f32 %v2099_v35, %v1933_v30  ;;  %v2186_v20 = vsel %vm2154_vm13, 1, %v8895_v40  ;;  %vm9187_vm1 = vcmp.ge.s32.totalorder %v8993_v7, 0  ;;  %v2259_v23 = vsel %vm8657_vm2, %v2163_v12, 0.0  ;;  %9193 = vst [vmem:[#allocation9_spill] sm:$0xff] %v6761_v48 }
 0x184   :  { %vm2141_vm10 = vmand %vm6551_vm9, %vm9187_vm1  ;;  %2227 = vperm.xlu0 %3960, %v2186_v20   ;;  %vm9189_vm15 = vcmp.lt.s32.totalorder %v8993_v7, 8  ;;  %vm8569_vm14 = vcmp.eq.s32.totalorder %v6653_v46, 1  ;;  %v6741_v37 = vadd.f32 %v1492_v17, %v6564_v62  ;;  %v2281_v60 = vmul.f32 %v9190_v1, %v2259_v23  ;;  %v9191_v7 = vld [vmem:[#allocation70_spill] sm:$0xff] }
 0x185   :  { %vm2157_vm7 = vmand %vm2141_vm10, %vm9189_vm15  ;;  %vm8658_vm13 = vcmp.eq.s32.totalorder %v6735_v3, 1  ;;  %v1672_v29 = vmul.f32 %v6748_v27, %v1650_v0  ;;  %vm9192_vm9 = vcmp.ge.s32.totalorder %v9191_v7, 0  ;;  %v2079_v62 = vsel %vm8541_vm5, %v6172_v11, 0.0  ;;  %v6778_v15 = vpop.permute.xlu0 %1429 }
 0x186   :  { %v2189_v58 = vsel %vm2157_vm7, 1, %v8895_v40  ;;  %vm2140_vm1 = vmand %vm6578_vm8, %vm9192_vm9  ;;  %v2258_v22 = vsel %vm8658_vm13, %v2162_v21, 0.0  ;;  %v1919_v14 = vmul.f32 %v6766_v19, %v1897_v13  ;;  %v2114_v35 = vadd.f32 %v2098_v44, %v1932_v39 }
 0x187   :  { %2236 = vperm.xlu1 %3961, %v2189_v58   ;;  %vm9194_vm8 = vcmp.lt.s32.totalorder %v9191_v7, 8  ;;  %v2297_v10 = vadd.f32 %v2281_v60, %v2115_v41  ;;  %v2280_v11 = vmul.f32 %v9190_v1, %v2258_v22  ;;  %v1506_v25 = vadd.f32 %v1490_v47, %v6664_v33 }
 0x188   :  { %vm2156_vm10 = vmand %vm2140_vm1, %vm9194_vm8  ;;  %v1918_v0 = vmul.f32 %v6766_v19, %v1896_v43  ;;  %v2078_v12 = vsel %vm8569_vm14, %v6400_v16, 0.0 }
 0x189   :  { %v2188_v30 = vsel %vm2156_vm10, 1, %v8895_v40 }
 0x18a   :  { %29 = vsyncpa [#allocation6], 0  ;;  %v1689_v39 = vadd.f32 %v1673_v28, %v6675_v32  ;;  %2233 = vperm.xlu0 %3960, %v2188_v30   ;;  %v2101_v13 = vmul.f32 %v5914_v61, %v2079_v62  ;;  %v9195_v50 = vld [vmem:[#allocation80_spill] sm:$0xff]  ;;  %v2296_v17 = vadd.f32 %v2280_v11, %v2114_v35  ;;  %v1688_v33 = vadd.f32 %v1672_v29, %v1506_v25  ;;  %v6783_v47 = vpop.permute.xlu1 %2212  ;;  %v6785_v21 = vld [vmem:[#allocation2 + $0x51] sm:$0xff]  ;;  %v6793_v28 = vpop.permute.xlu0 %2209  ;;  %s4023_s2 = smov [#allocation5]  }
 0x18b   :  { %v2320_v44 = vadd.f32 %v9195_v50, %v2297_v10  ;;  %9196 = vst [vmem:[#allocation70_spill] sm:$0xff] %v6783_v47  ;;  %v2100_v43 = vmul.f32 %v5914_v61, %v2078_v12  ;;  %vm8529_vm15 = vcmp.eq.s32.totalorder %v6783_v47, 1  ;;  %9197 = vst [vmem:[#allocation80_spill] sm:$0xff] %v6793_v28  ;;  %vm8533_vm7 = vcmp.eq.s32.totalorder %v6793_v28, 1  ;;  %v6860_v47 = vld [vmem:[#allocation2 + $0x61] sm:$0xff]  ;;  %v520_v46 = vld [vmem:[#allocation2 + $0x57] sm:$0xff] }
 0x18c   :  { %v1935_v40 = vadd.f32 %v1919_v14, %v1689_v39  ;;  %v2319_v16 = vadd.f32 %v9195_v50, %v2296_v17  ;;  %v1934_v41 = vadd.f32 %v1918_v0, %v1688_v33  ;;  %v2261_v32 = vsel %vm8529_vm15, %v6785_v21, 0.0  ;;  %v9218_v28 = vld [vmem:[#allocation64_spill] sm:$0xff]  ;;  %v9219_v51 = vld [vmem:[#allocation10_spill] sm:$0xff]  ;;  %v6874_v63 = vld [vmem:[#allocation2 + $0x59] sm:$0xff]  ;;  %s3733_s25 = sshll.u32 %s4023_s2, 4  ;;  %s3734_s25 = int_to_ptr.vmem [resolvable:$true] %s3733_s25 }
 0x18d   :  { %v2283_v23 = vmul.f32 %v9190_v1, %v2261_v32  ;;  %v2260_v61 = vsel %vm8533_vm7, %v6432_v53, 0.0  ;;  %vm9198_vm9 = vcmask 130048   ;;  %vm8553_vm15 = vcmp.eq.s32.totalorder %v9218_v28, 1  ;;  %v9221_v42 = vld [vmem:[#allocation31_spill] sm:$0xff]  ;;  %v9224_v45 = vld [vmem:[#allocation88_spill] sm:$0xff]  ;;  %v9226_v24 = vld [vmem:[#allocation82_spill] sm:$0xff]  ;;  %p4003_p1 = scmp.lt.s32.totalorder %s3734_s25, %s3734_s25 }
 0x18e   :  { %v2117_v20 = vadd.f32 %v2101_v13, %v1935_v40  ;;  %v2333_v60 = vpack.c.bf16 %v2320_v44, %v2319_v16  ;;  %v2116_v29 = vadd.f32 %v2100_v43, %v1934_v41  ;;  %v2282_v7 = vmul.f32 %v9190_v1, %v2260_v61  ;;  %v6802_v62 = vpop.permute.xlu1 %582  ;;  %v6805_v35 = vpop.permute.xlu0 %579  ;;  %vm9199_vm1 = vmmov %vm9198_vm9  ;;  %v9213_v61 = vld [vmem:[#allocation61_spill] sm:$0xff]  ;;  %v9222_v3 = vld [vmem:[#allocation87_spill] sm:$0xff]  ;;  %s3998_s26 = scalar_lea.vmem %s3734_s25, 2048 }
 0x18f   :  { %vm8539_vm8 = vcmp.eq.s32.totalorder %v9213_v61, 1  ;;  %vm8567_vm7 = vcmp.eq.s32.totalorder %v9219_v51, 1  ;;  %vm8560_vm5 = vcmp.eq.s32.totalorder %v9222_v3, 1  ;;  %v1061_v34 = vsel %vm8553_vm15, %v6860_v47, 0.0  ;;  %v6888_v59 = vld [vmem:[#allocation2 + $0x67] sm:$0xff]  ;;  %p3999_p0 = scmp.ne.s32.totalorder %s3734_s25, %s3998_s26  ;;  %p4004_p2 = scmp.lt.s32.totalorder %s3998_s26, %s3998_s26 }
 0x190   :  { %v2299_v58 = vadd.f32 %v2283_v23, %v2117_v20  ;;  %3887 = vmatprep.mubr.msk.bf16.mxu1 %vm9198_vm9, %v2333_v60  ;;  %v2298_v14 = vadd.f32 %v2282_v7, %v2116_v29  ;;  %v6847_v60 = vld [vmem:[#allocation2 + $0x60] sm:$0xff]  ;;  %v6851_v7 = vld [vmem:[#allocation2 + $0x58] sm:$0xff]  ;;  %v1289_v28 = vsel %vm8560_vm5, %v520_v46, 0.0  ;;  %vm8566_vm15 = vcmp.eq.s32.totalorder %v6673_v2, 1  ;;  %v6921_v2 = vld [vmem:[#allocation2 + $0x68] sm:$0xff] }
 0x191   :  { %v521_v29 = vld [vmem:[#allocation2 + $0x5f] sm:$0xff]  ;;  %v1311_v3 = vmul.f32 %v6618_v57, %v1289_v28  ;;  %v1471_v6 = vsel %vm8566_vm15, %v6851_v7, 0.0  ;;  %vm8575_vm15 = vcmp.eq.s32.totalorder %v6761_v48, 1  ;;  %vm8602_vm14 = vcmp.eq.s32.totalorder %v6778_v15, 1  ;;  %p4005_p3 = por %p4004_p2, %p4003_p1 }
 0x192   :  { %v2322_v22 = vadd.f32 %v9195_v50, %v2299_v58  ;;  %v2321_v10 = vadd.f32 %v9195_v50, %v2298_v14  ;;  %v6808_v11 = vpop.permute.xlu1 %796  ;;  %v6810_v0 = vpop.permute.xlu0 %793  ;;  %v9214_v58 = vld [vmem:[#allocation60_spill] sm:$0xff]  ;;  %v1493_v28 = vmul.f32 %v6680_v55, %v1471_v6  ;;  %v1472_v48 = vsel %vm8602_vm14, %v6847_v60, 0.0 }
 0x193   :  { %vm8556_vm10 = vcmp.eq.s32.totalorder %v9214_v58, 1  ;;  %v9216_v14 = vld [vmem:[#allocation56_spill] sm:$0xff]  ;;  %p4006_p4 = pnand %p4005_p3, %p3999_p0 }
 0x194   :  { %v2334_v25 = vpack.c.bf16 %v2322_v22, %v2321_v10  ;;  %v9215_v22 = vld [vmem:[#allocation15_spill] sm:$0xff]  ;;  %v617_v52 = vsel %vm8556_vm10, %v521_v29, 0.0  ;;  %vm8568_vm10 = vcmp.eq.s32.totalorder %v6613_v31, 1 }
 0x195   :  { %vm8550_vm9 = vcmp.eq.s32.totalorder %v9215_v22, 1  ;;  %v639_v18 = vmul.f32 %v9224_v45, %v617_v52  ;;  %v1083_v52 = vmul.f32 %v6513_v5, %v1061_v34 }
 0x196   :  { %3888 = vmatmul.mubr.msk.bf16.gmra.mxu1 %vm9199_vm1, %v2334_v25  ;;  %v6813_v53 = vpop.permute.xlu1 %1608  ;;  %v6815_v1 = vpop.permute.xlu0 %1605  ;;  %vm8609_vm1 = vcmp.eq.s32.totalorder %v9216_v14, 1  ;;  %v831_v25 = vsel %vm8539_vm8, %v6847_v60, 0.0  ;;  %v830_v9 = vsel %vm8550_vm9, %v6851_v7, 0.0  ;;  %vm8562_vm8 = vcmp.eq.s32.totalorder %v9221_v42, 1 }
 0x197   :  { %9200 = vst [vmem:[#allocation97_spill] sm:$0xff] %v6813_v53  ;;  %v1059_v61 = vsel %vm8609_vm1, %v6785_v21, 0.0  ;;  %v853_v58 = vmul.f32 %v6462_v26, %v831_v25  ;;  %v616_v14 = vsel %vm8567_vm7, %v520_v46, 0.0  ;;  %v852_v36 = vmul.f32 %v6462_v26, %v830_v9 }
 0x198   :  { %vm8564_vm9 = vcmp.eq.s32.totalorder %v6582_v54, 1  ;;  %v1081_v56 = vmul.f32 %v6513_v5, %v1059_v61  ;;  %v1060_v25 = vsel %vm8562_vm8, %v6874_v63, 0.0  ;;  %v638_v9 = vmul.f32 %v9224_v45, %v616_v14 }
 0x199   :  { %v869_v38 = vadd.f32 %v853_v58, %v639_v18  ;;  %v1291_v61 = vsel %vm8564_vm9, %v6888_v59, 0.0  ;;  %v1082_v42 = vmul.f32 %v6513_v5, %v1060_v25  ;;  %vm8570_vm5 = vcmp.eq.s32.totalorder %v6813_v53, 1 }
 0x19a   :  { %v6817_v30 = vpop.permute.xlu1 %588  ;;  %v6819_v12 = vpop.permute.xlu0 %585  ;;  %v868_v34 = vadd.f32 %v852_v36, %v638_v9  ;;  %v1097_v14 = vadd.f32 %v1081_v56, %v9226_v24  ;;  %vm8603_vm8 = vcmp.eq.s32.totalorder %v6815_v1, 1  ;;  %v1313_v54 = vmul.f32 %v6618_v57, %v1291_v61  ;;  %v6936_v9 = vld [vmem:[#allocation2 + $0x69] sm:$0xff] }
 0x19b   :  { %9201 = vst [vmem:[#allocation98_spill] sm:$0xff] %v6817_v30  ;;  %9202 = vst [vmem:[#allocation99_spill] sm:$0xff] %v6819_v12  ;;  %v1099_v58 = vadd.f32 %v1083_v52, %v869_v38  ;;  %v1290_v25 = vsel %vm8568_vm10, %v521_v29, 0.0  ;;  %v1653_v56 = vsel %vm8570_vm5, %v6874_v63, 0.0  ;;  %v1652_v52 = vsel %vm8603_vm8, %v6785_v21, 0.0 }
 0x19c   :  { %v1098_v36 = vadd.f32 %v1082_v42, %v868_v34  ;;  %v1327_v24 = vadd.f32 %v1311_v3, %v1097_v14  ;;  %v1312_v6 = vmul.f32 %v6618_v57, %v1290_v25  ;;  %v1473_v42 = vsel %vm8575_vm15, %v6921_v2, 0.0 }
 0x19d   :  { %v1675_v3 = vmul.f32 %v6748_v27, %v1653_v56  ;;  %v1329_v34 = vadd.f32 %v1313_v54, %v1099_v58  ;;  %v1674_v25 = vmul.f32 %v6748_v27, %v1652_v52  ;;  %vm9235_vm1 = vcmask 130048  }
 0x19e   :  { %v6821_v39 = vpop.permute.xlu1 %802  ;;  %v6823_v13 = vpop.permute.xlu0 %799  ;;  %v1509_v14 = vadd.f32 %v1493_v28, %v1327_v24  ;;  %v1328_v58 = vadd.f32 %v1312_v6, %v1098_v36  ;;  %v1495_v28 = vmul.f32 %v6680_v55, %v1473_v42  ;;  %v1494_v6 = vmul.f32 %v6680_v55, %v1472_v48 }
 0x19f   :  { %9203 = vst [vmem:[#allocation100_spill] sm:$0xff] %v6821_v39  ;;  %9204 = vst [vmem:[#allocation101_spill] sm:$0xff] %v6823_v13  ;;  %v1690_v42 = vadd.f32 %v1674_v25, %v6741_v37 }
 0x1a2   :  { %v6825_v50 = vpop.permute.xlu1 %1614  ;;  %v6827_v44 = vpop.permute.xlu0 %1611 }
 0x1a3   :  { %9205 = vst [vmem:[#allocation102_spill] sm:$0xff] %v6825_v50  ;;  %vm8577_vm5 = vcmp.eq.s32.totalorder %v6825_v50, 1  ;;  %vm8595_vm15 = vcmp.eq.s32.totalorder %v6827_v44, 1 }
 0x1a6   :  { %v6829_v17 = vpop.permute.xlu1 %1026  ;;  %v6831_v33 = vpop.permute.xlu0 %1023 }
 0x1aa   :  { %v6833_v40 = vpop.permute.xlu1 %1854  ;;  %v6835_v43 = vpop.permute.xlu0 %1851 }
 0x1ab   :  { %9206 = vst [vmem:[#allocation103_spill] sm:$0xff] %v6833_v40  ;;  %9207 = vst [vmem:[#allocation104_spill] sm:$0xff] %v6835_v43  ;;  %vm8581_vm9 = vcmp.eq.s32.totalorder %v6833_v40, 1  ;;  %vm8582_vm7 = vcmp.eq.s32.totalorder %v6835_v43, 1  ;;  %v1510_v43 = vadd.f32 %v1494_v6, %v1328_v58 }
 0x1ac   :  { %v1899_v61 = vsel %vm8581_vm9, %v521_v29, 0.0  ;;  %v1898_v21 = vsel %vm8582_vm7, %v520_v46, 0.0  ;;  %v1655_v46 = vsel %vm8577_vm5, %v6936_v9, 0.0 }
 0x1ad   :  { %v1921_v54 = vmul.f32 %v6766_v19, %v1899_v61  ;;  %v1920_v56 = vmul.f32 %v6766_v19, %v1898_v21  ;;  %v6976_v61 = vld [vmem:[%s8239_s6 + $0x7] ss:$0 sm:$0xff] }
 0x1ae   :  { %v6837_v16 = vpop.permute.xlu1 %1032  ;;  %v6839_v41 = vpop.permute.xlu0 %1029 }
 0x1af   :  { %9208 = vst [vmem:[#allocation105_spill] sm:$0xff] %v6837_v16  ;;  %9209 = vst [vmem:[#allocation106_spill] sm:$0xff] %v6839_v41  ;;  %v1936_v48 = vadd.f32 %v1920_v56, %v1690_v42  ;;  %v7009_v56 = vld [vmem:[%s8239_s6 + $0x8] ss:$0 sm:$0xff]  ;;  %v1511_v42 = vadd.f32 %v1495_v28, %v1329_v34  ;;  %vm8625_vm14 = vcmp.eq.s32.totalorder %v6837_v16, 1  ;;  %vm8626_vm8 = vcmp.eq.s32.totalorder %v6839_v41, 1 }
 0x1b2   :  { %v6841_v32 = vpop.permute.xlu1 %1860  ;;  %v6843_v20 = vpop.permute.xlu0 %1857 }
 0x1b3   :  { %9210 = vst [vmem:[#allocation107_spill] sm:$0xff] %v6841_v32  ;;  %9211 = vst [vmem:[#allocation108_spill] sm:$0xff] %v6843_v20  ;;  %vm8589_vm5 = vcmp.eq.s32.totalorder %v6843_v20, 1 }
 0x1b4   :  { %v1900_v25 = vsel %vm8589_vm5, %v6888_v59, 0.0  ;;  %vm8598_vm5 = vcmp.eq.s32.totalorder %v6808_v11, 1 }
 0x1b5   :  { %v1922_v34 = vmul.f32 %v6766_v19, %v1900_v25  ;;  %v7041_v25 = vld [vmem:[#allocation2 + $0x71] sm:$0xff] }
 0x1b6   :  { %v6845_v23 = vpop.permute.xlu1 %1256 }
 0x1b7   :  { %9212 = vst [vmem:[#allocation109_spill] sm:$0xff] %v6845_v23 }
 0x1bc   :  { %v6855_v10 = vpop.permute.xlu0 %1253 }
 0x1bd   :  { %9217 = vst [vmem:[#allocation110_spill] sm:$0xff] %v6855_v10 }
 0x1bf   :  { %v6869_v49 = vpop.permute.xlu1 %2036 }
 0x1c0   :  { %9220 = vst [vmem:[#allocation111_spill] sm:$0xff] %v6869_v49  ;;  %vm8576_vm10 = vcmp.eq.s32.totalorder %v6869_v49, 1 }
 0x1c1   :  { %v6882_v22 = vpop.permute.xlu0 %2033  ;;  %v2081_v29 = vsel %vm8576_vm10, %v6847_v60, 0.0  ;;  %v1691_v60 = vadd.f32 %v1675_v3, %v1509_v14  ;;  %vm8583_vm10 = vcmp.eq.s32.totalorder %v6841_v32, 1  ;;  %v1654_v3 = vsel %vm8595_vm15, %v6860_v47, 0.0  ;;  %v6987_v14 = vld [vmem:[#allocation2 + $0x6f] sm:$0xff] }
 0x1c2   :  { %9223 = vst [vmem:[#allocation112_spill] sm:$0xff] %v6882_v22  ;;  %vm8580_vm4 = vcmp.eq.s32.totalorder %v6882_v22, 1  ;;  %v2103_v36 = vmul.f32 %v6976_v61, %v2081_v29  ;;  %v1901_v37 = vsel %vm8583_vm10, %v6987_v14, 0.0  ;;  %v1676_v32 = vmul.f32 %v6748_v27, %v1654_v3 }
 0x1c3   :  { %v2080_v24 = vsel %vm8580_vm4, %v6851_v7, 0.0  ;;  %v1677_v7 = vmul.f32 %v6748_v27, %v1655_v46  ;;  %v1937_v50 = vadd.f32 %v1921_v54, %v1691_v60  ;;  %v7003_v54 = vld [vmem:[#allocation2 + $0x70] sm:$0xff]  ;;  %v1923_v20 = vmul.f32 %v6766_v19, %v1901_v37 }
 0x1c4   :  { %v6899_v51 = vpop.permute.xlu1 %1262  ;;  %v2102_v49 = vmul.f32 %v6976_v61, %v2080_v24  ;;  %vm8599_vm15 = vcmp.eq.s32.totalorder %v6810_v0, 1 }
 0x1c5   :  { %9225 = vst [vmem:[#allocation88_spill] sm:$0xff] %v6899_v51  ;;  %v2119_v24 = vadd.f32 %v2103_v36, %v1937_v50 }
 0x1c7   :  { %v6914_v18 = vpop.permute.xlu0 %1259 }
 0x1c9   :  { %v6928_v38 = vpop.permute.xlu1 %2042 }
 0x1ca   :  { %9227 = vst [vmem:[#allocation82_spill] sm:$0xff] %v6928_v38  ;;  %vm8591_vm4 = vcmp.eq.s32.totalorder %v6928_v38, 1 }
 0x1cb   :  { %v6941_v53 = vpop.permute.xlu0 %2039 }
 0x1cc   :  { %9228 = vst [vmem:[#allocation113_spill] sm:$0xff] %v6941_v53  ;;  %vm8592_vm7 = vcmp.eq.s32.totalorder %v6941_v53, 1 }
 0x1cd   :  { %v6954_v40 = vpop.permute.xlu1 %1438  ;;  %v2082_v28 = vsel %vm8592_vm7, %v6921_v2, 0.0 }
 0x1cf   :  { %v6969_v52 = vpop.permute.xlu0 %1435 }
 0x1d1   :  { %v6985_v21 = vpop.permute.xlu1 %2218 }
 0x1d2   :  { %9229 = vst [vmem:[#allocation114_spill] sm:$0xff] %v6985_v21  ;;  %vm8593_vm9 = vcmp.eq.s32.totalorder %v6985_v21, 1  ;;  %v2118_v21 = vadd.f32 %v2102_v49, %v1936_v48  ;;  %v7035_v49 = vld [vmem:[%s8240_s7] ss:$0 sm:$0xff]  ;;  %v1692_v48 = vadd.f32 %v1676_v32, %v1510_v43 }
 0x1d3   :  { %v2263_v29 = vsel %vm8593_vm9, %v6860_v47, 0.0  ;;  %v7001_v46 = vpop.permute.xlu0 %2215  ;;  %v2083_v47 = vsel %vm8591_vm4, %v7003_v54, 0.0  ;;  %vm8600_vm4 = vcmp.eq.s32.totalorder %v6802_v62, 1  ;;  %vm8601_vm9 = vcmp.eq.s32.totalorder %v6805_v35, 1 }
 0x1d4   :  { %v2285_v60 = vmul.f32 %v7009_v56, %v2263_v29  ;;  %vm8594_vm10 = vcmp.eq.s32.totalorder %v7001_v46, 1  ;;  %v2105_v38 = vmul.f32 %v6976_v61, %v2083_v47 }
 0x1d5   :  { %v2262_v50 = vsel %vm8594_vm10, %v6874_v63, 0.0  ;;  %v7020_v36 = vpop.permute.xlu1 %1444  ;;  %v1693_v63 = vadd.f32 %v1677_v7, %v1511_v42  ;;  %v2104_v7 = vmul.f32 %v6976_v61, %v2082_v28 }
 0x1d6   :  { %9230 = vst [vmem:[#allocation115_spill] sm:$0xff] %v7020_v36  ;;  %v2301_v22 = vadd.f32 %v2285_v60, %v2119_v24  ;;  %v2284_v29 = vmul.f32 %v7009_v56, %v2262_v50  ;;  %v619_v50 = vsel %vm8600_vm4, %v6987_v14, 0.0  ;;  %vm8655_vm4 = vcmp.eq.s32.totalorder %v6829_v17, 1 }
 0x1d7   :  { %v7029_v3 = vpop.permute.xlu0 %1441  ;;  %v1939_v24 = vadd.f32 %v1923_v20, %v1693_v63 }
 0x1d8   :  { %v2324_v58 = vadd.f32 %v7035_v49, %v2301_v22  ;;  %v2300_v6 = vadd.f32 %v2284_v29, %v2118_v21  ;;  %v833_v22 = vsel %vm8598_vm5, %v7003_v54, 0.0  ;;  %v1938_v21 = vadd.f32 %v1922_v34, %v1692_v48 }
 0x1d9   :  { %v7039_v37 = vpop.permute.xlu1 %2224  ;;  %v2121_v20 = vadd.f32 %v2105_v38, %v1939_v24  ;;  %v618_v38 = vsel %vm8601_vm9, %v6888_v59, 0.0  ;;  %v832_v24 = vsel %vm8599_vm15, %v6921_v2, 0.0  ;;  %vm8608_vm5 = vcmp.eq.s32.totalorder %v6817_v30, 1  ;;  %v7091_v2 = vld [vmem:[#allocation2 + $0x77] sm:$0xff] }
 0x1da   :  { %9231 = vst [vmem:[#allocation116_spill] sm:$0xff] %v7039_v37  ;;  %v2323_v60 = vadd.f32 %v7035_v49, %v2300_v6  ;;  %vm8596_vm7 = vcmp.eq.s32.totalorder %v7039_v37, 1  ;;  %v2120_v28 = vadd.f32 %v2104_v7, %v1938_v21  ;;  %v855_v6 = vmul.f32 %v6462_v26, %v833_v22 }
 0x1db   :  { %v2265_v43 = vsel %vm8596_vm7, %v7041_v25, 0.0  ;;  %v7053_v32 = vpop.permute.xlu0 %2221  ;;  %vm9233_vm7 = vcmask 130048   ;;  %v641_v21 = vmul.f32 %v9224_v45, %v619_v50  ;;  %vm8612_vm15 = vcmp.eq.s32.totalorder %v6819_v12, 1 }
 0x1dc   :  { %9232 = vst [vmem:[#allocation117_spill] sm:$0xff] %v7053_v32  ;;  %v2287_v42 = vmul.f32 %v7009_v56, %v2265_v43  ;;  %vm8597_vm10 = vcmp.eq.s32.totalorder %v7053_v32, 1  ;;  %v2335_v47 = vpack.c.bf16 %v2324_v58, %v2323_v60  ;;  %v7077_v60 = vld [vmem:[#allocation2 + $0x80] sm:$0xff]  ;;  %v640_v43 = vmul.f32 %v9224_v45, %v618_v38 }
 0x1dd   :  { %v2264_v29 = vsel %vm8597_vm10, %v6936_v9, 0.0  ;;  %v7064_v34 = vpop.permute.xlu1 %1620  ;;  %vm8605_vm10 = vcmp.eq.s32.totalorder %v6821_v39, 1  ;;  %v871_v50 = vadd.f32 %v855_v6, %v641_v21  ;;  %vm8656_vm9 = vcmp.eq.s32.totalorder %v6831_v33, 1 }
 0x1de   :  { %v2303_v63 = vadd.f32 %v2287_v42, %v2121_v20  ;;  %v2286_v58 = vmul.f32 %v7009_v56, %v2264_v29  ;;  %3891 = vmatprep.mubr.msk.bf16.mxu1 %vm9233_vm7, %v2335_v47  ;;  %v7083_v20 = vld [vmem:[#allocation2 + $0x78] sm:$0xff]  ;;  %vm8607_vm7 = vcmp.eq.s32.totalorder %v6823_v13, 1  ;;  %v854_v29 = vmul.f32 %v6462_v26, %v832_v24 }
 0x1df   :  { %v7072_v48 = vpop.permute.xlu0 %1617  ;;  %v7088_v42 = vld [vmem:[#allocation2 + $0x7f] sm:$0xff]  ;;  %v835_v38 = vsel %vm8605_vm10, %v7077_v60, 0.0  ;;  %v620_v21 = vsel %vm8612_vm15, %v7091_v2, 0.0  ;;  %v1063_v39 = vsel %vm8655_vm4, %v7041_v25, 0.0  ;;  %vm8619_vm10 = vcmp.eq.s32.totalorder %v6845_v23, 1 }
 0x1e0   :  { %v2326_v59 = vadd.f32 %v7035_v49, %v2303_v63  ;;  %v2302_v7 = vadd.f32 %v2286_v58, %v2120_v28  ;;  %v834_v63 = vsel %vm8607_vm7, %v7083_v20, 0.0  ;;  %v7106_v58 = vld [vmem:[#allocation2 + $0x81] sm:$0xff]  ;;  %v621_v24 = vsel %vm8608_vm5, %v7088_v42, 0.0 }
 0x1e1   :  { %v7086_v22 = vpop.permute.xlu1 %1626  ;;  %v857_v13 = vmul.f32 %v6462_v26, %v835_v38  ;;  %vm8654_vm7 = vcmp.eq.s32.totalorder %v6855_v10, 1  ;;  %vm8622_vm5 = vcmp.eq.s32.totalorder %v6899_v51, 1  ;;  %v856_v12 = vmul.f32 %v6462_v26, %v834_v63 }
 0x1e2   :  { %9234 = vst [vmem:[#allocation118_spill] sm:$0xff] %v7086_v22  ;;  %v2325_v47 = vadd.f32 %v7035_v49, %v2302_v7  ;;  %v7109_v7 = vld [vmem:[#allocation2 + $0x79] sm:$0xff]  ;;  %v1065_v38 = vsel %vm8625_vm14, %v7106_v58, 0.0  ;;  %vm8623_vm15 = vcmp.eq.s32.totalorder %v6914_v18, 1  ;;  %v643_v37 = vmul.f32 %v9224_v45, %v621_v24 }
 0x1e3   :  { %v7101_v28 = vpop.permute.xlu0 %1623  ;;  %v642_v32 = vmul.f32 %v9224_v45, %v620_v21  ;;  %v1293_v26 = vsel %vm8619_vm10, %v7091_v2, 0.0  ;;  %v1292_v16 = vsel %vm8654_vm7, %v6987_v14, 0.0  ;;  %v870_v45 = vadd.f32 %v854_v29, %v640_v43 }
 0x1e4   :  { %v2336_v6 = vpack.c.bf16 %v2326_v59, %v2325_v47  ;;  %v1062_v59 = vsel %vm8656_vm9, %v6936_v9, 0.0  ;;  %v7127_v47 = vld [vmem:[#allocation2 + $0x87] sm:$0xff]  ;;  %v1064_v9 = vsel %vm8626_vm8, %v7109_v7, 0.0  ;;  %v873_v23 = vadd.f32 %v857_v13, %v643_v37 }
 0x1e5   :  { %v1084_v63 = vmul.f32 %v6513_v5, %v1062_v59  ;;  %v1295_v41 = vsel %vm8622_vm5, %v7127_v47, 0.0  ;;  %v1086_v21 = vmul.f32 %v6513_v5, %v1064_v9  ;;  %v1294_v59 = vsel %vm8623_vm15, %v7088_v42, 0.0  ;;  %v7173_v13 = vld [vmem:[#allocation2 + $0x88] sm:$0xff] }
 0x1e6   :  { %3892 = vmatmul.mubr.msk.bf16.gmra.mxu1 %vm9235_vm1, %v2336_v6  ;;  %v7131_v30 = vpop.permute.xlu1 %1866  ;;  %v1085_v6 = vmul.f32 %v6513_v5, %v1063_v39  ;;  %vm8624_vm1 = vcmp.eq.s32.totalorder %v6954_v40, 1  ;;  %v1087_v39 = vmul.f32 %v6513_v5, %v1065_v38  ;;  %v872_v53 = vadd.f32 %v856_v12, %v642_v32 }
 0x1e7   :  { %9236 = vst [vmem:[#allocation119_spill] sm:$0xff] %v7131_v30  ;;  %v1315_v14 = vmul.f32 %v6618_v57, %v1293_v26  ;;  %vm8628_vm10 = vcmp.eq.s32.totalorder %v6969_v52, 1  ;;  %v1314_v51 = vmul.f32 %v6618_v57, %v1292_v16  ;;  %v1317_v10 = vmul.f32 %v6618_v57, %v1295_v41 }
 0x1e8   :  { %v1475_v43 = vsel %vm8624_vm1, %v7083_v20, 0.0  ;;  %vm8627_vm5 = vcmp.eq.s32.totalorder %v7064_v34, 1  ;;  %v1101_v29 = vadd.f32 %v1085_v6, %v871_v50  ;;  %v1100_v38 = vadd.f32 %v1084_v63, %v870_v45 }
 0x1e9   :  { %v1316_v12 = vmul.f32 %v6618_v57, %v1294_v59  ;;  %vm8629_vm15 = vcmp.eq.s32.totalorder %v7020_v36, 1  ;;  %v1103_v37 = vadd.f32 %v1087_v39, %v873_v23  ;;  %v1102_v16 = vadd.f32 %v1086_v21, %v872_v53 }
 0x1ea   :  { %v7155_v24 = vpop.permute.xlu0 %1863  ;;  %v1474_v41 = vsel %vm8628_vm10, %v7003_v54, 0.0  ;;  %vm8630_vm1 = vcmp.eq.s32.totalorder %v7072_v48, 1  ;;  %v1331_v32 = vadd.f32 %v1315_v14, %v1101_v29  ;;  %v1497_v9 = vmul.f32 %v6680_v55, %v1475_v43  ;;  %v7190_v54 = vld [vmem:[#allocation2 + $0x89] sm:$0xff] }
 0x1eb   :  { %9237 = vst [vmem:[#allocation120_spill] sm:$0xff] %v7155_v24  ;;  %v1657_v50 = vsel %vm8627_vm5, %v7109_v7, 0.0  ;;  %vm8631_vm14 = vcmp.eq.s32.totalorder %v7131_v30, 1  ;;  %v1330_v6 = vadd.f32 %v1314_v51, %v1100_v38  ;;  %v1333_v23 = vadd.f32 %v1317_v10, %v1103_v37 }
 0x1ec   :  { %v1477_v53 = vsel %vm8629_vm15, %v7173_v13, 0.0  ;;  %vm8632_vm8 = vcmp.eq.s32.totalorder %v7086_v22, 1  ;;  %v1332_v26 = vadd.f32 %v1316_v12, %v1102_v16  ;;  %v1496_v63 = vmul.f32 %v6680_v55, %v1474_v41  ;;  %v1809_v16 = vld [vmem:[#allocation2 + $0x8f] sm:$0xff] }
 0x1ed   :  { %v1656_v45 = vsel %vm8630_vm1, %v7041_v25, 0.0  ;;  %vm8634_vm5 = vcmp.eq.s32.totalorder %v7155_v24, 1  ;;  %vm8652_vm10 = vcmp.eq.s32.totalorder %v7029_v3, 1  ;;  %v1679_v51 = vmul.f32 %v6748_v27, %v1657_v50  ;;  %v1991_v50 = vld [vmem:[#allocation2 + $0x90] sm:$0xff]  ;;  %v9381_v24 = vld [vmem:[#allocation72_spill] sm:$0xff] }
 0x1ee   :  { %v7170_v5 = vpop.permute.xlu1 %1872  ;;  %v1903_v10 = vsel %vm8631_vm14, %v7088_v42, 0.0  ;;  %v1513_v21 = vadd.f32 %v1497_v9, %v1331_v32  ;;  %v1499_v59 = vmul.f32 %v6680_v55, %v1477_v53  ;;  %v1659_v25 = vsel %vm8632_vm8, %v7190_v54, 0.0 }
 0x1ef   :  { %9238 = vst [vmem:[#allocation121_spill] sm:$0xff] %v7170_v5  ;;  %vm8635_vm1 = vcmp.eq.s32.totalorder %v7170_v5, 1  ;;  %v1678_v43 = vmul.f32 %v6748_v27, %v1656_v45  ;;  %v1902_v29 = vsel %vm8634_vm5, %v7091_v2, 0.0  ;;  %v1512_v38 = vadd.f32 %v1496_v63, %v1330_v6 }
 0x1f0   :  { %v1476_v12 = vsel %vm8652_vm10, %v7077_v60, 0.0  ;;  %vm8644_vm8 = vcmp.eq.s32.totalorder %v7101_v28, 1  ;;  %v1925_v37 = vmul.f32 %v6766_v19, %v1903_v10  ;;  %v1695_v32 = vadd.f32 %v1679_v51, %v1513_v21 }
 0x1f1   :  { %v7185_v57 = vpop.permute.xlu0 %1869  ;;  %v1681_v2 = vmul.f32 %v6748_v27, %v1659_v25  ;;  %v1905_v9 = vsel %vm8635_vm1, %v1809_v16, 0.0  ;;  %v1924_v6 = vmul.f32 %v6766_v19, %v1902_v29  ;;  %v1515_v45 = vadd.f32 %v1499_v59, %v1333_v23 }
 0x1f2   :  { %9239 = vst [vmem:[#allocation122_spill] sm:$0xff] %v7185_v57  ;;  %vm8639_vm5 = vcmp.eq.s32.totalorder %v7185_v57, 1  ;;  %v1498_v51 = vmul.f32 %v6680_v55, %v1476_v12  ;;  %v1694_v10 = vadd.f32 %v1678_v43, %v1512_v38  ;;  %v1658_v21 = vsel %vm8644_vm8, %v7106_v58, 0.0 }
 0x1f3   :  { %v1941_v25 = vadd.f32 %v1925_v37, %v1695_v32  ;;  %v1927_v29 = vmul.f32 %v6766_v19, %v1905_v9  ;;  %v1904_v55 = vsel %vm8639_vm5, %v7127_v47, 0.0  ;;  %v1680_v59 = vmul.f32 %v6748_v27, %v1658_v21  ;;  %v2173_v9 = vld [vmem:[#allocation2 + $0x91] sm:$0xff] }
 0x1f4   :  { %v7198_v39 = vpop.permute.xlu1 %2048  ;;  %v1940_v43 = vadd.f32 %v1924_v6, %v1694_v10  ;;  %v1514_v27 = vadd.f32 %v1498_v51, %v1332_v26  ;;  %v1926_v6 = vmul.f32 %v6766_v19, %v1904_v55 }
 0x1f5   :  { %9240 = vst [vmem:[#allocation123_spill] sm:$0xff] %v7198_v39  ;;  %vm8633_vm15 = vcmp.eq.s32.totalorder %v7198_v39, 1 }
 0x1f6   :  { %v7211_v14 = vpop.permute.xlu0 %2045  ;;  %v2085_v42 = vsel %vm8633_vm15, %v7077_v60, 0.0 }
 0x1f7   :  { %9241 = vst [vmem:[#allocation124_spill] sm:$0xff] %v7211_v14  ;;  %vm8636_vm14 = vcmp.eq.s32.totalorder %v7211_v14, 1  ;;  %v2107_v60 = vmul.f32 %v6976_v61, %v2085_v42 }
 0x1f8   :  { %v7226_v41 = vpop.permute.xlu1 %2054  ;;  %v2084_v53 = vsel %vm8636_vm14, %v7083_v20, 0.0  ;;  %v1697_v20 = vadd.f32 %v1681_v2, %v1515_v45 }
 0x1f9   :  { %9242 = vst [vmem:[#allocation125_spill] sm:$0xff] %v7226_v41  ;;  %vm8637_vm15 = vcmp.eq.s32.totalorder %v7226_v41, 1  ;;  %v2106_v23 = vmul.f32 %v6976_v61, %v2084_v53  ;;  %v2123_v38 = vadd.f32 %v2107_v60, %v1941_v25 }
 0x1fa   :  { %v2087_v42 = vsel %vm8637_vm15, %v1991_v50, 0.0  ;;  %v1943_v50 = vadd.f32 %v1927_v29, %v1697_v20 }
 0x1fb   :  { %v7238_v63 = vpop.permute.xlu0 %2051  ;;  %v2109_v32 = vmul.f32 %v6976_v61, %v2087_v42  ;;  %v2122_v53 = vadd.f32 %v2106_v23, %v1940_v43 }
 0x1fc   :  { %9243 = vst [vmem:[#allocation126_spill] sm:$0xff] %v7238_v63  ;;  %vm8638_vm1 = vcmp.eq.s32.totalorder %v7238_v63, 1 }
 0x1fd   :  { %v7248_v16 = vpop.permute.xlu1 %2230  ;;  %v2086_v47 = vsel %vm8638_vm1, %v7173_v13, 0.0  ;;  %v1696_v13 = vadd.f32 %v1680_v59, %v1514_v27  ;;  %v2125_v19 = vadd.f32 %v2109_v32, %v1943_v50 }
 0x1fe   :  { %9244 = vst [vmem:[#allocation127_spill] sm:$0xff] %v7248_v16  ;;  %vm8641_vm14 = vcmp.eq.s32.totalorder %v7248_v16, 1  ;;  %v2108_v21 = vmul.f32 %v6976_v61, %v2086_v47 }
 0x1ff   :  { %v2267_v12 = vsel %vm8641_vm14, %v7106_v58, 0.0  ;;  %v7259_v37 = vpop.permute.xlu0 %2227  ;;  %v1942_v42 = vadd.f32 %v1926_v6, %v1696_v13 }
 0x200   :  { %9245 = vst [vmem:[#allocation128_spill] sm:$0xff] %v7259_v37  ;;  %v2289_v2 = vmul.f32 %v7009_v56, %v2267_v12  ;;  %vm8643_vm15 = vcmp.eq.s32.totalorder %v7259_v37, 1 }
 0x201   :  { %v2266_v58 = vsel %vm8643_vm15, %v7109_v7, 0.0  ;;  %v2124_v23 = vadd.f32 %v2108_v21, %v1942_v42 }
 0x202   :  { %v7271_v60 = vpop.permute.xlu1 %2236  ;;  %v2305_v45 = vadd.f32 %v2289_v2, %v2123_v38  ;;  %v2288_v10 = vmul.f32 %v7009_v56, %v2266_v58  ;;  %v3885_v2 = vpop.f32.mrf.mxu1 }
 0x203   :  { %9246 = vst [vmem:[#allocation129_spill] sm:$0xff] %v7271_v60  ;;  %vm8640_vm1 = vcmp.eq.s32.totalorder %v7271_v60, 1 }
 0x204   :  { %v2269_v26 = vsel %vm8640_vm1, %v2173_v9, 0.0  ;;  %v2328_v25 = vadd.f32 %v7035_v49, %v2305_v45  ;;  %v2304_v7 = vadd.f32 %v2288_v10, %v2122_v53  ;;  %vm9248_vm1 = vcmask 130048   ;;  %v2412_v9 = vpop.f32.mrf.mxu1 }
 0x205   :  { %v7278_v51 = vpop.permute.xlu0 %2233  ;;  %v2291_v29 = vmul.f32 %v7009_v56, %v2269_v26  ;;  %vm9249_vm14 = vmmov %vm9248_vm1 }
 0x206   :  { %9247 = vst [vmem:[#allocation130_spill] sm:$0xff] %v7278_v51  ;;  %vm8642_vm5 = vcmp.eq.s32.totalorder %v7278_v51, 1  ;;  %v2327_v20 = vadd.f32 %v7035_v49, %v2304_v7  ;;  %v3886_v27 = vpop.f32.mrf.mxu1 }
 0x207   :  { %v2307_v55 = vadd.f32 %v2291_v29, %v2125_v19  ;;  %v2268_v61 = vsel %vm8642_vm5, %v7190_v54, 0.0 }
 0x208   :  { %v2290_v59 = vmul.f32 %v7009_v56, %v2268_v61  ;;  %v2337_v43 = vpack.c.bf16 %v2328_v25, %v2327_v20  ;;  %v2415_v50 = vpop.f32.mrf.mxu1  ;;  %v3777_v56 = vld [vmem:[%s8242_s9] ss:$0 sm:$0xff] }
 0x209   :  { %v2330_v38 = vadd.f32 %v7035_v49, %v2307_v55  ;;  %v7295_v58 = vadd.f32 %v3777_v56, %v2415_v50  ;;  %v7297_v53 = vadd.f32 %v3777_v56, %v2412_v9  ;;  %v7301_v10 = vadd.f32 %v3885_v2, %v3777_v56  ;;  %v3973_v9 = vld [vmem:[%s8247_s14 + $0x8] sm:$0xff]  }
 0x20a   :  { %v2306_v12 = vadd.f32 %v2290_v59, %v2124_v23  ;;  %3895 = vmatprep.mubr.msk.bf16.mxu1 %vm9248_vm1, %v2337_v43  ;;  %vm9250_vm1 = vcmask 261120   ;;  %v7307_v7 = vadd.f32 %v3886_v27, %v3777_v56  ;;  %v3974_v27 = vld [vmem:[%s8247_s14] sm:$0xff]   ;;  %3899 = vmatprep.subr.bf16.mxu1 %v3973_v9 }
 0x20b   :  { %vm9252_vm5 = vmmov %vm9250_vm1  ;;  %3900 = vmatpush3.bf16.msra.mxu1 %v3973_v9 }
 0x20c   :  { %v2329_v32 = vadd.f32 %v7035_v49, %v2306_v12  ;;  %v2476_v49 = vsel %vm9250_vm1, %v7295_v58, 0.0  ;;  %v2478_v25 = vsel %vm9252_vm5, %v7301_v10, 0.0  ;;  %v2480_v61 = vsel %vm9250_vm1, %v7307_v7, 0.0  ;;  %vm9253_vm15 = vmmov %vm9250_vm1  ;;  %3901 = vmatprep.subr.bf16.mxu1 %v3974_v27 }
 0x20d   :  { %vm9255_vm5 = vmmov %vm9250_vm1 }
 0x20e   :  { %v2338_v47 = vpack.c.bf16 %v2330_v38, %v2329_v32  ;;  %vm9260_vm8 = vmmov %vm9250_vm1 }
 0x20f   :  { %3902 = vmatpush3.bf16.msra.mxu1 %v3974_v27  ;;  %vm9275_vm10 = vmmov %vm9250_vm1 }
 0x210   :  { %3896 = vmatmul.mubr.msk.bf16.gmra.mxu1 %vm9249_vm14, %v2338_v47  ;;  %vm9251_vm14 = vmmov %vm9250_vm1 }
 0x211   :  { %v2475_v13 = vsel %vm9251_vm14, %v7297_v53, 0.0  ;;  %vm9254_vm14 = vmmov %vm9250_vm1 }
 0x212   :  { %v2477_v21 = vadd.f32 %v2476_v49, %v2475_v13  ;;  %vm9281_vm7 = vmmov %vm9250_vm1 }
 0x213   :  { %vm9282_vm4 = vmmov %vm9250_vm1 }
 0x214   :  { %v2479_v42 = vadd.f32 %v2478_v25, %v2477_v21  ;;  %vm9283_vm9 = vmmov %vm9250_vm1 }
 0x215   :  { %vm9287_vm2 = vmmov %vm9250_vm1 }
 0x216   :  { %v2481_v59 = vadd.f32 %v2480_v61, %v2479_v42  ;;  %vm9288_vm13 = vmmov %vm9250_vm1 }
 0x256   :  { %v3889_v6 = vpop.f32.mrf.mxu1 }
 0x257   :  { %v2437_v32 = vadd.f32 %v3889_v6, %v3777_v56 }
 0x258   :  { %v2428_v54 = vpop.f32.mrf.mxu1 }
 0x259   :  { %v7309_v29 = vadd.f32 %v3777_v56, %v2428_v54  ;;  %v2486_v50 = vsel %vm9255_vm5, %v2437_v32, 0.0  ;;  %vm9258_vm5 = vmmov %vm9250_vm1 }
 0x25a   :  { %v3890_v45 = vpop.f32.mrf.mxu1 }
 0x25b   :  { %v2482_v23 = vsel %vm9253_vm15, %v7309_v29, 0.0  ;;  %v2440_v54 = vadd.f32 %v3890_v45, %v3777_v56  ;;  %vm9256_vm15 = vmmov %vm9250_vm1 }
 0x25c   :  { %v2431_v26 = vpop.f32.mrf.mxu1  ;;  %v2483_v38 = vadd.f32 %v2482_v23, %v2481_v59 }
 0x25d   :  { %v7311_v20 = vadd.f32 %v3777_v56, %v2431_v26  ;;  %v2488_v6 = vsel %vm9256_vm15, %v2440_v54, 0.0  ;;  %vm9259_vm15 = vmmov %vm9250_vm1 }
 0x25f   :  { %v2484_v43 = vsel %vm9254_vm14, %v7311_v20, 0.0  ;;  %vm9257_vm14 = vmmov %vm9250_vm1 }
 0x260   :  { %v2485_v47 = vadd.f32 %v2484_v43, %v2483_v38 }
 0x262   :  { %v2487_v13 = vadd.f32 %v2486_v50, %v2485_v47 }
 0x264   :  { %v2489_v25 = vadd.f32 %v2488_v6, %v2487_v13 }
 0x2a6   :  { %v3893_v19 = vpop.f32.mrf.mxu1 }
 0x2a7   :  { %v2453_v45 = vadd.f32 %v3893_v19, %v3777_v56 }
 0x2a8   :  { %v2444_v55 = vpop.f32.mrf.mxu1 }
 0x2a9   :  { %v7326_v49 = vadd.f32 %v3777_v56, %v2444_v55  ;;  %v2494_v59 = vsel %vm9258_vm5, %v2453_v45, 0.0  ;;  %vm9262_vm5 = vmmov %vm9250_vm1 }
 0x2aa   :  { %v3894_v12 = vpop.f32.mrf.mxu1 }
 0x2ab   :  { %v2490_v26 = vsel %vm9250_vm1, %v7326_v49, 0.0  ;;  %v2456_v43 = vadd.f32 %v3894_v12, %v3777_v56 }
 0x2ac   :  { %v2447_v2 = vpop.f32.mrf.mxu1  ;;  %v2491_v61 = vadd.f32 %v2490_v26, %v2489_v25 }
 0x2ad   :  { %v7328_v21 = vadd.f32 %v3777_v56, %v2447_v2  ;;  %v2496_v50 = vsel %vm9259_vm15, %v2456_v43, 0.0  ;;  %vm9264_vm15 = vmmov %vm9250_vm1 }
 0x2af   :  { %v2492_v42 = vsel %vm9257_vm14, %v7328_v21, 0.0  ;;  %vm9261_vm14 = vmmov %vm9250_vm1 }
 0x2b0   :  { %v2493_v55 = vadd.f32 %v2492_v42, %v2491_v61 }
 0x2b2   :  { %v2495_v38 = vadd.f32 %v2494_v59, %v2493_v55 }
 0x2b4   :  { %v2497_v13 = vadd.f32 %v2496_v50, %v2495_v38 }
 0x2d0   :  { %v3897_v23 = vpop.f32.mrf.mxu1 }
 0x2d1   :  { %v2469_v60 = vadd.f32 %v3897_v23, %v3777_v56 }
 0x2d2   :  { %v2460_v47 = vpop.f32.mrf.mxu1 }
 0x2d3   :  { %v2461_v2 = vadd.f32 %v3777_v56, %v2460_v47  ;;  %v2502_v12 = vsel %vm9261_vm14, %v2469_v60, 0.0  ;;  %vm9265_vm14 = vmmov %vm9250_vm1 }
 0x2d4   :  { %v3898_v9 = vpop.f32.mrf.mxu1 }
 0x2d5   :  { %v2498_v51 = vsel %vm9260_vm8, %v2461_v2, 0.0  ;;  %v7338_v26 = vadd.f32 %v3898_v9, %v3777_v56  ;;  %vm9263_vm8 = vmmov %vm9250_vm1 }
 0x2d6   :  { %v2463_v6 = vpop.f32.mrf.mxu1  ;;  %v2499_v27 = vadd.f32 %v2498_v51, %v2497_v13 }
 0x2d7   :  { %v2464_v63 = vadd.f32 %v3777_v56, %v2463_v6  ;;  %v2504_v61 = vsel %vm9262_vm5, %v7338_v26, 0.0  ;;  %vm9266_vm5 = vmmov %vm9250_vm1 }
 0x2d9   :  { %v2500_v19 = vsel %vm9250_vm1, %v2464_v63, 0.0 }
 0x2da   :  { %v2501_v25 = vadd.f32 %v2500_v19, %v2499_v27 }
 0x2dc   :  { %v2503_v42 = vadd.f32 %v2502_v12, %v2501_v25 }
 0x2de   :  { %v2505_v55 = vadd.f32 %v2504_v61, %v2503_v42 }
 0x2e0   :  { %v2506_v59 = vrot.slane %v2505_v55, 4 }
 0x2e2   :  { %v2507_v47 = vadd.f32 %v2506_v59, %v2505_v55 }
 0x2e4   :  { %v2508_v41 = vrot.slane %v2507_v47, 2 }
 0x2e6   :  { %v2509_v38 = vadd.f32 %v2508_v41, %v2507_v47 }
 0x2e8   :  { %v2510_v50 = vrot.slane %v2509_v38, 1 }
 0x2ea   :  { %v2511_v23 = vadd.f32 %v2510_v50, %v2509_v38 }
 0x2ec   :  { %v2513_v6 = vmul.f32 0.0078125, %v2511_v23 }
 0x2ee   :  { %v7345_v51 = vsub.f32 %v7297_v53, %v2513_v6  ;;  %v7348_v56 = vsub.f32 %v7295_v58, %v2513_v6  ;;  %v7351_v9 = vsub.f32 %v7301_v10, %v2513_v6  ;;  %v7354_v13 = vsub.f32 %v7307_v7, %v2513_v6 }
 0x2ef   :  { %v7361_v19 = vsub.f32 %v7309_v29, %v2513_v6  ;;  %v7366_v58 = vsub.f32 %v7311_v20, %v2513_v6  ;;  %v7372_v42 = vsub.f32 %v2437_v32, %v2513_v6  ;;  %v7377_v59 = vsub.f32 %v2440_v54, %v2513_v6 }
 0x2f0   :  { %v2530_v27 = vmul.f32 %v7345_v51, %v7345_v51  ;;  %v2531_v41 = vmul.f32 %v7348_v56, %v7348_v56  ;;  %v2532_v53 = vmul.f32 %v7351_v9, %v7351_v9  ;;  %v2533_v10 = vmul.f32 %v7354_v13, %v7354_v13 }
 0x2f1   :  { %v2534_v29 = vmul.f32 %v7361_v19, %v7361_v19  ;;  %v2535_v20 = vmul.f32 %v7366_v58, %v7366_v58  ;;  %v2522_v50 = vsub.f32 %v7326_v49, %v2513_v6  ;;  %v2536_v32 = vmul.f32 %v7372_v42, %v7372_v42 }
 0x2f2   :  { %v2546_v7 = vsel %vm9263_vm8, %v2530_v27, 0.0  ;;  %v2547_v25 = vsel %vm9264_vm15, %v2531_v41, 0.0  ;;  %v2549_v61 = vsel %vm9250_vm1, %v2532_v53, 0.0  ;;  %v2551_v47 = vsel %vm9265_vm14, %v2533_v10, 0.0  ;;  %vm9267_vm8 = vmmov %vm9250_vm1 }
 0x2f3   :  { %v2548_v12 = vadd.f32 %v2547_v25, %v2546_v7  ;;  %v2553_v23 = vsel %vm9266_vm5, %v2534_v29, 0.0  ;;  %v2523_v41 = vsub.f32 %v7328_v21, %v2513_v6  ;;  %v2537_v54 = vmul.f32 %v7377_v59, %v7377_v59  ;;  %vm9268_vm15 = vmmov %vm9250_vm1 }
 0x2f4   :  { %v2555_v53 = vsel %vm9267_vm8, %v2535_v20, 0.0  ;;  %v2524_v25 = vsub.f32 %v2453_v45, %v2513_v6  ;;  %v2557_v10 = vsel %vm9268_vm15, %v2536_v32, 0.0  ;;  %v2525_v49 = vsub.f32 %v2456_v43, %v2513_v6  ;;  %vm9269_vm14 = vmmov %vm9250_vm1 }
 0x2f5   :  { %v2550_v55 = vadd.f32 %v2549_v61, %v2548_v12  ;;  %v2538_v12 = vmul.f32 %v2522_v50, %v2522_v50  ;;  %v2526_v29 = vsub.f32 %v2461_v2, %v2513_v6  ;;  %v2527_v57 = vsub.f32 %v2464_v63, %v2513_v6  ;;  %vm9270_vm5 = vmmov %vm9250_vm1 }
 0x2f6   :  { %v2541_v22 = vmul.f32 %v2525_v49, %v2525_v49  ;;  %v2528_v45 = vsub.f32 %v2469_v60, %v2513_v6  ;;  %vm9271_vm8 = vmmov %vm9250_vm1  ;;  %v2529_v43 = vsub.f32 %v7338_v26, %v2513_v6 }
 0x2f7   :  { %v2552_v38 = vadd.f32 %v2551_v47, %v2550_v55  ;;  %v2539_v55 = vmul.f32 %v2523_v41, %v2523_v41  ;;  %v2559_v47 = vsel %vm9250_vm1, %v2537_v54, 0.0  ;;  %v2561_v21 = vsel %vm9269_vm14, %v2538_v12, 0.0  ;;  %vm9272_vm15 = vmmov %vm9250_vm1 }
 0x2f8   :  { %v2567_v54 = vsel %vm9272_vm15, %v2541_v22, 0.0  ;;  %v2545_v63 = vmul.f32 %v2529_v43, %v2529_v43  ;;  %vm9273_vm14 = vmmov %vm9250_vm1 }
 0x2f9   :  { %v2554_v27 = vadd.f32 %v2553_v23, %v2552_v38  ;;  %v2540_v38 = vmul.f32 %v2524_v25, %v2524_v25  ;;  %v2563_v20 = vsel %vm9270_vm5, %v2539_v55, 0.0  ;;  %vm9274_vm5 = vmmov %vm9250_vm1 }
 0x2fa   :  { %vm9278_vm15 = vmmov %vm9250_vm1 }
 0x2fb   :  { %v2556_v7 = vadd.f32 %v2555_v53, %v2554_v27  ;;  %v2542_v53 = vmul.f32 %v2526_v29, %v2526_v29  ;;  %v2565_v32 = vsel %vm9271_vm8, %v2540_v38, 0.0  ;;  %v2575_v38 = vsel %vm9275_vm10, %v2545_v63, 0.0  ;;  %vm9276_vm10 = vmmov %vm9250_vm1 }
 0x2fc   :  { %vm9277_vm8 = vmmov %vm9250_vm1 }
 0x2fd   :  { %v2558_v61 = vadd.f32 %v2557_v10, %v2556_v7  ;;  %v2543_v10 = vmul.f32 %v2527_v57, %v2527_v57  ;;  %v2569_v12 = vsel %vm9250_vm1, %v2542_v53, 0.0 }
 0x2ff   :  { %v2560_v5 = vadd.f32 %v2559_v47, %v2558_v61  ;;  %v2544_v61 = vmul.f32 %v2528_v45, %v2528_v45  ;;  %v2571_v47 = vsel %vm9273_vm14, %v2543_v10, 0.0  ;;  %vm9279_vm14 = vmmov %vm9250_vm1 }
 0x301   :  { %v2562_v23 = vadd.f32 %v2561_v21, %v2560_v5  ;;  %v2573_v60 = vsel %vm9274_vm5, %v2544_v61, 0.0  ;;  %vm9280_vm5 = vmmov %vm9250_vm1 }
 0x303   :  { %v2564_v27 = vadd.f32 %v2563_v20, %v2562_v23 }
 0x305   :  { %v2566_v7 = vadd.f32 %v2565_v32, %v2564_v27 }
 0x307   :  { %v2568_v2 = vadd.f32 %v2567_v54, %v2566_v7 }
 0x309   :  { %v2570_v5 = vadd.f32 %v2569_v12, %v2568_v2 }
 0x30b   :  { %v2572_v55 = vadd.f32 %v2571_v47, %v2570_v5 }
 0x30d   :  { %v2574_v21 = vadd.f32 %v2573_v60, %v2572_v55  ;;  %v3787_v60 = vld [vmem:[%s8243_s10] ss:$0 sm:$0xff]  ;;  %s9558_s10 = sld [smem:[#allocation136_spill]] }
 0x30f   :  { %v2576_v23 = vadd.f32 %v2575_v38, %v2574_v21 }
 0x311   :  { %v2577_v20 = vrot.slane %v2576_v23, 4 }
 0x313   :  { %v2578_v26 = vadd.f32 %v2577_v20, %v2576_v23 }
 0x315   :  { %v2579_v6 = vrot.slane %v2578_v26, 2 }
 0x317   :  { %v2580_v27 = vadd.f32 %v2579_v6, %v2578_v26 }
 0x319   :  { %v2581_v22 = vrot.slane %v2580_v27, 1 }
 0x31b   :  { %v2582_v32 = vadd.f32 %v2581_v22, %v2580_v27 }
 0x31d   :  { %v2583_v7 = vmul.f32 0.0078125, %v2582_v32  ;;  %v3788_v32 = vld [vmem:[%s8244_s11] ss:$0 sm:$0xff] }
 0x31f   :  { %v2584_v54 = vadd.f32 1e-05, %v2583_v7 }
 0x321   :  { %3975 = vrsqrt.f32 %v2584_v54 }
 0x32e   :  { %v3976_v53 = vpop.eup %3975 }
 0x32f   :  { %v2586_v2 = vmul.f32 %v3976_v53, %v7345_v51  ;;  %v2587_v10 = vmul.f32 %v3976_v53, %v7348_v56  ;;  %v2588_v61 = vmul.f32 %v3976_v53, %v7351_v9  ;;  %v2589_v12 = vmul.f32 %v3976_v53, %v7354_v13 }
 0x330   :  { %v2590_v5 = vmul.f32 %v3976_v53, %v7361_v19  ;;  %v2591_v63 = vmul.f32 %v3976_v53, %v7366_v58  ;;  %v2592_v47 = vmul.f32 %v3976_v53, %v7372_v42  ;;  %v2593_v55 = vmul.f32 %v3976_v53, %v7377_v59 }
 0x331   :  { %v2594_v21 = vmul.f32 %v3976_v53, %v2522_v50  ;;  %v2595_v51 = vmul.f32 %v3976_v53, %v2523_v41  ;;  %v2596_v38 = vmul.f32 %v3976_v53, %v2524_v25  ;;  %v2597_v56 = vmul.f32 %v3976_v53, %v2525_v49 }
 0x332   :  { %v2598_v23 = vmul.f32 %v3976_v53, %v2526_v29  ;;  %v2599_v9 = vmul.f32 %v3976_v53, %v2527_v57  ;;  %v2600_v20 = vmul.f32 %v3976_v53, %v2528_v45  ;;  %v2601_v13 = vmul.f32 %v3976_v53, %v2529_v43 }
 0x333   :  { %v2609_v26 = vmul.f32 %v3787_v60, %v2586_v2  ;;  %v2610_v19 = vmul.f32 %v3787_v60, %v2587_v10  ;;  %v2611_v6 = vmul.f32 %v3787_v60, %v2588_v61  ;;  %v2612_v58 = vmul.f32 %v3787_v60, %v2589_v12 }
 0x334   :  { %v2613_v27 = vmul.f32 %v3787_v60, %v2590_v5  ;;  %v2614_v42 = vmul.f32 %v3787_v60, %v2591_v63  ;;  %v2615_v22 = vmul.f32 %v3787_v60, %v2592_v47  ;;  %v2616_v59 = vmul.f32 %v3787_v60, %v2593_v55 }
 0x335   :  { %v2617_v50 = vmul.f32 %v3787_v60, %v2594_v21  ;;  %v2618_v41 = vmul.f32 %v3787_v60, %v2595_v51  ;;  %v2619_v25 = vmul.f32 %v3787_v60, %v2596_v38  ;;  %v2620_v49 = vmul.f32 %v3787_v60, %v2597_v56 }
 0x336   :  { %v2621_v29 = vmul.f32 %v3787_v60, %v2598_v23  ;;  %v2622_v57 = vmul.f32 %v3787_v60, %v2599_v9  ;;  %v2623_v45 = vmul.f32 %v3787_v60, %v2600_v20  ;;  %v2624_v43 = vmul.f32 %v3787_v60, %v2601_v13 }
 0x337   :  { %v2632_v7 = vadd.f32 %v3788_v32, %v2609_v26  ;;  %v2633_v54 = vadd.f32 %v3788_v32, %v2610_v19  ;;  %v2634_v53 = vadd.f32 %v3788_v32, %v2611_v6  ;;  %v2635_v2 = vadd.f32 %v3788_v32, %v2612_v58 }
 0x338   :  { %v2636_v10 = vadd.f32 %v3788_v32, %v2613_v27  ;;  %v2637_v61 = vadd.f32 %v3788_v32, %v2614_v42  ;;  %v2638_v12 = vadd.f32 %v3788_v32, %v2615_v22  ;;  %v2639_v5 = vadd.f32 %v3788_v32, %v2616_v59 }
 0x339   :  { %v2640_v63 = vadd.f32 %v3788_v32, %v2617_v50  ;;  %v2641_v47 = vadd.f32 %v3788_v32, %v2618_v41  ;;  %v2642_v55 = vadd.f32 %v3788_v32, %v2619_v25  ;;  %v2643_v36 = vadd.f32 %v3788_v32, %v2620_v49 }
 0x33a   :  { %v2644_v21 = vadd.f32 %v3788_v32, %v2621_v29  ;;  %v2645_v51 = vadd.f32 %v3788_v32, %v2622_v57  ;;  %v2646_v38 = vadd.f32 %v3788_v32, %v2623_v45  ;;  %v2647_v56 = vadd.f32 %v3788_v32, %v2624_v43  ;;  %v9290_v29 = vld [vmem:[#allocation14_spill] sm:$0xff]  ;;  %v9292_v45 = vld [vmem:[#allocation19_spill] sm:$0xff] }
 0x33b   :  { %v2648_v23 = vmax.f32 %v2632_v7, 0.0  ;;  %v2649_v9 = vmax.f32 %v2633_v54, 0.0  ;;  %v2650_v20 = vmax.f32 %v2634_v53, 0.0  ;;  %v2651_v60 = vmax.f32 %v2635_v2, 0.0  ;;  %v9294_v7 = vld [vmem:[#allocation16_spill] sm:$0xff] }
 0x33c   :  { %v2652_v13 = vmax.f32 %v2636_v10, 0.0  ;;  %v2653_v26 = vmax.f32 %v2637_v61, 0.0  ;;  %v2654_v19 = vmax.f32 %v2638_v12, 0.0  ;;  %v2655_v6 = vmax.f32 %v2639_v5, 0.0  ;;  %v7448_v10 = vld [vmem:[%s8245_s12 + $0x2] ss:$0 sm:$0xff] }
 0x33d   :  { %v2656_v58 = vmax.f32 %v2640_v63, 0.0  ;;  %v2657_v27 = vmax.f32 %v2641_v47, 0.0  ;;  %v2658_v42 = vmax.f32 %v2642_v55, 0.0  ;;  %v2659_v22 = vmax.f32 %v2643_v36, 0.0  ;;  %2684 = vst.msk [vmem:[#allocation3 + $0x10] sm:$0xff] %vm9276_vm10, %v2648_v23  ;;  %vm9284_vm10 = vmmov %vm9250_vm1  ;;  %v9296_v55 = vld [vmem:[#allocation12_spill] sm:$0xff] }
 0x33e   :  { %2685 = vst.msk [vmem:[#allocation3 + $0x18] sm:$0xff] %vm9277_vm8, %v2649_v9  ;;  %v2660_v59 = vmax.f32 %v2644_v21, 0.0  ;;  %v2661_v32 = vmax.f32 %v2645_v51, 0.0  ;;  %v2662_v50 = vmax.f32 %v2646_v38, 0.0  ;;  %v2663_v41 = vmax.f32 %v2647_v56, 0.0  ;;  %vm9285_vm8 = vmmov %vm9250_vm1  ;;  %v9298_v38 = vld [vmem:[#allocation22_spill] sm:$0xff] }
 0x33f   :  { %2686 = vst.msk [vmem:[#allocation3 + $0x20] sm:$0xff] %vm9278_vm15, %v2650_v20  ;;  %vm9286_vm15 = vmmov %vm9250_vm1  ;;  %v7453_v61 = vld [vmem:[%s8245_s12] ss:$0 sm:$0xff]  ;;  %v9300_v23 = vld [vmem:[#allocation20_spill] sm:$0xff] }
 0x340   :  { %2687 = vst.msk [vmem:[#allocation3 + $0x28] sm:$0xff] %vm9250_vm1, %v2651_v60  ;;  %2696 = vst.msk [vmem:[#allocation3 + $0x70] sm:$0xff] %vm9250_vm1, %v2660_v59  ;;  %v7471_v20 = vld [vmem:[%s8245_s12 + $0x1] ss:$0 sm:$0xff] }
 0x341   :  { %2688 = vst.msk [vmem:[#allocation3 + $0x30] sm:$0xff] %vm9279_vm14, %v2652_v13  ;;  %vm9289_vm14 = vmmov %vm9250_vm1 }
 0x342   :  { %2689 = vst.msk [vmem:[#allocation3 + $0x38] sm:$0xff] %vm9280_vm5, %v2653_v26  ;;  %vm9301_vm5 = vcmp.eq.s32.totalorder %v9300_v23, 1 }
 0x343   :  { %2690 = vst.msk [vmem:[#allocation3 + $0x40] sm:$0xff] %vm9281_vm7, %v2654_v19  ;;  %vm9295_vm7 = vcmp.eq.s32.totalorder %v9294_v7, 1 }
 0x344   :  { %2691 = vst.msk [vmem:[#allocation3 + $0x48] sm:$0xff] %vm9282_vm4, %v2655_v6  ;;  %v2710_v36 = vld [vmem:[#allocation3 + $0xf] sm:$0xff]  ;;  %vm9291_vm4 = vcmp.eq.s32.totalorder %v9290_v29, 1  ;;  %v9302_v6 = vld [vmem:[#allocation24_spill] sm:$0xff] }
 0x345   :  { %2692 = vst.msk [vmem:[#allocation3 + $0x50] sm:$0xff] %vm9283_vm9, %v2656_v58  ;;  %v7431_v25 = vld [vmem:[#allocation3 + $0x17] sm:$0xff]  ;;  %v2726_v57 = vsel %vm9291_vm4, %v2710_v36, 0.0  ;;  %vm9293_vm9 = vcmp.eq.s32.totalorder %v9292_v45, 1  ;;  %v2849_v51 = vld [vmem:[#allocation3 + $0x9] sm:$0xff] }
 0x346   :  { %2693 = vst.msk [vmem:[#allocation3 + $0x58] sm:$0xff] %vm9284_vm10, %v2657_v27  ;;  %v7433_v49 = vld [vmem:[#allocation3 + $0x1f] sm:$0xff]  ;;  %v2727_v43 = vsel %vm9293_vm9, %v7431_v25, 0.0  ;;  %v2780_v53 = vld [vmem:[#allocation3 + $0x10] sm:$0xff]  ;;  %v2748_v12 = vmul.f32 %v7453_v61, %v2726_v57  ;;  %vm9303_vm10 = vcmp.eq.s32.totalorder %v9302_v6, 1 }
 0x347   :  { %2694 = vst.msk [vmem:[#allocation3 + $0x60] sm:$0xff] %vm9285_vm8, %v2658_v42  ;;  %v2728_v54 = vsel %vm9295_vm7, %v7433_v49, 0.0  ;;  %v7443_v2 = vld [vmem:[#allocation3 + $0x18] sm:$0xff]  ;;  %v2749_v5 = vmul.f32 %v7453_v61, %v2727_v43  ;;  %v7458_v47 = vld [vmem:[#allocation3 + $0x20] sm:$0xff]  ;;  %v2865_v58 = vsel %vm9303_vm10, %v2849_v51, 0.0  ;;  %v9308_v57 = vld [vmem:[#allocation25_spill] sm:$0xff] }
 0x348   :  { %2695 = vst.msk [vmem:[#allocation3 + $0x68] sm:$0xff] %vm9286_vm15, %v2659_v22  ;;  %v2750_v63 = vmul.f32 %v7453_v61, %v2728_v54  ;;  %v2798_v9 = vsel %vm9301_vm5, %v7458_v47, 0.0  ;;  %v2850_v13 = vld [vmem:[#allocation3 + $0x11] sm:$0xff]  ;;  %v7474_v26 = vld [vmem:[#allocation3 + $0x19] sm:$0xff]  ;;  %v7476_v19 = vld [vmem:[#allocation3 + $0x21] sm:$0xff]  ;;  %vm9309_vm1 = vcmp.eq.s32.totalorder %v9308_v57, 1  ;;  %v2887_v43 = vmul.f32 %v7448_v10, %v2865_v58 }
 0x349   :  { %2697 = vst.msk [vmem:[#allocation3 + $0x78] sm:$0xff] %vm9287_vm2, %v2661_v32  ;;  %vm9297_vm2 = vcmp.eq.s32.totalorder %v9296_v55, 1  ;;  %v2820_v42 = vmul.f32 %v7471_v20, %v2798_v9  ;;  %v9304_v22 = vld [vmem:[#allocation23_spill] sm:$0xff]  ;;  %v9306_v32 = vld [vmem:[#allocation26_spill] sm:$0xff]  ;;  %v2868_v45 = vsel %vm9309_vm1, %v7476_v19, 0.0  ;;  %v9313_v58 = vld [vmem:[#allocation28_spill] sm:$0xff] }
 0x34a   :  { %2698 = vst.msk [vmem:[#allocation3 + $0x80] sm:$0xff] %vm9288_vm13, %v2662_v50  ;;  %v2796_v21 = vsel %vm9297_vm2, %v2780_v53, 0.0  ;;  %vm9299_vm13 = vcmp.eq.s32.totalorder %v9298_v38, 1  ;;  %vm9305_vm8 = vcmp.eq.s32.totalorder %v9304_v22, 1  ;;  %vm9307_vm15 = vcmp.eq.s32.totalorder %v9306_v32, 1  ;;  %v2855_v39 = vld [vmem:[#allocation3 + $0x39] sm:$0xff] }
 0x34b   :  { %2699 = vst.msk [vmem:[#allocation3 + $0x88] sm:$0xff] %vm9289_vm14, %v2663_v41  ;;  %v2797_v56 = vsel %vm9299_vm13, %v7443_v2, 0.0  ;;  %v2818_v60 = vmul.f32 %v7471_v20, %v2796_v21  ;;  %v2866_v59 = vsel %vm9305_vm8, %v2850_v13, 0.0  ;;  %v2867_v50 = vsel %vm9307_vm15, %v7474_v26, 0.0  ;;  %v7487_v41 = vld [vmem:[#allocation3 + $0x27] sm:$0xff] }
 0x34c   :  { %v2819_v27 = vmul.f32 %v7471_v20, %v2797_v56  ;;  %v2888_v7 = vmul.f32 %v7448_v10, %v2866_v59  ;;  %v7497_v54 = vld [vmem:[%s8245_s12 + $0x3] ss:$0 sm:$0xff]  ;;  %v2836_v21 = vadd.f32 %v2820_v42, %v2750_v63  ;;  %v2889_v51 = vmul.f32 %v7448_v10, %v2867_v50  ;;  %v9310_v56 = vld [vmem:[#allocation13_spill] sm:$0xff]  ;;  %v7518_v50 = vld [vmem:[%s8245_s12 + $0x4] ss:$0 sm:$0xff] }
 0x34d   :  { %v2834_v29 = vadd.f32 %v2818_v60, %v2748_v12  ;;  %v2890_v38 = vmul.f32 %v7448_v10, %v2868_v45  ;;  %v7501_v12 = vld [vmem:[#allocation3 + $0x28] sm:$0xff]  ;;  %v2903_v23 = vadd.f32 %v2887_v43, %v9310_v56  ;;  %vm9314_vm4 = vcmp.eq.s32.totalorder %v9313_v58, 1  ;;  %v9319_v43 = vld [vmem:[#allocation35_spill] sm:$0xff] }
 0x34e   :  { %v2835_v55 = vadd.f32 %v2819_v27, %v2749_v5  ;;  %v9311_v60 = vld [vmem:[#allocation29_spill] sm:$0xff]  ;;  %v2921_v22 = vsel %vm9314_vm4, %v7431_v25, 0.0  ;;  %v9315_v5 = vld [vmem:[#allocation32_spill] sm:$0xff]  ;;  %v9317_v27 = vld [vmem:[#allocation30_spill] sm:$0xff]  ;;  %vm9320_vm2 = vcmp.eq.s32.totalorder %v9319_v43, 1 }
 0x34f   :  { %v2904_v9 = vadd.f32 %v2888_v7, %v2834_v29  ;;  %vm9312_vm14 = vcmp.eq.s32.totalorder %v9311_v60, 1  ;;  %v2906_v32 = vadd.f32 %v2890_v38, %v2836_v21  ;;  %vm9316_vm9 = vcmp.eq.s32.totalorder %v9315_v5, 1  ;;  %v9325_v56 = vld [vmem:[#allocation36_spill] sm:$0xff] }
 0x350   :  { %v2920_v6 = vsel %vm9312_vm14, %v2710_v36, 0.0  ;;  %v2905_v59 = vadd.f32 %v2889_v51, %v2835_v55  ;;  %v2922_v63 = vsel %vm9316_vm9, %v7433_v49, 0.0  ;;  %vm9318_vm7 = vcmp.eq.s32.totalorder %v9317_v27, 1  ;;  %v9321_v55 = vld [vmem:[#allocation34_spill] sm:$0xff]  ;;  %v9323_v51 = vld [vmem:[#allocation37_spill] sm:$0xff] }
 0x351   :  { %v2923_v42 = vsel %vm9318_vm7, %v7487_v41, 0.0  ;;  %v2942_v36 = vmul.f32 %v7497_v54, %v2920_v6  ;;  %v2943_v29 = vmul.f32 %v7497_v54, %v2921_v22  ;;  %v2944_v57 = vmul.f32 %v7497_v54, %v2922_v63 }
 0x352   :  { %v2945_v45 = vmul.f32 %v7497_v54, %v2923_v42  ;;  %v2975_v7 = vsel %vm9320_vm2, %v2780_v53, 0.0  ;;  %vm9322_vm13 = vcmp.eq.s32.totalorder %v9321_v55, 1  ;;  %vm9324_vm5 = vcmp.eq.s32.totalorder %v9323_v51, 1  ;;  %v7538_v53 = vld [vmem:[%s8245_s12 + $0x5] ss:$0 sm:$0xff] }
 0x353   :  { %v2976_v21 = vsel %vm9322_vm13, %v7443_v2, 0.0  ;;  %v2977_v38 = vsel %vm9324_vm5, %v7458_v47, 0.0  ;;  %vm9326_vm10 = vcmp.eq.s32.totalorder %v9325_v56, 1  ;;  %v2958_v6 = vadd.f32 %v2942_v36, %v2903_v23  ;;  %v7547_v23 = vld [vmem:[%s8245_s12 + $0x6] ss:$0 sm:$0xff] }
 0x354   :  { %v2978_v60 = vsel %vm9326_vm10, %v7501_v12, 0.0  ;;  %v2959_v58 = vadd.f32 %v2943_v29, %v2904_v9  ;;  %v2960_v22 = vadd.f32 %v2944_v57, %v2905_v59  ;;  %v2961_v5 = vadd.f32 %v2945_v45, %v2906_v32  ;;  %v9327_v9 = vld [vmem:[#allocation43_spill] sm:$0xff]  ;;  %v9329_v32 = vld [vmem:[#allocation42_spill] sm:$0xff] }
 0x355   :  { %v2997_v63 = vmul.f32 %v7518_v50, %v2975_v7  ;;  %v2998_v27 = vmul.f32 %v7518_v50, %v2976_v21  ;;  %v2999_v42 = vmul.f32 %v7518_v50, %v2977_v38  ;;  %v3000_v43 = vmul.f32 %v7518_v50, %v2978_v60  ;;  %v9331_v29 = vld [vmem:[#allocation51_spill] sm:$0xff] }
 0x356   :  { %vm9328_vm8 = vcmp.eq.s32.totalorder %v9327_v9, 1  ;;  %vm9330_vm15 = vcmp.eq.s32.totalorder %v9329_v32, 1  ;;  %vm9332_vm1 = vcmp.eq.s32.totalorder %v9331_v29, 1  ;;  %v9333_v45 = vld [vmem:[#allocation59_spill] sm:$0xff]  ;;  %v9335_v9 = vld [vmem:[#allocation58_spill] sm:$0xff]  ;;  %v9337_v29 = vld [vmem:[#allocation69_spill] sm:$0xff] }
 0x357   :  { %v3030_v59 = vsel %vm9328_vm8, %v2850_v13, 0.0  ;;  %v3031_v36 = vsel %vm9330_vm15, %v7474_v26, 0.0  ;;  %v3032_v57 = vsel %vm9332_vm1, %v7476_v19, 0.0  ;;  %vm9334_vm14 = vcmp.eq.s32.totalorder %v9333_v45, 1  ;;  %v9343_v45 = vld [vmem:[#allocation68_spill] sm:$0xff] }
 0x358   :  { %v3085_v7 = vsel %vm9334_vm14, %v7431_v25, 0.0  ;;  %v3013_v55 = vadd.f32 %v2997_v63, %v2958_v6  ;;  %v3014_v21 = vadd.f32 %v2998_v27, %v2959_v58  ;;  %v3015_v51 = vadd.f32 %v2999_v42, %v2960_v22  ;;  %v9339_v58 = vld [vmem:[#allocation74_spill] sm:$0xff] }
 0x359   :  { %v3016_v38 = vadd.f32 %v3000_v43, %v2961_v5  ;;  %v3052_v56 = vmul.f32 %v7538_v53, %v3030_v59  ;;  %v3053_v13 = vmul.f32 %v7538_v53, %v3031_v36  ;;  %v3054_v60 = vmul.f32 %v7538_v53, %v3032_v57  ;;  %v7577_v5 = vld [vmem:[%s8245_s12 + $0x7] ss:$0 sm:$0xff]  ;;  %v7580_v43 = vld [vmem:[#allocation3 + $0x2f] sm:$0xff] }
 0x35a   :  { %vm9336_vm4 = vcmp.eq.s32.totalorder %v9335_v9, 1  ;;  %vm9338_vm9 = vcmp.eq.s32.totalorder %v9337_v29, 1  ;;  %v3107_v25 = vmul.f32 %v7547_v23, %v3085_v7  ;;  %vm9340_vm7 = vcmp.eq.s32.totalorder %v9339_v58, 1  ;;  %v7582_v59 = vld [vmem:[#allocation3 + $0x29] sm:$0xff]  ;;  %v7602_v9 = vld [vmem:[#allocation3 + $0x31] sm:$0xff] }
 0x35b   :  { %v3086_v32 = vsel %vm9336_vm4, %v7433_v49, 0.0  ;;  %v3087_v16 = vsel %vm9338_vm9, %v7487_v41, 0.0  ;;  %v3140_v22 = vsel %vm9340_vm7, %v7443_v2, 0.0  ;;  %v3068_v63 = vadd.f32 %v3052_v56, %v3013_v55  ;;  %v9341_v36 = vld [vmem:[#allocation73_spill] sm:$0xff]  ;;  %v9345_v55 = vld [vmem:[#allocation47_spill] sm:$0xff]  ;;  %v9349_v58 = vld [vmem:[#allocation66_spill] sm:$0xff] }
 0x35c   :  { %v3108_v6 = vmul.f32 %v7547_v23, %v3086_v32  ;;  %v3069_v27 = vadd.f32 %v3053_v13, %v3014_v21  ;;  %v3070_v49 = vadd.f32 %v3054_v60, %v3015_v51  ;;  %v3109_v42 = vmul.f32 %v7547_v23, %v3087_v16  ;;  %v7597_v16 = vld [vmem:[%s8245_s12 + $0x8] ss:$0 sm:$0xff]  ;;  %v7600_v60 = vld [vmem:[#allocation3 + $0x30] sm:$0xff] }
 0x35d   :  { %vm9342_vm2 = vcmp.eq.s32.totalorder %v9341_v36, 1  ;;  %v3162_v2 = vmul.f32 %v7577_v5, %v3140_v22  ;;  %vm9344_vm13 = vcmp.eq.s32.totalorder %v9343_v45, 1  ;;  %vm9346_vm5 = vcmp.eq.s32.totalorder %v9345_v55, 1  ;;  %v9357_v55 = vld [vmem:[#allocation53_spill] sm:$0xff] }
 0x35e   :  { %v3141_v57 = vsel %vm9342_vm2, %v7458_v47, 0.0  ;;  %v3195_v7 = vsel %vm9344_vm13, %v7474_v26, 0.0  ;;  %v3196_v21 = vsel %vm9346_vm5, %v7476_v19, 0.0  ;;  %v3123_v51 = vadd.f32 %v3107_v25, %v3068_v63  ;;  %v9347_v19 = vld [vmem:[#allocation50_spill] sm:$0xff] }
 0x35f   :  { %v3124_v56 = vadd.f32 %v3108_v6, %v3069_v27  ;;  %v3125_v13 = vadd.f32 %v3109_v42, %v3070_v49  ;;  %v3163_v47 = vmul.f32 %v7577_v5, %v3141_v57  ;;  %v3217_v26 = vmul.f32 %v7597_v16, %v3195_v7  ;;  %v7617_v49 = vld [vmem:[%s8246_s13] ss:$0 sm:$0xff]  ;;  %v9351_v42 = vld [vmem:[#allocation45_spill] sm:$0xff] }
 0x360   :  { %v3218_v32 = vmul.f32 %v7597_v16, %v3196_v21  ;;  %vm9348_vm10 = vcmp.eq.s32.totalorder %v9347_v19, 1  ;;  %vm9350_vm8 = vcmp.eq.s32.totalorder %v9349_v58, 1  ;;  %v3178_v6 = vadd.f32 %v3162_v2, %v3123_v51  ;;  %v9353_v57 = vld [vmem:[#allocation77_spill] sm:$0xff]  ;;  %v9355_v2 = vld [vmem:[#allocation79_spill] sm:$0xff] }
 0x361   :  { %v3033_v29 = vsel %vm9348_vm10, %v7582_v59, 0.0  ;;  %v3088_v25 = vsel %vm9350_vm8, %v7580_v43, 0.0  ;;  %v3179_v22 = vadd.f32 %v3163_v47, %v3124_v56  ;;  %vm9352_vm15 = vcmp.eq.s32.totalorder %v9351_v42, 1  ;;  %v7634_v58 = vld [vmem:[#allocation3 + $0x3f] sm:$0xff] }
 0x362   :  { %v3055_v63 = vmul.f32 %v7538_v53, %v3033_v29  ;;  %v3110_v27 = vmul.f32 %v7547_v23, %v3088_v25  ;;  %v3142_v36 = vsel %vm9352_vm15, %v7501_v12, 0.0  ;;  %vm9354_vm1 = vcmp.eq.s32.totalorder %v9353_v57, 1  ;;  %v7632_v29 = vld [vmem:[#allocation3 + $0x37] sm:$0xff] }
 0x363   :  { %v3143_v45 = vsel %vm9354_vm1, %v7600_v60, 0.0  ;;  %vm9356_vm14 = vcmp.eq.s32.totalorder %v9355_v2, 1  ;;  %vm9358_vm4 = vcmp.eq.s32.totalorder %v9357_v55, 1  ;;  %v3233_v51 = vadd.f32 %v3217_v26, %v3178_v6  ;;  %v9359_v2 = vld [vmem:[#allocation39_spill] sm:$0xff] }
 0x364   :  { %v3197_v7 = vsel %vm9356_vm14, %v7582_v59, 0.0  ;;  %v3198_v21 = vsel %vm9358_vm4, %v7602_v9, 0.0  ;;  %v3234_v56 = vadd.f32 %v3218_v32, %v3179_v22  ;;  %v3071_v47 = vadd.f32 %v3055_v63, %v3016_v38 }
 0x365   :  { %v3164_v19 = vmul.f32 %v7577_v5, %v3142_v36  ;;  %v3165_v25 = vmul.f32 %v7577_v5, %v3143_v45  ;;  %v3219_v42 = vmul.f32 %v7597_v16, %v3197_v7  ;;  %v3220_v57 = vmul.f32 %v7597_v16, %v3198_v21  ;;  %v9363_v7 = vld [vmem:[#allocation44_spill] sm:$0xff]  ;;  %v9365_v36 = vld [vmem:[#allocation41_spill] sm:$0xff] }
 0x366   :  { %vm9360_vm9 = vcmp.eq.s32.totalorder %v9359_v2, 1  ;;  %v3256_v26 = vadd.f32 %v7617_v49, %v3233_v51  ;;  %v3257_v38 = vadd.f32 %v7617_v49, %v3234_v56  ;;  %v3126_v32 = vadd.f32 %v3110_v27, %v3071_v47  ;;  %v2785_v2 = vld [vmem:[#allocation3 + $0x38] sm:$0xff]  ;;  %v7654_v51 = vld [vmem:[#allocation3 + $0x40] sm:$0xff] }
 0x367   :  { %v2729_v55 = vsel %vm9360_vm9, %v7487_v41, 0.0  ;;  %v3180_v6 = vadd.f32 %v3164_v19, %v3125_v13  ;;  %v2730_v63 = vsel %vm595_vm3, %v7580_v43, 0.0  ;;  %v2731_v45 = vsel %vm596_vm12, %v7632_v29, 0.0 }
 0x368   :  { %vm9364_vm7 = vcmp.eq.s32.totalorder %v9363_v7, 1  ;;  %v2751_v41 = vmul.f32 %v7453_v61, %v2729_v55  ;;  %v3272_v56 = vpack.c.bf16 %v3257_v38, %v3256_v26  ;;  %v3181_v27 = vadd.f32 %v3165_v25, %v3126_v32  ;;  %v9367_v7 = vld [vmem:[#allocation40_spill] sm:$0xff] }
 0x369   :  { %v2732_v21 = vsel %vm9364_vm7, %v7634_v58, 0.0  ;;  %v3235_v13 = vadd.f32 %v3219_v42, %v3180_v6  ;;  %v2752_v47 = vmul.f32 %v7453_v61, %v2730_v63  ;;  %v2753_v19 = vmul.f32 %v7453_v61, %v2731_v45  ;;  %v9370_v42 = vld [vmem:[#allocation49_spill] sm:$0xff]  ;;  %v9372_v32 = vld [vmem:[#allocation48_spill] sm:$0xff] }
 0x36a   :  { %v2754_v22 = vmul.f32 %v7453_v61, %v2732_v21  ;;  %vm9366_vm3 = vcmp.eq.s32.totalorder %v9365_v36, 1  ;;  %vm9368_vm12 = vcmp.eq.s32.totalorder %v9367_v7, 1  ;;  %vm9369_vm2 = vcmask 261120   ;;  %v2856_v36 = vld [vmem:[#allocation3 + $0x41] sm:$0xff] }
 0x36b   :  { %v2799_v37 = vsel %vm9366_vm3, %v7501_v12, 0.0  ;;  %v2800_v55 = vsel %vm9368_vm12, %v7600_v60, 0.0  ;;  %3903 = vmatprep.mubr.msk.bf16.mxu1 %vm9369_vm2, %v3272_v56  ;;  %v3236_v26 = vadd.f32 %v3220_v57, %v3181_v27  ;;  %v3258_v25 = vadd.f32 %v7617_v49, %v3235_v13  ;;  %v9374_v56 = vld [vmem:[#allocation55_spill] sm:$0xff]  ;;  %v9376_v13 = vld [vmem:[#allocation52_spill] sm:$0xff]  ;;  %vm9384_vm9 = vmmov %vm9369_vm2 }
 0x36c   :  { %vm9371_vm13 = vcmp.eq.s32.totalorder %v9370_v42, 1  ;;  %vm9373_vm5 = vcmp.eq.s32.totalorder %v9372_v32, 1  ;;  %v2821_v63 = vmul.f32 %v7471_v20, %v2799_v37  ;;  %v2822_v12 = vmul.f32 %v7471_v20, %v2800_v55 }
 0x36d   :  { %v2801_v38 = vsel %vm9371_vm13, %v2785_v2, 0.0  ;;  %v2802_v6 = vsel %vm9373_vm5, %v7654_v51, 0.0  ;;  %v3259_v57 = vadd.f32 %v7617_v49, %v3236_v26  ;;  %vm9375_vm10 = vcmp.eq.s32.totalorder %v9374_v56, 1 }
 0x36e   :  { %v2823_v45 = vmul.f32 %v7471_v20, %v2801_v38  ;;  %v2824_v21 = vmul.f32 %v7471_v20, %v2802_v6  ;;  %v2869_v27 = vsel %vm9375_vm10, %v7582_v59, 0.0  ;;  %vm9377_vm8 = vcmp.eq.s32.totalorder %v9376_v13, 1  ;;  %v9379_v6 = vld [vmem:[#allocation62_spill] sm:$0xff] }
 0x36f   :  { %v2870_v7 = vsel %vm9377_vm8, %v7602_v9, 0.0  ;;  %vm9378_vm15 = vcmp.eq.s32.totalorder %v9155_v8, 1  ;;  %v2837_v42 = vadd.f32 %v2821_v63, %v2751_v41  ;;  %v2838_v55 = vadd.f32 %v2822_v12, %v2752_v47 }
 0x370   :  { %v2871_v37 = vsel %vm9378_vm15, %v2855_v39, 0.0  ;;  %v2839_v32 = vadd.f32 %v2823_v45, %v2753_v19  ;;  %v2840_v38 = vadd.f32 %v2824_v21, %v2754_v22  ;;  %v3273_v14 = vpack.c.bf16 %v3259_v57, %v3258_v25  ;;  %v9385_v22 = vld [vmem:[#allocation76_spill] sm:$0xff]  ;;  %v2718_v57 = vld [vmem:[#allocation3 + $0x4f] sm:$0xff] }
 0x371   :  { %vm9380_vm1 = vcmp.eq.s32.totalorder %v9379_v6, 1  ;;  %v2891_v26 = vmul.f32 %v7448_v10, %v2869_v27  ;;  %v2892_v56 = vmul.f32 %v7448_v10, %v2870_v7  ;;  %v2893_v59 = vmul.f32 %v7448_v10, %v2871_v37 }
 0x372   :  { %v2872_v30 = vsel %vm9380_vm1, %v2856_v36, 0.0  ;;  %vm9382_vm14 = vcmp.eq.s32.totalorder %v9381_v24, 1  ;;  %vm9383_vm4 = vcmp.eq.s32.totalorder %v9153_v4, 1  ;;  %3904 = vmatmul.mubr.msk.bf16.vlgmr.msra.gmra.mxu1 %vm9384_vm9, %v3273_v14  ;;  %vm9386_vm7 = vcmp.eq.s32.totalorder %v9385_v22, 1  ;;  %v9389_v14 = vld [vmem:[#allocation67_spill] sm:$0xff] }
 0x373   :  { %v2894_v13 = vmul.f32 %v7448_v10, %v2872_v30  ;;  %v2924_v8 = vsel %vm9382_vm14, %v7580_v43, 0.0  ;;  %v2925_v41 = vsel %vm9383_vm4, %v7632_v29, 0.0  ;;  %v2907_v47 = vadd.f32 %v2891_v26, %v2837_v42  ;;  %v9387_v43 = vld [vmem:[#allocation33_spill] sm:$0xff]  ;;  %v9400_v22 = vld [vmem:[#allocation71_spill] sm:$0xff]  ;;  %v9408_v26 = vld [vmem:[#allocation54_spill] sm:$0xff] }
 0x374   :  { %v2908_v19 = vadd.f32 %v2892_v56, %v2838_v55  ;;  %v2926_v25 = vsel %vm9386_vm7, %v7634_v58, 0.0  ;;  %v2946_v63 = vmul.f32 %v7497_v54, %v2924_v8  ;;  %v7702_v12 = vadd.f32 %v2893_v59, %v2839_v32  ;;  %v9392_v55 = vld [vmem:[#allocation8_spill] sm:$0xff] }
 0x375   :  { %v7704_v30 = vadd.f32 %v2894_v13, %v2840_v38  ;;  %v2947_v24 = vmul.f32 %v7497_v54, %v2925_v41  ;;  %vm9388_vm3 = vcmp.eq.s32.totalorder %v9387_v43, 1  ;;  %vm9390_vm12 = vcmp.eq.s32.totalorder %v9389_v14, 1  ;;  %v9394_v38 = vld [vmem:[#allocation81_spill] sm:$0xff]  ;;  %v9402_v14 = vld [vmem:[#allocation90_spill] sm:$0xff] }
 0x376   :  { %v2979_v4 = vsel %vm9388_vm3, %v7600_v60, 0.0  ;;  %v2962_v45 = vadd.f32 %v2946_v63, %v2907_v47  ;;  %v2980_v21 = vsel %vm9390_vm12, %v2785_v2, 0.0  ;;  %v7715_v27 = vsel %vm1452_vm0, %v7654_v51, 0.0  ;;  %v9410_v41 = vld [vmem:[#allocation17_spill] sm:$0xff] }
 0x377   :  { %v3001_v7 = vmul.f32 %v7518_v50, %v2979_v4  ;;  %v2963_v37 = vadd.f32 %v2947_v24, %v2908_v19  ;;  %v3002_v42 = vmul.f32 %v7518_v50, %v2980_v21  ;;  %vm9393_vm2 = vcmp.eq.s32.totalorder %v9392_v55, 1  ;;  %v9398_v19 = vld [vmem:[#allocation27_spill] sm:$0xff]  ;;  %v2717_v24 = vld [vmem:[#allocation3 + $0x47] sm:$0xff]  ;;  %v2788_v55 = vld [vmem:[#allocation3 + $0x50] sm:$0xff] }
 0x378   :  { %v3034_v32 = vsel %vm9393_vm2, %v7602_v9, 0.0  ;;  %vm9395_vm13 = vcmp.eq.s32.totalorder %v9394_v38, 1  ;;  %v3036_v56 = vsel %vm1634_vm11, %v2856_v36, 0.0  ;;  %v3089_v47 = vsel %vm1878_vm6, %v7632_v29, 0.0  ;;  %v9406_v38 = vld [vmem:[#allocation95_spill] sm:$0xff] }
 0x379   :  { %v3035_v60 = vsel %vm9395_vm13, %v2855_v39, 0.0  ;;  %v3017_v6 = vadd.f32 %v3001_v7, %v2962_v45  ;;  %v3056_v59 = vmul.f32 %v7538_v53, %v3034_v32  ;;  %v3018_v8 = vadd.f32 %v3002_v42, %v2963_v37 }
 0x37a   :  { %v3057_v13 = vmul.f32 %v7538_v53, %v3035_v60  ;;  %vm9399_vm0 = vcmp.eq.s32.totalorder %v9398_v19, 1  ;;  %vm9401_vm5 = vcmp.eq.s32.totalorder %v9400_v22, 1  ;;  %v3111_v4 = vmul.f32 %v7547_v23, %v3089_v47  ;;  %v2858_v19 = vld [vmem:[#allocation3 + $0x51] sm:$0xff] }
 0x37b   :  { %v3090_v9 = vsel %vm9399_vm0, %v7634_v58, 0.0  ;;  %v3144_v63 = vsel %vm9401_vm5, %v2785_v2, 0.0  ;;  %v3072_v43 = vadd.f32 %v3056_v59, %v3017_v6  ;;  %vm9403_vm11 = vcmp.eq.s32.totalorder %v9402_v14, 1  ;;  %v9404_v58 = vld [vmem:[#allocation96_spill] sm:$0xff]  ;;  %v2857_v59 = vld [vmem:[#allocation3 + $0x49] sm:$0xff] }
 0x37c   :  { %v3112_v45 = vmul.f32 %v7547_v23, %v3090_v9  ;;  %v3145_v21 = vsel %vm9403_vm11, %v7654_v51, 0.0  ;;  %v3073_v7 = vadd.f32 %v3057_v13, %v3018_v8  ;;  %v3166_v29 = vmul.f32 %v7577_v5, %v3144_v63  ;;  %v2787_v2 = vld [vmem:[#allocation3 + $0x48] sm:$0xff] }
 0x37d   :  { %v3167_v37 = vmul.f32 %v7577_v5, %v3145_v21  ;;  %vm9405_vm6 = vcmp.eq.s32.totalorder %v9404_v58, 1  ;;  %v3127_v32 = vadd.f32 %v3111_v4, %v3072_v43  ;;  %vm9407_vm10 = vcmp.eq.s32.totalorder %v9406_v38, 1  ;;  %v9412_v63 = vld [vmem:[#allocation57_spill] sm:$0xff]  ;;  %v9418_v38 = vld [vmem:[#allocation56_spill] sm:$0xff] }
 0x37e   :  { %v3199_v42 = vsel %vm9405_vm6, %v2855_v39, 0.0  ;;  %v3200_v60 = vsel %vm9407_vm10, %v2856_v36, 0.0  ;;  %vm9409_vm8 = vcmp.eq.s32.totalorder %v9408_v26, 1  ;;  %v3128_v13 = vadd.f32 %v3112_v45, %v3073_v7  ;;  %v9414_v43 = vld [vmem:[#allocation21_spill] sm:$0xff]  ;;  %v9416_v7 = vld [vmem:[#allocation84_spill] sm:$0xff] }
 0x37f   :  { %v3221_v6 = vmul.f32 %v7597_v16, %v3199_v42  ;;  %v2733_v51 = vsel %vm9409_vm8, %v2717_v24, 0.0  ;;  %v3222_v8 = vmul.f32 %v7597_v16, %v3200_v60  ;;  %vm9411_vm15 = vcmp.eq.s32.totalorder %v9410_v41, 1  ;;  %v9420_v60 = vld [vmem:[#allocation75_spill] sm:$0xff] }
 0x380   :  { %v2734_v47 = vsel %vm9411_vm15, %v2718_v57, 0.0  ;;  %v2755_v39 = vmul.f32 %v7453_v61, %v2733_v51  ;;  %v3182_v9 = vadd.f32 %v3166_v29, %v3127_v32  ;;  %vm9413_vm1 = vcmp.eq.s32.totalorder %v9412_v63, 1  ;;  %v9422_v63 = vld [vmem:[#allocation89_spill] sm:$0xff] }
 0x381   :  { %v2756_v22 = vmul.f32 %v7453_v61, %v2734_v47  ;;  %v2803_v36 = vsel %vm9413_vm1, %v2787_v2, 0.0  ;;  %vm9415_vm14 = vcmp.eq.s32.totalorder %v9414_v43, 1  ;;  %v3183_v14 = vadd.f32 %v3167_v37, %v3128_v13 }
 0x382   :  { %v2804_v4 = vsel %vm9415_vm14, %v2788_v55, 0.0  ;;  %v2825_v45 = vmul.f32 %v7471_v20, %v2803_v36  ;;  %vm9417_vm4 = vcmp.eq.s32.totalorder %v9416_v7, 1  ;;  %v3237_v42 = vadd.f32 %v3221_v6, %v3182_v9 }
 0x383   :  { %v2826_v21 = vmul.f32 %v7471_v20, %v2804_v4  ;;  %v2873_v58 = vsel %vm9417_vm4, %v2857_v59, 0.0  ;;  %vm9419_vm9 = vcmp.eq.s32.totalorder %v9418_v38, 1  ;;  %vm9421_vm7 = vcmp.eq.s32.totalorder %v9420_v60, 1  ;;  %v9428_v38 = vld [vmem:[#allocation18_spill] sm:$0xff] }
 0x384   :  { %v2874_v29 = vsel %vm9419_vm9, %v2858_v19, 0.0  ;;  %v2895_v32 = vmul.f32 %v7448_v10, %v2873_v58  ;;  %v2927_v26 = vsel %vm9421_vm7, %v2717_v24, 0.0  ;;  %v3238_v51 = vadd.f32 %v3222_v8, %v3183_v14  ;;  %v9424_v8 = vld [vmem:[#allocation78_spill] sm:$0xff] }
 0x385   :  { %v2841_v41 = vadd.f32 %v2825_v45, %v2755_v39  ;;  %v2842_v47 = vadd.f32 %v2826_v21, %v2756_v22  ;;  %v2896_v37 = vmul.f32 %v7448_v10, %v2874_v29  ;;  %v3260_v13 = vadd.f32 %v7617_v49, %v3237_v42  ;;  %v9426_v45 = vld [vmem:[#allocation94_spill] sm:$0xff] }
 0x386   :  { %vm9423_vm3 = vcmp.eq.s32.totalorder %v9422_v63, 1  ;;  %v2948_v6 = vmul.f32 %v7497_v54, %v2926_v25  ;;  %v2949_v9 = vmul.f32 %v7497_v54, %v2927_v26  ;;  %v3261_v43 = vadd.f32 %v7617_v49, %v3238_v51  ;;  %v9431_v26 = vld [vmem:[#allocation86_spill] sm:$0xff] }
 0x387   :  { %v7772_v36 = vsel %vm9423_vm3, %v2718_v57, 0.0  ;;  %v7777_v4 = vadd.f32 %v2895_v32, %v2841_v41  ;;  %v7779_v7 = vadd.f32 %v2896_v37, %v2842_v47  ;;  %vm9425_vm12 = vcmp.eq.s32.totalorder %v9424_v8, 1  ;;  %v9434_v41 = vld [vmem:[#allocation85_spill] sm:$0xff]  ;;  %v2719_v63 = vld [vmem:[#allocation3 + $0x57] sm:$0xff]  ;;  %v2720_v8 = vld [vmem:[#allocation3 + $0x5f] sm:$0xff] }
 0x388   :  { %v2982_v39 = vsel %vm9425_vm12, %v2787_v2, 0.0  ;;  %v2964_v22 = vadd.f32 %v2948_v6, %v7702_v12  ;;  %v2965_v14 = vadd.f32 %v2949_v9, %v7704_v30  ;;  %vm9427_vm2 = vcmp.eq.s32.totalorder %v9426_v45, 1  ;;  %v9438_v9 = vld [vmem:[#allocation91_spill] sm:$0xff] }
 0x389   :  { %v7787_v21 = vsel %vm9427_vm2, %v2788_v55, 0.0  ;;  %v3003_v25 = vmul.f32 %v7518_v50, %v7715_v27  ;;  %v3274_v58 = vpack.c.bf16 %v3261_v43, %v3260_v13  ;;  %v3004_v42 = vmul.f32 %v7518_v50, %v2982_v39  ;;  %v9436_v13 = vld [vmem:[#allocation92_spill] sm:$0xff]  ;;  %v2789_v39 = vld [vmem:[#allocation3 + $0x58] sm:$0xff] }
 0x38a   :  { %vm9429_vm13 = vcmp.eq.s32.totalorder %v9428_v38, 1  ;;  %vm9430_vm0 = vcmp.eq.s32.totalorder %v6815_v1, 1  ;;  %v3058_v30 = vmul.f32 %v7538_v53, %v3036_v56  ;;  %vm9432_vm5 = vcmp.eq.s32.totalorder %v9431_v26, 1  ;;  %v2860_v26 = vld [vmem:[#allocation3 + $0x61] sm:$0xff] }
 0x38b   :  { %v3037_v29 = vsel %vm9429_vm13, %v2857_v59, 0.0  ;;  %v7796_v32 = vsel %vm9430_vm0, %v2858_v19, 0.0  ;;  %v3019_v12 = vadd.f32 %v3003_v25, %v2964_v22  ;;  %v3091_v51 = vsel %vm9432_vm5, %v2717_v24, 0.0  ;;  %v9442_v25 = vld [vmem:[#allocation70_spill] sm:$0xff] }
 0x38c   :  { %v3059_v60 = vmul.f32 %v7538_v53, %v3037_v29  ;;  %vm9433_vm11 = vcmask 261120   ;;  %v3020_v27 = vadd.f32 %v3004_v42, %v2965_v14  ;;  %vm9435_vm6 = vcmp.eq.s32.totalorder %v9434_v41, 1  ;;  %v9448_v41 = vld [vmem:[#allocation15_spill] sm:$0xff] }
 0x38d   :  { %3907 = vmatprep.mubr.msk.bf16.mxu1 %vm9433_vm11, %v3274_v58  ;;  %v3092_v47 = vsel %vm9435_vm6, %v2718_v57, 0.0  ;;  %v3113_v37 = vmul.f32 %v7547_v23, %v3091_v51  ;;  %vm9437_vm10 = vcmp.eq.s32.totalorder %v9436_v13, 1  ;;  %v3074_v6 = vadd.f32 %v3058_v30, %v3019_v12  ;;  %v9440_v57 = vld [vmem:[#allocation80_spill] sm:$0xff]  ;;  %v2859_v30 = vld [vmem:[#allocation3 + $0x59] sm:$0xff]  ;;  %v9450_v13 = vld [vmem:[#allocation61_spill] sm:$0xff] }
 0x38e   :  { %v3146_v1 = vsel %vm9437_vm10, %v2787_v2, 0.0  ;;  %v3114_v56 = vmul.f32 %v7547_v23, %v3092_v47  ;;  %vm9439_vm8 = vcmp.eq.s32.totalorder %v9438_v9, 1  ;;  %v3075_v22 = vadd.f32 %v3059_v60, %v3020_v27  ;;  %v2790_v58 = vld [vmem:[#allocation3 + $0x60] sm:$0xff] }
 0x38f   :  { %v3147_v43 = vsel %vm9439_vm8, %v2788_v55, 0.0  ;;  %v3168_v24 = vmul.f32 %v7577_v5, %v3146_v1  ;;  %vm9441_vm15 = vcmp.eq.s32.totalorder %v9440_v57, 1  ;;  %vm9443_vm1 = vcmp.eq.s32.totalorder %v9442_v25, 1  ;;  %v9444_v55 = vld [vmem:[#allocation10_spill] sm:$0xff]  ;;  %v9446_v51 = vld [vmem:[#allocation60_spill] sm:$0xff] }
 0x390   :  { %v3169_v14 = vmul.f32 %v7577_v5, %v3147_v43  ;;  %v3201_v45 = vsel %vm9441_vm15, %v2857_v59, 0.0  ;;  %v3202_v2 = vsel %vm9443_vm1, %v2858_v19, 0.0  ;;  %v3129_v42 = vadd.f32 %v3113_v37, %v3074_v6  ;;  %v9454_v57 = vld [vmem:[#allocation64_spill] sm:$0xff] }
 0x391   :  { %v3223_v38 = vmul.f32 %v7597_v16, %v3201_v45  ;;  %v3224_v29 = vmul.f32 %v7597_v16, %v3202_v2  ;;  %vm9445_vm14 = vcmp.eq.s32.totalorder %v9444_v55, 1  ;;  %v3130_v60 = vadd.f32 %v3114_v56, %v3075_v22  ;;  %v9452_v56 = vld [vmem:[#allocation31_spill] sm:$0xff] }
 0x392   :  { %v2735_v12 = vsel %vm9445_vm14, %v2719_v63, 0.0  ;;  %vm9447_vm4 = vcmp.eq.s32.totalorder %v9446_v51, 1  ;;  %vm9449_vm9 = vcmp.eq.s32.totalorder %v9448_v41, 1  ;;  %v3184_v47 = vadd.f32 %v3168_v24, %v3129_v42  ;;  %v9456_v51 = vld [vmem:[#allocation87_spill] sm:$0xff] }
 0x393   :  { %v2736_v27 = vsel %vm9447_vm4, %v2720_v8, 0.0  ;;  %v2757_v59 = vmul.f32 %v7453_v61, %v2735_v12  ;;  %v2805_v19 = vsel %vm9449_vm9, %v2789_v39, 0.0  ;;  %vm9451_vm7 = vcmp.eq.s32.totalorder %v9450_v13, 1 }
 0x394   :  { %v2758_v37 = vmul.f32 %v7453_v61, %v2736_v27  ;;  %v2806_v1 = vsel %vm9451_vm7, %v2790_v58, 0.0  ;;  %v2827_v6 = vmul.f32 %v7471_v20, %v2805_v19  ;;  %v3185_v9 = vadd.f32 %v3169_v14, %v3130_v60 }
 0x395   :  { %v2828_v43 = vmul.f32 %v7471_v20, %v2806_v1  ;;  %vm9453_vm3 = vcmp.eq.s32.totalorder %v9452_v56, 1  ;;  %vm9455_vm12 = vcmp.eq.s32.totalorder %v9454_v57, 1  ;;  %v3239_v25 = vadd.f32 %v3223_v38, %v3184_v47  ;;  %v9459_v47 = vld [vmem:[#allocation93_spill] sm:$0xff] }
 0x396   :  { %v2875_v22 = vsel %vm9453_vm3, %v2859_v30, 0.0  ;;  %v2876_v45 = vsel %vm9455_vm12, %v2860_v26, 0.0  ;;  %v2843_v2 = vadd.f32 %v2827_v6, %v2757_v59  ;;  %v3240_v55 = vadd.f32 %v3224_v29, %v3185_v9 }
 0x397   :  { %v2897_v24 = vmul.f32 %v7448_v10, %v2875_v22  ;;  %v2898_v42 = vmul.f32 %v7448_v10, %v2876_v45  ;;  %v2844_v12 = vadd.f32 %v2828_v43, %v2758_v37  ;;  %vm9457_vm2 = vcmp.eq.s32.totalorder %v9456_v51, 1  ;;  %v9462_v43 = vld [vmem:[#allocation97_spill] sm:$0xff]  ;;  %v9465_v45 = vld [vmem:[#allocation104_spill] sm:$0xff] }
 0x398   :  { %v2929_v27 = vsel %vm9457_vm2, %v2719_v63, 0.0  ;;  %vm9458_vm13 = vcmp.eq.s32.totalorder %v6613_v31, 1  ;;  %v3262_v60 = vadd.f32 %v7617_v49, %v3239_v25  ;;  %v2950_v38 = vmul.f32 %v7497_v54, %v7772_v36  ;;  %v2721_v25 = vld [vmem:[#allocation3 + $0x67] sm:$0xff] }
 0x399   :  { %v7841_v14 = vsel %vm9458_vm13, %v2720_v8, 0.0  ;;  %v7844_v41 = vadd.f32 %v2897_v24, %v2843_v2  ;;  %v2951_v59 = vmul.f32 %v7497_v54, %v2929_v27  ;;  %v3263_v19 = vadd.f32 %v7617_v49, %v3240_v55  ;;  %v9468_v2 = vld [vmem:[#allocation103_spill] sm:$0xff] }
 0x39a   :  { %v7850_v29 = vadd.f32 %v2898_v42, %v2844_v12  ;;  %vm9460_vm0 = vcmp.eq.s32.totalorder %v9459_v47, 1  ;;  %vm9461_vm5 = vcmp.eq.s32.totalorder %v6778_v15, 1  ;;  %v2966_v13 = vadd.f32 %v2950_v38, %v7777_v4  ;;  %v9470_v42 = vld [vmem:[#allocation112_spill] sm:$0xff]  ;;  %v9472_v12 = vld [vmem:[#allocation111_spill] sm:$0xff]  ;;  %v2722_v38 = vld [vmem:[#allocation3 + $0x6f] sm:$0xff] }
 0x39b   :  { %v2984_v37 = vsel %vm9460_vm0, %v2789_v39, 0.0  ;;  %v7856_v31 = vsel %vm9461_vm5, %v2790_v58, 0.0  ;;  %v2967_v1 = vadd.f32 %v2951_v59, %v7779_v7  ;;  %v3005_v36 = vmul.f32 %v7518_v50, %v7787_v21  ;;  %v2791_v59 = vld [vmem:[#allocation3 + $0x68] sm:$0xff] }
 0x39c   :  { %v3006_v6 = vmul.f32 %v7518_v50, %v2984_v37  ;;  %v3275_v9 = vpack.c.bf16 %v3263_v19, %v3262_v60  ;;  %vm9463_vm11 = vcmp.eq.s32.totalorder %v9462_v43, 1  ;;  %vm9464_vm6 = vcmp.eq.s32.totalorder %v6827_v44, 1  ;;  %v2792_v19 = vld [vmem:[#allocation3 + $0x70] sm:$0xff] }
 0x39d   :  { %v3039_v56 = vsel %vm9463_vm11, %v2859_v30, 0.0  ;;  %v7867_v22 = vsel %vm9464_vm6, %v2860_v26, 0.0  ;;  %v3060_v15 = vmul.f32 %v7538_v53, %v7796_v32  ;;  %v3021_v57 = vadd.f32 %v3005_v36, %v2966_v13  ;;  %v9475_v37 = vld [vmem:[#allocation114_spill] sm:$0xff] }
 0x39e   :  { %v3022_v4 = vadd.f32 %v3006_v6, %v2967_v1  ;;  %v3061_v7 = vmul.f32 %v7538_v53, %v3039_v56  ;;  %vm9466_vm10 = vcmp.eq.s32.totalorder %v9465_v45, 1  ;;  %vm9467_vm8 = vcmask 261120   ;;  %v2862_v43 = vld [vmem:[#allocation3 + $0x71] sm:$0xff] }
 0x39f   :  { %v3093_v21 = vsel %vm9466_vm10, %v2719_v63, 0.0  ;;  %3908 = vmatmul.mubr.msk.bf16.gmra.mxu1 %vm9467_vm8, %v3275_v9  ;;  %vm9469_vm15 = vcmp.eq.s32.totalorder %v9468_v2, 1  ;;  %vm9471_vm1 = vcmp.eq.s32.totalorder %v9470_v42, 1  ;;  %vm9473_vm14 = vcmp.eq.s32.totalorder %v9472_v12, 1  ;;  %v2861_v9 = vld [vmem:[#allocation3 + $0x69] sm:$0xff]  ;;  %v9485_v12 = vld [vmem:[#allocation110_spill] sm:$0xff] }
 0x3a0   :  { %v3094_v24 = vsel %vm9469_vm15, %v2720_v8, 0.0  ;;  %v3115_v44 = vmul.f32 %v7547_v23, %v3093_v21  ;;  %v3148_v55 = vsel %vm9471_vm1, %v2789_v39, 0.0  ;;  %v3149_v32 = vsel %vm9473_vm14, %v2790_v58, 0.0  ;;  %v9483_v21 = vld [vmem:[#allocation65_spill] sm:$0xff] }
 0x3a1   :  { %v3076_v51 = vadd.f32 %v3060_v15, %v3021_v57  ;;  %v3077_v27 = vadd.f32 %v3061_v7, %v3022_v4  ;;  %v3116_v60 = vmul.f32 %v7547_v23, %v3094_v24  ;;  %v3170_v63 = vmul.f32 %v7577_v5, %v3148_v55 }
 0x3a2   :  { %v3171_v47 = vmul.f32 %v7577_v5, %v3149_v32  ;;  %vm9474_vm4 = vcmp.eq.s32.totalorder %v7001_v46, 1  ;;  %vm9476_vm9 = vcmp.eq.s32.totalorder %v9475_v37, 1  ;;  %vm9477_vm7 = vcmp.eq.s32.totalorder %v6805_v35, 1 }
 0x3a3   :  { %v3203_v8 = vsel %vm9474_vm4, %v2859_v30, 0.0  ;;  %v3204_v39 = vsel %vm9476_vm9, %v2860_v26, 0.0  ;;  %v2737_v58 = vsel %vm9477_vm7, %v2721_v25, 0.0  ;;  %v3131_v13 = vadd.f32 %v3115_v44, %v3076_v51 }
 0x3a4   :  { %v3132_v1 = vadd.f32 %v3116_v60, %v3077_v27  ;;  %v3225_v36 = vmul.f32 %v7597_v16, %v3203_v8  ;;  %v3226_v6 = vmul.f32 %v7597_v16, %v3204_v39  ;;  %vm9478_vm3 = vcmp.eq.s32.totalorder %v6802_v62, 1  ;;  %v9487_v8 = vld [vmem:[#allocation9_spill] sm:$0xff] }
 0x3a5   :  { %v2738_v56 = vsel %vm9478_vm3, %v2722_v38, 0.0  ;;  %v2759_v46 = vmul.f32 %v7453_v61, %v2737_v58  ;;  %vm9479_vm12 = vcmp.eq.s32.totalorder %v6810_v0, 1  ;;  %vm9480_vm2 = vcmp.eq.s32.totalorder %v6808_v11, 1 }
 0x3a6   :  { %v2807_v30 = vsel %vm9479_vm12, %v2791_v59, 0.0  ;;  %v2808_v35 = vsel %vm9480_vm2, %v2792_v19, 0.0  ;;  %v3186_v26 = vadd.f32 %v3170_v63, %v3131_v13  ;;  %v3187_v15 = vadd.f32 %v3171_v47, %v3132_v1 }
 0x3a7   :  { %v2760_v57 = vmul.f32 %v7453_v61, %v2738_v56  ;;  %v2829_v4 = vmul.f32 %v7471_v20, %v2807_v30  ;;  %v2830_v7 = vmul.f32 %v7471_v20, %v2808_v35  ;;  %vm9481_vm13 = vcmp.eq.s32.totalorder %v6831_v33, 1  ;;  %v9493_v56 = vld [vmem:[#allocation108_spill] sm:$0xff]  ;;  %v9496_v35 = vld [vmem:[#allocation107_spill] sm:$0xff] }
 0x3a8   :  { %v2877_v62 = vsel %vm9481_vm13, %v2861_v9, 0.0  ;;  %vm9482_vm0 = vcmp.eq.s32.totalorder %v6829_v17, 1  ;;  %vm9484_vm5 = vcmp.eq.s32.totalorder %v9483_v21, 1  ;;  %v3241_v2 = vadd.f32 %v3225_v36, %v3186_v26  ;;  %v9490_v36 = vld [vmem:[#allocation102_spill] sm:$0xff] }
 0x3a9   :  { %v2878_v45 = vsel %vm9482_vm0, %v2862_v43, 0.0  ;;  %v2931_v0 = vsel %vm9484_vm5, %v2721_v25, 0.0  ;;  %v3242_v11 = vadd.f32 %v3226_v6, %v3187_v15  ;;  %v2845_v24 = vadd.f32 %v2829_v4, %v2759_v46  ;;  %v2723_v15 = vld [vmem:[#allocation3 + $0x77] sm:$0xff] }
 0x3aa   :  { %v2899_v44 = vmul.f32 %v7448_v10, %v2877_v62  ;;  %v2846_v42 = vadd.f32 %v2830_v7, %v2760_v57  ;;  %v2900_v55 = vmul.f32 %v7448_v10, %v2878_v45  ;;  %vm9486_vm11 = vcmp.eq.s32.totalorder %v9485_v12, 1  ;;  %v2724_v57 = vld [vmem:[#allocation3 + $0x7f] sm:$0xff]  ;;  %v9498_v7 = vld [vmem:[#allocation113_spill] sm:$0xff]  ;;  %v9500_v62 = vld [vmem:[#allocation82_spill] sm:$0xff] }
 0x3ab   :  { %v7913_v32 = vsel %vm9486_vm11, %v2722_v38, 0.0  ;;  %v2952_v33 = vmul.f32 %v7497_v54, %v7841_v14  ;;  %v3264_v17 = vadd.f32 %v7617_v49, %v3241_v2  ;;  %v3265_v51 = vadd.f32 %v7617_v49, %v3242_v11  ;;  %v2793_v11 = vld [vmem:[#allocation3 + $0x78] sm:$0xff] }
 0x3ac   :  { %v7919_v27 = vadd.f32 %v2899_v44, %v2845_v24  ;;  %v2953_v60 = vmul.f32 %v7497_v54, %v2931_v0  ;;  %v7922_v63 = vadd.f32 %v2900_v55, %v2846_v42  ;;  %vm9488_vm6 = vcmp.eq.s32.totalorder %v9487_v8, 1  ;;  %v9502_v24 = vld [vmem:[#allocation117_spill] sm:$0xff]  ;;  %v9504_v42 = vld [vmem:[#allocation116_spill] sm:$0xff]  ;;  %v9506_v12 = vld [vmem:[#allocation99_spill] sm:$0xff] }
 0x3ad   :  { %v2968_v47 = vadd.f32 %v2952_v33, %v7844_v41  ;;  %v2986_v37 = vsel %vm9488_vm6, %v2791_v59, 0.0  ;;  %vm9489_vm10 = vcmp.eq.s32.totalorder %v6969_v52, 1  ;;  %v3276_v14 = vpack.c.bf16 %v3265_v51, %v3264_v17  ;;  %v9508_v33 = vld [vmem:[#allocation98_spill] sm:$0xff]  ;;  %v2863_v8 = vld [vmem:[#allocation3 + $0x79] sm:$0xff] }
 0x3ae   :  { %v7929_v39 = vsel %vm9489_vm10, %v2792_v19, 0.0  ;;  %v2969_v58 = vadd.f32 %v2953_v60, %v7850_v29  ;;  %v3007_v13 = vmul.f32 %v7518_v50, %v7856_v31  ;;  %v3008_v1 = vmul.f32 %v7518_v50, %v2986_v37  ;;  %v2864_v37 = vld [vmem:[#allocation3 + $0x81] sm:$0xff] }
 0x3af   :  { %vm9491_vm8 = vcmp.eq.s32.totalorder %v9490_v36, 1  ;;  %vm9492_vm15 = vcmp.eq.s32.totalorder %v7072_v48, 1  ;;  %v3062_v52 = vmul.f32 %v7538_v53, %v7867_v22  ;;  %vm9494_vm1 = vcmp.eq.s32.totalorder %v9493_v56, 1 }
 0x3b0   :  { %v3041_v6 = vsel %vm9491_vm8, %v2861_v9, 0.0  ;;  %v7939_v41 = vsel %vm9492_vm15, %v2862_v43, 0.0  ;;  %v3095_v46 = vsel %vm9494_vm1, %v2721_v25, 0.0  ;;  %vm9495_vm14 = vcmask 261120  }
 0x3b1   :  { %3911 = vmatprep.mubr.msk.bf16.mxu1 %vm9495_vm14, %v3276_v14  ;;  %v3023_v29 = vadd.f32 %v3007_v13, %v2968_v47  ;;  %v3024_v30 = vadd.f32 %v3008_v1, %v2969_v58  ;;  %v3063_v31 = vmul.f32 %v7538_v53, %v3041_v6  ;;  %vm9497_vm4 = vcmp.eq.s32.totalorder %v9496_v35, 1  ;;  %v9510_v58 = vld [vmem:[#allocation101_spill] sm:$0xff]  ;;  %v9512_v13 = vld [vmem:[#allocation100_spill] sm:$0xff] }
 0x3b2   :  { %v3096_v26 = vsel %vm9497_vm4, %v2722_v38, 0.0  ;;  %v3117_v48 = vmul.f32 %v7547_v23, %v3095_v46  ;;  %vm9499_vm9 = vcmp.eq.s32.totalorder %v9498_v7, 1  ;;  %vm9501_vm7 = vcmp.eq.s32.totalorder %v9500_v62, 1  ;;  %v2794_v38 = vld [vmem:[#allocation3 + $0x80] sm:$0xff]  ;;  %v9514_v46 = vld [vmem:[#allocation106_spill] sm:$0xff]  ;;  %v9518_v35 = vld [vmem:[#allocation109_spill] sm:$0xff] }
 0x3b3   :  { %v3118_v4 = vmul.f32 %v7547_v23, %v3096_v26  ;;  %v3150_v22 = vsel %vm9499_vm9, %v2791_v59, 0.0  ;;  %v3151_v25 = vsel %vm9501_vm7, %v2792_v19, 0.0  ;;  %v3078_v45 = vadd.f32 %v3062_v52, %v3023_v29 }
 0x3b4   :  { %v3079_v21 = vadd.f32 %v3063_v31, %v3024_v30  ;;  %v3172_v0 = vmul.f32 %v7577_v5, %v3150_v22  ;;  %v3173_v2 = vmul.f32 %v7577_v5, %v3151_v25  ;;  %vm9503_vm3 = vcmp.eq.s32.totalorder %v9502_v24, 1  ;;  %v9516_v30 = vld [vmem:[#allocation105_spill] sm:$0xff] }
 0x3b5   :  { %v3205_v44 = vsel %vm9503_vm3, %v2861_v9, 0.0  ;;  %vm9505_vm12 = vcmp.eq.s32.totalorder %v9504_v42, 1  ;;  %vm9507_vm2 = vcmp.eq.s32.totalorder %v9506_v12, 1  ;;  %vm9509_vm13 = vcmp.eq.s32.totalorder %v9508_v33, 1 }
 0x3b6   :  { %v3206_v55 = vsel %vm9505_vm12, %v2862_v43, 0.0  ;;  %v2739_v59 = vsel %vm9507_vm2, %v2723_v15, 0.0  ;;  %v2740_v19 = vsel %vm9509_vm13, %v2724_v57, 0.0  ;;  %v3133_v17 = vadd.f32 %v3117_v48, %v3078_v45 }
 0x3b7   :  { %v3134_v51 = vadd.f32 %v3118_v4, %v3079_v21  ;;  %v3227_v60 = vmul.f32 %v7597_v16, %v3205_v44  ;;  %v3228_v47 = vmul.f32 %v7597_v16, %v3206_v55  ;;  %v2761_v14 = vmul.f32 %v7453_v61, %v2739_v59 }
 0x3b8   :  { %v2762_v9 = vmul.f32 %v7453_v61, %v2740_v19  ;;  %vm9511_vm0 = vcmp.eq.s32.totalorder %v9510_v58, 1  ;;  %vm9513_vm5 = vcmp.eq.s32.totalorder %v9512_v13, 1  ;;  %v3188_v36 = vadd.f32 %v3172_v0, %v3133_v17  ;;  %v9528_v17 = vld [vmem:[#allocation119_spill] sm:$0xff]  ;;  %v9534_v58 = vld [vmem:[#allocation128_spill] sm:$0xff] }
 0x3b9   :  { %v2809_v43 = vsel %vm9511_vm0, %v2793_v11, 0.0  ;;  %v2810_v1 = vsel %vm9513_vm5, %v2794_v38, 0.0  ;;  %v3189_v6 = vadd.f32 %v3173_v2, %v3134_v51  ;;  %vm9515_vm11 = vcmp.eq.s32.totalorder %v9514_v46, 1 }
 0x3ba   :  { %v2831_v52 = vmul.f32 %v7471_v20, %v2809_v43  ;;  %v2832_v56 = vmul.f32 %v7471_v20, %v2810_v1  ;;  %v2879_v29 = vsel %vm9515_vm11, %v2863_v8, 0.0  ;;  %vm9517_vm6 = vcmp.eq.s32.totalorder %v9516_v30, 1 }
 0x3bb   :  { %v2880_v31 = vsel %vm9517_vm6, %v2864_v37, 0.0  ;;  %vm9519_vm10 = vcmp.eq.s32.totalorder %v9518_v35, 1  ;;  %vm9520_vm8 = vcmp.eq.s32.totalorder %v6914_v18, 1  ;;  %v3243_v48 = vadd.f32 %v3227_v60, %v3188_v36  ;;  %v2919_v60 = vld [vmem:[#allocation3 + $0x87] sm:$0xff] }
 0x3bc   :  { %v2933_v61 = vsel %vm9519_vm10, %v2723_v15, 0.0  ;;  %v2934_v26 = vsel %vm9520_vm8, %v2724_v57, 0.0  ;;  %v3244_v4 = vadd.f32 %v3228_v47, %v3189_v6  ;;  %v2847_v7 = vadd.f32 %v2831_v52, %v2761_v14  ;;  %v9530_v47 = vld [vmem:[#allocation124_spill] sm:$0xff]  ;;  %v9532_v14 = vld [vmem:[#allocation123_spill] sm:$0xff]  ;;  %v3029_v6 = vld [vmem:[#allocation3 + $0x89] sm:$0xff] }
 0x3bd   :  { %v2848_v22 = vadd.f32 %v2832_v56, %v2762_v9  ;;  %v2901_v62 = vmul.f32 %v7448_v10, %v2879_v29  ;;  %v2902_v20 = vmul.f32 %v7448_v10, %v2880_v31  ;;  %v2954_v25 = vmul.f32 %v7497_v54, %v7913_v32  ;;  %v2974_v36 = vld [vmem:[#allocation3 + $0x88] sm:$0xff]  ;;  %v9536_v52 = vld [vmem:[#allocation127_spill] sm:$0xff] }
 0x3be   :  { %v2955_v45 = vmul.f32 %v7497_v54, %v2933_v61  ;;  %v3266_v21 = vadd.f32 %v7617_v49, %v3243_v48  ;;  %v3267_v0 = vadd.f32 %v7617_v49, %v3244_v4  ;;  %vm9521_vm15 = vcmp.eq.s32.totalorder %v6954_v40, 1  ;;  %v9540_v48 = vld [vmem:[#allocation115_spill] sm:$0xff] }
 0x3bf   :  { %v2988_v18 = vsel %vm9521_vm15, %v2793_v11, 0.0  ;;  %vm9522_vm1 = vcmp.eq.s32.totalorder %v7029_v3, 1  ;;  %v2917_v24 = vadd.f32 %v2901_v62, %v2847_v7  ;;  %v2918_v44 = vadd.f32 %v2902_v20, %v2848_v22  ;;  %v3084_v62 = vld [vmem:[#allocation3 + $0x8f] sm:$0xff] }
 0x3c0   :  { %v2989_v2 = vsel %vm9522_vm1, %v2794_v38, 0.0  ;;  %v2970_v42 = vadd.f32 %v2954_v25, %v7919_v27  ;;  %v2971_v10 = vadd.f32 %v2955_v45, %v7922_v63  ;;  %v3277_v55 = vpack.c.bf16 %v3267_v0, %v3266_v21  ;;  %v9525_v27 = vld [vmem:[#allocation120_spill] sm:$0xff]  ;;  %v3139_v20 = vld [vmem:[#allocation3 + $0x90] sm:$0xff] }
 0x3c1   :  { %v3009_v32 = vmul.f32 %v7518_v50, %v7929_v39  ;;  %v3010_v12 = vmul.f32 %v7518_v50, %v2988_v18  ;;  %vm9523_vm14 = vcmp.eq.s32.totalorder %v7064_v34, 1  ;;  %vm9524_vm4 = vcmp.eq.s32.totalorder %v7101_v28, 1 }
 0x3c2   :  { %v3043_v59 = vsel %vm9523_vm14, %v2863_v8, 0.0  ;;  %v3044_v40 = vsel %vm9524_vm4, %v2864_v37, 0.0  ;;  %v3064_v3 = vmul.f32 %v7538_v53, %v7939_v41  ;;  %vm9526_vm9 = vcmp.eq.s32.totalorder %v9525_v27, 1  ;;  %v9550_v27 = vld [vmem:[#allocation126_spill] sm:$0xff] }
 0x3c3   :  { %v3065_v33 = vmul.f32 %v7538_v53, %v3043_v59  ;;  %v3097_v63 = vsel %vm9526_vm9, %v2723_v15, 0.0  ;;  %vm9527_vm7 = vcmask 261120   ;;  %v3025_v19 = vadd.f32 %v3009_v32, %v2970_v42 }
 0x3c4   :  { %3912 = vmatmul.mubr.msk.bf16.gmra.mxu1 %vm9527_vm7, %v3277_v55  ;;  %v3026_v39 = vadd.f32 %v3010_v12, %v2971_v10  ;;  %vm9529_vm3 = vcmp.eq.s32.totalorder %v9528_v17, 1  ;;  %v3119_v34 = vmul.f32 %v7547_v23, %v3097_v63  ;;  %vm9531_vm12 = vcmp.eq.s32.totalorder %v9530_v47, 1  ;;  %v3194_v10 = vld [vmem:[#allocation3 + $0x91] sm:$0xff]  ;;  %v9546_v12 = vld [vmem:[#allocation121_spill] sm:$0xff]  ;;  %vm9556_vm9 = vmmov %vm9527_vm7 }
 0x3c5   :  { %v3098_v51 = vsel %vm9529_vm3, %v2724_v57, 0.0  ;;  %v3152_v41 = vsel %vm9531_vm12, %v2793_v11, 0.0  ;;  %vm9533_vm2 = vcmp.eq.s32.totalorder %v9532_v14, 1  ;;  %vm9535_vm13 = vcmp.eq.s32.totalorder %v9534_v58, 1  ;;  %v9538_v11 = vld [vmem:[#allocation88_spill] sm:$0xff]  ;;  %v9552_v17 = vld [vmem:[#allocation129_spill] sm:$0xff] }
 0x3c6   :  { %v3120_v28 = vmul.f32 %v7547_v23, %v3098_v51  ;;  %v3153_v9 = vsel %vm9533_vm2, %v2794_v38, 0.0  ;;  %v3207_v15 = vsel %vm9535_vm13, %v2863_v8, 0.0  ;;  %v3080_v43 = vadd.f32 %v3064_v3, %v3025_v19  ;;  %v9548_v3 = vld [vmem:[#allocation125_spill] sm:$0xff] }
 0x3c7   :  { %v3081_v13 = vadd.f32 %v3065_v33, %v3026_v39  ;;  %v3174_v1 = vmul.f32 %v7577_v5, %v3152_v41  ;;  %v3175_v57 = vmul.f32 %v7577_v5, %v3153_v9  ;;  %vm9537_vm0 = vcmp.eq.s32.totalorder %v9536_v52, 1 }
 0x3c8   :  { %v3208_v56 = vsel %vm9537_vm0, %v2864_v37, 0.0  ;;  %v3229_v46 = vmul.f32 %v7597_v16, %v3207_v15  ;;  %vm9539_vm5 = vcmp.eq.s32.totalorder %v9538_v11, 1  ;;  %v2956_v38 = vmul.f32 %v7497_v54, %v2934_v26  ;;  %v9542_v37 = vld [vmem:[#allocation118_spill] sm:$0xff] }
 0x3c9   :  { %v2935_v29 = vsel %vm9539_vm5, %v2919_v60, 0.0  ;;  %v3135_v30 = vadd.f32 %v3119_v34, %v3080_v43  ;;  %v3136_v8 = vadd.f32 %v3120_v28, %v3081_v13  ;;  %v3230_v31 = vmul.f32 %v7597_v16, %v3208_v56  ;;  %v9554_v28 = vld [vmem:[#allocation130_spill] sm:$0xff] }
 0x3ca   :  { %v2957_v35 = vmul.f32 %v7497_v54, %v2935_v29  ;;  %v2972_v61 = vadd.f32 %v2956_v38, %v2917_v24  ;;  %vm9541_vm11 = vcmp.eq.s32.totalorder %v9540_v48, 1  ;;  %v3011_v7 = vmul.f32 %v7518_v50, %v2989_v2  ;;  %v9544_v24 = vld [vmem:[#allocation122_spill] sm:$0xff] }
 0x3cb   :  { %v2990_v4 = vsel %vm9541_vm11, %v2974_v36, 0.0  ;;  %vm9543_vm6 = vcmp.eq.s32.totalorder %v9542_v37, 1  ;;  %v3190_v25 = vadd.f32 %v3174_v1, %v3135_v30  ;;  %v3191_v45 = vadd.f32 %v3175_v57, %v3136_v8 }
 0x3cc   :  { %v3045_v22 = vsel %vm9543_vm6, %v3029_v6, 0.0  ;;  %v2973_v26 = vadd.f32 %v2957_v35, %v2918_v44  ;;  %v3012_v21 = vmul.f32 %v7518_v50, %v2990_v4  ;;  %v3027_v0 = vadd.f32 %v3011_v7, %v2972_v61 }
 0x3cd   :  { %v3066_v18 = vmul.f32 %v7538_v53, %v3044_v40  ;;  %v3067_v54 = vmul.f32 %v7538_v53, %v3045_v22  ;;  %vm9545_vm10 = vcmp.eq.s32.totalorder %v9544_v24, 1  ;;  %v3245_v2 = vadd.f32 %v3229_v46, %v3190_v25 }
 0x3ce   :  { %v3099_v42 = vsel %vm9545_vm10, %v2919_v60, 0.0  ;;  %v3246_v55 = vadd.f32 %v3230_v31, %v3191_v45  ;;  %v3028_v32 = vadd.f32 %v3012_v21, %v2973_v26  ;;  %vm9547_vm8 = vcmp.eq.s32.totalorder %v9546_v12, 1 }
 0x3cf   :  { %v3100_v59 = vsel %vm9547_vm8, %v3084_v62, 0.0  ;;  %vm9549_vm15 = vcmp.eq.s32.totalorder %v9548_v3, 1  ;;  %v3082_v33 = vadd.f32 %v3066_v18, %v3027_v0  ;;  %v3121_v50 = vmul.f32 %v7547_v23, %v3099_v42 }
 0x3d0   :  { %v3155_v44 = vsel %vm9549_vm15, %v3139_v20, 0.0  ;;  %vm9551_vm1 = vcmp.eq.s32.totalorder %v9550_v27, 1  ;;  %v3268_v53 = vadd.f32 %v7617_v49, %v3245_v2  ;;  %v3269_v63 = vadd.f32 %v7617_v49, %v3246_v55 }
 0x3d1   :  { %v3154_v40 = vsel %vm9551_vm1, %v2974_v36, 0.0  ;;  %v3083_v19 = vadd.f32 %v3067_v54, %v3028_v32  ;;  %v3122_v39 = vmul.f32 %v7547_v23, %v3100_v59  ;;  %vm9553_vm14 = vcmp.eq.s32.totalorder %v9552_v17, 1 }
 0x3d2   :  { %v3210_v51 = vsel %vm9553_vm14, %v3194_v10, 0.0  ;;  %v3137_v34 = vadd.f32 %v3121_v50, %v3082_v33  ;;  %v3176_v60 = vmul.f32 %v7577_v5, %v3154_v40  ;;  %vm9555_vm4 = vcmp.eq.s32.totalorder %v9554_v28, 1 }
 0x3d3   :  { %v3209_v47 = vsel %vm9555_vm4, %v3029_v6, 0.0  ;;  %v3177_v41 = vmul.f32 %v7577_v5, %v3155_v44  ;;  %v3278_v14 = vpack.c.bf16 %v3269_v63, %v3268_v53  ;;  %v3138_v9 = vadd.f32 %v3122_v39, %v3083_v19 }
 0x3d4   :  { %v3192_v58 = vadd.f32 %v3176_v60, %v3137_v34  ;;  %v3231_v15 = vmul.f32 %v7597_v16, %v3209_v47  ;;  %v3232_v43 = vmul.f32 %v7597_v16, %v3210_v51  ;;  %v3799_v16 = vld [vmem:[%s8248_s15] ss:$0 sm:$0xff]  ;;  %vm3424_vm3 = vcmask 523264  }
 0x3d5   :  { %3915 = vmatprep.mubr.msk.bf16.mxu1 %vm9556_vm9, %v3278_v14  ;;  %v3193_v23 = vadd.f32 %v3177_v41, %v3138_v9  ;;  %vm4022_vm12 = vmmov 0   ;;  %vm3708_vm2 = vcmask 517120  }
 0x3d6   :  { %v3247_v13 = vadd.f32 %v3231_v15, %v3192_v58 }
 0x3d7   :  { %v3248_v1 = vadd.f32 %v3232_v43, %v3193_v23 }
 0x3d8   :  { %v3270_v57 = vadd.f32 %v7617_v49, %v3247_v13 }
 0x3d9   :  { %v3271_v36 = vadd.f32 %v7617_v49, %v3248_v1  ;;  %v9557_v1 = vmov 0.0  }
 0x3da   :  { %3951 = vmatprep.mubr.msk.f32.mxu0 %vm4022_vm12, %v9557_v1 }
 0x3db   :  { %v3279_v52 = vpack.c.bf16 %v3271_v36, %v3270_v57 }
 0x3dd   :  { %3916 = vmatmul.mubr.msk.bf16.gmra.mxu1 %vm9527_vm7, %v3279_v52 }
 0x432   :  { %v3905_v5 = vpop.f32.mrf.mxu1 }
 0x433   :  { %v8070_v8 = vadd.f32 %v3905_v5, %v3799_v16 }
 0x434   :  { %v3361_v6 = vpop.f32.mrf.mxu1 }
 0x435   :  { %v8066_v38 = vadd.f32 %v3799_v16, %v3361_v6  ;;  %v3428_v48 = vsel %vm3424_vm3, %v8070_v8, 0.0 }
 0x436   :  { %v3906_v56 = vpop.f32.mrf.mxu1 }
 0x437   :  { %v3425_v31 = vsel %vm3424_vm3, %v8066_v38, 0.0  ;;  %v3373_v4 = vadd.f32 %v3906_v56, %v3799_v16 }
 0x438   :  { %v3364_v46 = vpop.f32.mrf.mxu1 }
 0x439   :  { %v8064_v11 = vadd.f32 %v3799_v16, %v3364_v46  ;;  %v3430_v22 = vsel %vm3424_vm3, %v3373_v4, 0.0 }
 0x43b   :  { %v3426_v49 = vsel %vm3424_vm3, %v8064_v11, 0.0 }
 0x43c   :  { %v3427_v35 = vadd.f32 %v3426_v49, %v3425_v31 }
 0x43e   :  { %v3429_v7 = vadd.f32 %v3428_v48, %v3427_v35 }
 0x440   :  { %v3431_v20 = vadd.f32 %v3430_v22, %v3429_v7 }
 0x45f   :  { %v3909_v29 = vpop.f32.mrf.mxu1 }
 0x460   :  { %v3386_v0 = vadd.f32 %v3909_v29, %v3799_v16 }
 0x461   :  { %v3377_v30 = vpop.f32.mrf.mxu1 }
 0x462   :  { %v3378_v62 = vadd.f32 %v3799_v16, %v3377_v30  ;;  %v3436_v42 = vsel %vm3424_vm3, %v3386_v0, 0.0 }
 0x463   :  { %v3910_v61 = vpop.f32.mrf.mxu1 }
 0x464   :  { %v3432_v45 = vsel %vm3424_vm3, %v3378_v62, 0.0  ;;  %v3389_v10 = vadd.f32 %v3910_v61, %v3799_v16 }
 0x465   :  { %v3380_v37 = vpop.f32.mrf.mxu1  ;;  %v3433_v26 = vadd.f32 %v3432_v45, %v3431_v20 }
 0x466   :  { %v3381_v25 = vadd.f32 %v3799_v16, %v3380_v37  ;;  %v3438_v12 = vsel %vm3424_vm3, %v3389_v10, 0.0 }
 0x468   :  { %v3434_v21 = vsel %vm3424_vm3, %v3381_v25, 0.0 }
 0x469   :  { %v3435_v18 = vadd.f32 %v3434_v21, %v3433_v26 }
 0x46b   :  { %v3437_v2 = vadd.f32 %v3436_v42, %v3435_v18 }
 0x46d   :  { %v3439_v3 = vadd.f32 %v3438_v12, %v3437_v2 }
 0x484   :  { %v3913_v54 = vpop.f32.mrf.mxu1 }
 0x485   :  { %v3402_v40 = vadd.f32 %v3913_v54, %v3799_v16 }
 0x486   :  { %v3393_v24 = vpop.f32.mrf.mxu1 }
 0x487   :  { %v3394_v59 = vadd.f32 %v3799_v16, %v3393_v24  ;;  %v3444_v63 = vsel %vm3424_vm3, %v3402_v40, 0.0 }
 0x488   :  { %v3914_v55 = vpop.f32.mrf.mxu1 }
 0x489   :  { %v3440_v33 = vsel %vm3424_vm3, %v3394_v59, 0.0  ;;  %v3405_v19 = vadd.f32 %v3914_v55, %v3799_v16 }
 0x48a   :  { %v3396_v32 = vpop.f32.mrf.mxu1  ;;  %v3441_v50 = vadd.f32 %v3440_v33, %v3439_v3 }
 0x48b   :  { %v3397_v44 = vadd.f32 %v3799_v16, %v3396_v32  ;;  %v3446_v51 = vsel %vm3424_vm3, %v3405_v19, 0.0 }
 0x48d   :  { %v3442_v27 = vsel %vm3424_vm3, %v3397_v44, 0.0 }
 0x48e   :  { %v3443_v53 = vadd.f32 %v3442_v27, %v3441_v50 }
 0x490   :  { %v3445_v39 = vadd.f32 %v3444_v63, %v3443_v53 }
 0x492   :  { %v3447_v60 = vadd.f32 %v3446_v51, %v3445_v39 }
 0x49d   :  { %v3917_v17 = vpop.f32.mrf.mxu1 }
 0x49e   :  { %v8086_v58 = vadd.f32 %v3917_v17, %v3799_v16 }
 0x49f   :  { %v3409_v34 = vpop.f32.mrf.mxu1 }
 0x4a0   :  { %v3410_v28 = vadd.f32 %v3799_v16, %v3409_v34  ;;  %v3452_v57 = vsel %vm3424_vm3, %v8086_v58, 0.0 }
 0x4a1   :  { %v3918_v47 = vpop.f32.mrf.mxu1 }
 0x4a2   :  { %v3448_v41 = vsel %vm3424_vm3, %v3410_v28, 0.0  ;;  %v8088_v43 = vadd.f32 %v3918_v47, %v3799_v16 }
 0x4a3   :  { %v3449_v14 = vadd.f32 %v3448_v41, %v3447_v60  ;;  %v3412_v9 = vpop.f32.mrf.mxu1 }
 0x4a4   :  { %v3413_v15 = vadd.f32 %v3799_v16, %v3412_v9  ;;  %v3454_v52 = vsel %vm3424_vm3, %v8088_v43, 0.0 }
 0x4a6   :  { %v3450_v23 = vsel %vm3424_vm3, %v3413_v15, 0.0 }
 0x4a7   :  { %v3451_v13 = vadd.f32 %v3450_v23, %v3449_v14 }
 0x4a9   :  { %v3453_v36 = vadd.f32 %v3452_v57, %v3451_v13 }
 0x4ab   :  { %v3455_v5 = vadd.f32 %v3454_v52, %v3453_v36 }
 0x4ad   :  { %v3456_v6 = vrot.slane %v3455_v5, 4 }
 0x4af   :  { %v3457_v56 = vadd.f32 %v3456_v6, %v3455_v5 }
 0x4b1   :  { %v3458_v46 = vrot.slane %v3457_v56, 2 }
 0x4b3   :  { %v3459_v29 = vadd.f32 %v3458_v46, %v3457_v56 }
 0x4b5   :  { %v3460_v16 = vrot.slane %v3459_v29, 1 }
 0x4b7   :  { %v3461_v49 = vadd.f32 %v3460_v16, %v3459_v29 }
 0x4b9   :  { %v3462_v30 = vmul.f32 0.0078125, %v3461_v49 }
 0x4bb   :  { %v8097_v31 = vsub.f32 %v8066_v38, %v3462_v30  ;;  %v8100_v35 = vsub.f32 %v8064_v11, %v3462_v30  ;;  %v8103_v61 = vsub.f32 %v8070_v8, %v3462_v30  ;;  %v8105_v48 = vsub.f32 %v3373_v4, %v3462_v30 }
 0x4bc   :  { %v8111_v22 = vsub.f32 %v3378_v62, %v3462_v30  ;;  %v8115_v20 = vsub.f32 %v3381_v25, %v3462_v30  ;;  %v8121_v26 = vsub.f32 %v3386_v0, %v3462_v30  ;;  %v8126_v54 = vsub.f32 %v3389_v10, %v3462_v30 }
 0x4bd   :  { %v3479_v7 = vmul.f32 %v8097_v31, %v8097_v31  ;;  %v3480_v37 = vmul.f32 %v8100_v35, %v8100_v35  ;;  %v3481_v38 = vmul.f32 %v8103_v61, %v8103_v61  ;;  %v3482_v11 = vmul.f32 %v8105_v48, %v8105_v48 }
 0x4be   :  { %v3483_v21 = vmul.f32 %v8111_v22, %v8111_v22  ;;  %v3484_v25 = vmul.f32 %v8115_v20, %v8115_v20  ;;  %v3471_v2 = vsub.f32 %v3394_v59, %v3462_v30  ;;  %v3485_v55 = vmul.f32 %v8121_v26, %v8121_v26 }
 0x4bf   :  { %v3495_v8 = vsel %vm3424_vm3, %v3479_v7, 0.0  ;;  %v3496_v4 = vsel %vm3424_vm3, %v3480_v37, 0.0  ;;  %v3498_v62 = vsel %vm3424_vm3, %v3481_v38, 0.0  ;;  %v3500_v24 = vsel %vm3424_vm3, %v3482_v11, 0.0 }
 0x4c0   :  { %v3497_v45 = vadd.f32 %v3496_v4, %v3495_v8  ;;  %v3502_v0 = vsel %vm3424_vm3, %v3483_v21, 0.0  ;;  %v3472_v12 = vsub.f32 %v3397_v44, %v3462_v30  ;;  %v3486_v3 = vmul.f32 %v8126_v54, %v8126_v54 }
 0x4c1   :  { %v3504_v10 = vsel %vm3424_vm3, %v3484_v25, 0.0  ;;  %v3473_v50 = vsub.f32 %v3402_v40, %v3462_v30  ;;  %v3487_v27 = vmul.f32 %v3471_v2, %v3471_v2  ;;  %v3506_v53 = vsel %vm3424_vm3, %v3485_v55, 0.0 }
 0x4c2   :  { %v3499_v18 = vadd.f32 %v3498_v62, %v3497_v45  ;;  %v3474_v39 = vsub.f32 %v3405_v19, %v3462_v30  ;;  %v3488_v59 = vmul.f32 %v3472_v12, %v3472_v12  ;;  %v3508_v17 = vsel %vm3424_vm3, %v3486_v3, 0.0 }
 0x4c3   :  { %v3475_v34 = vsub.f32 %v3410_v28, %v3462_v30  ;;  %v3489_v60 = vmul.f32 %v3473_v50, %v3473_v50  ;;  %v3510_v44 = vsel %vm3424_vm3, %v3487_v27, 0.0  ;;  %v3476_v41 = vsub.f32 %v3413_v15, %v3462_v30 }
 0x4c4   :  { %v3501_v42 = vadd.f32 %v3500_v24, %v3499_v18  ;;  %v3490_v14 = vmul.f32 %v3474_v39, %v3474_v39  ;;  %v3512_v9 = vsel %vm3424_vm3, %v3488_v59, 0.0  ;;  %v3477_v40 = vsub.f32 %v8086_v58, %v3462_v30  ;;  %v3810_v18 = vld [vmem:[%s8249_s16] ss:$0 sm:$0xff] }
 0x4c5   :  { %v3491_v13 = vmul.f32 %v3475_v34, %v3475_v34  ;;  %v3514_v57 = vsel %vm3424_vm3, %v3489_v60, 0.0  ;;  %v3478_v36 = vsub.f32 %v8088_v43, %v3462_v30  ;;  %v3492_v52 = vmul.f32 %v3476_v41, %v3476_v41 }
 0x4c6   :  { %v3503_v32 = vadd.f32 %v3502_v0, %v3501_v42  ;;  %v3516_v28 = vsel %vm3424_vm3, %v3490_v14, 0.0  ;;  %v3493_v6 = vmul.f32 %v3477_v40, %v3477_v40  ;;  %v8155_v0 = vld [vmem:[%s8250_s17] ss:$0 sm:$0xff] }
 0x4c7   :  { %v3518_v56 = vsel %vm3424_vm3, %v3491_v13, 0.0  ;;  %v3494_v46 = vmul.f32 %v3478_v36, %v3478_v36  ;;  %v3520_v29 = vsel %vm3424_vm3, %v3492_v52, 0.0 }
 0x4c8   :  { %v3505_v33 = vadd.f32 %v3504_v10, %v3503_v32  ;;  %v3522_v58 = vsel %vm3424_vm3, %v3493_v6, 0.0 }
 0x4c9   :  { %v3524_v7 = vsel %vm3424_vm3, %v3494_v46, 0.0 }
 0x4ca   :  { %v3507_v63 = vadd.f32 %v3506_v53, %v3505_v33 }
 0x4cc   :  { %v3509_v51 = vadd.f32 %v3508_v17, %v3507_v63 }
 0x4ce   :  { %v3511_v47 = vadd.f32 %v3510_v44, %v3509_v51 }
 0x4d0   :  { %v3513_v23 = vadd.f32 %v3512_v9, %v3511_v47 }
 0x4d2   :  { %v3515_v19 = vadd.f32 %v3514_v57, %v3513_v23 }
 0x4d4   :  { %v3517_v5 = vadd.f32 %v3516_v28, %v3515_v19 }
 0x4d6   :  { %v3519_v15 = vadd.f32 %v3518_v56, %v3517_v5 }
 0x4d8   :  { %v3521_v16 = vadd.f32 %v3520_v29, %v3519_v15 }
 0x4da   :  { %v3523_v49 = vadd.f32 %v3522_v58, %v3521_v16 }
 0x4dc   :  { %v3525_v37 = vadd.f32 %v3524_v7, %v3523_v49 }
 0x4de   :  { %v3526_v38 = vrot.slane %v3525_v37, 4 }
 0x4e0   :  { %v3527_v43 = vadd.f32 %v3526_v38, %v3525_v37 }
 0x4e2   :  { %v3528_v30 = vrot.slane %v3527_v43, 2 }
 0x4e4   :  { %v3529_v11 = vadd.f32 %v3528_v30, %v3527_v43 }
 0x4e6   :  { %v3530_v8 = vrot.slane %v3529_v11, 1 }
 0x4e8   :  { %v3531_v4 = vadd.f32 %v3530_v8, %v3529_v11 }
 0x4ea   :  { %v3532_v45 = vmul.f32 0.0078125, %v3531_v4 }
 0x4ec   :  { %v3533_v21 = vadd.f32 1e-05, %v3532_v45 }
 0x4ee   :  { %3977 = vrsqrt.f32 %v3533_v21 }
 0x4fb   :  { %v3978_v62 = vpop.eup %3977 }
 0x4fc   :  { %v3548_v25 = vmul.f32 %v3978_v62, %v3476_v41  ;;  %v3550_v24 = vmul.f32 %v3978_v62, %v3478_v36  ;;  %v3549_v42 = vmul.f32 %v3978_v62, %v3477_v40  ;;  %v3547_v55 = vmul.f32 %v3978_v62, %v3475_v34 }
 0x4fd   :  { %v3546_v32 = vmul.f32 %v3978_v62, %v3474_v39  ;;  %v3545_v3 = vmul.f32 %v3978_v62, %v3473_v50  ;;  %v3544_v10 = vmul.f32 %v3978_v62, %v3472_v12  ;;  %v3543_v33 = vmul.f32 %v3978_v62, %v3471_v2 }
 0x4fe   :  { %v3571_v27 = vmul.f32 %v3810_v18, %v3548_v25  ;;  %v3573_v53 = vmul.f32 %v3810_v18, %v3550_v24  ;;  %v3572_v63 = vmul.f32 %v3810_v18, %v3549_v42  ;;  %v3570_v59 = vmul.f32 %v3810_v18, %v3547_v55  ;;  %v3629_v42 = vld [vmem:[%s9558_s10] sm:$0x3] }
 0x4ff   :  { %v3569_v17 = vmul.f32 %v3810_v18, %v3546_v32  ;;  %v3568_v51 = vmul.f32 %v3810_v18, %v3545_v3  ;;  %v3567_v60 = vmul.f32 %v3810_v18, %v3544_v10  ;;  %v3566_v44 = vmul.f32 %v3810_v18, %v3543_v33  ;;  %v3812_v55 = vld [vmem:[%s8251_s18] ss:$0 sm:$0xff] }
 0x500   :  { %v3596_v47 = vadd.f32 %v8155_v0, %v3573_v53  ;;  %v3595_v34 = vadd.f32 %v8155_v0, %v3572_v63  ;;  %v3594_v41 = vadd.f32 %v8155_v0, %v3571_v27  ;;  %v3593_v14 = vadd.f32 %v8155_v0, %v3570_v59 }
 0x501   :  { %v3592_v50 = vadd.f32 %v8155_v0, %v3569_v17  ;;  %v8163_v2 = vadd.f32 %v8155_v0, %v3568_v51  ;;  %v8166_v12 = vadd.f32 %v8155_v0, %v3567_v60  ;;  %v8169_v39 = vadd.f32 %v8155_v0, %v3566_v44 }
 0x502   :  { %v3612_v9 = vmax.f32 %v3596_v47, 0.0  ;;  %v3611_v23 = vmax.f32 %v3595_v34, 0.0  ;;  %v3610_v40 = vmax.f32 %v3594_v41, 0.0  ;;  %v3609_v13 = vmax.f32 %v3593_v14, 0.0 }
 0x503   :  { %v3608_v57 = vmax.f32 %v3592_v50, 0.0  ;;  %v3607_v19 = vmax.f32 %v8163_v2, 0.0  ;;  %v3606_v36 = vmax.f32 %v8166_v12, 0.0  ;;  %v3605_v52 = vmax.f32 %v8169_v39, 0.0 }
 0x504   :  { %3628 = vst.msk [vmem:[#allocation5 + $0x78] sm:$0xff] %vm3424_vm3, %v3612_v9  ;;  %3920 = vmatpush3.msra.mxu0 %v3612_v9  ;;  %3627 = vst.msk [vmem:[#allocation5 + $0x70] sm:$0xff] %vm3424_vm3, %v3611_v23  ;;  %v3542_v28 = vmul.f32 %v3978_v62, %v8126_v54  ;;  %v3541_v5 = vmul.f32 %v3978_v62, %v8121_v26  ;;  %v3540_v6 = vmul.f32 %v3978_v62, %v8115_v20 }
 0x505   :  { %3626 = vst.msk [vmem:[#allocation5 + $0x68] sm:$0xff] %vm3424_vm3, %v3610_v40  ;;  %3625 = vst.msk [vmem:[#allocation5 + $0x60] sm:$0xff] %vm3424_vm3, %v3609_v13  ;;  %v3539_v56 = vmul.f32 %v3978_v62, %v8111_v22  ;;  %3921 = vmatprep.subr.mxu0 %v9557_v1  ;;  %v3538_v15 = vmul.f32 %v3978_v62, %v8105_v48  ;;  %v3537_v54 = vmul.f32 %v3978_v62, %v8103_v61 }
 0x506   :  { %3624 = vst.msk [vmem:[#allocation5 + $0x58] sm:$0xff] %vm3424_vm3, %v3608_v57  ;;  %3623 = vst.msk [vmem:[#allocation5 + $0x50] sm:$0xff] %vm3424_vm3, %v3607_v19  ;;  %v3536_v26 = vmul.f32 %v3978_v62, %v8100_v35  ;;  %v3535_v20 = vmul.f32 %v3978_v62, %v8097_v31  ;;  %3922 = vmatpush3.msra.mxu0 %v3611_v23  ;;  %v3565_v22 = vmul.f32 %v3810_v18, %v3542_v28 }
 0x507   :  { %3622 = vst.msk [vmem:[#allocation5 + $0x48] sm:$0xff] %vm3424_vm3, %v3606_v36  ;;  %3621 = vst.msk [vmem:[#allocation5 + $0x40] sm:$0xff] %vm3424_vm3, %v3605_v52  ;;  %v3564_v46 = vmul.f32 %v3810_v18, %v3541_v5  ;;  %v3563_v29 = vmul.f32 %v3810_v18, %v3540_v6  ;;  %v3562_v16 = vmul.f32 %v3810_v18, %v3539_v56  ;;  %3923 = vmatprep.subr.mxu0 %v9557_v1 }
 0x508   :  { %v3561_v58 = vmul.f32 %v3810_v18, %v3538_v15  ;;  %v3560_v49 = vmul.f32 %v3810_v18, %v3537_v54  ;;  %v3559_v7 = vmul.f32 %v3810_v18, %v3536_v26  ;;  %v3558_v37 = vmul.f32 %v3810_v18, %v3535_v20  ;;  %3924 = vmatpush3.msra.mxu0 %v3610_v40 }
 0x509   :  { %v3588_v48 = vadd.f32 %v8155_v0, %v3565_v22  ;;  %v3587_v61 = vadd.f32 %v8155_v0, %v3564_v46  ;;  %v3586_v35 = vadd.f32 %v8155_v0, %v3563_v29  ;;  %v3585_v31 = vadd.f32 %v8155_v0, %v3562_v16  ;;  %3925 = vmatprep.subr.mxu0 %v9557_v1 }
 0x50a   :  { %v3584_v38 = vadd.f32 %v8155_v0, %v3561_v58  ;;  %v3583_v43 = vadd.f32 %v8155_v0, %v3560_v49  ;;  %v3582_v30 = vadd.f32 %v8155_v0, %v3559_v7  ;;  %v3581_v11 = vadd.f32 %v8155_v0, %v3558_v37  ;;  %3926 = vmatpush3.msra.mxu0 %v3609_v13 }
 0x50b   :  { %v3604_v8 = vmax.f32 %v3588_v48, 0.0  ;;  %v3603_v4 = vmax.f32 %v3587_v61, 0.0  ;;  %v3602_v45 = vmax.f32 %v3586_v35, 0.0  ;;  %v3601_v21 = vmax.f32 %v3585_v31, 0.0  ;;  %3927 = vmatprep.subr.mxu0 %v9557_v1 }
 0x50c   :  { %v3600_v62 = vmax.f32 %v3584_v38, 0.0  ;;  %v3599_v18 = vmax.f32 %v3583_v43, 0.0  ;;  %v3598_v25 = vmax.f32 %v3582_v30, 0.0  ;;  %v3597_v24 = vmax.f32 %v3581_v11, 0.0  ;;  %3928 = vmatpush3.msra.mxu0 %v3608_v57 }
 0x50d   :  { %3620 = vst.msk [vmem:[#allocation5 + $0x38] sm:$0xff] %vm3424_vm3, %v3604_v8  ;;  %3619 = vst.msk [vmem:[#allocation5 + $0x30] sm:$0xff] %vm3424_vm3, %v3603_v4  ;;  %3929 = vmatprep.subr.mxu0 %v9557_v1 }
 0x50e   :  { %3618 = vst.msk [vmem:[#allocation5 + $0x28] sm:$0xff] %vm3424_vm3, %v3602_v45  ;;  %3617 = vst.msk [vmem:[#allocation5 + $0x20] sm:$0xff] %vm3424_vm3, %v3601_v21  ;;  %3930 = vmatpush3.msra.mxu0 %v3607_v19 }
 0x50f   :  { %3616 = vst.msk [vmem:[#allocation5 + $0x18] sm:$0xff] %vm3424_vm3, %v3600_v62  ;;  %3615 = vst.msk [vmem:[#allocation5 + $0x10] sm:$0xff] %vm3424_vm3, %v3599_v18  ;;  %3931 = vmatprep.subr.mxu0 %v9557_v1 }
 0x510   :  { %3614 = vst.msk [vmem:[#allocation5 + $0x8] sm:$0xff] %vm3424_vm3, %v3598_v25  ;;  %3613 = vst.msk [vmem:[#allocation5] sm:$0xff] %vm3424_vm3, %v3597_v24  ;;  %3932 = vmatpush3.msra.mxu0 %v3606_v36 }
 0x511   :  { %3933 = vmatprep.subr.mxu0 %v9557_v1 }
 0x512   :  { %3934 = vmatpush3.msra.mxu0 %v3605_v52 }
 0x513   :  { %3935 = vmatprep.subr.mxu0 %v9557_v1 }
 0x514   :  { %3936 = vmatpush3.msra.mxu0 %v3604_v8 }
 0x515   :  { %3937 = vmatprep.subr.mxu0 %v9557_v1 }
 0x516   :  { %3938 = vmatpush3.msra.mxu0 %v3603_v4 }
 0x517   :  { %3939 = vmatprep.subr.mxu0 %v9557_v1 }
 0x518   :  { %3940 = vmatpush3.msra.mxu0 %v3602_v45 }
 0x519   :  { %3941 = vmatprep.subr.mxu0 %v9557_v1 }
 0x51a   :  { %3942 = vmatpush3.msra.mxu0 %v3601_v21 }
 0x51b   :  { %3943 = vmatprep.subr.mxu0 %v9557_v1 }
 0x51c   :  { %3944 = vmatpush3.msra.mxu0 %v3600_v62 }
 0x51d   :  { %3945 = vmatprep.subr.mxu0 %v9557_v1 }
 0x51e   :  { %3946 = vmatpush3.msra.mxu0 %v3599_v18 }
 0x51f   :  { %3947 = vmatprep.subr.mxu0 %v9557_v1 }
 0x520   :  { %3948 = vmatpush3.msra.mxu0 %v3598_v25 }
 0x521   :  { %3949 = vmatprep.subr.mxu0 %v9557_v1 }
 0x522   :  { %3950 = vmatpush3.msra.mxu0 %v3597_v24 }
 0x523   :  { %3952 = vmatmul.mubr.f32.vlgmr.msra.gmra.mxu0 %v3629_v42 }
 0x5e3   :  { %v3696_v0 = vpop.f32.mrf.mxu0 }
 0x5e4   :  { %v3707_v32 = vmul.f32 %v3812_v55, %v3696_v0 }
 0x5e5   :  { %v3953_v3 = vpop.f32.mrf.mxu0 }
 0x5e6   :  { %v3709_v10 = vsel %vm3708_vm2, %v3707_v32, 0.0 }
 0x5e7   :  { %3710 = vadd.xlane.f32.xlu0 %v3709_v10 }
 0x5e8   :  { %4009 = shalt.err (!%p4006_p4)
}
 0x5e9   :  { %s4024_s27 = smov 128   ;;  %s4025_s3 = smov 8   ;;  %v3813_v1 = vld [vmem:[#allocation4] ss:$0 sm:$0xff]  ;;  %vm3726_vm13 = vcmask 1024  }
 0x5ea   :  { %3739 = dma.vmem_to_hbm [thread:$0]  %s3734_s25, 2048, %s8253_s20, [#allocation6], %s4024_s27, %s4024_s27, %s4025_s3  }
 0x670   :  { %v3711_v33 = vpop.xlane.xlu0 %3710 }
 0x671   :  { %v3719_v27 = vadd.f32 %v3813_v1, %v3711_v33 }
 0x673   :  { %v3814_v53 = vmul.f32 -1.442695, %v3719_v27 }
 0x675   :  { %3979 = vpow2.f32 %v3814_v53 }
 0x682   :  { %v3980_v63 = vpop.eup %3979 }
 0x683   :  { %v3723_v59 = vadd.f32 1.0, %v3980_v63 }
 0x685   :  { %3981 = vrcp.f32 %v3723_v59 }
 0x692   :  { %v3982_v17 = vpop.eup %3981 }
 0x693   :  { %3727 = vst.msk [vmem:[%s8254_s21] sm:$0x3] %vm3726_vm13, %v3982_v17 }
 0x694   :  { %4018 = dma.done.wait [#allocation6], 2048  }
 0x695   :  { %4019 = vsyncadd [#allocation6], 4294965248 }
 0x696   :  { %3747 = vsyncpa [#allocation6], 1 }

</bundles_post_ra>
